<compile_context>
chip_gen: v5e
topology: v5e:2x2
jax: 0.10.0
libtpu: 0.0.40
codegen_flags: <defaults>
</compile_context>

<pallas_src>
import functools

import jax
import jax.numpy as jnp
from jax.experimental import pallas as pl
from jax.experimental.pallas import tpu as pltpu

EPS = 1e-5  # nn.BatchNorm2d default eps


def _pick_tile(m, cap):
    """Largest row tile <= cap that divides m and is a multiple of 8 (else m)."""
    if m <= cap:
        return m
    t = (cap // 8) * 8
    while t >= 8:
        if m % t == 0:
            return t
        t -= 8
    return m


# ----------------------------- Pallas kernels ------------------------------ #

def _matmul_stats_kernel(a_ref, b_ref, y_ref, s_ref, ss_ref):
    """MXU matmul tile + per-tile channel sum / sum-of-squares (for BatchNorm)."""
    y = jnp.dot(a_ref[...], b_ref[...], preferred_element_type=jnp.float32)
    y_ref[...] = y
    s = jnp.sum(y, axis=0, keepdims=True)            # (1, C)
    ss = jnp.sum(y * y, axis=0, keepdims=True)       # (1, C)
    # Write tile statistics broadcast across the 8-sublane output block.
    s_ref[...] = jnp.broadcast_to(s, s_ref.shape)
    ss_ref[...] = jnp.broadcast_to(ss, ss_ref.shape)


def pallas_matmul_stats(a, b, *, tm_cap=512):
    """(M, K)bf16 @ (K, C)bf16 -> y (M, C) f32 plus per-channel sum / sumsq."""
    M, K = a.shape
    _, C = b.shape
    tm = _pick_tile(M, tm_cap)
    nt = M // tm
    y, ps, pss = pl.pallas_call(
        _matmul_stats_kernel,
        out_shape=(jax.ShapeDtypeStruct((M, C), jnp.float32),
                   jax.ShapeDtypeStruct((nt * 8, C), jnp.float32),
                   jax.ShapeDtypeStruct((nt * 8, C), jnp.float32)),
        grid=(nt,),
        in_specs=[pl.BlockSpec((tm, K), lambda i: (i, 0)),
                  pl.BlockSpec((K, C), lambda i: (0, 0))],
        out_specs=(pl.BlockSpec((tm, C), lambda i: (i, 0)),
                   pl.BlockSpec((8, C), lambda i: (i, 0)),
                   pl.BlockSpec((8, C), lambda i: (i, 0))),
        compiler_params=pltpu.CompilerParams(
            dimension_semantics=("parallel",)),
    )(a, b)
    # Rows 8i..8i+7 of ps/pss all hold tile i's statistics; finish the tiny
    # (nt, C) reduction in XLA.
    s = ps[0::8, :].sum(axis=0)
    ss = pss[0::8, :].sum(axis=0)
    return y, s, ss


def _bn_act_kernel(y_ref, sc_ref, sh_ref, o_ref, *, relu):
    out = y_ref[...] * sc_ref[...] + sh_ref[...]
    if relu:
        out = jnp.maximum(out, 0.0)
    o_ref[...] = out


def _bn_act_res_kernel(y_ref, sc_ref, sh_ref, r_ref, o_ref, *, relu):
    out = y_ref[...] * sc_ref[...] + sh_ref[...] + r_ref[...]
    if relu:
        out = jnp.maximum(out, 0.0)
    o_ref[...] = out


def _bn2_act_kernel(y_ref, sc_ref, sh_ref, yd_ref, scd_ref, shd_ref, o_ref):
    # relu( bn(conv2) + bn(downsample conv) )
    out = (y_ref[...] * sc_ref[...] + sh_ref[...]
           + yd_ref[...] * scd_ref[...] + shd_ref[...])
    o_ref[...] = jnp.maximum(out, 0.0)


def pallas_bn_act(y, scale_row, shift_row, residual=None, relu=True,
                  tr_cap=1024):
    """Fused BN affine (+ optional residual) (+ optional ReLU), lane-dense."""
    rows, width = y.shape
    tr = _pick_tile(rows, tr_cap)
    nt = rows // tr
    tile = pl.BlockSpec((tr, width), lambda i: (i, 0))
    row = pl.BlockSpec((1, width), lambda i: (0, 0))
    if residual is None:
        kernel = functools.partial(_bn_act_kernel, relu=relu)
        in_specs = [tile, row, row]
        args = (y, scale_row, shift_row)
    else:
        kernel = functools.partial(_bn_act_res_kernel, relu=relu)
        in_specs = [tile, row, row, tile]
        args = (y, scale_row, shift_row, residual)
    return pl.pallas_call(
        kernel,
        out_shape=jax.ShapeDtypeStruct((rows, width), jnp.float32),
        grid=(nt,),
        in_specs=in_specs,
        out_specs=tile,
        compiler_params=pltpu.CompilerParams(
            dimension_semantics=("parallel",)),
    )(*args)


def pallas_bn2_act(y, sc, sh, yd, scd, shd, tr_cap=1024):
    """relu( bn(y) + bn(yd) ): second conv of a downsample block."""
    rows, width = y.shape
    tr = _pick_tile(rows, tr_cap)
    nt = rows // tr
    tile = pl.BlockSpec((tr, width), lambda i: (i, 0))
    row = pl.BlockSpec((1, width), lambda i: (0, 0))
    return pl.pallas_call(
        _bn2_act_kernel,
        out_shape=jax.ShapeDtypeStruct((rows, width), jnp.float32),
        grid=(nt,),
        in_specs=[tile, row, row, tile, row, row],
        out_specs=tile,
        compiler_params=pltpu.CompilerParams(
            dimension_semantics=("parallel",)),
    )(y, sc, sh, yd, scd, shd)


def _linear_kernel(a_ref, w_ref, b_ref, o_ref):
    o_ref[...] = jnp.dot(a_ref[...], w_ref[...],
                         preferred_element_type=jnp.float32) + b_ref[...]


def pallas_linear(a, w, b):
    M, K = a.shape
    _, N = w.shape
    tm = _pick_tile(M, 1024)
    return pl.pallas_call(
        _linear_kernel,
        out_shape=jax.ShapeDtypeStruct((M, N), jnp.float32),
        grid=(M // tm,),
        in_specs=[pl.BlockSpec((tm, K), lambda i: (i, 0)),
                  pl.BlockSpec((K, N), lambda i: (0, 0)),
                  pl.BlockSpec((1, N), lambda i: (0, 0))],
        out_specs=pl.BlockSpec((tm, N), lambda i: (i, 0)),
        compiler_params=pltpu.CompilerParams(
            dimension_semantics=("parallel",)),
    )(a, w, b.reshape(1, N))


# ------------------------------ conv helpers ------------------------------- #

def im2col_3x3(x, stride):
    """x: (N, H, W, C) NHWC, 3x3 kernel, padding=1 -> bf16 (N*Ho*Wo, 9*C)."""
    x = x.astype(jnp.bfloat16)   # halve patch HBM traffic; native bf16 MXU pass
    N, H, W, C = x.shape
    Ho = (H + 2 - 3) // stride + 1
    Wo = (W + 2 - 3) // stride + 1
    xp = jnp.pad(x, ((0, 0), (1, 1), (1, 1), (0, 0)))
    cols = []
    for dh in range(3):
        for dw in range(3):
            cols.append(xp[:,
                           dh:dh + stride * (Ho - 1) + 1:stride,
                           dw:dw + stride * (Wo - 1) + 1:stride,
                           :])
    patches = jnp.concatenate(cols, axis=-1)            # (N, Ho, Wo, 9*C)
    return patches.reshape(N * Ho * Wo, 9 * C), (N, Ho, Wo)


# TODO(synk): im2col patches are still materialized by XLA (pad+slice+concat);
# an in-kernel 9-tap shifted-window reduction would cut activation reads ~9x
# further but is left out here to keep the kernels simple and robust.


def _bn_scale_shift(s, ss, count, gamma, beta):
    """Fold training-mode batch stats + affine into per-channel scale/shift."""
    mean = s / count
    var = jnp.maximum(ss / count - mean * mean, 0.0)    # biased variance
    scale = gamma * jax.lax.rsqrt(var + EPS)
    shift = beta - mean * scale
    return scale, shift


def _row_tile(v, wo):
    """(C,) -> (1, Wo*C) row matching the lane-dense (N*Ho, Wo*C) view."""
    return jnp.tile(v, wo).reshape(1, -1)


def conv3x3_raw(x, w_mat, stride):
    """3x3 conv (pad=1, bias=False) as patches @ W, plus BN sum/sumsq."""
    patches, (n, ho, wo) = im2col_3x3(x, stride)
    y, s, ss = pallas_matmul_stats(patches, w_mat)
    return y, s, ss, (n, ho, wo)


def residual_block(x, p):
    stride = p["stride"]
    cout = p["g1"].shape[0]

    if p["down_w"] is not None:
        # conv1 and the downsample conv share the same stride-s patches:
        # run them as one wider matmul, then split columns (tiny).
        w_cat = jnp.concatenate([p["w1"], p["down_w"]], axis=1)
        y_cat, s_cat, ss_cat, (n, ho, wo) = conv3x3_raw(x, w_cat, stride)
        m = y_cat.shape[0]
        y1, y_ds = y_cat[:, :cout], y_cat[:, cout:]
        sc1, sh1 = _bn_scale_shift(s_cat[:cout], ss_cat[:cout], m,
                                   p["g1"], p["b1"])
        scd, shd = _bn_scale_shift(s_cat[cout:], ss_cat[cout:], m,
                                   p["down_g"], p["down_b"])
        out1 = pallas_bn_act(y1.reshape(n * ho, wo * cout),
                             _row_tile(sc1, wo), _row_tile(sh1, wo),
                             relu=True)
        y2, s2, ss2, _ = conv3x3_raw(out1.reshape(n, ho, wo, cout),
                                     p["w2"], 1)
        sc2, sh2 = _bn_scale_shift(s2, ss2, m, p["g2"], p["b2"])
        # Downsample BN folded into conv2's epilogue: relu(bn2(y2) + bn_ds(y_ds)).
        out2 = pallas_bn2_act(y2.reshape(n * ho, wo * cout),
                              _row_tile(sc2, wo), _row_tile(sh2, wo),
                              y_ds.reshape(n * ho, wo * cout),
                              _row_tile(scd, wo), _row_tile(shd, wo))
        return out2.reshape(n, ho, wo, cout)

    # Identity residual path (stride 1, cin == cout).
    y1, s1, ss1, (n, ho, wo) = conv3x3_raw(x, p["w1"], stride)
    m = y1.shape[0]
    sc1, sh1 = _bn_scale_shift(s1, ss1, m, p["g1"], p["b1"])
    out1 = pallas_bn_act(y1.reshape(n * ho, wo * cout),
                         _row_tile(sc1, wo), _row_tile(sh1, wo), relu=True)
    y2, s2, ss2, _ = conv3x3_raw(out1.reshape(n, ho, wo, cout), p["w2"], 1)
    sc2, sh2 = _bn_scale_shift(s2, ss2, m, p["g2"], p["b2"])
    out2 = pallas_bn_act(y2.reshape(n * ho, wo * cout),
                         _row_tile(sc2, wo), _row_tile(sh2, wo),
                         residual=x.reshape(n * ho, wo * cout), relu=True)
    return out2.reshape(n, ho, wo, cout)


# ---------------------------- parameter set-up ----------------------------- #

def init_conv(key, cin, cout):
    fan_in = cin * 9
    bound = 1.0 / (fan_in ** 0.5)
    w = jax.random.uniform(key, (cout, cin, 3, 3), jnp.float32, -bound, bound)
    # (Cout, Cin, kh, kw) -> (kh, kw, Cin, Cout) -> (9*Cin, Cout), matching the
    # im2col column ordering (dh, dw, cin).  Stored bf16 for the MXU.
    return jnp.transpose(w, (2, 3, 1, 0)).reshape(9 * cin, cout).astype(
        jnp.bfloat16)


def init_bn(c):
    return jnp.ones((c,), jnp.float32), jnp.zeros((c,), jnp.float32)


def init_block(key, cin, cout, stride):
    k1, k2, k3 = jax.random.split(key, 3)
    p = {"stride": stride,
         "w1": init_conv(k1, cin, cout), "w2": init_conv(k2, cout, cout),
         "down_w": None, "down_g": None, "down_b": None}
    p["g1"], p["b1"] = init_bn(cout)
    p["g2"], p["b2"] = init_bn(cout)
    if stride != 1 or cin != cout:
        p["down_w"] = init_conv(k3, cin, cout)
        p["down_g"], p["down_b"] = init_bn(cout)
    return p


def init_resnet(key, layers=(1, 1, 1), num_classes=10):
    keys = jax.random.split(key, 2 + sum(layers))
    params = {"stem_w": init_conv(keys[0], 3, 16)}
    params["stem_g"], params["stem_b"] = init_bn(16)
    ki = 1
    in_ch = 16
    for li, (out_ch, n_blocks, stride) in enumerate(
            [(16, layers[0], 1), (32, layers[1], 2), (64, layers[2], 2)]):
        blocks = []
        s = stride
        for _ in range(n_blocks):
            blocks.append(init_block(keys[ki], in_ch, out_ch, s))
            ki += 1
            in_ch = out_ch
            s = 1
        params[f"layer{li + 1}"] = blocks
    # nn.Linear(64, num_classes): store W transposed for x @ W.
    bound = 1.0 / (64 ** 0.5)
    kf = keys[ki]
    params["fc_w"] = jax.random.uniform(kf, (64, num_classes), jnp.float32,
                                        -bound, bound)
    params["fc_b"] = jax.random.uniform(jax.random.fold_in(kf, 1),
                                        (num_classes,), jnp.float32,
                                        -bound, bound)
    return params


# ------------------------------- forward pass ------------------------------ #

def resnet_forward(params, x_nchw):
    x = jnp.transpose(x_nchw, (0, 2, 3, 1)).astype(jnp.float32)  # NCHW -> NHWC

    # Stem: conv3x3 -> BN -> ReLU.
    y, s, ss, (n, ho, wo) = conv3x3_raw(x, params["stem_w"], 1)
    c = params["stem_g"].shape[0]
    sc, sh = _bn_scale_shift(s, ss, y.shape[0],
                             params["stem_g"], params["stem_b"])
    out = pallas_bn_act(y.reshape(n * ho, wo * c),
                        _row_tile(sc, wo), _row_tile(sh, wo),
                        relu=True).reshape(n, ho, wo, c)

    for name in ("layer1", "layer2", "layer3"):
        for blk in params[name]:
            out = residual_block(out, blk)

    # AvgPool2d(8): kernel=stride=8 over the final 8x8 map -> 1x1 (tiny glue).
    N, H, W, C = out.shape
    out = out.reshape(N, H // 8, 8, W // 8, 8, C).mean(axis=(2, 4))
    out = out.reshape(N, -1)                # == out.view(N, -1), spatial is 1x1
    return pallas_linear(out, params["fc_w"], params["fc_b"])


# TODO(synk): BatchNorm running-mean/var buffer *updates* (training side effect)
# are not modeled; only the forward output (batch statistics) is reproduced.


if __name__ == "__main__":
    key = jax.random.PRNGKey(0)
    k_params, k_x = jax.random.split(key)
    params = init_resnet(k_params, layers=(1, 1, 1), num_classes=10)

    # CIFAR-like input (NCHW, as PyTorch would receive): 32x32 is required so
    # that AvgPool2d(8) after two stride-2 stages reduces 8x8 -> 1x1.
    x = jax.random.normal(k_x, (2, 3, 32, 32), jnp.float32)

    fwd = jax.jit(lambda inp: resnet_forward(params, inp))
    logits = fwd(x)
    jax.block_until_ready(logits)

    assert logits.shape == (2, 10), logits.shape
    assert jnp.all(jnp.isfinite(logits))
    print("KERNEL_OK")
</pallas_src>

<mosaic_0001>
module attributes {stable_mosaic.version = 11 : i64} {
  func.func @_matmul_stats_kernel(%arg0: i32, %arg1: memref<512x27xbf16, #tpu.memory_space<vmem>>, %arg2: memref<27x16xbf16, #tpu.memory_space<vmem>>, %arg3: memref<512x16xf32, #tpu.memory_space<vmem>>, %arg4: memref<8x16xf32, #tpu.memory_space<vmem>>, %arg5: memref<8x16xf32, #tpu.memory_space<vmem>>) attributes {dimension_semantics = [#tpu.dimension_semantics<parallel>], iteration_bounds = array<i64: 4>, scalar_prefetch = 0 : i64, scratch_operands = 0 : i64, tpu.core_type = #tpu.core_type<tc>, window_params = [{transform_indices = @transform_0, window_bounds = array<i64: 512, 27>}, {pipeline_mode = #tpu.pipeline_mode<synchronous>, transform_indices = @transform_1, window_bounds = array<i64: 27, 16>}, {transform_indices = @transform_2, window_bounds = array<i64: 512, 16>}, {transform_indices = @transform_3, window_bounds = array<i64: 8, 16>}, {transform_indices = @transform_4, window_bounds = array<i64: 8, 16>}]} {
    %c0 = arith.constant 0 : index
    %c0_0 = arith.constant 0 : index
    %0 = vector.load %arg1[%c0, %c0_0] : memref<512x27xbf16, #tpu.memory_space<vmem>>, vector<512x27xbf16>
    %c0_1 = arith.constant 0 : index
    %c0_2 = arith.constant 0 : index
    %1 = vector.load %arg2[%c0_1, %c0_2] : memref<27x16xbf16, #tpu.memory_space<vmem>>, vector<27x16xbf16>
    %cst = arith.constant dense<0.000000e+00> : vector<512x16xf32>
    %2 = tpu.matmul %0, %1, %cst {dimension_numbers = #tpu.dot_dimension_numbers<[1], [0], [0], [1], [0, 0, 1, 1], [], []>} : vector<512x27xbf16>, vector<27x16xbf16>, vector<512x16xf32> -> vector<512x16xf32>
    %c0_3 = arith.constant 0 : index
    %c0_4 = arith.constant 0 : index
    %3 = vector.load %arg3[%c0_3, %c0_4] : memref<512x16xf32, #tpu.memory_space<vmem>>, vector<512x16xf32>
    tpu.vector_store %arg3[%c0_3, %c0_4], %2 {strides = array<i32>} : memref<512x16xf32, #tpu.memory_space<vmem>>, vector<512x16xf32>,
    %cst_5 = arith.constant dense<0.000000e+00> : vector<16xf32>
    %4 = vector.multi_reduction <add>, %2, %cst_5 [0] : vector<512x16xf32> to vector<16xf32>
    %5 = vector.shape_cast %4 : vector<16xf32> to vector<1x16xf32>
    %6 = arith.mulf %2, %2 : vector<512x16xf32>
    %cst_6 = arith.constant dense<0.000000e+00> : vector<16xf32>
    %7 = vector.multi_reduction <add>, %6, %cst_6 [0] : vector<512x16xf32> to vector<16xf32>
    %8 = vector.shape_cast %7 : vector<16xf32> to vector<1x16xf32>
    %9 = vector.shape_cast %5 : vector<1x16xf32> to vector<1x16xf32>
    %10 = vector.broadcast %9 : vector<1x16xf32> to vector<8x16xf32>
    %c0_7 = arith.constant 0 : index
    %c0_8 = arith.constant 0 : index
    %11 = vector.load %arg4[%c0_7, %c0_8] : memref<8x16xf32, #tpu.memory_space<vmem>>, vector<8x16xf32>
    tpu.vector_store %arg4[%c0_7, %c0_8], %10 {strides = array<i32>} : memref<8x16xf32, #tpu.memory_space<vmem>>, vector<8x16xf32>,
    %12 = vector.shape_cast %8 : vector<1x16xf32> to vector<1x16xf32>
    %13 = vector.broadcast %12 : vector<1x16xf32> to vector<8x16xf32>
    %c0_9 = arith.constant 0 : index
    %c0_10 = arith.constant 0 : index
    %14 = vector.load %arg5[%c0_9, %c0_10] : memref<8x16xf32, #tpu.memory_space<vmem>>, vector<8x16xf32>
    tpu.vector_store %arg5[%c0_9, %c0_10], %13 {strides = array<i32>} : memref<8x16xf32, #tpu.memory_space<vmem>>, vector<8x16xf32>,
    return
  }
  func.func @transform_0(%arg0: i32) -> (i32, i32) {
    %c0_i32 = arith.constant 0 : i32
    %c0_i32_0 = arith.constant 0 : i32
    return %arg0, %c0_i32 : i32, i32
  }
  func.func @transform_1(%arg0: i32) -> (i32, i32) {
    %c0_i32 = arith.constant 0 : i32
    %c0_i32_0 = arith.constant 0 : i32
    %c0_i32_1 = arith.constant 0 : i32
    return %c0_i32, %c0_i32_0 : i32, i32
  }
  func.func @transform_2(%arg0: i32) -> (i32, i32) {
    %c0_i32 = arith.constant 0 : i32
    %c0_i32_0 = arith.constant 0 : i32
    return %arg0, %c0_i32 : i32, i32
  }
  func.func @transform_3(%arg0: i32) -> (i32, i32) {
    %c0_i32 = arith.constant 0 : i32
    %c0_i32_0 = arith.constant 0 : i32
    return %arg0, %c0_i32 : i32, i32
  }
  func.func @transform_4(%arg0: i32) -> (i32, i32) {
    %c0_i32 = arith.constant 0 : i32
    %c0_i32_0 = arith.constant 0 : i32
    return %arg0, %c0_i32 : i32, i32
  }
}

module attributes {stable_mosaic.version = 11 : i64} {
  func.func @_bn_act_kernel(%arg0: i32, %arg1: memref<64x512xf32, #tpu.memory_space<vmem>>, %arg2: memref<1x512xf32, #tpu.memory_space<vmem>>, %arg3: memref<1x512xf32, #tpu.memory_space<vmem>>, %arg4: memref<64x512xf32, #tpu.memory_space<vmem>>) attributes {dimension_semantics = [#tpu.dimension_semantics<parallel>], iteration_bounds = array<i64: 1>, scalar_prefetch = 0 : i64, scratch_operands = 0 : i64, tpu.core_type = #tpu.core_type<tc>, window_params = [{transform_indices = @transform_0, window_bounds = array<i64: 64, 512>}, {pipeline_mode = #tpu.pipeline_mode<synchronous>, transform_indices = @transform_1, window_bounds = array<i64: 1, 512>}, {pipeline_mode = #tpu.pipeline_mode<synchronous>, transform_indices = @transform_2, window_bounds = array<i64: 1, 512>}, {transform_indices = @transform_3, window_bounds = array<i64: 64, 512>}]} {
    %c0 = arith.constant 0 : index
    %c0_0 = arith.constant 0 : index
    %0 = vector.load %arg1[%c0, %c0_0] : memref<64x512xf32, #tpu.memory_space<vmem>>, vector<64x512xf32>
    %c0_1 = arith.constant 0 : index
    %c0_2 = arith.constant 0 : index
    %1 = vector.load %arg2[%c0_1, %c0_2] : memref<1x512xf32, #tpu.memory_space<vmem>>, vector<1x512xf32>
    %2 = vector.broadcast %1 : vector<1x512xf32> to vector<64x512xf32>
    %3 = arith.mulf %0, %2 : vector<64x512xf32>
    %c0_3 = arith.constant 0 : index
    %c0_4 = arith.constant 0 : index
    %4 = vector.load %arg3[%c0_3, %c0_4] : memref<1x512xf32, #tpu.memory_space<vmem>>, vector<1x512xf32>
    %5 = vector.broadcast %4 : vector<1x512xf32> to vector<64x512xf32>
    %6 = arith.addf %3, %5 : vector<64x512xf32>
    %cst = arith.constant 0.000000e+00 : f32
    %7 = vector.broadcast %cst : f32 to vector<64x512xf32>
    %8 = arith.maximumf %6, %7 : vector<64x512xf32>
    %c0_5 = arith.constant 0 : index
    %c0_6 = arith.constant 0 : index
    %9 = vector.load %arg4[%c0_5, %c0_6] : memref<64x512xf32, #tpu.memory_space<vmem>>, vector<64x512xf32>
    tpu.vector_store %arg4[%c0_5, %c0_6], %8 {strides = array<i32>} : memref<64x512xf32, #tpu.memory_space<vmem>>, vector<64x512xf32>,
    return
  }
  func.func @transform_0(%arg0: i32) -> (i32, i32) {
    %c0_i32 = arith.constant 0 : i32
    %c0_i32_0 = arith.constant 0 : i32
    return %arg0, %c0_i32 : i32, i32
  }
  func.func @transform_1(%arg0: i32) -> (i32, i32) {
    %c0_i32 = arith.constant 0 : i32
    %c0_i32_0 = arith.constant 0 : i32
    %c0_i32_1 = arith.constant 0 : i32
    return %c0_i32, %c0_i32_0 : i32, i32
  }
  func.func @transform_2(%arg0: i32) -> (i32, i32) {
    %c0_i32 = arith.constant 0 : i32
    %c0_i32_0 = arith.constant 0 : i32
    %c0_i32_1 = arith.constant 0 : i32
    return %c0_i32, %c0_i32_0 : i32, i32
  }
  func.func @transform_3(%arg0: i32) -> (i32, i32) {
    %c0_i32 = arith.constant 0 : i32
    %c0_i32_0 = arith.constant 0 : i32
    return %arg0, %c0_i32 : i32, i32
  }
}

module attributes {stable_mosaic.version = 11 : i64} {
  func.func @_matmul_stats_kernel(%arg0: i32, %arg1: memref<512x144xbf16, #tpu.memory_space<vmem>>, %arg2: memref<144x16xbf16, #tpu.memory_space<vmem>>, %arg3: memref<512x16xf32, #tpu.memory_space<vmem>>, %arg4: memref<8x16xf32, #tpu.memory_space<vmem>>, %arg5: memref<8x16xf32, #tpu.memory_space<vmem>>) attributes {dimension_semantics = [#tpu.dimension_semantics<parallel>], iteration_bounds = array<i64: 4>, scalar_prefetch = 0 : i64, scratch_operands = 0 : i64, tpu.core_type = #tpu.core_type<tc>, window_params = [{transform_indices = @transform_0, window_bounds = array<i64: 512, 144>}, {pipeline_mode = #tpu.pipeline_mode<synchronous>, transform_indices = @transform_1, window_bounds = array<i64: 144, 16>}, {transform_indices = @transform_2, window_bounds = array<i64: 512, 16>}, {transform_indices = @transform_3, window_bounds = array<i64: 8, 16>}, {transform_indices = @transform_4, window_bounds = array<i64: 8, 16>}]} {
    %c0 = arith.constant 0 : index
    %c0_0 = arith.constant 0 : index
    %0 = vector.load %arg1[%c0, %c0_0] : memref<512x144xbf16, #tpu.memory_space<vmem>>, vector<512x144xbf16>
    %c0_1 = arith.constant 0 : index
    %c0_2 = arith.constant 0 : index
    %1 = vector.load %arg2[%c0_1, %c0_2] : memref<144x16xbf16, #tpu.memory_space<vmem>>, vector<144x16xbf16>
    %cst = arith.constant dense<0.000000e+00> : vector<512x16xf32>
    %2 = tpu.matmul %0, %1, %cst {dimension_numbers = #tpu.dot_dimension_numbers<[1], [0], [0], [1], [0, 0, 1, 1], [], []>} : vector<512x144xbf16>, vector<144x16xbf16>, vector<512x16xf32> -> vector<512x16xf32>
    %c0_3 = arith.constant 0 : index
    %c0_4 = arith.constant 0 : index
    %3 = vector.load %arg3[%c0_3, %c0_4] : memref<512x16xf32, #tpu.memory_space<vmem>>, vector<512x16xf32>
    tpu.vector_store %arg3[%c0_3, %c0_4], %2 {strides = array<i32>} : memref<512x16xf32, #tpu.memory_space<vmem>>, vector<512x16xf32>,
    %cst_5 = arith.constant dense<0.000000e+00> : vector<16xf32>
    %4 = vector.multi_reduction <add>, %2, %cst_5 [0] : vector<512x16xf32> to vector<16xf32>
    %5 = vector.shape_cast %4 : vector<16xf32> to vector<1x16xf32>
    %6 = arith.mulf %2, %2 : vector<512x16xf32>
    %cst_6 = arith.constant dense<0.000000e+00> : vector<16xf32>
    %7 = vector.multi_reduction <add>, %6, %cst_6 [0] : vector<512x16xf32> to vector<16xf32>
    %8 = vector.shape_cast %7 : vector<16xf32> to vector<1x16xf32>
    %9 = vector.shape_cast %5 : vector<1x16xf32> to vector<1x16xf32>
    %10 = vector.broadcast %9 : vector<1x16xf32> to vector<8x16xf32>
    %c0_7 = arith.constant 0 : index
    %c0_8 = arith.constant 0 : index
    %11 = vector.load %arg4[%c0_7, %c0_8] : memref<8x16xf32, #tpu.memory_space<vmem>>, vector<8x16xf32>
    tpu.vector_store %arg4[%c0_7, %c0_8], %10 {strides = array<i32>} : memref<8x16xf32, #tpu.memory_space<vmem>>, vector<8x16xf32>,
    %12 = vector.shape_cast %8 : vector<1x16xf32> to vector<1x16xf32>
    %13 = vector.broadcast %12 : vector<1x16xf32> to vector<8x16xf32>
    %c0_9 = arith.constant 0 : index
    %c0_10 = arith.constant 0 : index
    %14 = vector.load %arg5[%c0_9, %c0_10] : memref<8x16xf32, #tpu.memory_space<vmem>>, vector<8x16xf32>
    tpu.vector_store %arg5[%c0_9, %c0_10], %13 {strides = array<i32>} : memref<8x16xf32, #tpu.memory_space<vmem>>, vector<8x16xf32>,
    return
  }
  func.func @transform_0(%arg0: i32) -> (i32, i32) {
    %c0_i32 = arith.constant 0 : i32
    %c0_i32_0 = arith.constant 0 : i32
    return %arg0, %c0_i32 : i32, i32
  }
  func.func @transform_1(%arg0: i32) -> (i32, i32) {
    %c0_i32 = arith.constant 0 : i32
    %c0_i32_0 = arith.constant 0 : i32
    %c0_i32_1 = arith.constant 0 : i32
    return %c0_i32, %c0_i32_0 : i32, i32
  }
  func.func @transform_2(%arg0: i32) -> (i32, i32) {
    %c0_i32 = arith.constant 0 : i32
    %c0_i32_0 = arith.constant 0 : i32
    return %arg0, %c0_i32 : i32, i32
  }
  func.func @transform_3(%arg0: i32) -> (i32, i32) {
    %c0_i32 = arith.constant 0 : i32
    %c0_i32_0 = arith.constant 0 : i32
    return %arg0, %c0_i32 : i32, i32
  }
  func.func @transform_4(%arg0: i32) -> (i32, i32) {
    %c0_i32 = arith.constant 0 : i32
    %c0_i32_0 = arith.constant 0 : i32
    return %arg0, %c0_i32 : i32, i32
  }
}

module attributes {stable_mosaic.version = 11 : i64} {
  func.func @_bn_act_res_kernel(%arg0: i32, %arg1: memref<64x512xf32, #tpu.memory_space<vmem>>, %arg2: memref<1x512xf32, #tpu.memory_space<vmem>>, %arg3: memref<1x512xf32, #tpu.memory_space<vmem>>, %arg4: memref<64x512xf32, #tpu.memory_space<vmem>>, %arg5: memref<64x512xf32, #tpu.memory_space<vmem>>) attributes {dimension_semantics = [#tpu.dimension_semantics<parallel>], iteration_bounds = array<i64: 1>, scalar_prefetch = 0 : i64, scratch_operands = 0 : i64, tpu.core_type = #tpu.core_type<tc>, window_params = [{transform_indices = @transform_0, window_bounds = array<i64: 64, 512>}, {pipeline_mode = #tpu.pipeline_mode<synchronous>, transform_indices = @transform_1, window_bounds = array<i64: 1, 512>}, {pipeline_mode = #tpu.pipeline_mode<synchronous>, transform_indices = @transform_2, window_bounds = array<i64: 1, 512>}, {transform_indices = @transform_3, window_bounds = array<i64: 64, 512>}, {transform_indices = @transform_4, window_bounds = array<i64: 64, 512>}]} {
    %c0 = arith.constant 0 : index
    %c0_0 = arith.constant 0 : index
    %0 = vector.load %arg1[%c0, %c0_0] : memref<64x512xf32, #tpu.memory_space<vmem>>, vector<64x512xf32>
    %c0_1 = arith.constant 0 : index
    %c0_2 = arith.constant 0 : index
    %1 = vector.load %arg2[%c0_1, %c0_2] : memref<1x512xf32, #tpu.memory_space<vmem>>, vector<1x512xf32>
    %2 = vector.broadcast %1 : vector<1x512xf32> to vector<64x512xf32>
    %3 = arith.mulf %0, %2 : vector<64x512xf32>
    %c0_3 = arith.constant 0 : index
    %c0_4 = arith.constant 0 : index
    %4 = vector.load %arg3[%c0_3, %c0_4] : memref<1x512xf32, #tpu.memory_space<vmem>>, vector<1x512xf32>
    %5 = vector.broadcast %4 : vector<1x512xf32> to vector<64x512xf32>
    %6 = arith.addf %3, %5 : vector<64x512xf32>
    %c0_5 = arith.constant 0 : index
    %c0_6 = arith.constant 0 : index
    %7 = vector.load %arg4[%c0_5, %c0_6] : memref<64x512xf32, #tpu.memory_space<vmem>>, vector<64x512xf32>
    %8 = arith.addf %6, %7 : vector<64x512xf32>
    %cst = arith.constant 0.000000e+00 : f32
    %9 = vector.broadcast %cst : f32 to vector<64x512xf32>
    %10 = arith.maximumf %8, %9 : vector<64x512xf32>
    %c0_7 = arith.constant 0 : index
    %c0_8 = arith.constant 0 : index
    %11 = vector.load %arg5[%c0_7, %c0_8] : memref<64x512xf32, #tpu.memory_space<vmem>>, vector<64x512xf32>
    tpu.vector_store %arg5[%c0_7, %c0_8], %10 {strides = array<i32>} : memref<64x512xf32, #tpu.memory_space<vmem>>, vector<64x512xf32>,
    return
  }
  func.func @transform_0(%arg0: i32) -> (i32, i32) {
    %c0_i32 = arith.constant 0 : i32
    %c0_i32_0 = arith.constant 0 : i32
    return %arg0, %c0_i32 : i32, i32
  }
  func.func @transform_1(%arg0: i32) -> (i32, i32) {
    %c0_i32 = arith.constant 0 : i32
    %c0_i32_0 = arith.constant 0 : i32
    %c0_i32_1 = arith.constant 0 : i32
    return %c0_i32, %c0_i32_0 : i32, i32
  }
  func.func @transform_2(%arg0: i32) -> (i32, i32) {
    %c0_i32 = arith.constant 0 : i32
    %c0_i32_0 = arith.constant 0 : i32
    %c0_i32_1 = arith.constant 0 : i32
    return %c0_i32, %c0_i32_0 : i32, i32
  }
  func.func @transform_3(%arg0: i32) -> (i32, i32) {
    %c0_i32 = arith.constant 0 : i32
    %c0_i32_0 = arith.constant 0 : i32
    return %arg0, %c0_i32 : i32, i32
  }
  func.func @transform_4(%arg0: i32) -> (i32, i32) {
    %c0_i32 = arith.constant 0 : i32
    %c0_i32_0 = arith.constant 0 : i32
    return %arg0, %c0_i32 : i32, i32
  }
}

module attributes {stable_mosaic.version = 11 : i64} {
  func.func @_matmul_stats_kernel(%arg0: i32, %arg1: memref<512x144xbf16, #tpu.memory_space<vmem>>, %arg2: memref<144x64xbf16, #tpu.memory_space<vmem>>, %arg3: memref<512x64xf32, #tpu.memory_space<vmem>>, %arg4: memref<8x64xf32, #tpu.memory_space<vmem>>, %arg5: memref<8x64xf32, #tpu.memory_space<vmem>>) attributes {dimension_semantics = [#tpu.dimension_semantics<parallel>], iteration_bounds = array<i64: 1>, scalar_prefetch = 0 : i64, scratch_operands = 0 : i64, tpu.core_type = #tpu.core_type<tc>, window_params = [{transform_indices = @transform_0, window_bounds = array<i64: 512, 144>}, {pipeline_mode = #tpu.pipeline_mode<synchronous>, transform_indices = @transform_1, window_bounds = array<i64: 144, 64>}, {transform_indices = @transform_2, window_bounds = array<i64: 512, 64>}, {transform_indices = @transform_3, window_bounds = array<i64: 8, 64>}, {transform_indices = @transform_4, window_bounds = array<i64: 8, 64>}]} {
    %c0 = arith.constant 0 : index
    %c0_0 = arith.constant 0 : index
    %0 = vector.load %arg1[%c0, %c0_0] : memref<512x144xbf16, #tpu.memory_space<vmem>>, vector<512x144xbf16>
    %c0_1 = arith.constant 0 : index
    %c0_2 = arith.constant 0 : index
    %1 = vector.load %arg2[%c0_1, %c0_2] : memref<144x64xbf16, #tpu.memory_space<vmem>>, vector<144x64xbf16>
    %cst = arith.constant dense<0.000000e+00> : vector<512x64xf32>
    %2 = tpu.matmul %0, %1, %cst {dimension_numbers = #tpu.dot_dimension_numbers<[1], [0], [0], [1], [0, 0, 1, 1], [], []>} : vector<512x144xbf16>, vector<144x64xbf16>, vector<512x64xf32> -> vector<512x64xf32>
    %c0_3 = arith.constant 0 : index
    %c0_4 = arith.constant 0 : index
    %3 = vector.load %arg3[%c0_3, %c0_4] : memref<512x64xf32, #tpu.memory_space<vmem>>, vector<512x64xf32>
    tpu.vector_store %arg3[%c0_3, %c0_4], %2 {strides = array<i32>} : memref<512x64xf32, #tpu.memory_space<vmem>>, vector<512x64xf32>,
    %cst_5 = arith.constant dense<0.000000e+00> : vector<64xf32>
    %4 = vector.multi_reduction <add>, %2, %cst_5 [0] : vector<512x64xf32> to vector<64xf32>
    %5 = vector.shape_cast %4 : vector<64xf32> to vector<1x64xf32>
    %6 = arith.mulf %2, %2 : vector<512x64xf32>
    %cst_6 = arith.constant dense<0.000000e+00> : vector<64xf32>
    %7 = vector.multi_reduction <add>, %6, %cst_6 [0] : vector<512x64xf32> to vector<64xf32>
    %8 = vector.shape_cast %7 : vector<64xf32> to vector<1x64xf32>
    %9 = vector.shape_cast %5 : vector<1x64xf32> to vector<1x64xf32>
    %10 = vector.broadcast %9 : vector<1x64xf32> to vector<8x64xf32>
    %c0_7 = arith.constant 0 : index
    %c0_8 = arith.constant 0 : index
    %11 = vector.load %arg4[%c0_7, %c0_8] : memref<8x64xf32, #tpu.memory_space<vmem>>, vector<8x64xf32>
    tpu.vector_store %arg4[%c0_7, %c0_8], %10 {strides = array<i32>} : memref<8x64xf32, #tpu.memory_space<vmem>>, vector<8x64xf32>,
    %12 = vector.shape_cast %8 : vector<1x64xf32> to vector<1x64xf32>
    %13 = vector.broadcast %12 : vector<1x64xf32> to vector<8x64xf32>
    %c0_9 = arith.constant 0 : index
    %c0_10 = arith.constant 0 : index
    %14 = vector.load %arg5[%c0_9, %c0_10] : memref<8x64xf32, #tpu.memory_space<vmem>>, vector<8x64xf32>
    tpu.vector_store %arg5[%c0_9, %c0_10], %13 {strides = array<i32>} : memref<8x64xf32, #tpu.memory_space<vmem>>, vector<8x64xf32>,
    return
  }
  func.func @transform_0(%arg0: i32) -> (i32, i32) {
    %c0_i32 = arith.constant 0 : i32
    %c0_i32_0 = arith.constant 0 : i32
    return %arg0, %c0_i32 : i32, i32
  }
  func.func @transform_1(%arg0: i32) -> (i32, i32) {
    %c0_i32 = arith.constant 0 : i32
    %c0_i32_0 = arith.constant 0 : i32
    %c0_i32_1 = arith.constant 0 : i32
    return %c0_i32, %c0_i32_0 : i32, i32
  }
  func.func @transform_2(%arg0: i32) -> (i32, i32) {
    %c0_i32 = arith.constant 0 : i32
    %c0_i32_0 = arith.constant 0 : i32
    return %arg0, %c0_i32 : i32, i32
  }
  func.func @transform_3(%arg0: i32) -> (i32, i32) {
    %c0_i32 = arith.constant 0 : i32
    %c0_i32_0 = arith.constant 0 : i32
    return %arg0, %c0_i32 : i32, i32
  }
  func.func @transform_4(%arg0: i32) -> (i32, i32) {
    %c0_i32 = arith.constant 0 : i32
    %c0_i32_0 = arith.constant 0 : i32
    return %arg0, %c0_i32 : i32, i32
  }
}

module attributes {stable_mosaic.version = 11 : i64} {
  func.func @_bn_act_kernel(%arg0: i32, %arg1: memref<32x512xf32, #tpu.memory_space<vmem>>, %arg2: memref<1x512xf32, #tpu.memory_space<vmem>>, %arg3: memref<1x512xf32, #tpu.memory_space<vmem>>, %arg4: memref<32x512xf32, #tpu.memory_space<vmem>>) attributes {dimension_semantics = [#tpu.dimension_semantics<parallel>], iteration_bounds = array<i64: 1>, scalar_prefetch = 0 : i64, scratch_operands = 0 : i64, tpu.core_type = #tpu.core_type<tc>, window_params = [{transform_indices = @transform_0, window_bounds = array<i64: 32, 512>}, {pipeline_mode = #tpu.pipeline_mode<synchronous>, transform_indices = @transform_1, window_bounds = array<i64: 1, 512>}, {pipeline_mode = #tpu.pipeline_mode<synchronous>, transform_indices = @transform_2, window_bounds = array<i64: 1, 512>}, {transform_indices = @transform_3, window_bounds = array<i64: 32, 512>}]} {
    %c0 = arith.constant 0 : index
    %c0_0 = arith.constant 0 : index
    %0 = vector.load %arg1[%c0, %c0_0] : memref<32x512xf32, #tpu.memory_space<vmem>>, vector<32x512xf32>
    %c0_1 = arith.constant 0 : index
    %c0_2 = arith.constant 0 : index
    %1 = vector.load %arg2[%c0_1, %c0_2] : memref<1x512xf32, #tpu.memory_space<vmem>>, vector<1x512xf32>
    %2 = vector.broadcast %1 : vector<1x512xf32> to vector<32x512xf32>
    %3 = arith.mulf %0, %2 : vector<32x512xf32>
    %c0_3 = arith.constant 0 : index
    %c0_4 = arith.constant 0 : index
    %4 = vector.load %arg3[%c0_3, %c0_4] : memref<1x512xf32, #tpu.memory_space<vmem>>, vector<1x512xf32>
    %5 = vector.broadcast %4 : vector<1x512xf32> to vector<32x512xf32>
    %6 = arith.addf %3, %5 : vector<32x512xf32>
    %cst = arith.constant 0.000000e+00 : f32
    %7 = vector.broadcast %cst : f32 to vector<32x512xf32>
    %8 = arith.maximumf %6, %7 : vector<32x512xf32>
    %c0_5 = arith.constant 0 : index
    %c0_6 = arith.constant 0 : index
    %9 = vector.load %arg4[%c0_5, %c0_6] : memref<32x512xf32, #tpu.memory_space<vmem>>, vector<32x512xf32>
    tpu.vector_store %arg4[%c0_5, %c0_6], %8 {strides = array<i32>} : memref<32x512xf32, #tpu.memory_space<vmem>>, vector<32x512xf32>,
    return
  }
  func.func @transform_0(%arg0: i32) -> (i32, i32) {
    %c0_i32 = arith.constant 0 : i32
    %c0_i32_0 = arith.constant 0 : i32
    return %arg0, %c0_i32 : i32, i32
  }
  func.func @transform_1(%arg0: i32) -> (i32, i32) {
    %c0_i32 = arith.constant 0 : i32
    %c0_i32_0 = arith.constant 0 : i32
    %c0_i32_1 = arith.constant 0 : i32
    return %c0_i32, %c0_i32_0 : i32, i32
  }
  func.func @transform_2(%arg0: i32) -> (i32, i32) {
    %c0_i32 = arith.constant 0 : i32
    %c0_i32_0 = arith.constant 0 : i32
    %c0_i32_1 = arith.constant 0 : i32
    return %c0_i32, %c0_i32_0 : i32, i32
  }
  func.func @transform_3(%arg0: i32) -> (i32, i32) {
    %c0_i32 = arith.constant 0 : i32
    %c0_i32_0 = arith.constant 0 : i32
    return %arg0, %c0_i32 : i32, i32
  }
}

module attributes {stable_mosaic.version = 11 : i64} {
  func.func @_matmul_stats_kernel(%arg0: i32, %arg1: memref<512x288xbf16, #tpu.memory_space<vmem>>, %arg2: memref<288x32xbf16, #tpu.memory_space<vmem>>, %arg3: memref<512x32xf32, #tpu.memory_space<vmem>>, %arg4: memref<8x32xf32, #tpu.memory_space<vmem>>, %arg5: memref<8x32xf32, #tpu.memory_space<vmem>>) attributes {dimension_semantics = [#tpu.dimension_semantics<parallel>], iteration_bounds = array<i64: 1>, scalar_prefetch = 0 : i64, scratch_operands = 0 : i64, tpu.core_type = #tpu.core_type<tc>, window_params = [{transform_indices = @transform_0, window_bounds = array<i64: 512, 288>}, {pipeline_mode = #tpu.pipeline_mode<synchronous>, transform_indices = @transform_1, window_bounds = array<i64: 288, 32>}, {transform_indices = @transform_2, window_bounds = array<i64: 512, 32>}, {transform_indices = @transform_3, window_bounds = array<i64: 8, 32>}, {transform_indices = @transform_4, window_bounds = array<i64: 8, 32>}]} {
    %c0 = arith.constant 0 : index
    %c0_0 = arith.constant 0 : index
    %0 = vector.load %arg1[%c0, %c0_0] : memref<512x288xbf16, #tpu.memory_space<vmem>>, vector<512x288xbf16>
    %c0_1 = arith.constant 0 : index
    %c0_2 = arith.constant 0 : index
    %1 = vector.load %arg2[%c0_1, %c0_2] : memref<288x32xbf16, #tpu.memory_space<vmem>>, vector<288x32xbf16>
    %cst = arith.constant dense<0.000000e+00> : vector<512x32xf32>
    %2 = tpu.matmul %0, %1, %cst {dimension_numbers = #tpu.dot_dimension_numbers<[1], [0], [0], [1], [0, 0, 1, 1], [], []>} : vector<512x288xbf16>, vector<288x32xbf16>, vector<512x32xf32> -> vector<512x32xf32>
    %c0_3 = arith.constant 0 : index
    %c0_4 = arith.constant 0 : index
    %3 = vector.load %arg3[%c0_3, %c0_4] : memref<512x32xf32, #tpu.memory_space<vmem>>, vector<512x32xf32>
    tpu.vector_store %arg3[%c0_3, %c0_4], %2 {strides = array<i32>} : memref<512x32xf32, #tpu.memory_space<vmem>>, vector<512x32xf32>,
    %cst_5 = arith.constant dense<0.000000e+00> : vector<32xf32>
    %4 = vector.multi_reduction <add>, %2, %cst_5 [0] : vector<512x32xf32> to vector<32xf32>
    %5 = vector.shape_cast %4 : vector<32xf32> to vector<1x32xf32>
    %6 = arith.mulf %2, %2 : vector<512x32xf32>
    %cst_6 = arith.constant dense<0.000000e+00> : vector<32xf32>
    %7 = vector.multi_reduction <add>, %6, %cst_6 [0] : vector<512x32xf32> to vector<32xf32>
    %8 = vector.shape_cast %7 : vector<32xf32> to vector<1x32xf32>
    %9 = vector.shape_cast %5 : vector<1x32xf32> to vector<1x32xf32>
    %10 = vector.broadcast %9 : vector<1x32xf32> to vector<8x32xf32>
    %c0_7 = arith.constant 0 : index
    %c0_8 = arith.constant 0 : index
    %11 = vector.load %arg4[%c0_7, %c0_8] : memref<8x32xf32, #tpu.memory_space<vmem>>, vector<8x32xf32>
    tpu.vector_store %arg4[%c0_7, %c0_8], %10 {strides = array<i32>} : memref<8x32xf32, #tpu.memory_space<vmem>>, vector<8x32xf32>,
    %12 = vector.shape_cast %8 : vector<1x32xf32> to vector<1x32xf32>
    %13 = vector.broadcast %12 : vector<1x32xf32> to vector<8x32xf32>
    %c0_9 = arith.constant 0 : index
    %c0_10 = arith.constant 0 : index
    %14 = vector.load %arg5[%c0_9, %c0_10] : memref<8x32xf32, #tpu.memory_space<vmem>>, vector<8x32xf32>
    tpu.vector_store %arg5[%c0_9, %c0_10], %13 {strides = array<i32>} : memref<8x32xf32, #tpu.memory_space<vmem>>, vector<8x32xf32>,
    return
  }
  func.func @transform_0(%arg0: i32) -> (i32, i32) {
    %c0_i32 = arith.constant 0 : i32
    %c0_i32_0 = arith.constant 0 : i32
    return %arg0, %c0_i32 : i32, i32
  }
  func.func @transform_1(%arg0: i32) -> (i32, i32) {
    %c0_i32 = arith.constant 0 : i32
    %c0_i32_0 = arith.constant 0 : i32
    %c0_i32_1 = arith.constant 0 : i32
    return %c0_i32, %c0_i32_0 : i32, i32
  }
  func.func @transform_2(%arg0: i32) -> (i32, i32) {
    %c0_i32 = arith.constant 0 : i32
    %c0_i32_0 = arith.constant 0 : i32
    return %arg0, %c0_i32 : i32, i32
  }
  func.func @transform_3(%arg0: i32) -> (i32, i32) {
    %c0_i32 = arith.constant 0 : i32
    %c0_i32_0 = arith.constant 0 : i32
    return %arg0, %c0_i32 : i32, i32
  }
  func.func @transform_4(%arg0: i32) -> (i32, i32) {
    %c0_i32 = arith.constant 0 : i32
    %c0_i32_0 = arith.constant 0 : i32
    return %arg0, %c0_i32 : i32, i32
  }
}

module attributes {stable_mosaic.version = 11 : i64} {
  func.func @_bn2_act_kernel(%arg0: i32, %arg1: memref<32x512xf32, #tpu.memory_space<vmem>>, %arg2: memref<1x512xf32, #tpu.memory_space<vmem>>, %arg3: memref<1x512xf32, #tpu.memory_space<vmem>>, %arg4: memref<32x512xf32, #tpu.memory_space<vmem>>, %arg5: memref<1x512xf32, #tpu.memory_space<vmem>>, %arg6: memref<1x512xf32, #tpu.memory_space<vmem>>, %arg7: memref<32x512xf32, #tpu.memory_space<vmem>>) attributes {dimension_semantics = [#tpu.dimension_semantics<parallel>], iteration_bounds = array<i64: 1>, scalar_prefetch = 0 : i64, scratch_operands = 0 : i64, tpu.core_type = #tpu.core_type<tc>, window_params = [{transform_indices = @transform_0, window_bounds = array<i64: 32, 512>}, {pipeline_mode = #tpu.pipeline_mode<synchronous>, transform_indices = @transform_1, window_bounds = array<i64: 1, 512>}, {pipeline_mode = #tpu.pipeline_mode<synchronous>, transform_indices = @transform_2, window_bounds = array<i64: 1, 512>}, {transform_indices = @transform_3, window_bounds = array<i64: 32, 512>}, {pipeline_mode = #tpu.pipeline_mode<synchronous>, transform_indices = @transform_4, window_bounds = array<i64: 1, 512>}, {pipeline_mode = #tpu.pipeline_mode<synchronous>, transform_indices = @transform_5, window_bounds = array<i64: 1, 512>}, {transform_indices = @transform_6, window_bounds = array<i64: 32, 512>}]} {
    %c0 = arith.constant 0 : index
    %c0_0 = arith.constant 0 : index
    %0 = vector.load %arg1[%c0, %c0_0] : memref<32x512xf32, #tpu.memory_space<vmem>>, vector<32x512xf32>
    %c0_1 = arith.constant 0 : index
    %c0_2 = arith.constant 0 : index
    %1 = vector.load %arg2[%c0_1, %c0_2] : memref<1x512xf32, #tpu.memory_space<vmem>>, vector<1x512xf32>
    %2 = vector.broadcast %1 : vector<1x512xf32> to vector<32x512xf32>
    %3 = arith.mulf %0, %2 : vector<32x512xf32>
    %c0_3 = arith.constant 0 : index
    %c0_4 = arith.constant 0 : index
    %4 = vector.load %arg3[%c0_3, %c0_4] : memref<1x512xf32, #tpu.memory_space<vmem>>, vector<1x512xf32>
    %5 = vector.broadcast %4 : vector<1x512xf32> to vector<32x512xf32>
    %6 = arith.addf %3, %5 : vector<32x512xf32>
    %c0_5 = arith.constant 0 : index
    %c0_6 = arith.constant 0 : index
    %7 = vector.load %arg4[%c0_5, %c0_6] : memref<32x512xf32, #tpu.memory_space<vmem>>, vector<32x512xf32>
    %c0_7 = arith.constant 0 : index
    %c0_8 = arith.constant 0 : index
    %8 = vector.load %arg5[%c0_7, %c0_8] : memref<1x512xf32, #tpu.memory_space<vmem>>, vector<1x512xf32>
    %9 = vector.broadcast %8 : vector<1x512xf32> to vector<32x512xf32>
    %10 = arith.mulf %7, %9 : vector<32x512xf32>
    %11 = arith.addf %6, %10 : vector<32x512xf32>
    %c0_9 = arith.constant 0 : index
    %c0_10 = arith.constant 0 : index
    %12 = vector.load %arg6[%c0_9, %c0_10] : memref<1x512xf32, #tpu.memory_space<vmem>>, vector<1x512xf32>
    %13 = vector.broadcast %12 : vector<1x512xf32> to vector<32x512xf32>
    %14 = arith.addf %11, %13 : vector<32x512xf32>
    %cst = arith.constant 0.000000e+00 : f32
    %15 = vector.broadcast %cst : f32 to vector<32x512xf32>
    %16 = arith.maximumf %14, %15 : vector<32x512xf32>
    %c0_11 = arith.constant 0 : index
    %c0_12 = arith.constant 0 : index
    %17 = vector.load %arg7[%c0_11, %c0_12] : memref<32x512xf32, #tpu.memory_space<vmem>>, vector<32x512xf32>
    tpu.vector_store %arg7[%c0_11, %c0_12], %16 {strides = array<i32>} : memref<32x512xf32, #tpu.memory_space<vmem>>, vector<32x512xf32>,
    return
  }
  func.func @transform_0(%arg0: i32) -> (i32, i32) {
    %c0_i32 = arith.constant 0 : i32
    %c0_i32_0 = arith.constant 0 : i32
    return %arg0, %c0_i32 : i32, i32
  }
  func.func @transform_1(%arg0: i32) -> (i32, i32) {
    %c0_i32 = arith.constant 0 : i32
    %c0_i32_0 = arith.constant 0 : i32
    %c0_i32_1 = arith.constant 0 : i32
    return %c0_i32, %c0_i32_0 : i32, i32
  }
  func.func @transform_2(%arg0: i32) -> (i32, i32) {
    %c0_i32 = arith.constant 0 : i32
    %c0_i32_0 = arith.constant 0 : i32
    %c0_i32_1 = arith.constant 0 : i32
    return %c0_i32, %c0_i32_0 : i32, i32
  }
  func.func @transform_3(%arg0: i32) -> (i32, i32) {
    %c0_i32 = arith.constant 0 : i32
    %c0_i32_0 = arith.constant 0 : i32
    return %arg0, %c0_i32 : i32, i32
  }
  func.func @transform_4(%arg0: i32) -> (i32, i32) {
    %c0_i32 = arith.constant 0 : i32
    %c0_i32_0 = arith.constant 0 : i32
    %c0_i32_1 = arith.constant 0 : i32
    return %c0_i32, %c0_i32_0 : i32, i32
  }
  func.func @transform_5(%arg0: i32) -> (i32, i32) {
    %c0_i32 = arith.constant 0 : i32
    %c0_i32_0 = arith.constant 0 : i32
    %c0_i32_1 = arith.constant 0 : i32
    return %c0_i32, %c0_i32_0 : i32, i32
  }
  func.func @transform_6(%arg0: i32) -> (i32, i32) {
    %c0_i32 = arith.constant 0 : i32
    %c0_i32_0 = arith.constant 0 : i32
    return %arg0, %c0_i32 : i32, i32
  }
}

module attributes {stable_mosaic.version = 11 : i64} {
  func.func @_matmul_stats_kernel(%arg0: i32, %arg1: memref<128x288xbf16, #tpu.memory_space<vmem>>, %arg2: memref<288x128xbf16, #tpu.memory_space<vmem>>, %arg3: memref<128x128xf32, #tpu.memory_space<vmem>>, %arg4: memref<8x128xf32, #tpu.memory_space<vmem>>, %arg5: memref<8x128xf32, #tpu.memory_space<vmem>>) attributes {dimension_semantics = [#tpu.dimension_semantics<parallel>], iteration_bounds = array<i64: 1>, scalar_prefetch = 0 : i64, scratch_operands = 0 : i64, tpu.core_type = #tpu.core_type<tc>, window_params = [{transform_indices = @transform_0, window_bounds = array<i64: 128, 288>}, {pipeline_mode = #tpu.pipeline_mode<synchronous>, transform_indices = @transform_1, window_bounds = array<i64: 288, 128>}, {transform_indices = @transform_2, window_bounds = array<i64: 128, 128>}, {transform_indices = @transform_3, window_bounds = array<i64: 8, 128>}, {transform_indices = @transform_4, window_bounds = array<i64: 8, 128>}]} {
    %c0 = arith.constant 0 : index
    %c0_0 = arith.constant 0 : index
    %0 = vector.load %arg1[%c0, %c0_0] : memref<128x288xbf16, #tpu.memory_space<vmem>>, vector<128x288xbf16>
    %c0_1 = arith.constant 0 : index
    %c0_2 = arith.constant 0 : index
    %1 = vector.load %arg2[%c0_1, %c0_2] : memref<288x128xbf16, #tpu.memory_space<vmem>>, vector<288x128xbf16>
    %cst = arith.constant dense<0.000000e+00> : vector<128x128xf32>
    %2 = tpu.matmul %0, %1, %cst {dimension_numbers = #tpu.dot_dimension_numbers<[1], [0], [0], [1], [0, 0, 1, 1], [], []>} : vector<128x288xbf16>, vector<288x128xbf16>, vector<128x128xf32> -> vector<128x128xf32>
    %c0_3 = arith.constant 0 : index
    %c0_4 = arith.constant 0 : index
    %3 = vector.load %arg3[%c0_3, %c0_4] : memref<128x128xf32, #tpu.memory_space<vmem>>, vector<128x128xf32>
    tpu.vector_store %arg3[%c0_3, %c0_4], %2 {strides = array<i32>} : memref<128x128xf32, #tpu.memory_space<vmem>>, vector<128x128xf32>,
    %cst_5 = arith.constant dense<0.000000e+00> : vector<128xf32>
    %4 = vector.multi_reduction <add>, %2, %cst_5 [0] : vector<128x128xf32> to vector<128xf32>
    %5 = vector.shape_cast %4 : vector<128xf32> to vector<1x128xf32>
    %6 = arith.mulf %2, %2 : vector<128x128xf32>
    %cst_6 = arith.constant dense<0.000000e+00> : vector<128xf32>
    %7 = vector.multi_reduction <add>, %6, %cst_6 [0] : vector<128x128xf32> to vector<128xf32>
    %8 = vector.shape_cast %7 : vector<128xf32> to vector<1x128xf32>
    %9 = vector.shape_cast %5 : vector<1x128xf32> to vector<1x128xf32>
    %10 = vector.broadcast %9 : vector<1x128xf32> to vector<8x128xf32>
    %c0_7 = arith.constant 0 : index
    %c0_8 = arith.constant 0 : index
    %11 = vector.load %arg4[%c0_7, %c0_8] : memref<8x128xf32, #tpu.memory_space<vmem>>, vector<8x128xf32>
    tpu.vector_store %arg4[%c0_7, %c0_8], %10 {strides = array<i32>} : memref<8x128xf32, #tpu.memory_space<vmem>>, vector<8x128xf32>,
    %12 = vector.shape_cast %8 : vector<1x128xf32> to vector<1x128xf32>
    %13 = vector.broadcast %12 : vector<1x128xf32> to vector<8x128xf32>
    %c0_9 = arith.constant 0 : index
    %c0_10 = arith.constant 0 : index
    %14 = vector.load %arg5[%c0_9, %c0_10] : memref<8x128xf32, #tpu.memory_space<vmem>>, vector<8x128xf32>
    tpu.vector_store %arg5[%c0_9, %c0_10], %13 {strides = array<i32>} : memref<8x128xf32, #tpu.memory_space<vmem>>, vector<8x128xf32>,
    return
  }
  func.func @transform_0(%arg0: i32) -> (i32, i32) {
    %c0_i32 = arith.constant 0 : i32
    %c0_i32_0 = arith.constant 0 : i32
    return %arg0, %c0_i32 : i32, i32
  }
  func.func @transform_1(%arg0: i32) -> (i32, i32) {
    %c0_i32 = arith.constant 0 : i32
    %c0_i32_0 = arith.constant 0 : i32
    %c0_i32_1 = arith.constant 0 : i32
    return %c0_i32, %c0_i32_0 : i32, i32
  }
  func.func @transform_2(%arg0: i32) -> (i32, i32) {
    %c0_i32 = arith.constant 0 : i32
    %c0_i32_0 = arith.constant 0 : i32
    return %arg0, %c0_i32 : i32, i32
  }
  func.func @transform_3(%arg0: i32) -> (i32, i32) {
    %c0_i32 = arith.constant 0 : i32
    %c0_i32_0 = arith.constant 0 : i32
    return %arg0, %c0_i32 : i32, i32
  }
  func.func @transform_4(%arg0: i32) -> (i32, i32) {
    %c0_i32 = arith.constant 0 : i32
    %c0_i32_0 = arith.constant 0 : i32
    return %arg0, %c0_i32 : i32, i32
  }
}

module attributes {stable_mosaic.version = 11 : i64} {
  func.func @_bn_act_kernel(%arg0: i32, %arg1: memref<16x512xf32, #tpu.memory_space<vmem>>, %arg2: memref<1x512xf32, #tpu.memory_space<vmem>>, %arg3: memref<1x512xf32, #tpu.memory_space<vmem>>, %arg4: memref<16x512xf32, #tpu.memory_space<vmem>>) attributes {dimension_semantics = [#tpu.dimension_semantics<parallel>], iteration_bounds = array<i64: 1>, scalar_prefetch = 0 : i64, scratch_operands = 0 : i64, tpu.core_type = #tpu.core_type<tc>, window_params = [{transform_indices = @transform_0, window_bounds = array<i64: 16, 512>}, {pipeline_mode = #tpu.pipeline_mode<synchronous>, transform_indices = @transform_1, window_bounds = array<i64: 1, 512>}, {pipeline_mode = #tpu.pipeline_mode<synchronous>, transform_indices = @transform_2, window_bounds = array<i64: 1, 512>}, {transform_indices = @transform_3, window_bounds = array<i64: 16, 512>}]} {
    %c0 = arith.constant 0 : index
    %c0_0 = arith.constant 0 : index
    %0 = vector.load %arg1[%c0, %c0_0] : memref<16x512xf32, #tpu.memory_space<vmem>>, vector<16x512xf32>
    %c0_1 = arith.constant 0 : index
    %c0_2 = arith.constant 0 : index
    %1 = vector.load %arg2[%c0_1, %c0_2] : memref<1x512xf32, #tpu.memory_space<vmem>>, vector<1x512xf32>
    %2 = vector.broadcast %1 : vector<1x512xf32> to vector<16x512xf32>
    %3 = arith.mulf %0, %2 : vector<16x512xf32>
    %c0_3 = arith.constant 0 : index
    %c0_4 = arith.constant 0 : index
    %4 = vector.load %arg3[%c0_3, %c0_4] : memref<1x512xf32, #tpu.memory_space<vmem>>, vector<1x512xf32>
    %5 = vector.broadcast %4 : vector<1x512xf32> to vector<16x512xf32>
    %6 = arith.addf %3, %5 : vector<16x512xf32>
    %cst = arith.constant 0.000000e+00 : f32
    %7 = vector.broadcast %cst : f32 to vector<16x512xf32>
    %8 = arith.maximumf %6, %7 : vector<16x512xf32>
    %c0_5 = arith.constant 0 : index
    %c0_6 = arith.constant 0 : index
    %9 = vector.load %arg4[%c0_5, %c0_6] : memref<16x512xf32, #tpu.memory_space<vmem>>, vector<16x512xf32>
    tpu.vector_store %arg4[%c0_5, %c0_6], %8 {strides = array<i32>} : memref<16x512xf32, #tpu.memory_space<vmem>>, vector<16x512xf32>,
    return
  }
  func.func @transform_0(%arg0: i32) -> (i32, i32) {
    %c0_i32 = arith.constant 0 : i32
    %c0_i32_0 = arith.constant 0 : i32
    return %arg0, %c0_i32 : i32, i32
  }
  func.func @transform_1(%arg0: i32) -> (i32, i32) {
    %c0_i32 = arith.constant 0 : i32
    %c0_i32_0 = arith.constant 0 : i32
    %c0_i32_1 = arith.constant 0 : i32
    return %c0_i32, %c0_i32_0 : i32, i32
  }
  func.func @transform_2(%arg0: i32) -> (i32, i32) {
    %c0_i32 = arith.constant 0 : i32
    %c0_i32_0 = arith.constant 0 : i32
    %c0_i32_1 = arith.constant 0 : i32
    return %c0_i32, %c0_i32_0 : i32, i32
  }
  func.func @transform_3(%arg0: i32) -> (i32, i32) {
    %c0_i32 = arith.constant 0 : i32
    %c0_i32_0 = arith.constant 0 : i32
    return %arg0, %c0_i32 : i32, i32
  }
}

module attributes {stable_mosaic.version = 11 : i64} {
  func.func @_matmul_stats_kernel(%arg0: i32, %arg1: memref<128x576xbf16, #tpu.memory_space<vmem>>, %arg2: memref<576x64xbf16, #tpu.memory_space<vmem>>, %arg3: memref<128x64xf32, #tpu.memory_space<vmem>>, %arg4: memref<8x64xf32, #tpu.memory_space<vmem>>, %arg5: memref<8x64xf32, #tpu.memory_space<vmem>>) attributes {dimension_semantics = [#tpu.dimension_semantics<parallel>], iteration_bounds = array<i64: 1>, scalar_prefetch = 0 : i64, scratch_operands = 0 : i64, tpu.core_type = #tpu.core_type<tc>, window_params = [{transform_indices = @transform_0, window_bounds = array<i64: 128, 576>}, {pipeline_mode = #tpu.pipeline_mode<synchronous>, transform_indices = @transform_1, window_bounds = array<i64: 576, 64>}, {transform_indices = @transform_2, window_bounds = array<i64: 128, 64>}, {transform_indices = @transform_3, window_bounds = array<i64: 8, 64>}, {transform_indices = @transform_4, window_bounds = array<i64: 8, 64>}]} {
    %c0 = arith.constant 0 : index
    %c0_0 = arith.constant 0 : index
    %0 = vector.load %arg1[%c0, %c0_0] : memref<128x576xbf16, #tpu.memory_space<vmem>>, vector<128x576xbf16>
    %c0_1 = arith.constant 0 : index
    %c0_2 = arith.constant 0 : index
    %1 = vector.load %arg2[%c0_1, %c0_2] : memref<576x64xbf16, #tpu.memory_space<vmem>>, vector<576x64xbf16>
    %cst = arith.constant dense<0.000000e+00> : vector<128x64xf32>
    %2 = tpu.matmul %0, %1, %cst {dimension_numbers = #tpu.dot_dimension_numbers<[1], [0], [0], [1], [0, 0, 1, 1], [], []>} : vector<128x576xbf16>, vector<576x64xbf16>, vector<128x64xf32> -> vector<128x64xf32>
    %c0_3 = arith.constant 0 : index
    %c0_4 = arith.constant 0 : index
    %3 = vector.load %arg3[%c0_3, %c0_4] : memref<128x64xf32, #tpu.memory_space<vmem>>, vector<128x64xf32>
    tpu.vector_store %arg3[%c0_3, %c0_4], %2 {strides = array<i32>} : memref<128x64xf32, #tpu.memory_space<vmem>>, vector<128x64xf32>,
    %cst_5 = arith.constant dense<0.000000e+00> : vector<64xf32>
    %4 = vector.multi_reduction <add>, %2, %cst_5 [0] : vector<128x64xf32> to vector<64xf32>
    %5 = vector.shape_cast %4 : vector<64xf32> to vector<1x64xf32>
    %6 = arith.mulf %2, %2 : vector<128x64xf32>
    %cst_6 = arith.constant dense<0.000000e+00> : vector<64xf32>
    %7 = vector.multi_reduction <add>, %6, %cst_6 [0] : vector<128x64xf32> to vector<64xf32>
    %8 = vector.shape_cast %7 : vector<64xf32> to vector<1x64xf32>
    %9 = vector.shape_cast %5 : vector<1x64xf32> to vector<1x64xf32>
    %10 = vector.broadcast %9 : vector<1x64xf32> to vector<8x64xf32>
    %c0_7 = arith.constant 0 : index
    %c0_8 = arith.constant 0 : index
    %11 = vector.load %arg4[%c0_7, %c0_8] : memref<8x64xf32, #tpu.memory_space<vmem>>, vector<8x64xf32>
    tpu.vector_store %arg4[%c0_7, %c0_8], %10 {strides = array<i32>} : memref<8x64xf32, #tpu.memory_space<vmem>>, vector<8x64xf32>,
    %12 = vector.shape_cast %8 : vector<1x64xf32> to vector<1x64xf32>
    %13 = vector.broadcast %12 : vector<1x64xf32> to vector<8x64xf32>
    %c0_9 = arith.constant 0 : index
    %c0_10 = arith.constant 0 : index
    %14 = vector.load %arg5[%c0_9, %c0_10] : memref<8x64xf32, #tpu.memory_space<vmem>>, vector<8x64xf32>
    tpu.vector_store %arg5[%c0_9, %c0_10], %13 {strides = array<i32>} : memref<8x64xf32, #tpu.memory_space<vmem>>, vector<8x64xf32>,
    return
  }
  func.func @transform_0(%arg0: i32) -> (i32, i32) {
    %c0_i32 = arith.constant 0 : i32
    %c0_i32_0 = arith.constant 0 : i32
    return %arg0, %c0_i32 : i32, i32
  }
  func.func @transform_1(%arg0: i32) -> (i32, i32) {
    %c0_i32 = arith.constant 0 : i32
    %c0_i32_0 = arith.constant 0 : i32
    %c0_i32_1 = arith.constant 0 : i32
    return %c0_i32, %c0_i32_0 : i32, i32
  }
  func.func @transform_2(%arg0: i32) -> (i32, i32) {
    %c0_i32 = arith.constant 0 : i32
    %c0_i32_0 = arith.constant 0 : i32
    return %arg0, %c0_i32 : i32, i32
  }
  func.func @transform_3(%arg0: i32) -> (i32, i32) {
    %c0_i32 = arith.constant 0 : i32
    %c0_i32_0 = arith.constant 0 : i32
    return %arg0, %c0_i32 : i32, i32
  }
  func.func @transform_4(%arg0: i32) -> (i32, i32) {
    %c0_i32 = arith.constant 0 : i32
    %c0_i32_0 = arith.constant 0 : i32
    return %arg0, %c0_i32 : i32, i32
  }
}

module attributes {stable_mosaic.version = 11 : i64} {
  func.func @_bn2_act_kernel(%arg0: i32, %arg1: memref<16x512xf32, #tpu.memory_space<vmem>>, %arg2: memref<1x512xf32, #tpu.memory_space<vmem>>, %arg3: memref<1x512xf32, #tpu.memory_space<vmem>>, %arg4: memref<16x512xf32, #tpu.memory_space<vmem>>, %arg5: memref<1x512xf32, #tpu.memory_space<vmem>>, %arg6: memref<1x512xf32, #tpu.memory_space<vmem>>, %arg7: memref<16x512xf32, #tpu.memory_space<vmem>>) attributes {dimension_semantics = [#tpu.dimension_semantics<parallel>], iteration_bounds = array<i64: 1>, scalar_prefetch = 0 : i64, scratch_operands = 0 : i64, tpu.core_type = #tpu.core_type<tc>, window_params = [{transform_indices = @transform_0, window_bounds = array<i64: 16, 512>}, {pipeline_mode = #tpu.pipeline_mode<synchronous>, transform_indices = @transform_1, window_bounds = array<i64: 1, 512>}, {pipeline_mode = #tpu.pipeline_mode<synchronous>, transform_indices = @transform_2, window_bounds = array<i64: 1, 512>}, {transform_indices = @transform_3, window_bounds = array<i64: 16, 512>}, {pipeline_mode = #tpu.pipeline_mode<synchronous>, transform_indices = @transform_4, window_bounds = array<i64: 1, 512>}, {pipeline_mode = #tpu.pipeline_mode<synchronous>, transform_indices = @transform_5, window_bounds = array<i64: 1, 512>}, {transform_indices = @transform_6, window_bounds = array<i64: 16, 512>}]} {
    %c0 = arith.constant 0 : index
    %c0_0 = arith.constant 0 : index
    %0 = vector.load %arg1[%c0, %c0_0] : memref<16x512xf32, #tpu.memory_space<vmem>>, vector<16x512xf32>
    %c0_1 = arith.constant 0 : index
    %c0_2 = arith.constant 0 : index
    %1 = vector.load %arg2[%c0_1, %c0_2] : memref<1x512xf32, #tpu.memory_space<vmem>>, vector<1x512xf32>
    %2 = vector.broadcast %1 : vector<1x512xf32> to vector<16x512xf32>
    %3 = arith.mulf %0, %2 : vector<16x512xf32>
    %c0_3 = arith.constant 0 : index
    %c0_4 = arith.constant 0 : index
    %4 = vector.load %arg3[%c0_3, %c0_4] : memref<1x512xf32, #tpu.memory_space<vmem>>, vector<1x512xf32>
    %5 = vector.broadcast %4 : vector<1x512xf32> to vector<16x512xf32>
    %6 = arith.addf %3, %5 : vector<16x512xf32>
    %c0_5 = arith.constant 0 : index
    %c0_6 = arith.constant 0 : index
    %7 = vector.load %arg4[%c0_5, %c0_6] : memref<16x512xf32, #tpu.memory_space<vmem>>, vector<16x512xf32>
    %c0_7 = arith.constant 0 : index
    %c0_8 = arith.constant 0 : index
    %8 = vector.load %arg5[%c0_7, %c0_8] : memref<1x512xf32, #tpu.memory_space<vmem>>, vector<1x512xf32>
    %9 = vector.broadcast %8 : vector<1x512xf32> to vector<16x512xf32>
    %10 = arith.mulf %7, %9 : vector<16x512xf32>
    %11 = arith.addf %6, %10 : vector<16x512xf32>
    %c0_9 = arith.constant 0 : index
    %c0_10 = arith.constant 0 : index
    %12 = vector.load %arg6[%c0_9, %c0_10] : memref<1x512xf32, #tpu.memory_space<vmem>>, vector<1x512xf32>
    %13 = vector.broadcast %12 : vector<1x512xf32> to vector<16x512xf32>
    %14 = arith.addf %11, %13 : vector<16x512xf32>
    %cst = arith.constant 0.000000e+00 : f32
    %15 = vector.broadcast %cst : f32 to vector<16x512xf32>
    %16 = arith.maximumf %14, %15 : vector<16x512xf32>
    %c0_11 = arith.constant 0 : index
    %c0_12 = arith.constant 0 : index
    %17 = vector.load %arg7[%c0_11, %c0_12] : memref<16x512xf32, #tpu.memory_space<vmem>>, vector<16x512xf32>
    tpu.vector_store %arg7[%c0_11, %c0_12], %16 {strides = array<i32>} : memref<16x512xf32, #tpu.memory_space<vmem>>, vector<16x512xf32>,
    return
  }
  func.func @transform_0(%arg0: i32) -> (i32, i32) {
    %c0_i32 = arith.constant 0 : i32
    %c0_i32_0 = arith.constant 0 : i32
    return %arg0, %c0_i32 : i32, i32
  }
  func.func @transform_1(%arg0: i32) -> (i32, i32) {
    %c0_i32 = arith.constant 0 : i32
    %c0_i32_0 = arith.constant 0 : i32
    %c0_i32_1 = arith.constant 0 : i32
    return %c0_i32, %c0_i32_0 : i32, i32
  }
  func.func @transform_2(%arg0: i32) -> (i32, i32) {
    %c0_i32 = arith.constant 0 : i32
    %c0_i32_0 = arith.constant 0 : i32
    %c0_i32_1 = arith.constant 0 : i32
    return %c0_i32, %c0_i32_0 : i32, i32
  }
  func.func @transform_3(%arg0: i32) -> (i32, i32) {
    %c0_i32 = arith.constant 0 : i32
    %c0_i32_0 = arith.constant 0 : i32
    return %arg0, %c0_i32 : i32, i32
  }
  func.func @transform_4(%arg0: i32) -> (i32, i32) {
    %c0_i32 = arith.constant 0 : i32
    %c0_i32_0 = arith.constant 0 : i32
    %c0_i32_1 = arith.constant 0 : i32
    return %c0_i32, %c0_i32_0 : i32, i32
  }
  func.func @transform_5(%arg0: i32) -> (i32, i32) {
    %c0_i32 = arith.constant 0 : i32
    %c0_i32_0 = arith.constant 0 : i32
    %c0_i32_1 = arith.constant 0 : i32
    return %c0_i32, %c0_i32_0 : i32, i32
  }
  func.func @transform_6(%arg0: i32) -> (i32, i32) {
    %c0_i32 = arith.constant 0 : i32
    %c0_i32_0 = arith.constant 0 : i32
    return %arg0, %c0_i32 : i32, i32
  }
}

module attributes {stable_mosaic.version = 11 : i64} {
  func.func @_linear_kernel(%arg0: i32, %arg1: memref<2x64xf32, #tpu.memory_space<vmem>>, %arg2: memref<64x10xf32, #tpu.memory_space<vmem>>, %arg3: memref<1x10xf32, #tpu.memory_space<vmem>>, %arg4: memref<2x10xf32, #tpu.memory_space<vmem>>) attributes {dimension_semantics = [#tpu.dimension_semantics<parallel>], iteration_bounds = array<i64: 1>, scalar_prefetch = 0 : i64, scratch_operands = 0 : i64, tpu.core_type = #tpu.core_type<tc>, window_params = [{transform_indices = @transform_0, window_bounds = array<i64: 2, 64>}, {pipeline_mode = #tpu.pipeline_mode<synchronous>, transform_indices = @transform_1, window_bounds = array<i64: 64, 10>}, {pipeline_mode = #tpu.pipeline_mode<synchronous>, transform_indices = @transform_2, window_bounds = array<i64: 1, 10>}, {transform_indices = @transform_3, window_bounds = array<i64: 2, 10>}]} {
    %c0 = arith.constant 0 : index
    %c0_0 = arith.constant 0 : index
    %0 = vector.load %arg1[%c0, %c0_0] : memref<2x64xf32, #tpu.memory_space<vmem>>, vector<2x64xf32>
    %c0_1 = arith.constant 0 : index
    %c0_2 = arith.constant 0 : index
    %1 = vector.load %arg2[%c0_1, %c0_2] : memref<64x10xf32, #tpu.memory_space<vmem>>, vector<64x10xf32>
    %cst = arith.constant dense<0.000000e+00> : vector<2x10xf32>
    %2 = tpu.matmul %0, %1, %cst {dimension_numbers = #tpu.dot_dimension_numbers<[1], [0], [0], [1], [0, 0, 1, 1], [], []>} : vector<2x64xf32>, vector<64x10xf32>, vector<2x10xf32> -> vector<2x10xf32>
    %c0_3 = arith.constant 0 : index
    %c0_4 = arith.constant 0 : index
    %3 = vector.load %arg3[%c0_3, %c0_4] : memref<1x10xf32, #tpu.memory_space<vmem>>, vector<1x10xf32>
    %4 = vector.broadcast %3 : vector<1x10xf32> to vector<2x10xf32>
    %5 = arith.addf %2, %4 : vector<2x10xf32>
    %c0_5 = arith.constant 0 : index
    %c0_6 = arith.constant 0 : index
    %6 = vector.load %arg4[%c0_5, %c0_6] : memref<2x10xf32, #tpu.memory_space<vmem>>, vector<2x10xf32>
    tpu.vector_store %arg4[%c0_5, %c0_6], %5 {strides = array<i32>} : memref<2x10xf32, #tpu.memory_space<vmem>>, vector<2x10xf32>,
    return
  }
  func.func @transform_0(%arg0: i32) -> (i32, i32) {
    %c0_i32 = arith.constant 0 : i32
    %c0_i32_0 = arith.constant 0 : i32
    return %arg0, %c0_i32 : i32, i32
  }
  func.func @transform_1(%arg0: i32) -> (i32, i32) {
    %c0_i32 = arith.constant 0 : i32
    %c0_i32_0 = arith.constant 0 : i32
    %c0_i32_1 = arith.constant 0 : i32
    return %c0_i32, %c0_i32_0 : i32, i32
  }
  func.func @transform_2(%arg0: i32) -> (i32, i32) {
    %c0_i32 = arith.constant 0 : i32
    %c0_i32_0 = arith.constant 0 : i32
    %c0_i32_1 = arith.constant 0 : i32
    return %c0_i32, %c0_i32_0 : i32, i32
  }
  func.func @transform_3(%arg0: i32) -> (i32, i32) {
    %c0_i32 = arith.constant 0 : i32
    %c0_i32_0 = arith.constant 0 : i32
    return %arg0, %c0_i32 : i32, i32
  }
}

</mosaic_0001>

<bundles_post_ra>
// kernel: tile.98
= control target key start
LH: loop header
LB: loop body
LE: loop exit
PB: predicated region body
PF: predicated region fallthrough
CT: control target
= control target key end

     0   :  { %s40_s0 = inlined_call_operand.vmem [shape: f32[16], index: 0, kind: input, shape index: {}]   ;;  %s41_s1 = inlined_call_operand.vmem [shape: f32[32,16], index: 1, kind: output, shape index: {}]  }
   0x1   :  { %v4_v0 = vld [vmem:[%s40_s0] ss:$0 sm:$0xff] }
   0x2   :  { %5 = vst [vmem:[%s41_s1] sm:$0xff] %v4_v0 }
   0x3   :  { %12 = vst [vmem:[%s41_s1 + $0x8] sm:$0xff] %v4_v0 }
   0x4   :  { %13 = vst [vmem:[%s41_s1 + $0x10] sm:$0xff] %v4_v0 }
   0x5   :  { %14 = vst [vmem:[%s41_s1 + $0x18] sm:$0xff] %v4_v0 }

// kernel: tile.99
= control target key start
LH: loop header
LB: loop body
LE: loop exit
PB: predicated region body
PF: predicated region fallthrough
CT: control target
= control target key end

     0   :  { %s88_s8 = smov 112   ;;  %s89_s11 = smov 80   ;;  %vm3_vm0 = vcmask 130048   ;;  %vm9_vm1 = vcmask 1048448   ;;  %vm15_vm2 = vcmask 917248   ;;  %vm21_vm3 = vcmask 786048   ;;  %s141_s0 = inlined_call_operand.vmem [shape: f32[32,16], index: 0, kind: input, shape index: {}]   ;;  %s142_s1 = inlined_call_operand.vmem [shape: f32[1,512], index: 1, kind: output, shape index: {}]  }
   0x1   :  { %v71_v0 = vld [vmem:[%s141_s0 + $0x7] ss:$8 sm:$0xf]   ;;  %v73_v1 = vld [vmem:[%s141_s0 + $0x5] ss:$8 sm:$0xf]  }
   0x2   :  { %7 = vrot.lane.b32.xlu0 %v71_v0, %s88_s8  ;;  %19 = vrot.lane.b32.xlu1 %v73_v1, %s89_s11  ;;  %v75_v2 = vld [vmem:[%s141_s0 + $0x3] ss:$8 sm:$0xf]   ;;  %s90_s14 = smov 48   ;;  %s91_s19 = smov 96   ;;  %vm27_vm4 = vcmask 654848  }
   0x3   :  { %31 = vrot.lane.b32.xlu2 %v75_v2, %s90_s14  ;;  %v72_v3 = vld [vmem:[%s141_s0 + $0x6] ss:$8 sm:$0xf]   ;;  %v74_v4 = vld [vmem:[%s141_s0 + $0x4] ss:$8 sm:$0xf]  }
   0x4   :  { %s92_s20 = smov 64   ;;  %v76_v5 = vld [vmem:[%s141_s0 + $0x2] ss:$8 sm:$0xf]   ;;  %s93_s23 = smov 32   ;;  %vm33_vm5 = vcmask 523648  }
   0x5   :  { %v77_v6 = vld [vmem:[%s141_s0 + $0x1] ss:$8 sm:$0xf]   ;;  %s94_s26 = smov 16   ;;  %vm39_vm6 = vcmask 392448   ;;  %vm45_vm7 = vcmask 261248  }
   0x6   :  { %v2_v7 = vld [vmem:[%s141_s0] ss:$8 sm:$0xf]  }
   0x7   :  { %4 = vst.msk [vmem:[#allocation0] ss:$8 sm:$0xf] %vm3_vm0, %v2_v7  }
   0xa   :  { %13 = vrot.lane.b32.xlu0 %v72_v3, %s91_s19  ;;  %25 = vrot.lane.b32.xlu1 %v74_v4, %s92_s20 }
   0xb   :  { %37 = vrot.lane.b32.xlu2 %v76_v5, %s93_s23 }
  0x12   :  { %43 = vrot.lane.b32.xlu0 %v77_v6, %s94_s26 }
  0x5d   :  { %v32_v8 = vpop.permute.xlu2 %31  }
  0x65   :  { %v38_v9 = vpop.permute.xlu2 %37  }
  0x74   :  { %v8_v10 = vpop.permute.xlu0 %7   ;;  %v20_v11 = vpop.permute.xlu1 %19  }
  0x75   :  { %10 = vst.msk [vmem:[#allocation0] ss:$8 sm:$0xf] %vm9_vm1, %v8_v10  }
  0x7c   :  { %v14_v12 = vpop.permute.xlu0 %13   ;;  %v26_v13 = vpop.permute.xlu1 %25  }
  0x7d   :  { %16 = vst.msk [vmem:[#allocation0] ss:$8 sm:$0xf] %vm15_vm2, %v14_v12  }
  0x7e   :  { %22 = vst.msk [vmem:[#allocation0] ss:$8 sm:$0xf] %vm21_vm3, %v20_v11  }
  0x7f   :  { %28 = vst.msk [vmem:[#allocation0] ss:$8 sm:$0xf] %vm27_vm4, %v26_v13  }
  0x80   :  { %34 = vst.msk [vmem:[#allocation0] ss:$8 sm:$0xf] %vm33_vm5, %v32_v8  }
  0x81   :  { %40 = vst.msk [vmem:[#allocation0] ss:$8 sm:$0xf] %vm39_vm6, %v38_v9  }
  0x84   :  { %v44_v14 = vpop.permute.xlu0 %43  }
  0x85   :  { %46 = vst.msk [vmem:[#allocation0] ss:$8 sm:$0xf] %vm45_vm7, %v44_v14  }
  0x8c   :  { %v49_v15 = vld [vmem:[#allocation0] sm:$0x1]  ;;  %v54_v16 = vld [vmem:[#allocation0 + $0x8] sm:$0x1]  ;;  %v60_v17 = vld [vmem:[#allocation0 + $0x10] sm:$0x1] }
  0x8d   :  { %52 = vst [vmem:[%s142_s1] sm:$0x1] %v49_v15  ;;  %v66_v18 = vld [vmem:[#allocation0 + $0x18] sm:$0x1] }
  0x8e   :  { %78 = vst [vmem:[%s142_s1 + $0x1] sm:$0x1] %v54_v16 }
  0x8f   :  { %79 = vst [vmem:[%s142_s1 + $0x2] sm:$0x1] %v60_v17 }
  0x90   :  { %80 = vst [vmem:[%s142_s1 + $0x3] sm:$0x1] %v66_v18 }

// kernel: _lambda_.15
= control target key start
LH: loop header
LB: loop body
LE: loop exit
PB: predicated region body
PF: predicated region fallthrough
CT: control target
= control target key end

     0   :  { %s1514_s15 = smov 0   ;;  %s2175_s0 = inlined_call_operand.vmem [shape: bf16[2048,27], index: 0, kind: input, shape index: {}]   ;;  %s2176_s1 = inlined_call_operand.vmem [shape: bf16[27,16], index: 1, kind: input, shape index: {}]   ;;  %s2177_s2 = inlined_call_operand.vmem [shape: f32[2048,16], index: 2, kind: output, shape index: {0}]   ;;  %s2178_s3 = inlined_call_operand.vmem [shape: f32[32,16], index: 3, kind: output, shape index: {1}]   ;;  %s2179_s4 = inlined_call_operand.vmem [shape: f32[32,16], index: 4, kind: output, shape index: {2}]  }
   0x1 LB: > { %s1520_s16 = sadd.s32 4294967295, %s1486_s15   ;;  %p1254_p0 = scmp.ge.s32.totalorder %s1486_s15, 1  ;;  %s1486_s15 = sphi %s1514_s15, %s15_s15  }
   0x2   : > { %p168_p1 = scmp.lt.s32.totalorder %s1486_s15, 5 }
   0x4   : > { %p169_p2 = pnand %p1254_p0, %p168_p1 }
   0x5   : > { %s1255_s21 = sshll.u32 (!%p169_p2), %s1520_s16, 6  ;;  %p214_p4 = scmp.lt.s32.totalorder (!%p169_p2), %s1520_s16, 3 }
   0x6   : > { %172 = sbr.rel (%p169_p2) target bundleno = 384 (0x180), region = 28  ;;  %p203_p3 = scmp.lt.s32.totalorder (!%p169_p2), %s1255_s21, 255 }
   0xb   : > { %v1395_v0 = vld [vmem:[%s2176_s1 + $0x8] sm:$0xf]  ;;  %v1464_v1 = vld [vmem:[%s2176_s1 + $0x8] sm:$0x30]  ;;  %vm559_vm0 = vcmask 1044480   ;;  %vm560_vm1 = vcmask 1045504  }
   0xc   : > { %v1396_v2 = vor.u32 %v1464_v1, %v1395_v0  ;;  %v1488_v3 = vmov 65535   ;;  %s2181_s21 = smov (!%p203_p3, %s1255_s21), 255  ;;  %v1463_v7 = vld [vmem:[%s2176_s1] sm:$0xff]  ;;  %vm462_vm2 = vcmask 220160   ;;  %vm735_vm3 = vcmask 130048   ;;  %s2183_s16 = smov (!%p214_p4, %s1520_s16), 3 }
   0xd   : > { %v561_v4 = vsel %vm559_vm0, 4294967295, %v1488_v3  ;;  %s1256_s24 = sshll.u32 %s2181_s21, 2  ;;  %s1258_s28 = sshll.u32 %s2181_s21, 3 }
   0xe   : > { %v562_v5 = vsel %vm560_vm1, %v561_v4, 0  ;;  %s1540_s27 = scalar_lea.vmem %s2175_s0, %s1256_s24  ;;  %s1602_s5 = scalar_lea.vmem %s2177_s2, %s1258_s28 }
   0xf   : > { %v564_v6 = vand.u32 %v1396_v2, %v562_v5  ;;  %v1431_v8 = vld [vmem:[%s1540_s27] sm:$0xff]  ;;  %v1432_v10 = vld [vmem:[%s1540_s27 + $0x8] sm:$0xff]  ;;  %v1433_v13 = vld [vmem:[%s1540_s27 + $0x10] sm:$0xff]  ;;  %s1259_s6 = sshll.u32 %s2183_s16, 3 }
  0x10   : > { %v1439_v9 = vld [vmem:[%s1540_s27 + $0x40] sm:$0xff]  ;;  %v1440_v11 = vld [vmem:[%s1540_s27 + $0x48] sm:$0xff]  ;;  %v1441_v14 = vld [vmem:[%s1540_s27 + $0x50] sm:$0xff]  ;;  %s217_s9 = scalar_lea.vmem %s2178_s3, %s1259_s6  ;;  %s221_s12 = scalar_lea.vmem %s2179_s4, %s1259_s6 }
  0x11   : > { %572 = vmatpush.bf16.msra.mxu0 %v564_v6  ;;  %1465 = vmatpush.bf16.msra.mxu1 %v564_v6  ;;  %v1447_v12 = vld [vmem:[%s1540_s27 + $0x80] sm:$0xff]  ;;  %v1448_v15 = vld [vmem:[%s1540_s27 + $0x88] sm:$0xff]  ;;  %v1434_v16 = vld [vmem:[%s1540_s27 + $0x18] sm:$0xff] }
  0x12   : > { %1466 = vmatpush.bf16.msra.mxu2 %v564_v6  ;;  %1467 = vmatpush.bf16.msra.mxu3 %v564_v6  ;;  %v1442_v17 = vld [vmem:[%s1540_s27 + $0x58] sm:$0xff]  ;;  %v1449_v18 = vld [vmem:[%s1540_s27 + $0x90] sm:$0xff]  ;;  %v1455_v19 = vld [vmem:[%s1540_s27 + $0xc0] sm:$0xff] }
  0x13   : > { %v1435_v20 = vld [vmem:[%s1540_s27 + $0x20] sm:$0xff]  ;;  %v1450_v22 = vld [vmem:[%s1540_s27 + $0x98] sm:$0xff]  ;;  %v1456_v23 = vld [vmem:[%s1540_s27 + $0xc8] sm:$0xff] }
  0x14   : > { %v1443_v21 = vld [vmem:[%s1540_s27 + $0x60] sm:$0xff]  ;;  %v1436_v24 = vld [vmem:[%s1540_s27 + $0x28] sm:$0xff]  ;;  %v1457_v27 = vld [vmem:[%s1540_s27 + $0xd0] sm:$0xff] }
  0x15   : > { %573 = vmatpush.bf16.msra.mxu0 %v1463_v7  ;;  %1468 = vmatpush.bf16.msra.mxu1 %v1463_v7  ;;  %v1444_v25 = vld [vmem:[%s1540_s27 + $0x68] sm:$0xff]  ;;  %v1451_v26 = vld [vmem:[%s1540_s27 + $0xa0] sm:$0xff]  ;;  %v1437_v28 = vld [vmem:[%s1540_s27 + $0x30] sm:$0xff] }
  0x16   : > { %1469 = vmatpush.bf16.msra.mxu2 %v1463_v7  ;;  %1470 = vmatpush.bf16.msra.mxu3 %v1463_v7  ;;  %v1445_v29 = vld [vmem:[%s1540_s27 + $0x70] sm:$0xff]  ;;  %v1452_v30 = vld [vmem:[%s1540_s27 + $0xa8] sm:$0xff]  ;;  %v1458_v31 = vld [vmem:[%s1540_s27 + $0xd8] sm:$0xff] }
  0x17   : > { %v1438_v32 = vld [vmem:[%s1540_s27 + $0x38] sm:$0xff]  ;;  %v1453_v34 = vld [vmem:[%s1540_s27 + $0xb0] sm:$0xff]  ;;  %v1459_v35 = vld [vmem:[%s1540_s27 + $0xe0] sm:$0xff] }
  0x18   : > { %1397 = vmatmul.msk.bf16.vlgmr.msra.gmra.mxu0 %vm462_vm2, %v1431_v8  ;;  %1405 = vmatmul.msk.bf16.vlgmr.msra.gmra.mxu1 %vm462_vm2, %v1439_v9  ;;  %v1446_v33 = vld [vmem:[%s1540_s27 + $0x78] sm:$0xff]  ;;  %v1460_v39 = vld [vmem:[%s1540_s27 + $0xe8] sm:$0xff]  ;;  %v1461_v56 = vld [vmem:[%s1540_s27 + $0xf0] sm:$0xff] }
  0x19   : > { %1413 = vmatmul.msk.bf16.vlgmr.msra.gmra.mxu2 %vm462_vm2, %v1447_v12  ;;  %1421 = vmatmul.msk.bf16.vlgmr.msra.gmra.mxu3 %vm462_vm2, %v1455_v19  ;;  %v1454_v38 = vld [vmem:[%s1540_s27 + $0xb8] sm:$0xff] }
  0x1a   : > { %v1462_v9 = vld [vmem:[%s1540_s27 + $0xf8] sm:$0xff] }
  0x28   : > { %1398 = vmatmul.msk.bf16.gmra.mxu0 %vm462_vm2, %v1432_v10  ;;  %1406 = vmatmul.msk.bf16.gmra.mxu1 %vm462_vm2, %v1440_v11 }
  0x29   : > { %1414 = vmatmul.msk.bf16.gmra.mxu2 %vm462_vm2, %v1448_v15  ;;  %1422 = vmatmul.msk.bf16.gmra.mxu3 %vm462_vm2, %v1456_v23 }
  0x38   : > { %1399 = vmatmul.msk.bf16.gmra.mxu0 %vm462_vm2, %v1433_v13  ;;  %1407 = vmatmul.msk.bf16.gmra.mxu1 %vm462_vm2, %v1441_v14 }
  0x39   : > { %1415 = vmatmul.msk.bf16.gmra.mxu2 %vm462_vm2, %v1449_v18  ;;  %1423 = vmatmul.msk.bf16.gmra.mxu3 %vm462_vm2, %v1457_v27 }
  0x48   : > { %1400 = vmatmul.msk.bf16.gmra.mxu0 %vm462_vm2, %v1434_v16  ;;  %1408 = vmatmul.msk.bf16.gmra.mxu1 %vm462_vm2, %v1442_v17 }
  0x49   : > { %1416 = vmatmul.msk.bf16.gmra.mxu2 %vm462_vm2, %v1450_v22  ;;  %1424 = vmatmul.msk.bf16.gmra.mxu3 %vm462_vm2, %v1458_v31 }
  0x58   : > { %1401 = vmatmul.msk.bf16.gmra.mxu0 %vm462_vm2, %v1435_v20  ;;  %1409 = vmatmul.msk.bf16.gmra.mxu1 %vm462_vm2, %v1443_v21 }
  0x59   : > { %1417 = vmatmul.msk.bf16.gmra.mxu2 %vm462_vm2, %v1451_v26  ;;  %1425 = vmatmul.msk.bf16.gmra.mxu3 %vm462_vm2, %v1459_v35 }
  0x68   : > { %1402 = vmatmul.msk.bf16.gmra.mxu0 %vm462_vm2, %v1436_v24  ;;  %1410 = vmatmul.msk.bf16.gmra.mxu1 %vm462_vm2, %v1444_v25 }
  0x69   : > { %1418 = vmatmul.msk.bf16.gmra.mxu2 %vm462_vm2, %v1452_v30  ;;  %1426 = vmatmul.msk.bf16.gmra.mxu3 %vm462_vm2, %v1460_v39 }
  0x78   : > { %1403 = vmatmul.msk.bf16.gmra.mxu0 %vm462_vm2, %v1437_v28  ;;  %1411 = vmatmul.msk.bf16.gmra.mxu1 %vm462_vm2, %v1445_v29 }
  0x79   : > { %1419 = vmatmul.msk.bf16.gmra.mxu2 %vm462_vm2, %v1453_v34  ;;  %1427 = vmatmul.msk.bf16.gmra.mxu3 %vm462_vm2, %v1461_v56 }
  0x88   : > { %1404 = vmatmul.msk.bf16.gmra.mxu0 %vm462_vm2, %v1438_v32  ;;  %1412 = vmatmul.msk.bf16.gmra.mxu1 %vm462_vm2, %v1446_v33 }
  0x89   : > { %1420 = vmatmul.msk.bf16.gmra.mxu2 %vm462_vm2, %v1454_v38  ;;  %1428 = vmatmul.msk.bf16.gmra.mxu3 %vm462_vm2, %v1462_v9 }
  0x95   : > { %v575_v36 = vpop.f32.mrf.mxu0  ;;  %v1604_v37 = vpop.f32.mrf.mxu1 }
  0x96   : > { %736 = vst.msk [vmem:[%s1602_s5] sm:$0xff] %vm735_vm3, %v575_v36  ;;  %v933_v40 = vmul.f32 %v575_v36, %v575_v36  ;;  %v800_v43 = vsel %vm735_vm3, %v575_v36, 0.0 }
  0x97   : > { %752 = vst.msk [vmem:[%s1602_s5 + $0x80] sm:$0xff] %vm735_vm3, %v1604_v37 }
  0x98   : > { %v997_v47 = vsel %vm735_vm3, %v933_v40, 0.0 }
  0x9c   : > { %v1642_v62 = vpop.f32.mrf.mxu2  ;;  %v1701_v20 = vpop.f32.mrf.mxu3 }
  0x9d   : > { %v577_v41 = vpop.f32.mrf.mxu0  ;;  %v1615_v42 = vpop.f32.mrf.mxu1  ;;  %768 = vst.msk [vmem:[%s1602_s5 + $0x100] sm:$0xff] %vm735_vm3, %v1642_v62 }
  0x9e   : > { %737 = vst.msk [vmem:[%s1602_s5 + $0x8] sm:$0xff] %vm735_vm3, %v577_v41  ;;  %v801_v44 = vsel %vm735_vm3, %v577_v41, 0.0  ;;  %v934_v45 = vmul.f32 %v577_v41, %v577_v41 }
  0x9f   : > { %v802_v46 = vadd.f32 %v801_v44, %v800_v43  ;;  %753 = vst.msk [vmem:[%s1602_s5 + $0x88] sm:$0xff] %vm735_vm3, %v1615_v42 }
  0xa0   : > { %v998_v48 = vsel %vm735_vm3, %v934_v45, 0.0  ;;  %784 = vst.msk [vmem:[%s1602_s5 + $0x180] sm:$0xff] %vm735_vm3, %v1701_v20 }
  0xa1   : > { %v999_v49 = vadd.f32 %v998_v48, %v997_v47 }
  0xa4   : > { %v1656_v6 = vpop.f32.mrf.mxu2  ;;  %v1718_v24 = vpop.f32.mrf.mxu3 }
  0xa5   : > { %v580_v50 = vpop.f32.mrf.mxu0  ;;  %v1626_v51 = vpop.f32.mrf.mxu1  ;;  %769 = vst.msk [vmem:[%s1602_s5 + $0x108] sm:$0xff] %vm735_vm3, %v1656_v6 }
  0xa6   : > { %738 = vst.msk [vmem:[%s1602_s5 + $0x10] sm:$0xff] %vm735_vm3, %v580_v50  ;;  %v803_v52 = vsel %vm735_vm3, %v580_v50, 0.0  ;;  %v935_v53 = vmul.f32 %v580_v50, %v580_v50 }
  0xa7   : > { %v804_v54 = vadd.f32 %v803_v52, %v802_v46  ;;  %754 = vst.msk [vmem:[%s1602_s5 + $0x90] sm:$0xff] %vm735_vm3, %v1626_v51 }
  0xa8   : > { %v1000_v55 = vsel %vm735_vm3, %v935_v53, 0.0  ;;  %785 = vst.msk [vmem:[%s1602_s5 + $0x188] sm:$0xff] %vm735_vm3, %v1718_v24 }
  0xa9   : > { %v1001_v57 = vadd.f32 %v1000_v55, %v999_v49 }
  0xac   : > { %v1675_v13 = vpop.f32.mrf.mxu2  ;;  %v1735_v28 = vpop.f32.mrf.mxu3 }
  0xad   : > { %v582_v58 = vpop.f32.mrf.mxu0  ;;  %v1637_v59 = vpop.f32.mrf.mxu1  ;;  %770 = vst.msk [vmem:[%s1602_s5 + $0x110] sm:$0xff] %vm735_vm3, %v1675_v13 }
  0xae   : > { %739 = vst.msk [vmem:[%s1602_s5 + $0x18] sm:$0xff] %vm735_vm3, %v582_v58  ;;  %v805_v60 = vsel %vm735_vm3, %v582_v58, 0.0  ;;  %v936_v61 = vmul.f32 %v582_v58, %v582_v58 }
  0xaf   : > { %v806_v63 = vadd.f32 %v805_v60, %v804_v54  ;;  %755 = vst.msk [vmem:[%s1602_s5 + $0x98] sm:$0xff] %vm735_vm3, %v1637_v59 }
  0xb0   : > { %v1002_v0 = vsel %vm735_vm3, %v936_v61, 0.0  ;;  %786 = vst.msk [vmem:[%s1602_s5 + $0x190] sm:$0xff] %vm735_vm3, %v1735_v28 }
  0xb1   : > { %v1003_v1 = vadd.f32 %v1002_v0, %v1001_v57 }
  0xb4   : > { %v1687_v16 = vpop.f32.mrf.mxu2  ;;  %v1752_v32 = vpop.f32.mrf.mxu3 }
  0xb5   : > { %v585_v2 = vpop.f32.mrf.mxu0  ;;  %v1651_v3 = vpop.f32.mrf.mxu1  ;;  %771 = vst.msk [vmem:[%s1602_s5 + $0x118] sm:$0xff] %vm735_vm3, %v1687_v16 }
  0xb6   : > { %740 = vst.msk [vmem:[%s1602_s5 + $0x20] sm:$0xff] %vm735_vm3, %v585_v2  ;;  %v807_v4 = vsel %vm735_vm3, %v585_v2, 0.0  ;;  %v937_v5 = vmul.f32 %v585_v2, %v585_v2 }
  0xb7   : > { %v1658_v7 = vadd.f32 %v807_v4, %v806_v63  ;;  %756 = vst.msk [vmem:[%s1602_s5 + $0xa0] sm:$0xff] %vm735_vm3, %v1651_v3 }
  0xb8   : > { %v1004_v8 = vsel %vm735_vm3, %v937_v5, 0.0  ;;  %787 = vst.msk [vmem:[%s1602_s5 + $0x198] sm:$0xff] %vm735_vm3, %v1752_v32 }
  0xb9   : > { %v1668_v10 = vadd.f32 %v1004_v8, %v1003_v1 }
  0xbc   : > { %v1699_v19 = vpop.f32.mrf.mxu2  ;;  %v1769_v36 = vpop.f32.mrf.mxu3 }
  0xbd   : > { %v587_v11 = vpop.f32.mrf.mxu0  ;;  %v1671_v12 = vpop.f32.mrf.mxu1  ;;  %772 = vst.msk [vmem:[%s1602_s5 + $0x120] sm:$0xff] %vm735_vm3, %v1699_v19 }
  0xbe   : > { %741 = vst.msk [vmem:[%s1602_s5 + $0x28] sm:$0xff] %vm735_vm3, %v587_v11  ;;  %v938_v40 = vmul.f32 %v587_v11, %v587_v11  ;;  %v809_v44 = vsel %vm735_vm3, %v587_v11, 0.0 }
  0xbf   : > { %757 = vst.msk [vmem:[%s1602_s5 + $0xa8] sm:$0xff] %vm735_vm3, %v1671_v12  ;;  %v810_v49 = vadd.f32 %v809_v44, %v1658_v7 }
  0xc0   : > { %788 = vst.msk [vmem:[%s1602_s5 + $0x1a0] sm:$0xff] %vm735_vm3, %v1769_v36  ;;  %v1006_v46 = vsel %vm735_vm3, %v938_v40, 0.0 }
  0xc1   : > { %v1007_v54 = vadd.f32 %v1006_v46, %v1668_v10 }
  0xc4   : > { %v1716_v23 = vpop.f32.mrf.mxu2  ;;  %v1786_v43 = vpop.f32.mrf.mxu3 }
  0xc5   : > { %v590_v14 = vpop.f32.mrf.mxu0  ;;  %v1683_v15 = vpop.f32.mrf.mxu1  ;;  %773 = vst.msk [vmem:[%s1602_s5 + $0x128] sm:$0xff] %vm735_vm3, %v1716_v23 }
  0xc6   : > { %742 = vst.msk [vmem:[%s1602_s5 + $0x30] sm:$0xff] %vm735_vm3, %v590_v14  ;;  %v939_v45 = vmul.f32 %v590_v14, %v590_v14  ;;  %v811_v47 = vsel %vm735_vm3, %v590_v14, 0.0 }
  0xc7   : > { %758 = vst.msk [vmem:[%s1602_s5 + $0xb0] sm:$0xff] %vm735_vm3, %v1683_v15  ;;  %v812_v55 = vadd.f32 %v811_v47, %v810_v49 }
  0xc8   : > { %789 = vst.msk [vmem:[%s1602_s5 + $0x1a8] sm:$0xff] %vm735_vm3, %v1786_v43  ;;  %v1008_v50 = vsel %vm735_vm3, %v939_v45, 0.0 }
  0xc9   : > { %v1009_v1 = vadd.f32 %v1008_v50, %v1007_v54 }
  0xcc   : > { %v1733_v27 = vpop.f32.mrf.mxu2  ;;  %v1812_v0 = vpop.f32.mrf.mxu3 }
  0xcd   : > { %v592_v17 = vpop.f32.mrf.mxu0  ;;  %v1695_v18 = vpop.f32.mrf.mxu1  ;;  %774 = vst.msk [vmem:[%s1602_s5 + $0x130] sm:$0xff] %vm735_vm3, %v1733_v27 }
  0xce   : > { %743 = vst.msk [vmem:[%s1602_s5 + $0x38] sm:$0xff] %vm735_vm3, %v592_v17  ;;  %v940_v48 = vmul.f32 %v592_v17, %v592_v17  ;;  %v813_v52 = vsel %vm735_vm3, %v592_v17, 0.0 }
  0xcf   : > { %759 = vst.msk [vmem:[%s1602_s5 + $0xb8] sm:$0xff] %vm735_vm3, %v1695_v18  ;;  %v814_v2 = vadd.f32 %v813_v52, %v812_v55 }
  0xd0   : > { %v1010_v58 = vsel %vm735_vm3, %v940_v48, 0.0  ;;  %790 = vst.msk [vmem:[%s1602_s5 + $0x1b0] sm:$0xff] %vm735_vm3, %v1812_v0 }
  0xd1   : > { %v1011_v8 = vadd.f32 %v1010_v58, %v1009_v1 }
  0xd4   : > { %v1750_v31 = vpop.f32.mrf.mxu2 }
  0xd5   : > { %v595_v21 = vpop.f32.mrf.mxu0  ;;  %v1712_v22 = vpop.f32.mrf.mxu1  ;;  %775 = vst.msk [vmem:[%s1602_s5 + $0x138] sm:$0xff] %vm735_vm3, %v1750_v31 }
  0xd6   : > { %744 = vst.msk [vmem:[%s1602_s5 + $0x40] sm:$0xff] %vm735_vm3, %v595_v21  ;;  %v941_v53 = vmul.f32 %v595_v21, %v595_v21  ;;  %v815_v60 = vsel %vm735_vm3, %v595_v21, 0.0 }
  0xd7   : > { %760 = vst.msk [vmem:[%s1602_s5 + $0xc0] sm:$0xff] %vm735_vm3, %v1712_v22  ;;  %v816_v9 = vadd.f32 %v815_v60, %v814_v2 }
  0xd8   : > { %v1012_v4 = vsel %vm735_vm3, %v941_v53, 0.0  ;;  %v1837_v53 = vpop.f32.mrf.mxu3 }
  0xd9   : > { %v1013_v17 = vadd.f32 %v1012_v4, %v1011_v8  ;;  %791 = vst.msk [vmem:[%s1602_s5 + $0x1b8] sm:$0xff] %vm735_vm3, %v1837_v53 }
  0xdc   : > { %v1767_v35 = vpop.f32.mrf.mxu2 }
  0xdd   : > { %v597_v25 = vpop.f32.mrf.mxu0  ;;  %v1729_v26 = vpop.f32.mrf.mxu1  ;;  %776 = vst.msk [vmem:[%s1602_s5 + $0x140] sm:$0xff] %vm735_vm3, %v1767_v35 }
  0xde   : > { %745 = vst.msk [vmem:[%s1602_s5 + $0x48] sm:$0xff] %vm735_vm3, %v597_v25  ;;  %v942_v61 = vmul.f32 %v597_v25, %v597_v25  ;;  %v817_v5 = vsel %vm735_vm3, %v597_v25, 0.0 }
  0xdf   : > { %761 = vst.msk [vmem:[%s1602_s5 + $0xc8] sm:$0xff] %vm735_vm3, %v1729_v26  ;;  %v818_v21 = vadd.f32 %v817_v5, %v816_v9 }
  0xe0   : > { %v1014_v10 = vsel %vm735_vm3, %v942_v61, 0.0 }
  0xe1   : > { %v1015_v45 = vadd.f32 %v1014_v10, %v1013_v17 }
  0xe4   : > { %v1784_v41 = vpop.f32.mrf.mxu2 }
  0xe5   : > { %v600_v29 = vpop.f32.mrf.mxu0  ;;  %v1746_v30 = vpop.f32.mrf.mxu1  ;;  %777 = vst.msk [vmem:[%s1602_s5 + $0x148] sm:$0xff] %vm735_vm3, %v1784_v41 }
  0xe6   : > { %746 = vst.msk [vmem:[%s1602_s5 + $0x50] sm:$0xff] %vm735_vm3, %v600_v29  ;;  %v943_v7 = vmul.f32 %v600_v29, %v600_v29  ;;  %v819_v11 = vsel %vm735_vm3, %v600_v29, 0.0 }
  0xe7   : > { %762 = vst.msk [vmem:[%s1602_s5 + $0xd0] sm:$0xff] %vm735_vm3, %v1746_v30  ;;  %v820_v46 = vadd.f32 %v819_v11, %v818_v21  ;;  %v949_v11 = vmul.f32 %v1604_v37, %v1604_v37 }
  0xe8   : > { %v1016_v25 = vsel %vm735_vm3, %v943_v7, 0.0 }
  0xec   : > { %v1810_v63 = vpop.f32.mrf.mxu2 }
  0xed   : > { %v602_v33 = vpop.f32.mrf.mxu0  ;;  %v1763_v34 = vpop.f32.mrf.mxu1  ;;  %778 = vst.msk [vmem:[%s1602_s5 + $0x150] sm:$0xff] %vm735_vm3, %v1810_v63 }
  0xee   : > { %747 = vst.msk [vmem:[%s1602_s5 + $0x58] sm:$0xff] %vm735_vm3, %v602_v33  ;;  %v944_v14 = vmul.f32 %v602_v33, %v602_v33  ;;  %v821_v40 = vsel %vm735_vm3, %v602_v33, 0.0  ;;  %v1017_v33 = vadd.f32 %v1016_v25, %v1015_v45  ;;  %v1862_v25 = vpop.f32.mrf.mxu3  ;;  %v831_v45 = vsel %vm735_vm3, %v1604_v37, 0.0 }
  0xef   : > { %763 = vst.msk [vmem:[%s1602_s5 + $0xd8] sm:$0xff] %vm735_vm3, %v1763_v34  ;;  %v822_v54 = vadd.f32 %v821_v40, %v820_v46  ;;  %v950_v46 = vmul.f32 %v1615_v42, %v1615_v42  ;;  %v951_v37 = vmul.f32 %v1626_v51, %v1626_v51 }
  0xf0   : > { %v1018_v49 = vsel %vm735_vm3, %v944_v14, 0.0  ;;  %792 = vst.msk [vmem:[%s1602_s5 + $0x1c0] sm:$0xff] %vm735_vm3, %v1862_v25 }
  0xf4   : > { %v1835_v52 = vpop.f32.mrf.mxu2 }
  0xf5   : > { %v605_v38 = vpop.f32.mrf.mxu0  ;;  %v1780_v39 = vpop.f32.mrf.mxu1  ;;  %779 = vst.msk [vmem:[%s1602_s5 + $0x158] sm:$0xff] %vm735_vm3, %v1835_v52 }
  0xf6   : > { %748 = vst.msk [vmem:[%s1602_s5 + $0x60] sm:$0xff] %vm735_vm3, %v605_v38  ;;  %v945_v44 = vmul.f32 %v605_v38, %v605_v38  ;;  %v823_v29 = vsel %vm735_vm3, %v605_v38, 0.0  ;;  %v1019_v38 = vadd.f32 %v1018_v49, %v1017_v33  ;;  %v833_v33 = vsel %vm735_vm3, %v1615_v42, 0.0 }
  0xf7   : > { %764 = vst.msk [vmem:[%s1602_s5 + $0xe0] sm:$0xff] %vm735_vm3, %v1780_v39  ;;  %v824_v61 = vadd.f32 %v823_v29, %v822_v54  ;;  %v837_v42 = vsel %vm735_vm3, %v1637_v59, 0.0 }
  0xf8   : > { %v1020_v55 = vsel %vm735_vm3, %v945_v44, 0.0 }
  0xf9   : > { %v1021_v4 = vadd.f32 %v1020_v55, %v1019_v38  ;;  %v952_v38 = vmul.f32 %v1637_v59, %v1637_v59  ;;  %v954_v59 = vmul.f32 %v1671_v12, %v1671_v12 }
  0xfc   : > { %v1860_v21 = vpop.f32.mrf.mxu2 }
  0xfd   : > { %v607_v56 = vpop.f32.mrf.mxu0  ;;  %v1804_v57 = vpop.f32.mrf.mxu1  ;;  %780 = vst.msk [vmem:[%s1602_s5 + $0x160] sm:$0xff] %vm735_vm3, %v1860_v21 }
  0xfe   : > { %749 = vst.msk [vmem:[%s1602_s5 + $0x68] sm:$0xff] %vm735_vm3, %v607_v56  ;;  %v946_v50 = vmul.f32 %v607_v56, %v607_v56  ;;  %v825_v58 = vsel %vm735_vm3, %v607_v56, 0.0 }
  0xff   : > { %765 = vst.msk [vmem:[%s1602_s5 + $0xe8] sm:$0xff] %vm735_vm3, %v1804_v57  ;;  %v826_v5 = vadd.f32 %v825_v58, %v824_v61  ;;  %v1030_v58 = vsel %vm735_vm3, %v950_v46, 0.0 }
 0x100   : > { %v1022_v1 = vsel %vm735_vm3, %v946_v50, 0.0  ;;  %v1028_v50 = vsel %vm735_vm3, %v949_v11, 0.0 }
 0x101   : > { %v1023_v56 = vadd.f32 %v1022_v1, %v1021_v4  ;;  %v953_v4 = vmul.f32 %v1651_v3, %v1651_v3 }
 0x105   : > { %v610_v47 = vpop.f32.mrf.mxu0  ;;  %v1829_v48 = vpop.f32.mrf.mxu1 }
 0x106   : > { %750 = vst.msk [vmem:[%s1602_s5 + $0x70] sm:$0xff] %vm735_vm3, %v610_v47  ;;  %v947_v60 = vmul.f32 %v610_v47, %v610_v47  ;;  %v827_v2 = vsel %vm735_vm3, %v610_v47, 0.0 }
 0x107   : > { %766 = vst.msk [vmem:[%s1602_s5 + $0xf0] sm:$0xff] %vm735_vm3, %v1829_v48  ;;  %v828_v8 = vadd.f32 %v827_v2, %v826_v5  ;;  %v1032_v2 = vsel %vm735_vm3, %v951_v37, 0.0  ;;  %v1893_v5 = vpop.f32.mrf.mxu2  ;;  %v957_v37 = vmul.f32 %v1712_v22, %v1712_v22 }
 0x108   : > { %v1024_v7 = vsel %vm735_vm3, %v947_v60, 0.0  ;;  %v835_v60 = vsel %vm735_vm3, %v1626_v51, 0.0  ;;  %781 = vst.msk [vmem:[%s1602_s5 + $0x168] sm:$0xff] %vm735_vm3, %v1893_v5  ;;  %v1034_v51 = vsel %vm735_vm3, %v952_v38, 0.0  ;;  %v847_v38 = vsel %vm735_vm3, %v1712_v22, 0.0 }
 0x109   : > { %v1025_v40 = vadd.f32 %v1024_v7, %v1023_v56  ;;  %v1895_v7 = vpop.f32.mrf.mxu3 }
 0x10a   : > { %793 = vst.msk [vmem:[%s1602_s5 + $0x1c8] sm:$0xff] %vm735_vm3, %v1895_v7 }
 0x10d   : > { %v612_v9 = vpop.f32.mrf.mxu0  ;;  %v1853_v10 = vpop.f32.mrf.mxu1 }
 0x10e   : > { %751 = vst.msk [vmem:[%s1602_s5 + $0x78] sm:$0xff] %vm735_vm3, %v612_v9  ;;  %v829_v14 = vsel %vm735_vm3, %v612_v9, 0.0  ;;  %v948_v17 = vmul.f32 %v612_v9, %v612_v9  ;;  %v839_v9 = vsel %vm735_vm3, %v1651_v3, 0.0  ;;  %v1038_v3 = vsel %vm735_vm3, %v954_v59, 0.0 }
 0x10f   : > { %v830_v44 = vadd.f32 %v829_v14, %v828_v8  ;;  %767 = vst.msk [vmem:[%s1602_s5 + $0xf8] sm:$0xff] %vm735_vm3, %v1853_v10 }
 0x110   : > { %v1026_v47 = vsel %vm735_vm3, %v948_v17, 0.0  ;;  %v1036_v17 = vsel %vm735_vm3, %v953_v4, 0.0  ;;  %v959_v4 = vmul.f32 %v1746_v30, %v1746_v30 }
 0x111   : > { %v832_v49 = vadd.f32 %v831_v45, %v830_v44  ;;  %v1027_v29 = vadd.f32 %v1026_v47, %v1025_v40  ;;  %v841_v40 = vsel %vm735_vm3, %v1671_v12, 0.0  ;;  %v955_v44 = vmul.f32 %v1683_v15, %v1683_v15 }
 0x112   : > { %v843_v47 = vsel %vm735_vm3, %v1683_v15, 0.0  ;;  %v845_v12 = vsel %vm735_vm3, %v1695_v18, 0.0 }
 0x113   : > { %v834_v54 = vadd.f32 %v833_v33, %v832_v49  ;;  %v1029_v55 = vadd.f32 %v1028_v50, %v1027_v29  ;;  %v956_v49 = vmul.f32 %v1695_v18, %v1695_v18  ;;  %v1040_v33 = vsel %vm735_vm3, %v955_v44, 0.0 }
 0x114   : > { %v958_v18 = vmul.f32 %v1729_v26, %v1729_v26 }
 0x115   : > { %v836_v61 = vadd.f32 %v835_v60, %v834_v54  ;;  %v1031_v1 = vadd.f32 %v1030_v58, %v1029_v55  ;;  %v1923_v54 = vpop.f32.mrf.mxu2  ;;  %v1925_v55 = vpop.f32.mrf.mxu3  ;;  %v1042_v15 = vsel %vm735_vm3, %v956_v49, 0.0 }
 0x116   : > { %782 = vst.msk [vmem:[%s1602_s5 + $0x170] sm:$0xff] %vm735_vm3, %v1923_v54  ;;  %v1046_v22 = vsel %vm735_vm3, %v958_v18, 0.0  ;;  %v965_v18 = vmul.f32 %v1642_v62, %v1642_v62 }
 0x117   : > { %v838_v56 = vadd.f32 %v837_v42, %v836_v61  ;;  %v1033_v8 = vadd.f32 %v1032_v2, %v1031_v1  ;;  %794 = vst.msk [vmem:[%s1602_s5 + $0x1d0] sm:$0xff] %vm735_vm3, %v1925_v55  ;;  %v1044_v2 = vsel %vm735_vm3, %v957_v37, 0.0  ;;  %v849_v42 = vsel %vm735_vm3, %v1729_v26, 0.0 }
 0x118   : > { %v853_v26 = vsel %vm735_vm3, %v1763_v34, 0.0 }
 0x119   : > { %v840_v11 = vadd.f32 %v839_v9, %v838_v56  ;;  %v1035_v14 = vadd.f32 %v1034_v51, %v1033_v8  ;;  %v851_v51 = vsel %vm735_vm3, %v1746_v30, 0.0  ;;  %v960_v9 = vmul.f32 %v1763_v34, %v1763_v34 }
 0x11a   : > { %v962_v34 = vmul.f32 %v1804_v57, %v1804_v57 }
 0x11b   : > { %v842_v45 = vadd.f32 %v841_v40, %v840_v11  ;;  %v1037_v46 = vadd.f32 %v1036_v17, %v1035_v14  ;;  %v1048_v14 = vsel %vm735_vm3, %v959_v4, 0.0  ;;  %v961_v17 = vmul.f32 %v1780_v39, %v1780_v39 }
 0x11c   : > { %v1050_v30 = vsel %vm735_vm3, %v960_v9, 0.0  ;;  %v966_v4 = vmul.f32 %v1656_v6, %v1656_v6  ;;  %v967_v9 = vmul.f32 %v1675_v13, %v1675_v13 }
 0x11d   : > { %v1039_v29 = vadd.f32 %v1038_v3, %v1037_v46  ;;  %v844_v50 = vadd.f32 %v843_v47, %v842_v45  ;;  %v1953_v40 = vpop.f32.mrf.mxu2  ;;  %v1955_v44 = vpop.f32.mrf.mxu3  ;;  %v855_v3 = vsel %vm735_vm3, %v1780_v39, 0.0  ;;  %v1054_v39 = vsel %vm735_vm3, %v962_v34, 0.0 }
 0x11e   : > { %783 = vst.msk [vmem:[%s1602_s5 + $0x178] sm:$0xff] %vm735_vm3, %v1953_v40 }
 0x11f   : > { %v846_v58 = vadd.f32 %v845_v12, %v844_v50  ;;  %v1041_v60 = vadd.f32 %v1040_v33, %v1039_v29  ;;  %795 = vst.msk [vmem:[%s1602_s5 + $0x1d8] sm:$0xff] %vm735_vm3, %v1955_v44  ;;  %v1052_v29 = vsel %vm735_vm3, %v961_v17, 0.0  ;;  %v857_v50 = vsel %vm735_vm3, %v1804_v57, 0.0 }
 0x120   : > { %v963_v33 = vmul.f32 %v1829_v48, %v1829_v48 }
 0x121   : > { %v848_v61 = vadd.f32 %v847_v38, %v846_v58  ;;  %v1043_v1 = vadd.f32 %v1042_v15, %v1041_v60  ;;  %v859_v58 = vsel %vm735_vm3, %v1829_v48, 0.0  ;;  %v964_v60 = vmul.f32 %v1853_v10, %v1853_v10 }
 0x122   : > { %v1056_v57 = vsel %vm735_vm3, %v963_v33, 0.0  ;;  %v863_v48 = vsel %vm735_vm3, %v1642_v62, 0.0  ;;  %v1062_v62 = vsel %vm735_vm3, %v966_v4, 0.0  ;;  %v879_v4 = vsel %vm735_vm3, %v1767_v35, 0.0 }
 0x123   : > { %v850_v56 = vadd.f32 %v849_v42, %v848_v61  ;;  %v1045_v8 = vadd.f32 %v1044_v2, %v1043_v1  ;;  %v861_v61 = vsel %vm735_vm3, %v1853_v10, 0.0  ;;  %v865_v10 = vsel %vm735_vm3, %v1656_v6, 0.0 }
 0x124   : > { %v869_v6 = vsel %vm735_vm3, %v1687_v16, 0.0 }
 0x125   : > { %v852_v59 = vadd.f32 %v851_v51, %v850_v56  ;;  %v1047_v11 = vadd.f32 %v1046_v22, %v1045_v8  ;;  %v1983_v1 = vpop.f32.mrf.mxu3  ;;  %v1058_v56 = vsel %vm735_vm3, %v964_v60, 0.0  ;;  %v1060_v51 = vsel %vm735_vm3, %v965_v18, 0.0 }
 0x126   : > { %796 = vst.msk [vmem:[%s1602_s5 + $0x1e0] sm:$0xff] %vm735_vm3, %v1983_v1 }
 0x127   : > { %v854_v45 = vadd.f32 %v853_v26, %v852_v59  ;;  %v1049_v46 = vadd.f32 %v1048_v14, %v1047_v11  ;;  %v867_v14 = vsel %vm735_vm3, %v1675_v13, 0.0  ;;  %v968_v26 = vmul.f32 %v1687_v16, %v1687_v16 }
 0x129   : > { %v856_v47 = vadd.f32 %v855_v3, %v854_v45  ;;  %v1051_v49 = vadd.f32 %v1050_v30, %v1049_v46  ;;  %v1064_v46 = vsel %vm735_vm3, %v967_v9, 0.0  ;;  %v969_v30 = vmul.f32 %v1699_v19, %v1699_v19 }
 0x12a   : > { %v1066_v13 = vsel %vm735_vm3, %v968_v26, 0.0 }
 0x12b   : > { %v1053_v12 = vadd.f32 %v1052_v29, %v1051_v49  ;;  %v858_v37 = vadd.f32 %v857_v50, %v856_v47  ;;  %v871_v49 = vsel %vm735_vm3, %v1699_v19, 0.0  ;;  %v970_v29 = vmul.f32 %v1716_v23, %v1716_v23 }
 0x12c   : > { %v1068_v33 = vsel %vm735_vm3, %v969_v30, 0.0  ;;  %v875_v19 = vsel %vm735_vm3, %v1733_v27, 0.0 }
 0x12d   : > { %v1055_v15 = vadd.f32 %v1054_v39, %v1053_v12  ;;  %v860_v38 = vadd.f32 %v859_v58, %v858_v37  ;;  %v2008_v3 = vpop.f32.mrf.mxu3  ;;  %v873_v12 = vsel %vm735_vm3, %v1716_v23, 0.0  ;;  %v971_v37 = vmul.f32 %v1733_v27, %v1733_v27 }
 0x12e   : > { %797 = vst.msk [vmem:[%s1602_s5 + $0x1e8] sm:$0xff] %vm735_vm3, %v2008_v3  ;;  %v1070_v60 = vsel %vm735_vm3, %v970_v29, 0.0  ;;  %v877_v23 = vsel %vm735_vm3, %v1750_v31, 0.0  ;;  %v889_v29 = vsel %vm735_vm3, %v1893_v5, 0.0 }
 0x12f   : > { %v1057_v2 = vadd.f32 %v1056_v57, %v1055_v15  ;;  %v862_v42 = vadd.f32 %v861_v61, %v860_v38  ;;  %v972_v15 = vmul.f32 %v1750_v31, %v1750_v31  ;;  %v1072_v57 = vsel %vm735_vm3, %v971_v37, 0.0 }
 0x130   : > { %v973_v61 = vmul.f32 %v1767_v35, %v1767_v35  ;;  %v883_v35 = vsel %vm735_vm3, %v1810_v63, 0.0  ;;  %v980_v37 = vmul.f32 %v1953_v40, %v1953_v40 }
 0x131   : > { %v864_v8 = vadd.f32 %v863_v48, %v862_v42  ;;  %v1059_v22 = vadd.f32 %v1058_v56, %v1057_v2  ;;  %v1074_v27 = vsel %vm735_vm3, %v972_v15, 0.0  ;;  %v974_v56 = vmul.f32 %v1784_v41, %v1784_v41 }
 0x133   : > { %v866_v59 = vadd.f32 %v865_v10, %v864_v8  ;;  %v1061_v11 = vadd.f32 %v1060_v51, %v1059_v22  ;;  %v1076_v22 = vsel %vm735_vm3, %v973_v61, 0.0  ;;  %v881_v51 = vsel %vm735_vm3, %v1784_v41, 0.0 }
 0x134   : > { %v975_v10 = vmul.f32 %v1810_v63, %v1810_v63  ;;  %v885_v41 = vsel %vm735_vm3, %v1835_v52, 0.0 }
 0x135   : > { %v868_v17 = vadd.f32 %v867_v14, %v866_v59  ;;  %v1063_v45 = vadd.f32 %v1062_v62, %v1061_v11  ;;  %v2033_v2 = vpop.f32.mrf.mxu3  ;;  %v1078_v11 = vsel %vm735_vm3, %v974_v56, 0.0  ;;  %v976_v62 = vmul.f32 %v1835_v52, %v1835_v52 }
 0x136   : > { %798 = vst.msk [vmem:[%s1602_s5 + $0x1f0] sm:$0xff] %vm735_vm3, %v2033_v2 }
 0x137   : > { %v870_v34 = vadd.f32 %v869_v6, %v868_v17  ;;  %v1065_v47 = vadd.f32 %v1064_v46, %v1063_v45  ;;  %v1080_v17 = vsel %vm735_vm3, %v975_v10, 0.0  ;;  %v977_v45 = vmul.f32 %v1860_v21, %v1860_v21 }
 0x138   : > { %v1082_v63 = vsel %vm735_vm3, %v976_v62, 0.0  ;;  %v985_v10 = vmul.f32 %v1769_v36, %v1769_v36 }
 0x139   : > { %v872_v50 = vadd.f32 %v871_v49, %v870_v34  ;;  %v1067_v16 = vadd.f32 %v1066_v13, %v1065_v47  ;;  %v887_v34 = vsel %vm735_vm3, %v1860_v21, 0.0  ;;  %v978_v47 = vmul.f32 %v1893_v5, %v1893_v5 }
 0x13a   : > { %v1084_v49 = vsel %vm735_vm3, %v977_v45, 0.0  ;;  %v891_v21 = vsel %vm735_vm3, %v1923_v54, 0.0 }
 0x13b   : > { %v874_v39 = vadd.f32 %v873_v12, %v872_v50  ;;  %v1069_v58 = vadd.f32 %v1068_v33, %v1067_v16  ;;  %v979_v50 = vmul.f32 %v1923_v54, %v1923_v54  ;;  %v1086_v12 = vsel %vm735_vm3, %v978_v47, 0.0 }
 0x13c   : > { %v982_v54 = vmul.f32 %v1718_v24, %v1718_v24 }
 0x13d   : > { %v1071_v38 = vadd.f32 %v1070_v60, %v1069_v58  ;;  %v876_v18 = vadd.f32 %v875_v19, %v874_v39  ;;  %v2058_v46 = vpop.f32.mrf.mxu3  ;;  %v981_v60 = vmul.f32 %v1701_v20, %v1701_v20  ;;  %v1088_v5 = vsel %vm735_vm3, %v979_v50, 0.0 }
 0x13e   : > { %799 = vst.msk [vmem:[%s1602_s5 + $0x1f8] sm:$0xff] %vm735_vm3, %v2058_v46  ;;  %v893_v19 = vsel %vm735_vm3, %v1953_v40, 0.0  ;;  %v983_v40 = vmul.f32 %v1735_v28, %v1735_v28  ;;  %v1094_v56 = vsel %vm735_vm3, %v982_v54, 0.0  ;;  %v990_v50 = vmul.f32 %v1895_v7, %v1895_v7 }
 0x13f   : > { %v878_v42 = vadd.f32 %v877_v23, %v876_v18  ;;  %v1073_v48 = vadd.f32 %v1072_v57, %v1071_v38  ;;  %v895_v18 = vsel %vm735_vm3, %v1701_v20, 0.0  ;;  %v1090_v57 = vsel %vm735_vm3, %v980_v37, 0.0 }
 0x140   : > { %v899_v20 = vsel %vm735_vm3, %v1735_v28, 0.0  ;;  %v903_v28 = vsel %vm735_vm3, %v1769_v36, 0.0  ;;  %v907_v36 = vsel %vm735_vm3, %v1812_v0, 0.0 }
 0x141   : > { %v880_v8 = vadd.f32 %v879_v4, %v878_v42  ;;  %v1075_v31 = vadd.f32 %v1074_v27, %v1073_v48  ;;  %v1092_v42 = vsel %vm735_vm3, %v981_v60, 0.0  ;;  %v897_v48 = vsel %vm735_vm3, %v1718_v24, 0.0 }
 0x142   : > { %v901_v24 = vsel %vm735_vm3, %v1752_v32, 0.0  ;;  %v992_v60 = vmul.f32 %v1955_v44, %v1955_v44 }
 0x143   : > { %v882_v9 = vadd.f32 %v881_v51, %v880_v8  ;;  %v1077_v59 = vadd.f32 %v1076_v22, %v1075_v31  ;;  %v984_v8 = vmul.f32 %v1752_v32, %v1752_v32  ;;  %v1096_v51 = vsel %vm735_vm3, %v983_v40, 0.0 }
 0x144   : > { %v905_v32 = vsel %vm735_vm3, %v1786_v43, 0.0  ;;  %v995_v40 = vmul.f32 %v2033_v2, %v2033_v2 }
 0x145   : > { %v884_v14 = vadd.f32 %v883_v35, %v882_v9  ;;  %v1079_v26 = vadd.f32 %v1078_v11, %v1077_v59  ;;  %v1098_v11 = vsel %vm735_vm3, %v984_v8, 0.0  ;;  %v986_v35 = vmul.f32 %v1786_v43, %v1786_v43 }
 0x146   : > { %v909_v43 = vsel %vm735_vm3, %v1837_v53, 0.0 }
 0x147   : > { %v886_v6 = vadd.f32 %v885_v41, %v884_v14  ;;  %v1081_v30 = vadd.f32 %v1080_v17, %v1079_v26  ;;  %v1100_v26 = vsel %vm735_vm3, %v985_v10, 0.0  ;;  %v987_v17 = vmul.f32 %v1812_v0, %v1812_v0 }
 0x148   : > { %v911_v0 = vsel %vm735_vm3, %v1862_v25, 0.0 }
 0x149   : > { %v1083_v13 = vadd.f32 %v1082_v63, %v1081_v30  ;;  %v888_v52 = vadd.f32 %v887_v34, %v886_v6  ;;  %v1102_v6 = vsel %vm735_vm3, %v986_v35, 0.0  ;;  %v988_v30 = vmul.f32 %v1837_v53, %v1837_v53 }
 0x14a   : > { %v1104_v47 = vsel %vm735_vm3, %v987_v17, 0.0  ;;  %v913_v53 = vsel %vm735_vm3, %v1895_v7, 0.0  ;;  %v917_v7 = vsel %vm735_vm3, %v1955_v44, 0.0  ;;  %v921_v44 = vsel %vm735_vm3, %v2008_v3, 0.0 }
 0x14b   : > { %v1085_v16 = vadd.f32 %v1084_v49, %v1083_v13  ;;  %v890_v33 = vadd.f32 %v889_v29, %v888_v52  ;;  %v989_v13 = vmul.f32 %v1862_v25, %v1862_v25  ;;  %v1106_v29 = vsel %vm735_vm3, %v988_v30, 0.0 }
 0x14c   : > { %v915_v25 = vsel %vm735_vm3, %v1925_v55, 0.0 }
 0x14d   : > { %v1087_v39 = vadd.f32 %v1086_v12, %v1085_v16  ;;  %v892_v58 = vadd.f32 %v891_v21, %v890_v33  ;;  %v1108_v12 = vsel %vm735_vm3, %v989_v13, 0.0  ;;  %v991_v21 = vmul.f32 %v1925_v55, %v1925_v55 }
 0x14e   : > { %v919_v55 = vsel %vm735_vm3, %v1983_v1, 0.0 }
 0x14f   : > { %v1089_v15 = vadd.f32 %v1088_v5, %v1087_v39  ;;  %v894_v38 = vadd.f32 %v893_v19, %v892_v58  ;;  %v1110_v58 = vsel %vm735_vm3, %v990_v50, 0.0 }
 0x151   : > { %v896_v23 = vadd.f32 %v895_v18, %v894_v38  ;;  %v1091_v61 = vadd.f32 %v1090_v57, %v1089_v15  ;;  %v1112_v15 = vsel %vm735_vm3, %v991_v21, 0.0  ;;  %v993_v38 = vmul.f32 %v1983_v1, %v1983_v1 }
 0x152   : > { %v1114_v57 = vsel %vm735_vm3, %v992_v60, 0.0  ;;  %v923_v1 = vsel %vm735_vm3, %v2033_v2, 0.0 }
 0x153   : > { %v898_v27 = vadd.f32 %v897_v48, %v896_v23  ;;  %v1093_v4 = vadd.f32 %v1092_v42, %v1091_v61  ;;  %v994_v23 = vmul.f32 %v2008_v3, %v2008_v3  ;;  %v1116_v48 = vsel %vm735_vm3, %v993_v38, 0.0 }
 0x154   : > { %v925_v3 = vsel %vm735_vm3, %v2058_v46, 0.0 }
 0x155   : > { %v900_v31 = vadd.f32 %v899_v20, %v898_v27  ;;  %v1095_v22 = vadd.f32 %v1094_v56, %v1093_v4  ;;  %v1118_v56 = vsel %vm735_vm3, %v994_v23, 0.0  ;;  %v996_v20 = vmul.f32 %v2058_v46, %v2058_v46 }
 0x157   : > { %v902_v9 = vadd.f32 %v901_v24, %v900_v31  ;;  %v1097_v59 = vadd.f32 %v1096_v51, %v1095_v22  ;;  %v1120_v22 = vsel %vm735_vm3, %v995_v40, 0.0  ;;  %v1122_v10 = vsel %vm735_vm3, %v996_v20, 0.0 }
 0x159   : > { %v904_v62 = vadd.f32 %v903_v28, %v902_v9  ;;  %v1099_v14 = vadd.f32 %v1098_v11, %v1097_v59 }
 0x15b   : > { %v906_v41 = vadd.f32 %v905_v32, %v904_v62  ;;  %v1101_v45 = vadd.f32 %v1100_v26, %v1099_v14 }
 0x15d   : > { %v1103_v63 = vadd.f32 %v1102_v6, %v1101_v45  ;;  %v908_v34 = vadd.f32 %v907_v36, %v906_v41 }
 0x15f   : > { %v910_v52 = vadd.f32 %v909_v43, %v908_v34  ;;  %v1105_v49 = vadd.f32 %v1104_v47, %v1103_v63 }
 0x161   : > { %v912_v16 = vadd.f32 %v911_v0, %v910_v52  ;;  %v1107_v33 = vadd.f32 %v1106_v29, %v1105_v49 }
 0x163   : > { %v914_v37 = vadd.f32 %v913_v53, %v912_v16  ;;  %v1109_v39 = vadd.f32 %v1108_v12, %v1107_v33 }
 0x165   : > { %v916_v5 = vadd.f32 %v915_v25, %v914_v37  ;;  %v1111_v19 = vadd.f32 %v1110_v58, %v1109_v39 }
 0x167   : > { %v918_v18 = vadd.f32 %v917_v7, %v916_v5  ;;  %v1113_v54 = vadd.f32 %v1112_v15, %v1111_v19 }
 0x169   : > { %v1115_v61 = vadd.f32 %v1114_v57, %v1113_v54  ;;  %v920_v42 = vadd.f32 %v919_v55, %v918_v18 }
 0x16b   : > { %v1117_v27 = vadd.f32 %v1116_v48, %v1115_v61  ;;  %v922_v4 = vadd.f32 %v921_v44, %v920_v42 }
 0x16d   : > { %v1119_v8 = vadd.f32 %v1118_v56, %v1117_v27  ;;  %v924_v31 = vadd.f32 %v923_v1, %v922_v4 }
 0x16f   : > { %v1121_v51 = vadd.f32 %v1120_v22, %v1119_v8  ;;  %v926_v24 = vadd.f32 %v925_v3, %v924_v31 }
 0x171   : > { %v927_v9 = vrot.slane %v926_v24, 4  ;;  %v1123_v59 = vadd.f32 %v1122_v10, %v1121_v51 }
 0x173   : > { %v928_v11 = vadd.f32 %v927_v9, %v926_v24  ;;  %v1124_v2 = vrot.slane %v1123_v59, 4 }
 0x175   : > { %v929_v28 = vrot.slane %v928_v11, 2  ;;  %v1125_v35 = vadd.f32 %v1124_v2, %v1123_v59 }
 0x177   : > { %v930_v62 = vadd.f32 %v929_v28, %v928_v11  ;;  %v1126_v14 = vrot.slane %v1125_v35, 2 }
 0x179   : > { %v931_v26 = vrot.slane %v930_v62, 1  ;;  %v1127_v32 = vadd.f32 %v1126_v14, %v1125_v35 }
 0x17b   : > { %v932_v46 = vadd.f32 %v931_v26, %v930_v62  ;;  %v1128_v17 = vrot.slane %v1127_v32, 1 }
 0x17d   : > { %v1129_v41 = vadd.f32 %v1128_v17, %v1127_v32  ;;  %1130 = vst.msk [vmem:[%s217_s9] sm:$0xff] %vm735_vm3, %v932_v46 }
 0x17f   : > { %1131 = vst.msk [vmem:[%s221_s12] sm:$0xff] %vm735_vm3, %v1129_v41 }
 0x180 PF: > { %s15_s15 = sadd.s32 1, %s1486_s15  }
 0x181   : > { %p12_p5 = scmp.ge.s32.totalorder %s15_s15, 6  }
 0x183   :  { %14 = sbr.rel (!%p12_p5) target bundleno = 1 (0x1), region = 82 }

// kernel: _lambda_.16
= control target key start
LH: loop header
LB: loop body
LE: loop exit
PB: predicated region body
PF: predicated region fallthrough
CT: control target
= control target key end

     0   :  { %s496_s0 = inlined_call_operand.vmem [shape: f32[64,512], index: 0, kind: input, shape index: {}]   ;;  %s497_s1 = inlined_call_operand.vmem [shape: f32[1,512], index: 1, kind: input, shape index: {}]   ;;  %s498_s2 = inlined_call_operand.vmem [shape: f32[1,512], index: 2, kind: input, shape index: {}]   ;;  %s499_s3 = inlined_call_operand.vmem [shape: f32[64,512], index: 3, kind: output, shape index: {}]  }
   0x1   :  { %v14_v0 = vld [vmem:[%s496_s0] sm:$0xff]  ;;  %v15_v5 = vld [vmem:[%s496_s0 + $0x8] sm:$0xff]  ;;  %v16_v8 = vld [vmem:[%s496_s0 + $0x10] sm:$0xff] }
   0x2   :  { %v46_v1 = vld [vmem:[%s497_s1] sm:$0xf]  ;;  %v17_v11 = vld [vmem:[%s496_s0 + $0x18] sm:$0xff]  ;;  %v19_v18 = vld [vmem:[%s496_s0 + $0x28] sm:$0xff] }
   0x3   :  { %v88_v2 = vld [vmem:[%s498_s2] sm:$0xf]  ;;  %v227_v3 = vperm.slane %v46_v1, 0  ;;  %v234_v6 = vperm.slane %v46_v1, 1  ;;  %v241_v9 = vperm.slane %v46_v1, 2  ;;  %v248_v12 = vperm.slane %v46_v1, 3 }
   0x4   :  { %v229_v4 = vperm.slane %v88_v2, 0  ;;  %v236_v7 = vperm.slane %v88_v2, 1  ;;  %v243_v10 = vperm.slane %v88_v2, 2  ;;  %v250_v13 = vperm.slane %v88_v2, 3  ;;  %v18_v14 = vld [vmem:[%s496_s0 + $0x20] sm:$0xff]  ;;  %v20_v19 = vld [vmem:[%s496_s0 + $0x30] sm:$0xff] }
   0x5   :  { %v56_v15 = vmul.f32 %v227_v3, %v14_v0  ;;  %v57_v16 = vmul.f32 %v234_v6, %v15_v5  ;;  %v60_v17 = vmul.f32 %v227_v3, %v18_v14  ;;  %v21_v20 = vld [vmem:[%s496_s0 + $0x38] sm:$0xff]  ;;  %v58_v21 = vmul.f32 %v241_v9, %v16_v8  ;;  %v22_v29 = vld [vmem:[%s496_s0 + $0x40] sm:$0xff]  ;;  %v23_v33 = vld [vmem:[%s496_s0 + $0x48] sm:$0xff] }
   0x6   :  { %v59_v22 = vmul.f32 %v248_v12, %v17_v11  ;;  %v61_v23 = vmul.f32 %v234_v6, %v19_v18  ;;  %v62_v24 = vmul.f32 %v241_v9, %v20_v19  ;;  %v63_v28 = vmul.f32 %v248_v12, %v21_v20  ;;  %v24_v34 = vld [vmem:[%s496_s0 + $0x50] sm:$0xff]  ;;  %v25_v35 = vld [vmem:[%s496_s0 + $0x58] sm:$0xff]  ;;  %v26_v39 = vld [vmem:[%s496_s0 + $0x60] sm:$0xff] }
   0x7   :  { %v98_v25 = vadd.f32 %v229_v4, %v56_v15  ;;  %v99_v26 = vadd.f32 %v236_v7, %v57_v16  ;;  %v102_v27 = vadd.f32 %v229_v4, %v60_v17  ;;  %v100_v30 = vadd.f32 %v243_v10, %v58_v21  ;;  %v27_v40 = vld [vmem:[%s496_s0 + $0x68] sm:$0xff]  ;;  %v28_v41 = vld [vmem:[%s496_s0 + $0x70] sm:$0xff]  ;;  %v29_v50 = vld [vmem:[%s496_s0 + $0x78] sm:$0xff] }
   0x8   :  { %v101_v31 = vadd.f32 %v250_v13, %v59_v22  ;;  %v103_v32 = vadd.f32 %v236_v7, %v61_v23  ;;  %v104_v38 = vadd.f32 %v243_v10, %v62_v24  ;;  %v105_v45 = vadd.f32 %v250_v13, %v63_v28  ;;  %v30_v62 = vld [vmem:[%s496_s0 + $0x80] sm:$0xff]  ;;  %v31_v63 = vld [vmem:[%s496_s0 + $0x88] sm:$0xff]  ;;  %v32_v0 = vld [vmem:[%s496_s0 + $0x90] sm:$0xff] }
   0x9   :  { %v130_v36 = vmax.f32 %v98_v25, 0.0  ;;  %v131_v37 = vmax.f32 %v99_v26, 0.0  ;;  %v132_v42 = vmax.f32 %v100_v30, 0.0  ;;  %v134_v44 = vmax.f32 %v102_v27, 0.0  ;;  %v33_v5 = vld [vmem:[%s496_s0 + $0x98] sm:$0xff]  ;;  %v34_v15 = vld [vmem:[%s496_s0 + $0xa0] sm:$0xff] }
   0xa   :  { %v133_v43 = vmax.f32 %v101_v31, 0.0  ;;  %v135_v46 = vmax.f32 %v103_v32, 0.0  ;;  %v64_v47 = vmul.f32 %v227_v3, %v22_v29  ;;  %v65_v48 = vmul.f32 %v234_v6, %v23_v33  ;;  %v35_v20 = vld [vmem:[%s496_s0 + $0xa8] sm:$0xff]  ;;  %v36_v24 = vld [vmem:[%s496_s0 + $0xb0] sm:$0xff]  ;;  %v37_v28 = vld [vmem:[%s496_s0 + $0xb8] sm:$0xff] }
   0xb   :  { %162 = vst [vmem:[%s499_s3] sm:$0xff] %v130_v36  ;;  %v66_v49 = vmul.f32 %v241_v9, %v24_v34  ;;  %v67_v51 = vmul.f32 %v248_v12, %v25_v35  ;;  %v68_v52 = vmul.f32 %v227_v3, %v26_v39  ;;  %v69_v53 = vmul.f32 %v234_v6, %v27_v40  ;;  %v38_v32 = vld [vmem:[%s496_s0 + $0xc0] sm:$0xff]  ;;  %v39_v36 = vld [vmem:[%s496_s0 + $0xc8] sm:$0xff]  ;;  %v40_v40 = vld [vmem:[%s496_s0 + $0xd0] sm:$0xff] }
   0xc   :  { %163 = vst [vmem:[%s499_s3 + $0x8] sm:$0xff] %v131_v37  ;;  %v70_v54 = vmul.f32 %v241_v9, %v28_v41  ;;  %v136_v55 = vmax.f32 %v104_v38, 0.0  ;;  %v106_v56 = vadd.f32 %v229_v4, %v64_v47  ;;  %v107_v57 = vadd.f32 %v236_v7, %v65_v48  ;;  %v42_v48 = vld [vmem:[%s496_s0 + $0xe0] sm:$0xff] }
   0xd   :  { %164 = vst [vmem:[%s499_s3 + $0x10] sm:$0xff] %v132_v42  ;;  %v108_v58 = vadd.f32 %v243_v10, %v66_v49  ;;  %v137_v59 = vmax.f32 %v105_v45, 0.0  ;;  %v109_v60 = vadd.f32 %v250_v13, %v67_v51  ;;  %v71_v61 = vmul.f32 %v248_v12, %v29_v50 }
   0xe   :  { %165 = vst [vmem:[%s499_s3 + $0x18] sm:$0xff] %v133_v43  ;;  %v138_v1 = vmax.f32 %v106_v56, 0.0  ;;  %v110_v2 = vadd.f32 %v229_v4, %v68_v52  ;;  %v139_v8 = vmax.f32 %v107_v57, 0.0  ;;  %v111_v11 = vadd.f32 %v236_v7, %v69_v53  ;;  %v43_v52 = vld [vmem:[%s496_s0 + $0xe8] sm:$0xff]  ;;  %v44_v56 = vld [vmem:[%s496_s0 + $0xf0] sm:$0xff] }
   0xf   :  { %166 = vst [vmem:[%s499_s3 + $0x20] sm:$0xff] %v134_v44  ;;  %v112_v14 = vadd.f32 %v243_v10, %v70_v54  ;;  %v140_v16 = vmax.f32 %v108_v58, 0.0  ;;  %v72_v17 = vmul.f32 %v227_v3, %v30_v62  ;;  %v73_v18 = vmul.f32 %v234_v6, %v31_v63  ;;  %v41_v44 = vld [vmem:[%s496_s0 + $0xd8] sm:$0xff] }
  0x10   :  { %167 = vst [vmem:[%s499_s3 + $0x28] sm:$0xff] %v135_v46  ;;  %v74_v19 = vmul.f32 %v241_v9, %v32_v0  ;;  %v141_v21 = vmax.f32 %v109_v60, 0.0  ;;  %v113_v22 = vadd.f32 %v250_v13, %v71_v61  ;;  %v75_v23 = vmul.f32 %v248_v12, %v33_v5  ;;  %v45_v60 = vld [vmem:[%s496_s0 + $0xf8] sm:$0xff] }
  0x11   :  { %168 = vst [vmem:[%s499_s3 + $0x30] sm:$0xff] %v136_v55  ;;  %v142_v25 = vmax.f32 %v110_v2, 0.0  ;;  %v114_v26 = vadd.f32 %v229_v4, %v72_v17  ;;  %v76_v27 = vmul.f32 %v227_v3, %v34_v15  ;;  %v143_v29 = vmax.f32 %v111_v11, 0.0 }
  0x12   :  { %169 = vst [vmem:[%s499_s3 + $0x38] sm:$0xff] %v137_v59  ;;  %v115_v30 = vadd.f32 %v236_v7, %v73_v18  ;;  %v77_v31 = vmul.f32 %v234_v6, %v35_v20  ;;  %v144_v33 = vmax.f32 %v112_v14, 0.0  ;;  %v116_v34 = vadd.f32 %v243_v10, %v74_v19 }
  0x13   :  { %170 = vst [vmem:[%s499_s3 + $0x40] sm:$0xff] %v138_v1  ;;  %v78_v35 = vmul.f32 %v241_v9, %v36_v24  ;;  %v145_v37 = vmax.f32 %v113_v22, 0.0  ;;  %v117_v38 = vadd.f32 %v250_v13, %v75_v23  ;;  %v79_v39 = vmul.f32 %v248_v12, %v37_v28 }
  0x14   :  { %171 = vst [vmem:[%s499_s3 + $0x48] sm:$0xff] %v139_v8  ;;  %v146_v41 = vmax.f32 %v114_v26, 0.0  ;;  %v118_v42 = vadd.f32 %v229_v4, %v76_v27  ;;  %v80_v43 = vmul.f32 %v227_v3, %v38_v32  ;;  %v147_v45 = vmax.f32 %v115_v30, 0.0 }
  0x15   :  { %172 = vst [vmem:[%s499_s3 + $0x50] sm:$0xff] %v140_v16  ;;  %v119_v46 = vadd.f32 %v236_v7, %v77_v31  ;;  %v81_v47 = vmul.f32 %v234_v6, %v39_v36  ;;  %v148_v49 = vmax.f32 %v116_v34, 0.0  ;;  %v120_v50 = vadd.f32 %v243_v10, %v78_v35 }
  0x16   :  { %173 = vst [vmem:[%s499_s3 + $0x58] sm:$0xff] %v141_v21  ;;  %v82_v51 = vmul.f32 %v241_v9, %v40_v40  ;;  %v149_v53 = vmax.f32 %v117_v38, 0.0  ;;  %v121_v54 = vadd.f32 %v250_v13, %v79_v39  ;;  %v83_v55 = vmul.f32 %v248_v12, %v41_v44 }
  0x17   :  { %174 = vst [vmem:[%s499_s3 + $0x60] sm:$0xff] %v142_v25  ;;  %v150_v57 = vmax.f32 %v118_v42, 0.0  ;;  %v122_v58 = vadd.f32 %v229_v4, %v80_v43  ;;  %v84_v59 = vmul.f32 %v227_v3, %v42_v48  ;;  %v151_v61 = vmax.f32 %v119_v46, 0.0 }
  0x18   :  { %175 = vst [vmem:[%s499_s3 + $0x68] sm:$0xff] %v143_v29  ;;  %v123_v62 = vadd.f32 %v236_v7, %v81_v47  ;;  %v85_v63 = vmul.f32 %v234_v6, %v43_v52  ;;  %v152_v0 = vmax.f32 %v120_v50, 0.0  ;;  %v124_v3 = vadd.f32 %v243_v10, %v82_v51 }
  0x19   :  { %176 = vst [vmem:[%s499_s3 + $0x70] sm:$0xff] %v144_v33  ;;  %v86_v1 = vmul.f32 %v241_v9, %v44_v56  ;;  %v153_v2 = vmax.f32 %v121_v54, 0.0  ;;  %v125_v5 = vadd.f32 %v250_v13, %v83_v55  ;;  %v87_v8 = vmul.f32 %v248_v12, %v45_v60 }
  0x1a   :  { %177 = vst [vmem:[%s499_s3 + $0x78] sm:$0xff] %v145_v37  ;;  %v154_v6 = vmax.f32 %v122_v58, 0.0  ;;  %v126_v11 = vadd.f32 %v229_v4, %v84_v59  ;;  %v155_v9 = vmax.f32 %v123_v62, 0.0  ;;  %v127_v14 = vadd.f32 %v236_v7, %v85_v63 }
  0x1b   :  { %178 = vst [vmem:[%s499_s3 + $0x80] sm:$0xff] %v146_v41  ;;  %v156_v15 = vmax.f32 %v124_v3, 0.0  ;;  %v128_v12 = vadd.f32 %v243_v10, %v86_v1  ;;  %v157_v16 = vmax.f32 %v125_v5, 0.0  ;;  %v129_v4 = vadd.f32 %v250_v13, %v87_v8 }
  0x1c   :  { %179 = vst [vmem:[%s499_s3 + $0x88] sm:$0xff] %v147_v45  ;;  %v158_v17 = vmax.f32 %v126_v11, 0.0  ;;  %v159_v7 = vmax.f32 %v127_v14, 0.0 }
  0x1d   :  { %180 = vst [vmem:[%s499_s3 + $0x90] sm:$0xff] %v148_v49  ;;  %v160_v10 = vmax.f32 %v128_v12, 0.0  ;;  %v161_v13 = vmax.f32 %v129_v4, 0.0 }
  0x1e   :  { %181 = vst [vmem:[%s499_s3 + $0x98] sm:$0xff] %v149_v53 }
  0x1f   :  { %182 = vst [vmem:[%s499_s3 + $0xa0] sm:$0xff] %v150_v57 }
  0x20   :  { %183 = vst [vmem:[%s499_s3 + $0xa8] sm:$0xff] %v151_v61 }
  0x21   :  { %184 = vst [vmem:[%s499_s3 + $0xb0] sm:$0xff] %v152_v0 }
  0x22   :  { %185 = vst [vmem:[%s499_s3 + $0xb8] sm:$0xff] %v153_v2 }
  0x23   :  { %186 = vst [vmem:[%s499_s3 + $0xc0] sm:$0xff] %v154_v6 }
  0x24   :  { %187 = vst [vmem:[%s499_s3 + $0xc8] sm:$0xff] %v155_v9 }
  0x25   :  { %188 = vst [vmem:[%s499_s3 + $0xd0] sm:$0xff] %v156_v15 }
  0x26   :  { %189 = vst [vmem:[%s499_s3 + $0xd8] sm:$0xff] %v157_v16 }
  0x27   :  { %190 = vst [vmem:[%s499_s3 + $0xe0] sm:$0xff] %v158_v17 }
  0x28   :  { %191 = vst [vmem:[%s499_s3 + $0xe8] sm:$0xff] %v159_v7 }
  0x29   :  { %192 = vst [vmem:[%s499_s3 + $0xf0] sm:$0xff] %v160_v10 }
  0x2a   :  { %193 = vst [vmem:[%s499_s3 + $0xf8] sm:$0xff] %v161_v13 }

// kernel: _lambda_.20
= control target key start
LH: loop header
LB: loop body
LE: loop exit
PB: predicated region body
PF: predicated region fallthrough
CT: control target
= control target key end

     0   :  { %s664_s0 = inlined_call_operand.vmem [shape: f32[64,512], index: 0, kind: input, shape index: {}]   ;;  %s665_s1 = inlined_call_operand.vmem [shape: f32[1,512], index: 1, kind: input, shape index: {}]   ;;  %s666_s2 = inlined_call_operand.vmem [shape: f32[1,512], index: 2, kind: input, shape index: {}]   ;;  %s667_s3 = inlined_call_operand.vmem [shape: f32[64,512], index: 3, kind: input, shape index: {}]   ;;  %s668_s4 = inlined_call_operand.vmem [shape: f32[64,512], index: 4, kind: output, shape index: {}]  }
   0x1   :  { %v17_v0 = vld [vmem:[%s664_s0] sm:$0xff]  ;;  %v18_v5 = vld [vmem:[%s664_s0 + $0x8] sm:$0xff]  ;;  %v19_v9 = vld [vmem:[%s664_s0 + $0x10] sm:$0xff] }
   0x2   :  { %v49_v1 = vld [vmem:[%s665_s1] sm:$0xf]  ;;  %v134_v15 = vld [vmem:[%s667_s3 + $0x8] sm:$0xff]  ;;  %v20_v16 = vld [vmem:[%s664_s0 + $0x18] sm:$0xff] }
   0x3   :  { %v91_v2 = vld [vmem:[%s666_s2] sm:$0xf]  ;;  %v299_v3 = vperm.slane %v49_v1, 0  ;;  %v306_v6 = vperm.slane %v49_v1, 1  ;;  %v316_v10 = vperm.slane %v49_v1, 2  ;;  %v320_v12 = vperm.slane %v49_v1, 3 }
   0x4   :  { %v301_v4 = vperm.slane %v91_v2, 0  ;;  %v308_v7 = vperm.slane %v91_v2, 1  ;;  %v133_v8 = vld [vmem:[%s667_s3] sm:$0xff]  ;;  %v318_v11 = vperm.slane %v91_v2, 2  ;;  %v330_v17 = vperm.slane %v91_v2, 3  ;;  %v135_v20 = vld [vmem:[%s667_s3 + $0x10] sm:$0xff] }
   0x5   :  { %v59_v13 = vmul.f32 %v299_v3, %v17_v0  ;;  %v60_v14 = vmul.f32 %v306_v6, %v18_v5  ;;  %v21_v18 = vld [vmem:[%s664_s0 + $0x20] sm:$0xff]  ;;  %v61_v19 = vmul.f32 %v316_v10, %v19_v9  ;;  %v62_v21 = vmul.f32 %v320_v12, %v20_v16  ;;  %v136_v22 = vld [vmem:[%s667_s3 + $0x18] sm:$0xff]  ;;  %v22_v24 = vld [vmem:[%s664_s0 + $0x28] sm:$0xff] }
   0x6   :  { %v63_v23 = vmul.f32 %v299_v3, %v21_v18  ;;  %v137_v27 = vld [vmem:[%s667_s3 + $0x20] sm:$0xff]  ;;  %v64_v28 = vmul.f32 %v306_v6, %v22_v24  ;;  %v23_v29 = vld [vmem:[%s664_s0 + $0x30] sm:$0xff]  ;;  %v24_v30 = vld [vmem:[%s664_s0 + $0x38] sm:$0xff] }
   0x7   :  { %v101_v25 = vadd.f32 %v301_v4, %v59_v13  ;;  %v102_v26 = vadd.f32 %v308_v7, %v60_v14  ;;  %v103_v31 = vadd.f32 %v318_v11, %v61_v19  ;;  %v104_v32 = vadd.f32 %v330_v17, %v62_v21  ;;  %v138_v34 = vld [vmem:[%s667_s3 + $0x28] sm:$0xff]  ;;  %v139_v39 = vld [vmem:[%s667_s3 + $0x30] sm:$0xff]  ;;  %v140_v45 = vld [vmem:[%s667_s3 + $0x38] sm:$0xff] }
   0x8   :  { %v105_v33 = vadd.f32 %v301_v4, %v63_v23  ;;  %v65_v35 = vmul.f32 %v316_v10, %v23_v29  ;;  %v106_v38 = vadd.f32 %v308_v7, %v64_v28  ;;  %v66_v40 = vmul.f32 %v320_v12, %v24_v30  ;;  %v25_v46 = vld [vmem:[%s664_s0 + $0x40] sm:$0xff]  ;;  %v26_v47 = vld [vmem:[%s664_s0 + $0x48] sm:$0xff]  ;;  %v27_v52 = vld [vmem:[%s664_s0 + $0x50] sm:$0xff] }
   0x9   :  { %v165_v36 = vadd.f32 %v133_v8, %v101_v25  ;;  %v166_v37 = vadd.f32 %v134_v15, %v102_v26  ;;  %v167_v41 = vadd.f32 %v135_v20, %v103_v31  ;;  %v168_v42 = vadd.f32 %v136_v22, %v104_v32  ;;  %v28_v53 = vld [vmem:[%s664_s0 + $0x58] sm:$0xff]  ;;  %v29_v54 = vld [vmem:[%s664_s0 + $0x60] sm:$0xff]  ;;  %v30_v59 = vld [vmem:[%s664_s0 + $0x68] sm:$0xff] }
   0xa   :  { %v169_v43 = vadd.f32 %v137_v27, %v105_v33  ;;  %v107_v44 = vadd.f32 %v318_v11, %v65_v35  ;;  %v170_v50 = vadd.f32 %v138_v34, %v106_v38  ;;  %v108_v51 = vadd.f32 %v330_v17, %v66_v40  ;;  %v31_v0 = vld [vmem:[%s664_s0 + $0x70] sm:$0xff]  ;;  %v141_v2 = vld [vmem:[%s667_s3 + $0x40] sm:$0xff]  ;;  %v142_v5 = vld [vmem:[%s667_s3 + $0x48] sm:$0xff] }
   0xb   :  { %v197_v48 = vmax.f32 %v165_v36, 0.0  ;;  %v198_v49 = vmax.f32 %v166_v37, 0.0  ;;  %v199_v55 = vmax.f32 %v167_v41, 0.0  ;;  %v200_v56 = vmax.f32 %v168_v42, 0.0  ;;  %v32_v14 = vld [vmem:[%s664_s0 + $0x78] sm:$0xff]  ;;  %v143_v19 = vld [vmem:[%s667_s3 + $0x50] sm:$0xff] }
   0xc   :  { %v201_v57 = vmax.f32 %v169_v43, 0.0  ;;  %v171_v58 = vadd.f32 %v139_v39, %v107_v44  ;;  %v202_v60 = vmax.f32 %v170_v50, 0.0  ;;  %v172_v61 = vadd.f32 %v140_v45, %v108_v51  ;;  %v144_v20 = vld [vmem:[%s667_s3 + $0x58] sm:$0xff]  ;;  %v145_v21 = vld [vmem:[%s667_s3 + $0x60] sm:$0xff]  ;;  %v146_v26 = vld [vmem:[%s667_s3 + $0x68] sm:$0xff] }
   0xd   :  { %229 = vst [vmem:[%s668_s4] sm:$0xff] %v197_v48  ;;  %v67_v62 = vmul.f32 %v299_v3, %v25_v46  ;;  %v68_v63 = vmul.f32 %v306_v6, %v26_v47  ;;  %v69_v8 = vmul.f32 %v316_v10, %v27_v52  ;;  %v70_v9 = vmul.f32 %v320_v12, %v28_v53  ;;  %v147_v31 = vld [vmem:[%s667_s3 + $0x70] sm:$0xff]  ;;  %v148_v37 = vld [vmem:[%s667_s3 + $0x78] sm:$0xff]  ;;  %v33_v38 = vld [vmem:[%s664_s0 + $0x80] sm:$0xff] }
   0xe   :  { %230 = vst [vmem:[%s668_s4 + $0x8] sm:$0xff] %v198_v49  ;;  %v203_v1 = vmax.f32 %v171_v58, 0.0  ;;  %v71_v13 = vmul.f32 %v299_v3, %v29_v54  ;;  %v204_v15 = vmax.f32 %v172_v61, 0.0  ;;  %v72_v22 = vmul.f32 %v306_v6, %v30_v59  ;;  %v34_v39 = vld [vmem:[%s664_s0 + $0x88] sm:$0xff]  ;;  %v35_v44 = vld [vmem:[%s664_s0 + $0x90] sm:$0xff]  ;;  %v36_v45 = vld [vmem:[%s664_s0 + $0x98] sm:$0xff] }
   0xf   :  { %231 = vst [vmem:[%s668_s4 + $0x10] sm:$0xff] %v199_v55  ;;  %v109_v16 = vadd.f32 %v301_v4, %v67_v62  ;;  %v110_v18 = vadd.f32 %v308_v7, %v68_v63  ;;  %v111_v23 = vadd.f32 %v318_v11, %v69_v8  ;;  %v112_v24 = vadd.f32 %v330_v17, %v70_v9  ;;  %v37_v46 = vld [vmem:[%s664_s0 + $0xa0] sm:$0xff]  ;;  %v38_v51 = vld [vmem:[%s664_s0 + $0xa8] sm:$0xff]  ;;  %v40_v63 = vld [vmem:[%s664_s0 + $0xb8] sm:$0xff] }
  0x10   :  { %232 = vst [vmem:[%s668_s4 + $0x18] sm:$0xff] %v200_v56  ;;  %v113_v25 = vadd.f32 %v301_v4, %v71_v13  ;;  %v73_v27 = vmul.f32 %v316_v10, %v31_v0  ;;  %v114_v30 = vadd.f32 %v308_v7, %v72_v22  ;;  %v74_v32 = vmul.f32 %v320_v12, %v32_v14  ;;  %v39_v56 = vld [vmem:[%s664_s0 + $0xb0] sm:$0xff]  ;;  %v149_v58 = vld [vmem:[%s667_s3 + $0x80] sm:$0xff]  ;;  %v150_v59 = vld [vmem:[%s667_s3 + $0x88] sm:$0xff] }
  0x11   :  { %233 = vst [vmem:[%s668_s4 + $0x20] sm:$0xff] %v201_v57  ;;  %v173_v28 = vadd.f32 %v141_v2, %v109_v16  ;;  %v174_v29 = vadd.f32 %v142_v5, %v110_v18  ;;  %v175_v33 = vadd.f32 %v143_v19, %v111_v23  ;;  %v176_v34 = vadd.f32 %v144_v20, %v112_v24  ;;  %v151_v5 = vld [vmem:[%s667_s3 + $0x90] sm:$0xff]  ;;  %v152_v8 = vld [vmem:[%s667_s3 + $0x98] sm:$0xff]  ;;  %v153_v9 = vld [vmem:[%s667_s3 + $0xa0] sm:$0xff] }
  0x12   :  { %234 = vst [vmem:[%s668_s4 + $0x28] sm:$0xff] %v202_v60  ;;  %v177_v35 = vadd.f32 %v145_v21, %v113_v25  ;;  %v115_v36 = vadd.f32 %v318_v11, %v73_v27  ;;  %v178_v42 = vadd.f32 %v146_v26, %v114_v30  ;;  %v116_v43 = vadd.f32 %v330_v17, %v74_v32  ;;  %v154_v18 = vld [vmem:[%s667_s3 + $0xa8] sm:$0xff]  ;;  %v155_v23 = vld [vmem:[%s667_s3 + $0xb0] sm:$0xff]  ;;  %v41_v30 = vld [vmem:[%s664_s0 + $0xc0] sm:$0xff] }
  0x13   :  { %235 = vst [vmem:[%s668_s4 + $0x30] sm:$0xff] %v203_v1  ;;  %v205_v40 = vmax.f32 %v173_v28, 0.0  ;;  %v206_v41 = vmax.f32 %v174_v29, 0.0  ;;  %v207_v47 = vmax.f32 %v175_v33, 0.0  ;;  %v208_v48 = vmax.f32 %v176_v34, 0.0  ;;  %v156_v29 = vld [vmem:[%s667_s3 + $0xb8] sm:$0xff] }
  0x14   :  { %236 = vst [vmem:[%s668_s4 + $0x38] sm:$0xff] %v204_v15  ;;  %v209_v49 = vmax.f32 %v177_v35, 0.0  ;;  %v179_v50 = vadd.f32 %v147_v31, %v115_v36  ;;  %v210_v52 = vmax.f32 %v178_v42, 0.0  ;;  %v180_v53 = vadd.f32 %v148_v37, %v116_v43  ;;  %v42_v31 = vld [vmem:[%s664_s0 + $0xc8] sm:$0xff]  ;;  %v43_v36 = vld [vmem:[%s664_s0 + $0xd0] sm:$0xff]  ;;  %v44_v37 = vld [vmem:[%s664_s0 + $0xd8] sm:$0xff] }
  0x15   :  { %237 = vst [vmem:[%s668_s4 + $0x40] sm:$0xff] %v205_v40  ;;  %v75_v54 = vmul.f32 %v299_v3, %v33_v38  ;;  %v76_v55 = vmul.f32 %v306_v6, %v34_v39  ;;  %v77_v60 = vmul.f32 %v316_v10, %v35_v44  ;;  %v78_v61 = vmul.f32 %v320_v12, %v36_v45  ;;  %v45_v38 = vld [vmem:[%s664_s0 + $0xe0] sm:$0xff]  ;;  %v46_v43 = vld [vmem:[%s664_s0 + $0xe8] sm:$0xff] }
  0x16   :  { %238 = vst [vmem:[%s668_s4 + $0x48] sm:$0xff] %v206_v41  ;;  %v211_v57 = vmax.f32 %v179_v50, 0.0  ;;  %v79_v62 = vmul.f32 %v299_v3, %v37_v46  ;;  %v212_v0 = vmax.f32 %v180_v53, 0.0  ;;  %v80_v13 = vmul.f32 %v306_v6, %v38_v51  ;;  %v157_v50 = vld [vmem:[%s667_s3 + $0xc0] sm:$0xff]  ;;  %v158_v51 = vld [vmem:[%s667_s3 + $0xc8] sm:$0xff] }
  0x17   :  { %239 = vst [vmem:[%s668_s4 + $0x50] sm:$0xff] %v207_v47  ;;  %v117_v1 = vadd.f32 %v301_v4, %v75_v54  ;;  %v118_v2 = vadd.f32 %v308_v7, %v76_v55  ;;  %v119_v14 = vadd.f32 %v318_v11, %v77_v60  ;;  %v120_v15 = vadd.f32 %v330_v17, %v78_v61  ;;  %v48_v55 = vld [vmem:[%s664_s0 + $0xf8] sm:$0xff]  ;;  %v161_v60 = vld [vmem:[%s667_s3 + $0xe0] sm:$0xff] }
  0x18   :  { %240 = vst [vmem:[%s668_s4 + $0x58] sm:$0xff] %v208_v48  ;;  %v121_v16 = vadd.f32 %v301_v4, %v79_v62  ;;  %v81_v19 = vmul.f32 %v316_v10, %v39_v56  ;;  %v122_v22 = vadd.f32 %v308_v7, %v80_v13  ;;  %v82_v24 = vmul.f32 %v320_v12, %v40_v63  ;;  %v47_v48 = vld [vmem:[%s664_s0 + $0xf0] sm:$0xff] }
  0x19   :  { %241 = vst [vmem:[%s668_s4 + $0x60] sm:$0xff] %v209_v49  ;;  %v181_v20 = vadd.f32 %v149_v58, %v117_v1  ;;  %v182_v21 = vadd.f32 %v150_v59, %v118_v2  ;;  %v183_v25 = vadd.f32 %v151_v5, %v119_v14  ;;  %v184_v26 = vadd.f32 %v152_v8, %v120_v15  ;;  %v159_v59 = vld [vmem:[%s667_s3 + $0xd0] sm:$0xff]  ;;  %v162_v1 = vld [vmem:[%s667_s3 + $0xe8] sm:$0xff] }
  0x1a   :  { %242 = vst [vmem:[%s668_s4 + $0x68] sm:$0xff] %v210_v52  ;;  %v185_v27 = vadd.f32 %v153_v9, %v121_v16  ;;  %v123_v28 = vadd.f32 %v318_v11, %v81_v19  ;;  %v186_v34 = vadd.f32 %v154_v18, %v122_v22  ;;  %v124_v35 = vadd.f32 %v330_v17, %v82_v24  ;;  %v163_v9 = vld [vmem:[%s667_s3 + $0xf0] sm:$0xff]  ;;  %v164_v16 = vld [vmem:[%s667_s3 + $0xf8] sm:$0xff] }
  0x1b   :  { %243 = vst [vmem:[%s668_s4 + $0x70] sm:$0xff] %v211_v57  ;;  %v213_v32 = vmax.f32 %v181_v20, 0.0  ;;  %v214_v33 = vmax.f32 %v182_v21, 0.0  ;;  %v215_v39 = vmax.f32 %v183_v25, 0.0  ;;  %v216_v40 = vmax.f32 %v184_v26, 0.0 }
  0x1c   :  { %244 = vst [vmem:[%s668_s4 + $0x78] sm:$0xff] %v212_v0  ;;  %v217_v41 = vmax.f32 %v185_v27, 0.0  ;;  %v187_v42 = vadd.f32 %v155_v23, %v123_v28  ;;  %v218_v44 = vmax.f32 %v186_v34, 0.0  ;;  %v188_v45 = vadd.f32 %v156_v29, %v124_v35 }
  0x1d   :  { %245 = vst [vmem:[%s668_s4 + $0x80] sm:$0xff] %v213_v32  ;;  %v83_v46 = vmul.f32 %v299_v3, %v41_v30  ;;  %v84_v47 = vmul.f32 %v306_v6, %v42_v31  ;;  %v85_v52 = vmul.f32 %v316_v10, %v43_v36  ;;  %v86_v53 = vmul.f32 %v320_v12, %v44_v37 }
  0x1e   :  { %246 = vst [vmem:[%s668_s4 + $0x88] sm:$0xff] %v214_v33  ;;  %v219_v49 = vmax.f32 %v187_v42, 0.0  ;;  %v87_v54 = vmul.f32 %v299_v3, %v45_v38  ;;  %v220_v56 = vmax.f32 %v188_v45, 0.0  ;;  %v160_v3 = vld [vmem:[%s667_s3 + $0xd8] sm:$0xff]  ;;  %v88_v61 = vmul.f32 %v306_v6, %v46_v43 }
  0x1f   :  { %247 = vst [vmem:[%s668_s4 + $0x90] sm:$0xff] %v215_v39  ;;  %v125_v57 = vadd.f32 %v301_v4, %v83_v46  ;;  %v126_v58 = vadd.f32 %v308_v7, %v84_v47  ;;  %v127_v62 = vadd.f32 %v318_v11, %v85_v52  ;;  %v128_v63 = vadd.f32 %v330_v17, %v86_v53 }
  0x20   :  { %248 = vst [vmem:[%s668_s4 + $0x98] sm:$0xff] %v216_v40  ;;  %v129_v0 = vadd.f32 %v301_v4, %v87_v54  ;;  %v89_v2 = vmul.f32 %v316_v10, %v47_v48  ;;  %v130_v8 = vadd.f32 %v308_v7, %v88_v61  ;;  %v90_v4 = vmul.f32 %v320_v12, %v48_v55 }
  0x21   :  { %249 = vst [vmem:[%s668_s4 + $0xa0] sm:$0xff] %v217_v41  ;;  %v189_v6 = vadd.f32 %v157_v50, %v125_v57  ;;  %v190_v5 = vadd.f32 %v158_v51, %v126_v58  ;;  %v191_v13 = vadd.f32 %v159_v59, %v127_v62  ;;  %v192_v10 = vadd.f32 %v160_v3, %v128_v63 }
  0x22   :  { %250 = vst [vmem:[%s668_s4 + $0xa8] sm:$0xff] %v218_v44  ;;  %v193_v14 = vadd.f32 %v161_v60, %v129_v0  ;;  %v131_v15 = vadd.f32 %v318_v11, %v89_v2  ;;  %v194_v12 = vadd.f32 %v162_v1, %v130_v8  ;;  %v132_v19 = vadd.f32 %v330_v17, %v90_v4 }
  0x23   :  { %251 = vst [vmem:[%s668_s4 + $0xb0] sm:$0xff] %v219_v49  ;;  %v221_v7 = vmax.f32 %v189_v6, 0.0  ;;  %v222_v18 = vmax.f32 %v190_v5, 0.0  ;;  %v223_v20 = vmax.f32 %v191_v13, 0.0  ;;  %v224_v21 = vmax.f32 %v192_v10, 0.0 }
  0x24   :  { %252 = vst [vmem:[%s668_s4 + $0xb8] sm:$0xff] %v220_v56  ;;  %v195_v11 = vadd.f32 %v163_v9, %v131_v15  ;;  %v225_v22 = vmax.f32 %v193_v14, 0.0  ;;  %v196_v23 = vadd.f32 %v164_v16, %v132_v19  ;;  %v226_v24 = vmax.f32 %v194_v12, 0.0 }
  0x25   :  { %253 = vst [vmem:[%s668_s4 + $0xc0] sm:$0xff] %v221_v7 }
  0x26   :  { %254 = vst [vmem:[%s668_s4 + $0xc8] sm:$0xff] %v222_v18  ;;  %v227_v17 = vmax.f32 %v195_v11, 0.0  ;;  %v228_v25 = vmax.f32 %v196_v23, 0.0 }
  0x27   :  { %255 = vst [vmem:[%s668_s4 + $0xd0] sm:$0xff] %v223_v20 }
  0x28   :  { %256 = vst [vmem:[%s668_s4 + $0xd8] sm:$0xff] %v224_v21 }
  0x29   :  { %257 = vst [vmem:[%s668_s4 + $0xe0] sm:$0xff] %v225_v22 }
  0x2a   :  { %258 = vst [vmem:[%s668_s4 + $0xe8] sm:$0xff] %v226_v24 }
  0x2b   :  { %259 = vst [vmem:[%s668_s4 + $0xf0] sm:$0xff] %v227_v17 }
  0x2c   :  { %260 = vst [vmem:[%s668_s4 + $0xf8] sm:$0xff] %v228_v25 }

// kernel: _lambda_.17
= control target key start
LH: loop header
LB: loop body
LE: loop exit
PB: predicated region body
PF: predicated region fallthrough
CT: control target
= control target key end

     0   :  { %s2061_s15 = smov 0   ;;  %s2755_s0 = inlined_call_operand.vmem [shape: bf16[2048,144], index: 0, kind: input, shape index: {}]   ;;  %s2756_s1 = inlined_call_operand.vmem [shape: bf16[144,16], index: 1, kind: input, shape index: {}]   ;;  %s2757_s2 = inlined_call_operand.vmem [shape: f32[2048,16], index: 2, kind: output, shape index: {0}]   ;;  %s2758_s3 = inlined_call_operand.vmem [shape: f32[32,16], index: 3, kind: output, shape index: {1}]   ;;  %s2759_s4 = inlined_call_operand.vmem [shape: f32[32,16], index: 4, kind: output, shape index: {2}]  }
   0x1 LB: > { %s2067_s16 = sadd.s32 4294967295, %s2034_s15   ;;  %p1603_p0 = scmp.ge.s32.totalorder %s2034_s15, 1  ;;  %s2034_s15 = sphi %s2061_s15, %s15_s15  }
   0x2   : > { %p169_p1 = scmp.lt.s32.totalorder %s2034_s15, 5 }
   0x4   : > { %p170_p2 = pnand %p1603_p0, %p169_p1 }
   0x5   : > { %s1604_s21 = sshll.u32 (!%p170_p2), %s2067_s16, 6  ;;  %p217_p4 = scmp.lt.s32.totalorder (!%p170_p2), %s2067_s16, 3 }
   0x6   : > { %173 = sbr.rel (%p170_p2) target bundleno = 501 (0x1f5), region = 28  ;;  %p205_p3 = scmp.lt.s32.totalorder (!%p170_p2), %s1604_s21, 255 }
   0xb   : > { %v2009_v0 = vld [vmem:[%s2756_s1 + $0x38] sm:$0xff]  ;;  %v2010_v1 = vld [vmem:[%s2756_s1 + $0x40] sm:$0xff]  ;;  %v2008_v2 = vld [vmem:[%s2756_s1 + $0x30] sm:$0xff]  ;;  %s2761_s21 = smov (!%p205_p3, %s1604_s21), 255  ;;  %vm650_vm0 = vcmask 130048   ;;  %s2763_s16 = smov (!%p217_p4, %s2067_s16), 3 }
   0xc   : > { %747 = vmatpush.bf16.msra.mxu0 %v2009_v0  ;;  %923 = vmatpush.bf16.msra.mxu1 %v2010_v1  ;;  %s1937_s24 = sshll.u32 %s2761_s21, 3  ;;  %v2007_v3 = vld [vmem:[%s2756_s1 + $0x28] sm:$0xff]  ;;  %v2006_v7 = vld [vmem:[%s2756_s1 + $0x20] sm:$0xff]  ;;  %v2005_v8 = vld [vmem:[%s2756_s1 + $0x18] sm:$0xff]  ;;  %s1609_s19 = sshll.u32 %s2763_s16, 3 }
   0xd   : > { %2011 = vmatpush.bf16.msra.mxu2 %v2009_v0  ;;  %2019 = vmatpush.bf16.msra.mxu3 %v2010_v1  ;;  %s2089_s27 = scalar_lea.vmem %s2755_s0, %s1937_s24  ;;  %v2004_v9 = vld [vmem:[%s2756_s1 + $0x10] sm:$0xff]  ;;  %v2003_v13 = vld [vmem:[%s2756_s1 + $0x8] sm:$0xff]  ;;  %v2002_v14 = vld [vmem:[%s2756_s1] sm:$0xff]  ;;  %s2194_s18 = scalar_lea.vmem %s2757_s2, %s1937_s24 }
   0xe   : > { %v1938_v4 = vld [vmem:[%s2089_s27 + $0x4] sm:$0xf]  ;;  %v1615_v5 = vld [vmem:[%s2089_s27 + $0x8] sm:$0xf0]  ;;  %v1940_v10 = vld [vmem:[%s2089_s27 + $0x14] sm:$0xf]  ;;  %s220_s22 = scalar_lea.vmem %s2758_s3, %s1609_s19  ;;  %s224_s25 = scalar_lea.vmem %s2759_s4, %s1609_s19 }
   0xf   : > { %v1618_v6 = vor.u32 %v1938_v4, %v1615_v5  ;;  %v1623_v11 = vld [vmem:[%s2089_s27 + $0x18] sm:$0xf0]  ;;  %v1613_v15 = vld [vmem:[%s2089_s27] sm:$0xf]  ;;  %v1939_v16 = vld [vmem:[%s2089_s27 + $0x4] sm:$0xf0] }
  0x10   : > { %748 = vmatpush.bf16.msra.mxu0 %v2008_v2  ;;  %v1626_v12 = vor.u32 %v1940_v10, %v1623_v11  ;;  %v1614_v17 = vor.u32 %v1939_v16, %v1613_v15  ;;  %v1942_v18 = vld [vmem:[%s2089_s27 + $0x24] sm:$0xf]  ;;  %v1631_v19 = vld [vmem:[%s2089_s27 + $0x28] sm:$0xf0]  ;;  %v1621_v21 = vld [vmem:[%s2089_s27 + $0x10] sm:$0xf] }
  0x11   : > { %2012 = vmatpush.bf16.msra.mxu2 %v2008_v2  ;;  %1903 = vmatmul.msk.bf16.vlgmr.msra.gmra.mxu1 %vm650_vm0, %v1618_v6  ;;  %v1634_v20 = vor.u32 %v1942_v18, %v1631_v19  ;;  %v1941_v22 = vld [vmem:[%s2089_s27 + $0x14] sm:$0xf0]  ;;  %v1741_v24 = vld [vmem:[%s2089_s27 + $0x100] sm:$0xf]  ;;  %v1971_v25 = vld [vmem:[%s2089_s27 + $0x104] sm:$0xf0] }
  0x12   : > { %v1622_v23 = vor.u32 %v1941_v22, %v1621_v21  ;;  %v1742_v26 = vor.u32 %v1971_v25, %v1741_v24  ;;  %v1944_v27 = vld [vmem:[%s2089_s27 + $0x34] sm:$0xf]  ;;  %v1639_v28 = vld [vmem:[%s2089_s27 + $0x38] sm:$0xf0]  ;;  %v1629_v30 = vld [vmem:[%s2089_s27 + $0x20] sm:$0xf] }
  0x13   : > { %v1642_v29 = vor.u32 %v1944_v27, %v1639_v28  ;;  %v1943_v31 = vld [vmem:[%s2089_s27 + $0x24] sm:$0xf0]  ;;  %v1749_v33 = vld [vmem:[%s2089_s27 + $0x110] sm:$0xf]  ;;  %v1973_v34 = vld [vmem:[%s2089_s27 + $0x114] sm:$0xf0] }
  0x14   : > { %749 = vmatpush.bf16.msra.mxu0 %v2007_v3  ;;  %v1630_v32 = vor.u32 %v1943_v31, %v1629_v30  ;;  %v1972_v35 = vld [vmem:[%s2089_s27 + $0x114] sm:$0xf]  ;;  %v1750_v36 = vor.u32 %v1973_v34, %v1749_v33  ;;  %v1751_v37 = vld [vmem:[%s2089_s27 + $0x118] sm:$0xf0]  ;;  %v1946_v39 = vld [vmem:[%s2089_s27 + $0x44] sm:$0xf] }
  0x15   : > { %2013 = vmatpush.bf16.msra.mxu2 %v2007_v3  ;;  %v1754_v38 = vor.u32 %v1972_v35, %v1751_v37  ;;  %v1647_v40 = vld [vmem:[%s2089_s27 + $0x48] sm:$0xf0]  ;;  %v1637_v42 = vld [vmem:[%s2089_s27 + $0x30] sm:$0xf]  ;;  %v1945_v43 = vld [vmem:[%s2089_s27 + $0x34] sm:$0xf0] }
  0x16   : > { %v1650_v41 = vor.u32 %v1946_v39, %v1647_v40  ;;  %v1638_v44 = vor.u32 %v1945_v43, %v1637_v42  ;;  %v1757_v45 = vld [vmem:[%s2089_s27 + $0x120] sm:$0xf]  ;;  %v1975_v46 = vld [vmem:[%s2089_s27 + $0x124] sm:$0xf0]  ;;  %v1974_v47 = vld [vmem:[%s2089_s27 + $0x124] sm:$0xf] }
  0x17   : > { %1920 = vmatmul.msk.bf16.vlgmr.msra.gmra.mxu3 %vm650_vm0, %v1754_v38  ;;  %v1758_v48 = vor.u32 %v1975_v46, %v1757_v45  ;;  %v1759_v49 = vld [vmem:[%s2089_s27 + $0x128] sm:$0xf0]  ;;  %v1948_v51 = vld [vmem:[%s2089_s27 + $0x54] sm:$0xf]  ;;  %v1655_v52 = vld [vmem:[%s2089_s27 + $0x58] sm:$0xf0] }
  0x18   : > { %750 = vmatpush.bf16.msra.mxu0 %v2006_v7  ;;  %v1762_v50 = vor.u32 %v1974_v47, %v1759_v49  ;;  %v1658_v53 = vor.u32 %v1948_v51, %v1655_v52  ;;  %v1645_v54 = vld [vmem:[%s2089_s27 + $0x40] sm:$0xf]  ;;  %v1947_v55 = vld [vmem:[%s2089_s27 + $0x44] sm:$0xf0]  ;;  %v1765_v57 = vld [vmem:[%s2089_s27 + $0x130] sm:$0xf] }
  0x19   : > { %2014 = vmatpush.bf16.msra.mxu2 %v2006_v7  ;;  %v1646_v56 = vor.u32 %v1947_v55, %v1645_v54  ;;  %v1977_v58 = vld [vmem:[%s2089_s27 + $0x134] sm:$0xf0]  ;;  %v1976_v59 = vld [vmem:[%s2089_s27 + $0x134] sm:$0xf]  ;;  %v1767_v61 = vld [vmem:[%s2089_s27 + $0x138] sm:$0xf0] }
  0x1a   : > { %v1766_v60 = vor.u32 %v1977_v58, %v1765_v57  ;;  %v1770_v62 = vor.u32 %v1976_v59, %v1767_v61  ;;  %v1950_v63 = vld [vmem:[%s2089_s27 + $0x64] sm:$0xf]  ;;  %v1663_v0 = vld [vmem:[%s2089_s27 + $0x68] sm:$0xf0]  ;;  %v1653_v2 = vld [vmem:[%s2089_s27 + $0x50] sm:$0xf] }
  0x1b   : > { %v1666_v1 = vor.u32 %v1950_v63, %v1663_v0  ;;  %v1949_v3 = vld [vmem:[%s2089_s27 + $0x54] sm:$0xf0]  ;;  %v1773_v5 = vld [vmem:[%s2089_s27 + $0x140] sm:$0xf]  ;;  %v1979_v6 = vld [vmem:[%s2089_s27 + $0x144] sm:$0xf0] }
  0x1c   : > { %751 = vmatpush.bf16.msra.mxu0 %v2005_v8  ;;  %v1654_v4 = vor.u32 %v1949_v3, %v1653_v2  ;;  %v1978_v7 = vld [vmem:[%s2089_s27 + $0x144] sm:$0xf]  ;;  %v1952_v11 = vld [vmem:[%s2089_s27 + $0x74] sm:$0xf]  ;;  %v1951_v15 = vld [vmem:[%s2089_s27 + $0x64] sm:$0xf0] }
  0x1d   : > { %2015 = vmatpush.bf16.msra.mxu2 %v2005_v8  ;;  %v1774_v8 = vor.u32 %v1979_v6, %v1773_v5  ;;  %v1981_v18 = vld [vmem:[%s2089_s27 + $0x154] sm:$0xf0]  ;;  %v1980_v19 = vld [vmem:[%s2089_s27 + $0x154] sm:$0xf]  ;;  %v1783_v21 = vld [vmem:[%s2089_s27 + $0x158] sm:$0xf0] }
  0x1e   : > { %v1786_v22 = vor.u32 %v1980_v19, %v1783_v21  ;;  %v1679_v24 = vld [vmem:[%s2089_s27 + $0x88] sm:$0xf0]  ;;  %v1669_v27 = vld [vmem:[%s2089_s27 + $0x70] sm:$0xf]  ;;  %v1953_v28 = vld [vmem:[%s2089_s27 + $0x74] sm:$0xf0] }
  0x1f   : > { %v1789_v31 = vld [vmem:[%s2089_s27 + $0x160] sm:$0xf]  ;;  %v1982_v33 = vld [vmem:[%s2089_s27 + $0x164] sm:$0xf]  ;;  %v1791_v35 = vld [vmem:[%s2089_s27 + $0x168] sm:$0xf0] }
  0x20   : > { %752 = vmatpush.bf16.msra.mxu0 %v2004_v9  ;;  %v1956_v37 = vld [vmem:[%s2089_s27 + $0x94] sm:$0xf]  ;;  %v1687_v38 = vld [vmem:[%s2089_s27 + $0x98] sm:$0xf0]  ;;  %v1955_v42 = vld [vmem:[%s2089_s27 + $0x84] sm:$0xf0] }
  0x21   : > { %2016 = vmatpush.bf16.msra.mxu2 %v2004_v9  ;;  %1904 = vmatmul.msk.bf16.gmra.mxu1 %vm650_vm0, %v1626_v12  ;;  %v1775_v9 = vld [vmem:[%s2089_s27 + $0x148] sm:$0xf0]  ;;  %v1671_v12 = vld [vmem:[%s2089_s27 + $0x78] sm:$0xf0]  ;;  %v1690_v39 = vor.u32 %v1956_v37, %v1687_v38  ;;  %v1797_v47 = vld [vmem:[%s2089_s27 + $0x170] sm:$0xf] }
  0x22   : > { %v1778_v10 = vor.u32 %v1978_v7, %v1775_v9  ;;  %v1984_v49 = vld [vmem:[%s2089_s27 + $0x174] sm:$0xf]  ;;  %v1799_v51 = vld [vmem:[%s2089_s27 + $0x178] sm:$0xf0]  ;;  %v1695_v54 = vld [vmem:[%s2089_s27 + $0xa8] sm:$0xf0] }
  0x23   : > { %v1802_v52 = vor.u32 %v1984_v49, %v1799_v51  ;;  %v1685_v0 = vld [vmem:[%s2089_s27 + $0x90] sm:$0xf]  ;;  %v1805_v9 = vld [vmem:[%s2089_s27 + $0x180] sm:$0xf]  ;;  %v1960_v19 = vld [vmem:[%s2089_s27 + $0xb4] sm:$0xf] }
  0x24   : > { %753 = vmatpush.bf16.msra.mxu0 %v2003_v13  ;;  %v1962_v49 = vld [vmem:[%s2089_s27 + $0xc4] sm:$0xf] }
  0x25   : > { %2017 = vmatpush.bf16.msra.mxu2 %v2003_v13  ;;  %v1674_v13 = vor.u32 %v1952_v11, %v1671_v12  ;;  %v1986_v11 = vld [vmem:[%s2089_s27 + $0x184] sm:$0xf] }
  0x27   : > { %1921 = vmatmul.msk.bf16.gmra.mxu3 %vm650_vm0, %v1762_v50 }
  0x28   : > { %754 = vmatpush.bf16.msra.mxu0 %v2002_v14 }
  0x29   : > { %2018 = vmatpush.bf16.msra.mxu2 %v2002_v14  ;;  %v1661_v14 = vld [vmem:[%s2089_s27 + $0x60] sm:$0xf] }
  0x2a   : > { %v1662_v16 = vor.u32 %v1951_v15, %v1661_v14  ;;  %v1807_v15 = vld [vmem:[%s2089_s27 + $0x188] sm:$0xf0] }
  0x2b   : > { %755 = vmatmul.bf16.vlgmr.msra.gmra.mxu0 %v1614_v17  ;;  %v1781_v17 = vld [vmem:[%s2089_s27 + $0x150] sm:$0xf] }
  0x2c   : > { %835 = vmatmul.bf16.vlgmr.msra.gmra.mxu2 %v1742_v26 }
  0x31   : > { %1905 = vmatmul.msk.bf16.gmra.mxu1 %vm650_vm0, %v1634_v20  ;;  %v1782_v20 = vor.u32 %v1981_v18, %v1781_v17  ;;  %v1810_v17 = vor.u32 %v1986_v11, %v1807_v15  ;;  %v1823_v15 = vld [vmem:[%s2089_s27 + $0x1a8] sm:$0xf0] }
  0x37   : > { %1922 = vmatmul.msk.bf16.gmra.mxu3 %vm650_vm0, %v1770_v62 }
  0x3b   : > { %760 = vmatmul.bf16.gmra.mxu0 %v1622_v23  ;;  %v1954_v23 = vld [vmem:[%s2089_s27 + $0x84] sm:$0xf] }
  0x3c   : > { %840 = vmatmul.bf16.gmra.mxu2 %v1750_v36  ;;  %v1682_v25 = vor.u32 %v1954_v23, %v1679_v24  ;;  %v1794_v36 = vor.u32 %v1982_v33, %v1791_v35 }
  0x41   : > { %1906 = vmatmul.msk.bf16.gmra.mxu1 %vm650_vm0, %v1642_v29  ;;  %v1670_v29 = vor.u32 %v1953_v28, %v1669_v27 }
  0x47   : > { %1923 = vmatmul.msk.bf16.gmra.mxu3 %vm650_vm0, %v1778_v10  ;;  %v1987_v10 = vld [vmem:[%s2089_s27 + $0x184] sm:$0xf0] }
  0x48   : > { %v1806_v14 = vor.u32 %v1987_v10, %v1805_v9  ;;  %v1821_v9 = vld [vmem:[%s2089_s27 + $0x1a0] sm:$0xf]  ;;  %v1991_v10 = vld [vmem:[%s2089_s27 + $0x1a4] sm:$0xf0] }
  0x4b   : > { %765 = vmatmul.bf16.gmra.mxu0 %v1630_v32  ;;  %v1983_v32 = vld [vmem:[%s2089_s27 + $0x164] sm:$0xf0] }
  0x4c   : > { %845 = vmatmul.bf16.gmra.mxu2 %v1758_v48  ;;  %v1790_v34 = vor.u32 %v1983_v32, %v1789_v31  ;;  %v1985_v48 = vld [vmem:[%s2089_s27 + $0x174] sm:$0xf0]  ;;  %v1959_v31 = vld [vmem:[%s2089_s27 + $0xa4] sm:$0xf0] }
  0x4d   : > { %v1798_v50 = vor.u32 %v1985_v48, %v1797_v47 }
  0x51   : > { %1907 = vmatmul.msk.bf16.gmra.mxu1 %vm650_vm0, %v1650_v41  ;;  %v1677_v41 = vld [vmem:[%s2089_s27 + $0x80] sm:$0xf] }
  0x52   : > { %v1678_v43 = vor.u32 %v1955_v42, %v1677_v41  ;;  %v1988_v41 = vld [vmem:[%s2089_s27 + $0x194] sm:$0xf] }
  0x57   : > { %1924 = vmatmul.msk.bf16.gmra.mxu3 %vm650_vm0, %v1786_v22 }
  0x5b   : > { %770 = vmatmul.bf16.gmra.mxu0 %v1638_v44 }
  0x5c   : > { %850 = vmatmul.bf16.gmra.mxu2 %v1766_v60 }
  0x61   : > { %1908 = vmatmul.msk.bf16.gmra.mxu1 %vm650_vm0, %v1658_v53  ;;  %v1958_v53 = vld [vmem:[%s2089_s27 + $0xa4] sm:$0xf] }
  0x67   : > { %1925 = vmatmul.msk.bf16.gmra.mxu3 %vm650_vm0, %v1794_v36 }
  0x6b   : > { %775 = vmatmul.bf16.gmra.mxu0 %v1646_v56  ;;  %v1698_v56 = vor.u32 %v1958_v53, %v1695_v54 }
  0x6c   : > { %855 = vmatmul.bf16.gmra.mxu2 %v1774_v8 }
  0x71   : > { %1909 = vmatmul.msk.bf16.gmra.mxu1 %vm650_vm0, %v1666_v1  ;;  %v1957_v1 = vld [vmem:[%s2089_s27 + $0x94] sm:$0xf0] }
  0x72   : > { %v1686_v5 = vor.u32 %v1957_v1, %v1685_v0 }
  0x77   : > { %1926 = vmatmul.msk.bf16.gmra.mxu3 %vm650_vm0, %v1802_v52 }
  0x7b   : > { %780 = vmatmul.bf16.gmra.mxu0 %v1654_v4 }
  0x7c   : > { %860 = vmatmul.bf16.gmra.mxu2 %v1782_v20  ;;  %v1703_v20 = vld [vmem:[%s2089_s27 + $0xb8] sm:$0xf0] }
  0x7d   : > { %v1706_v23 = vor.u32 %v1960_v19, %v1703_v20  ;;  %v1964_v19 = vld [vmem:[%s2089_s27 + $0xd4] sm:$0xf]  ;;  %v1719_v20 = vld [vmem:[%s2089_s27 + $0xd8] sm:$0xf0] }
  0x81   : > { %1910 = vmatmul.msk.bf16.gmra.mxu1 %vm650_vm0, %v1674_v13 }
  0x87   : > { %1927 = vmatmul.msk.bf16.gmra.mxu3 %vm650_vm0, %v1810_v17 }
  0x8b   : > { %785 = vmatmul.bf16.gmra.mxu0 %v1662_v16 }
  0x8c   : > { %865 = vmatmul.bf16.gmra.mxu2 %v1790_v34 }
  0x8e   : > { %v925_v26 = vpop.f32.mrf.mxu1 }
  0x91   : > { %1911 = vmatmul.msk.bf16.gmra.mxu1 %vm650_vm0, %v1682_v25 }
  0x96   : > { %v927_v30 = vpop.f32.mrf.mxu1 }
  0x9b   : > { %790 = vmatmul.bf16.gmra.mxu0 %v1670_v29 }
  0x9c   : > { %870 = vmatmul.bf16.gmra.mxu2 %v1798_v50  ;;  %v1711_v50 = vld [vmem:[%s2089_s27 + $0xc8] sm:$0xf0] }
  0x9d   : > { %v1714_v53 = vor.u32 %v1962_v49, %v1711_v50  ;;  %v1992_v50 = vld [vmem:[%s2089_s27 + $0x1b4] sm:$0xf] }
  0x9e   : > { %v930_v40 = vpop.f32.mrf.mxu1 }
  0xa1   : > { %1912 = vmatmul.msk.bf16.gmra.mxu1 %vm650_vm0, %v1690_v39  ;;  %v1813_v39 = vld [vmem:[%s2089_s27 + $0x190] sm:$0xf] }
  0xa6   : > { %v932_v46 = vpop.f32.mrf.mxu1 }
  0xa8   : > { %v756_v44 = vpop.f32.mrf.mxu0 }
  0xa9   : > { %v926_v45 = vadd.f32 %v925_v26, %v756_v44 }
  0xab   : > { %1085 = vst.msk [vmem:[%s2194_s18] sm:$0xff] %vm650_vm0, %v926_v45  ;;  %795 = vmatmul.bf16.gmra.mxu0 %v1678_v43  ;;  %v1282_v57 = vmul.f32 %v926_v45, %v926_v45  ;;  %v1149_v60 = vsel %vm650_vm0, %v926_v45, 0.0  ;;  %v1815_v45 = vld [vmem:[%s2089_s27 + $0x198] sm:$0xf0] }
  0xac   : > { %875 = vmatmul.bf16.gmra.mxu2 %v1806_v14  ;;  %v1818_v47 = vor.u32 %v1988_v41, %v1815_v45  ;;  %v1990_v14 = vld [vmem:[%s2089_s27 + $0x1a4] sm:$0xf]  ;;  %v1829_v45 = vld [vmem:[%s2089_s27 + $0x1b0] sm:$0xf] }
  0xad   : > { %v1346_v2 = vsel %vm650_vm0, %v1282_v57, 0.0  ;;  %v1010_v57 = vpop.f32.mrf.mxu3  ;;  %v1826_v17 = vor.u32 %v1990_v14, %v1823_v15 }
  0xae   : > { %v935_v59 = vpop.f32.mrf.mxu1  ;;  %1928 = vmatmul.msk.bf16.gmra.mxu3 %vm650_vm0, %v1818_v47 }
  0xaf   : > { %v2225_v24 = vpop.f32.mrf.mxu2 }
  0xb0   : > { %v758_v55 = vpop.f32.mrf.mxu0 }
  0xb1   : > { %v928_v58 = vadd.f32 %v927_v30, %v758_v55  ;;  %1913 = vmatmul.msk.bf16.gmra.mxu1 %vm650_vm0, %v1698_v56  ;;  %v1693_v30 = vld [vmem:[%s2089_s27 + $0xa0] sm:$0xf] }
  0xb2   : > { %v1694_v34 = vor.u32 %v1959_v31, %v1693_v30 }
  0xb3   : > { %1086 = vst.msk [vmem:[%s2194_s18 + $0x8] sm:$0xff] %vm650_vm0, %v928_v58  ;;  %v1150_v61 = vsel %vm650_vm0, %v928_v58, 0.0  ;;  %v1283_v62 = vmul.f32 %v928_v58, %v928_v58 }
  0xb4   : > { %v1151_v63 = vadd.f32 %v1150_v61, %v1149_v60  ;;  %v1701_v61 = vld [vmem:[%s2089_s27 + $0xb0] sm:$0xf] }
  0xb5   : > { %v1347_v3 = vsel %vm650_vm0, %v1283_v62, 0.0  ;;  %v1961_v62 = vld [vmem:[%s2089_s27 + $0xb4] sm:$0xf0] }
  0xb6   : > { %v1348_v4 = vadd.f32 %v1347_v3, %v1346_v2  ;;  %v937_v8 = vpop.f32.mrf.mxu1  ;;  %v1702_v2 = vor.u32 %v1961_v62, %v1701_v61 }
  0xb7   : > { %v2234_v36 = vpop.f32.mrf.mxu2 }
  0xb8   : > { %v761_v6 = vpop.f32.mrf.mxu0 }
  0xb9   : > { %v931_v7 = vadd.f32 %v930_v40, %v761_v6  ;;  %v1989_v40 = vld [vmem:[%s2089_s27 + $0x194] sm:$0xf0] }
  0xba   : > { %v1814_v44 = vor.u32 %v1989_v40, %v1813_v39 }
  0xbb   : > { %1087 = vst.msk [vmem:[%s2194_s18 + $0x10] sm:$0xff] %vm650_vm0, %v931_v7  ;;  %v1152_v12 = vsel %vm650_vm0, %v931_v7, 0.0  ;;  %v1284_v13 = vmul.f32 %v931_v7, %v931_v7  ;;  %800 = vmatmul.bf16.gmra.mxu0 %v1686_v5  ;;  %v1012_v7 = vpop.f32.mrf.mxu3 }
  0xbc   : > { %v1153_v16 = vadd.f32 %v1152_v12, %v1151_v63  ;;  %880 = vmatmul.bf16.gmra.mxu2 %v1814_v44 }
  0xbd   : > { %v1349_v18 = vsel %vm650_vm0, %v1284_v13, 0.0  ;;  %v1822_v13 = vor.u32 %v1991_v10, %v1821_v9 }
  0xbe   : > { %v1350_v21 = vadd.f32 %v1349_v18, %v1348_v4  ;;  %v940_v26 = vpop.f32.mrf.mxu1  ;;  %1929 = vmatmul.msk.bf16.gmra.mxu3 %vm650_vm0, %v1826_v17  ;;  %v1837_v17 = vld [vmem:[%s2089_s27 + $0x1c0] sm:$0xf] }
  0xbf   : > { %v841_v54 = vpop.f32.mrf.mxu2 }
  0xc0   : > { %v763_v22 = vpop.f32.mrf.mxu0  ;;  %v2256_v1 = vadd.f32 %v1010_v57, %v841_v54 }
  0xc1   : > { %v933_v25 = vadd.f32 %v932_v46, %v763_v22  ;;  %1914 = vmatmul.msk.bf16.gmra.mxu1 %vm650_vm0, %v1706_v23  ;;  %v1722_v23 = vor.u32 %v1964_v19, %v1719_v20 }
  0xc2   : > { %1119 = vst.msk [vmem:[%s2194_s18 + $0x110] sm:$0xff] %vm650_vm0, %v2256_v1 }
  0xc3   : > { %1088 = vst.msk [vmem:[%s2194_s18 + $0x18] sm:$0xff] %vm650_vm0, %v933_v25  ;;  %v1154_v27 = vsel %vm650_vm0, %v933_v25, 0.0  ;;  %v1285_v28 = vmul.f32 %v933_v25, %v933_v25 }
  0xc4   : > { %v1155_v29 = vadd.f32 %v1154_v27, %v1153_v16 }
  0xc5   : > { %v1351_v32 = vsel %vm650_vm0, %v1285_v28, 0.0  ;;  %v1015_v28 = vpop.f32.mrf.mxu3 }
  0xc6   : > { %v1352_v33 = vadd.f32 %v1351_v32, %v1350_v21  ;;  %v2236_v38 = vpop.f32.mrf.mxu1  ;;  %v1709_v32 = vld [vmem:[%s2089_s27 + $0xc0] sm:$0xf] }
  0xc7   : > { %v843_v4 = vpop.f32.mrf.mxu2 }
  0xc8   : > { %v766_v35 = vpop.f32.mrf.mxu0 }
  0xc9   : > { %v936_v37 = vadd.f32 %v935_v59, %v766_v35 }
  0xcb   : > { %1089 = vst.msk [vmem:[%s2194_s18 + $0x20] sm:$0xff] %vm650_vm0, %v936_v37  ;;  %v1156_v42 = vsel %vm650_vm0, %v936_v37, 0.0  ;;  %v1286_v43 = vmul.f32 %v936_v37, %v936_v37  ;;  %805 = vmatmul.bf16.gmra.mxu0 %v1694_v34 }
  0xcc   : > { %v1157_v46 = vadd.f32 %v1156_v42, %v1155_v29  ;;  %885 = vmatmul.bf16.gmra.mxu2 %v1822_v13 }
  0xcd   : > { %v1353_v48 = vsel %vm650_vm0, %v1286_v43, 0.0  ;;  %v1017_v43 = vpop.f32.mrf.mxu3 }
  0xce   : > { %v1354_v51 = vadd.f32 %v1353_v48, %v1352_v33  ;;  %v945_v56 = vpop.f32.mrf.mxu1  ;;  %v1963_v33 = vld [vmem:[%s2089_s27 + $0xc4] sm:$0xf0] }
  0xcf   : > { %v846_v25 = vpop.f32.mrf.mxu2 }
  0xd0   : > { %v768_v52 = vpop.f32.mrf.mxu0  ;;  %v2287_v37 = vadd.f32 %v1015_v28, %v846_v25  ;;  %v1968_v28 = vld [vmem:[%s2089_s27 + $0xf4] sm:$0xf] }
  0xd1   : > { %v938_v55 = vadd.f32 %v937_v8, %v768_v52  ;;  %1915 = vmatmul.msk.bf16.gmra.mxu1 %vm650_vm0, %v1714_v53  ;;  %v2263_v8 = vadd.f32 %v1012_v7, %v843_v4  ;;  %v1717_v4 = vld [vmem:[%s2089_s27 + $0xd0] sm:$0xf] }
  0xd2   : > { %1121 = vst.msk [vmem:[%s2194_s18 + $0x120] sm:$0xff] %vm650_vm0, %v2287_v37 }
  0xd3   : > { %1090 = vst.msk [vmem:[%s2194_s18 + $0x28] sm:$0xff] %vm650_vm0, %v938_v55  ;;  %v1158_v58 = vsel %vm650_vm0, %v938_v55, 0.0  ;;  %v1287_v59 = vmul.f32 %v938_v55, %v938_v55  ;;  %v1966_v55 = vld [vmem:[%s2089_s27 + $0xe4] sm:$0xf] }
  0xd4   : > { %v1159_v60 = vadd.f32 %v1158_v58, %v1157_v46  ;;  %1120 = vst.msk [vmem:[%s2194_s18 + $0x118] sm:$0xff] %vm650_vm0, %v2263_v8  ;;  %v1993_v46 = vld [vmem:[%s2089_s27 + $0x1b4] sm:$0xf0] }
  0xd5   : > { %v1355_v63 = vsel %vm650_vm0, %v1287_v59, 0.0  ;;  %v1830_v49 = vor.u32 %v1993_v46, %v1829_v45  ;;  %v1967_v45 = vld [vmem:[%s2089_s27 + $0xe4] sm:$0xf0] }
  0xd6   : > { %v1356_v0 = vadd.f32 %v1355_v63, %v1354_v51  ;;  %v2261_v6 = vpop.f32.mrf.mxu1  ;;  %v1831_v51 = vld [vmem:[%s2089_s27 + $0x1b8] sm:$0xf0]  ;;  %v1020_v63 = vpop.f32.mrf.mxu3 }
  0xd7   : > { %v848_v40 = vpop.f32.mrf.mxu2  ;;  %v1834_v53 = vor.u32 %v1992_v50, %v1831_v51 }
  0xd8   : > { %v771_v3 = vpop.f32.mrf.mxu0  ;;  %v2294_v44 = vadd.f32 %v1017_v43, %v848_v40  ;;  %v1725_v43 = vld [vmem:[%s2089_s27 + $0xe0] sm:$0xf] }
  0xd9   : > { %v941_v5 = vadd.f32 %v940_v26, %v771_v3  ;;  %1930 = vmatmul.msk.bf16.gmra.mxu3 %vm650_vm0, %v1834_v53 }
  0xda   : > { %1122 = vst.msk [vmem:[%s2194_s18 + $0x128] sm:$0xff] %vm650_vm0, %v2294_v44 }
  0xdb   : > { %1091 = vst.msk [vmem:[%s2194_s18 + $0x30] sm:$0xff] %vm650_vm0, %v941_v5  ;;  %v1160_v11 = vsel %vm650_vm0, %v941_v5, 0.0  ;;  %v1288_v12 = vmul.f32 %v941_v5, %v941_v5  ;;  %810 = vmatmul.bf16.gmra.mxu0 %v1702_v2  ;;  %v1965_v5 = vld [vmem:[%s2089_s27 + $0xd4] sm:$0xf0] }
  0xdc   : > { %v1161_v16 = vadd.f32 %v1160_v11, %v1159_v60  ;;  %890 = vmatmul.bf16.gmra.mxu2 %v1830_v49 }
  0xdd   : > { %v1357_v18 = vsel %vm650_vm0, %v1288_v12, 0.0 }
  0xde   : > { %v1358_v21 = vadd.f32 %v1357_v18, %v1356_v0  ;;  %v950_v27 = vpop.f32.mrf.mxu1  ;;  %v1022_v15 = vpop.f32.mrf.mxu3  ;;  %v1995_v18 = vld [vmem:[%s2089_s27 + $0x1c4] sm:$0xf0] }
  0xdf   : > { %v851_v60 = vpop.f32.mrf.mxu2 }
  0xe0   : > { %v773_v22 = vpop.f32.mrf.mxu0  ;;  %v2318_v10 = vadd.f32 %v1020_v63, %v851_v60  ;;  %v1996_v60 = vld [vmem:[%s2089_s27 + $0x1d4] sm:$0xf] }
  0xe1   : > { %v943_v26 = vadd.f32 %v2236_v38, %v773_v22  ;;  %1916 = vmatmul.msk.bf16.gmra.mxu1 %vm650_vm0, %v1722_v23  ;;  %v1710_v38 = vor.u32 %v1963_v33, %v1709_v32  ;;  %v1994_v22 = vld [vmem:[%s2089_s27 + $0x1c4] sm:$0xf]  ;;  %v1839_v23 = vld [vmem:[%s2089_s27 + $0x1c8] sm:$0xf0] }
  0xe2   : > { %1123 = vst.msk [vmem:[%s2194_s18 + $0x130] sm:$0xff] %vm650_vm0, %v2318_v10 }
  0xe3   : > { %1092 = vst.msk [vmem:[%s2194_s18 + $0x38] sm:$0xff] %vm650_vm0, %v943_v26  ;;  %v1162_v29 = vsel %vm650_vm0, %v943_v26, 0.0  ;;  %v1289_v30 = vmul.f32 %v943_v26, %v943_v26  ;;  %v1842_v26 = vor.u32 %v1994_v22, %v1839_v23 }
  0xe4   : > { %v1163_v31 = vadd.f32 %v1162_v29, %v1161_v16  ;;  %v1735_v29 = vld [vmem:[%s2089_s27 + $0xf8] sm:$0xf0] }
  0xe5   : > { %v1359_v34 = vsel %vm650_vm0, %v1289_v30, 0.0  ;;  %v1738_v32 = vor.u32 %v1968_v28, %v1735_v29 }
  0xe6   : > { %v1360_v35 = vadd.f32 %v1359_v34, %v1358_v21  ;;  %v2292_v42 = vpop.f32.mrf.mxu1  ;;  %v1838_v21 = vor.u32 %v1995_v18, %v1837_v17  ;;  %v1733_v18 = vld [vmem:[%s2089_s27 + $0xf0] sm:$0xf] }
  0xe7   : > { %v853_v12 = vpop.f32.mrf.mxu2 }
  0xe8   : > { %v776_v39 = vpop.f32.mrf.mxu0  ;;  %v2325_v16 = vadd.f32 %v1022_v15, %v853_v12 }
  0xe9   : > { %v946_v41 = vadd.f32 %v945_v56, %v776_v39  ;;  %v1727_v56 = vld [vmem:[%s2089_s27 + $0xe8] sm:$0xf0]  ;;  %1931 = vmatmul.msk.bf16.gmra.mxu3 %vm650_vm0, %v1842_v26 }
  0xea   : > { %v1730_v59 = vor.u32 %v1966_v55, %v1727_v56  ;;  %1124 = vst.msk [vmem:[%s2194_s18 + $0x138] sm:$0xff] %vm650_vm0, %v2325_v16  ;;  %v1845_v55 = vld [vmem:[%s2089_s27 + $0x1d0] sm:$0xf]  ;;  %v1997_v56 = vld [vmem:[%s2089_s27 + $0x1d4] sm:$0xf0] }
  0xeb   : > { %1093 = vst.msk [vmem:[%s2194_s18 + $0x40] sm:$0xff] %vm650_vm0, %v946_v41  ;;  %v1164_v47 = vsel %vm650_vm0, %v946_v41, 0.0  ;;  %v1290_v48 = vmul.f32 %v946_v41, %v946_v41  ;;  %815 = vmatmul.bf16.gmra.mxu0 %v1710_v38  ;;  %v1025_v38 = vpop.f32.mrf.mxu3 }
  0xec   : > { %v1165_v52 = vadd.f32 %v1164_v47, %v1163_v31  ;;  %895 = vmatmul.bf16.gmra.mxu2 %v1838_v21 }
  0xed   : > { %v1361_v54 = vsel %vm650_vm0, %v1290_v48, 0.0 }
  0xee   : > { %v1362_v57 = vadd.f32 %v1361_v54, %v1360_v35  ;;  %v955_v62 = vpop.f32.mrf.mxu1 }
  0xef   : > { %v856_v33 = vpop.f32.mrf.mxu2 }
  0xf0   : > { %v778_v58 = vpop.f32.mrf.mxu0  ;;  %v2349_v48 = vadd.f32 %v1025_v38, %v856_v33  ;;  %v1998_v38 = vld [vmem:[%s2089_s27 + $0x1e4] sm:$0xf] }
  0xf1   : > { %v948_v61 = vadd.f32 %v2261_v6, %v778_v58  ;;  %1917 = vmatmul.msk.bf16.gmra.mxu1 %vm650_vm0, %v1730_v59  ;;  %v1718_v6 = vor.u32 %v1965_v5, %v1717_v4  ;;  %v1846_v59 = vor.u32 %v1997_v56, %v1845_v55 }
  0xf2   : > { %1125 = vst.msk [vmem:[%s2194_s18 + $0x140] sm:$0xff] %vm650_vm0, %v2349_v48 }
  0xf3   : > { %1094 = vst.msk [vmem:[%s2194_s18 + $0x48] sm:$0xff] %vm650_vm0, %v948_v61  ;;  %v1166_v0 = vsel %vm650_vm0, %v948_v61, 0.0  ;;  %v1291_v2 = vmul.f32 %v948_v61, %v948_v61  ;;  %v1027_v53 = vpop.f32.mrf.mxu3  ;;  %v1847_v61 = vld [vmem:[%s2089_s27 + $0x1d8] sm:$0xf0] }
  0xf4   : > { %v1167_v3 = vadd.f32 %v1166_v0, %v1165_v52  ;;  %v1850_v63 = vor.u32 %v1996_v60, %v1847_v61 }
  0xf5   : > { %v1363_v7 = vsel %vm650_vm0, %v1291_v2, 0.0  ;;  %v1970_v2 = vld [vmem:[%s2089_s27 + $0x104] sm:$0xf] }
  0xf6   : > { %v1364_v9 = vadd.f32 %v1363_v7, %v1362_v57  ;;  %v2323_v14 = vpop.f32.mrf.mxu1 }
  0xf7   : > { %v858_v50 = vpop.f32.mrf.mxu2 }
  0xf8   : > { %v781_v11 = vpop.f32.mrf.mxu0  ;;  %v2356_v54 = vadd.f32 %v1027_v53, %v858_v50 }
  0xf9   : > { %v951_v13 = vadd.f32 %v950_v27, %v781_v11  ;;  %1932 = vmatmul.msk.bf16.gmra.mxu3 %vm650_vm0, %v1850_v63  ;;  %v1861_v63 = vld [vmem:[%s2089_s27 + $0x1f0] sm:$0xf] }
  0xfa   : > { %1126 = vst.msk [vmem:[%s2194_s18 + $0x148] sm:$0xff] %vm650_vm0, %v2356_v54 }
  0xfb   : > { %1095 = vst.msk [vmem:[%s2194_s18 + $0x50] sm:$0xff] %vm650_vm0, %v951_v13  ;;  %v1168_v19 = vsel %vm650_vm0, %v951_v13, 0.0  ;;  %v1292_v20 = vmul.f32 %v951_v13, %v951_v13  ;;  %820 = vmatmul.bf16.gmra.mxu0 %v1718_v6  ;;  %v1030_v12 = vpop.f32.mrf.mxu3 }
  0xfc   : > { %v1169_v25 = vadd.f32 %v1168_v19, %v1167_v3  ;;  %v1743_v3 = vld [vmem:[%s2089_s27 + $0x108] sm:$0xf0]  ;;  %900 = vmatmul.bf16.gmra.mxu2 %v1846_v59  ;;  %v1969_v19 = vld [vmem:[%s2089_s27 + $0xf4] sm:$0xf0] }
  0xfd   : > { %v1365_v27 = vsel %vm650_vm0, %v1292_v20, 0.0  ;;  %v1746_v7 = vor.u32 %v1970_v2, %v1743_v3 }
  0xfe   : > { %v1366_v30 = vadd.f32 %v1365_v27, %v1364_v9  ;;  %v960_v35 = vpop.f32.mrf.mxu1 }
  0xff   : > { %v861_v9 = vpop.f32.mrf.mxu2 }
 0x100   : > { %v783_v31 = vpop.f32.mrf.mxu0  ;;  %v2380_v22 = vadd.f32 %v1030_v12, %v861_v9 }
 0x101   : > { %v953_v34 = vadd.f32 %v2292_v42, %v783_v31  ;;  %1918 = vmatmul.msk.bf16.gmra.mxu1 %vm650_vm0, %v1738_v32  ;;  %v1726_v42 = vor.u32 %v1967_v45, %v1725_v43  ;;  %v1999_v31 = vld [vmem:[%s2089_s27 + $0x1e4] sm:$0xf0] }
 0x102   : > { %1127 = vst.msk [vmem:[%s2194_s18 + $0x150] sm:$0xff] %vm650_vm0, %v2380_v22 }
 0x103   : > { %1096 = vst.msk [vmem:[%s2194_s18 + $0x58] sm:$0xff] %vm650_vm0, %v953_v34  ;;  %v1170_v39 = vsel %vm650_vm0, %v953_v34, 0.0  ;;  %v1293_v40 = vmul.f32 %v953_v34, %v953_v34  ;;  %v1032_v28 = vpop.f32.mrf.mxu3 }
 0x104   : > { %v1171_v41 = vadd.f32 %v1170_v39, %v1169_v25  ;;  %v1855_v39 = vld [vmem:[%s2089_s27 + $0x1e8] sm:$0xf0] }
 0x105   : > { %v1367_v46 = vsel %vm650_vm0, %v1293_v40, 0.0 }
 0x106   : > { %v1368_v47 = vadd.f32 %v1367_v46, %v1366_v30  ;;  %v2354_v52 = vpop.f32.mrf.mxu1  ;;  %v1853_v30 = vld [vmem:[%s2089_s27 + $0x1e0] sm:$0xf] }
 0x107   : > { %v863_v25 = vpop.f32.mrf.mxu2  ;;  %v1854_v34 = vor.u32 %v1999_v31, %v1853_v30 }
 0x108   : > { %v786_v49 = vpop.f32.mrf.mxu0  ;;  %v2385_v29 = vadd.f32 %v1032_v28, %v863_v25 }
 0x109   : > { %v956_v51 = vadd.f32 %v955_v62, %v786_v49 }
 0x10a   : > { %1128 = vst.msk [vmem:[%s2194_s18 + $0x158] sm:$0xff] %vm650_vm0, %v2385_v29 }
 0x10b   : > { %1097 = vst.msk [vmem:[%s2194_s18 + $0x60] sm:$0xff] %vm650_vm0, %v956_v51  ;;  %v1172_v57 = vsel %vm650_vm0, %v956_v51, 0.0  ;;  %v1294_v58 = vmul.f32 %v956_v51, %v956_v51  ;;  %825 = vmatmul.bf16.gmra.mxu0 %v1726_v42  ;;  %v1035_v49 = vpop.f32.mrf.mxu3 }
 0x10c   : > { %v1173_v62 = vadd.f32 %v1172_v57, %v1171_v41  ;;  %905 = vmatmul.bf16.gmra.mxu2 %v1854_v34 }
 0x10d   : > { %v1369_v0 = vsel %vm650_vm0, %v1294_v58, 0.0 }
 0x10e   : > { %v1370_v4 = vadd.f32 %v1369_v0, %v1368_v47  ;;  %v965_v11 = vpop.f32.mrf.mxu1  ;;  %v2001_v0 = vld [vmem:[%s2089_s27 + $0x1f4] sm:$0xf0] }
 0x10f   : > { %v866_v46 = vpop.f32.mrf.mxu2 }
 0x110   : > { %v788_v5 = vpop.f32.mrf.mxu0  ;;  %v2404_v57 = vadd.f32 %v1035_v49, %v866_v46 }
 0x111   : > { %v958_v6 = vadd.f32 %v2323_v14, %v788_v5  ;;  %1919 = vmatmul.msk.bf16.gmra.mxu1 %vm650_vm0, %v1746_v7  ;;  %v1734_v14 = vor.u32 %v1969_v19, %v1733_v18  ;;  %v2000_v5 = vld [vmem:[%s2089_s27 + $0x1f4] sm:$0xf]  ;;  %v1863_v7 = vld [vmem:[%s2089_s27 + $0x1f8] sm:$0xf0] }
 0x112   : > { %1129 = vst.msk [vmem:[%s2194_s18 + $0x160] sm:$0xff] %vm650_vm0, %v2404_v57 }
 0x113   : > { %1098 = vst.msk [vmem:[%s2194_s18 + $0x68] sm:$0xff] %vm650_vm0, %v958_v6  ;;  %v1174_v13 = vsel %vm650_vm0, %v958_v6, 0.0  ;;  %v1295_v15 = vmul.f32 %v958_v6, %v958_v6  ;;  %v1037_v61 = vpop.f32.mrf.mxu3  ;;  %v1866_v6 = vor.u32 %v2000_v5, %v1863_v7 }
 0x114   : > { %v1175_v17 = vadd.f32 %v1174_v13, %v1173_v62 }
 0x115   : > { %v1371_v20 = vsel %vm650_vm0, %v1295_v15, 0.0 }
 0x116   : > { %v1372_v21 = vadd.f32 %v1371_v20, %v1370_v4  ;;  %v967_v27 = vpop.f32.mrf.mxu1  ;;  %v1862_v4 = vor.u32 %v2001_v0, %v1861_v63 }
 0x118   : > { %v791_v23 = vpop.f32.mrf.mxu0 }
 0x119   : > { %v961_v26 = vadd.f32 %v960_v35, %v791_v23  ;;  %v1858_v35 = vor.u32 %v1998_v38, %v1855_v39 }
 0x11b   : > { %1099 = vst.msk [vmem:[%s2194_s18 + $0x70] sm:$0xff] %vm650_vm0, %v961_v26  ;;  %v1176_v32 = vsel %vm650_vm0, %v961_v26, 0.0  ;;  %v1296_v33 = vmul.f32 %v961_v26, %v961_v26  ;;  %830 = vmatmul.bf16.gmra.mxu0 %v1734_v14  ;;  %1933 = vmatmul.msk.bf16.gmra.mxu3 %vm650_vm0, %v1858_v35  ;;  %v1040_v19 = vpop.f32.mrf.mxu3 }
 0x11c   : > { %v1177_v40 = vadd.f32 %v1176_v32, %v1175_v17  ;;  %910 = vmatmul.bf16.gmra.mxu2 %v1862_v4 }
 0x11d   : > { %v1373_v41 = vsel %vm650_vm0, %v1296_v33, 0.0 }
 0x11e   : > { %v1374_v43 = vadd.f32 %v1373_v41, %v1372_v21  ;;  %v970_v42 = vpop.f32.mrf.mxu1 }
 0x120   : > { %v793_v45 = vpop.f32.mrf.mxu0 }
 0x121   : > { %v963_v47 = vadd.f32 %v2354_v52, %v793_v45  ;;  %v868_v52 = vpop.f32.mrf.mxu2 }
 0x122   : > { %v2409_v62 = vadd.f32 %v1037_v61, %v868_v52 }
 0x123   : > { %1100 = vst.msk [vmem:[%s2194_s18 + $0x78] sm:$0xff] %vm650_vm0, %v963_v47  ;;  %v1178_v50 = vsel %vm650_vm0, %v963_v47, 0.0  ;;  %v1297_v51 = vmul.f32 %v963_v47, %v963_v47  ;;  %v1042_v32 = vpop.f32.mrf.mxu3 }
 0x124   : > { %v1179_v53 = vadd.f32 %v1178_v50, %v1177_v40  ;;  %1130 = vst.msk [vmem:[%s2194_s18 + $0x168] sm:$0xff] %vm650_vm0, %v2409_v62 }
 0x125   : > { %v1375_v55 = vsel %vm650_vm0, %v1297_v51, 0.0 }
 0x126   : > { %v1376_v56 = vadd.f32 %v1375_v55, %v1374_v43  ;;  %v972_v60 = vpop.f32.mrf.mxu1 }
 0x128   : > { %v796_v58 = vpop.f32.mrf.mxu0 }
 0x129   : > { %v966_v59 = vadd.f32 %v965_v11, %v796_v58  ;;  %v871_v15 = vpop.f32.mrf.mxu2 }
 0x12a   : > { %v2427_v26 = vadd.f32 %v1040_v19, %v871_v15 }
 0x12b   : > { %1101 = vst.msk [vmem:[%s2194_s18 + $0x80] sm:$0xff] %vm650_vm0, %v966_v59  ;;  %v1180_v2 = vsel %vm650_vm0, %v966_v59, 0.0  ;;  %v1298_v3 = vmul.f32 %v966_v59, %v966_v59  ;;  %1934 = vmatmul.msk.bf16.gmra.mxu3 %vm650_vm0, %v1866_v6  ;;  %v1045_v47 = vpop.f32.mrf.mxu3 }
 0x12c   : > { %v1181_v9 = vadd.f32 %v1180_v2, %v1179_v53  ;;  %1131 = vst.msk [vmem:[%s2194_s18 + $0x170] sm:$0xff] %vm650_vm0, %v2427_v26 }
 0x12d   : > { %v1377_v11 = vsel %vm650_vm0, %v1298_v3, 0.0 }
 0x12e   : > { %v1378_v12 = vadd.f32 %v1377_v11, %v1376_v56  ;;  %v975_v18 = vpop.f32.mrf.mxu1 }
 0x130   : > { %v798_v13 = vpop.f32.mrf.mxu0 }
 0x131   : > { %v968_v17 = vadd.f32 %v967_v27, %v798_v13  ;;  %v873_v27 = vpop.f32.mrf.mxu2 }
 0x132   : > { %v2432_v33 = vadd.f32 %v1042_v32, %v873_v27 }
 0x133   : > { %1102 = vst.msk [vmem:[%s2194_s18 + $0x88] sm:$0xff] %vm650_vm0, %v968_v17  ;;  %v1182_v20 = vsel %vm650_vm0, %v968_v17, 0.0  ;;  %v1299_v21 = vmul.f32 %v968_v17, %v968_v17 }
 0x134   : > { %v1183_v14 = vadd.f32 %v1182_v20, %v1181_v9  ;;  %1132 = vst.msk [vmem:[%s2194_s18 + $0x178] sm:$0xff] %vm650_vm0, %v2432_v33 }
 0x135   : > { %v1379_v23 = vsel %vm650_vm0, %v1299_v21, 0.0 }
 0x136   : > { %v1380_v25 = vadd.f32 %v1379_v23, %v1378_v12  ;;  %v977_v31 = vpop.f32.mrf.mxu1 }
 0x138   : > { %v801_v28 = vpop.f32.mrf.mxu0 }
 0x139   : > { %v971_v30 = vadd.f32 %v970_v42, %v801_v28  ;;  %v876_v43 = vpop.f32.mrf.mxu2 }
 0x13a   : > { %v2445_v55 = vadd.f32 %v1045_v47, %v876_v43 }
 0x13b   : > { %1103 = vst.msk [vmem:[%s2194_s18 + $0x90] sm:$0xff] %vm650_vm0, %v971_v30  ;;  %v1184_v34 = vsel %vm650_vm0, %v971_v30, 0.0  ;;  %v1300_v38 = vmul.f32 %v971_v30, %v971_v30 }
 0x13c   : > { %v1185_v39 = vadd.f32 %v1184_v34, %v1183_v14  ;;  %1133 = vst.msk [vmem:[%s2194_s18 + $0x180] sm:$0xff] %vm650_vm0, %v2445_v55 }
 0x13d   : > { %v1381_v40 = vsel %vm650_vm0, %v1300_v38, 0.0 }
 0x13e   : > { %v1382_v35 = vadd.f32 %v1381_v40, %v1380_v25  ;;  %v980_v46 = vpop.f32.mrf.mxu1 }
 0x140   : > { %v803_v41 = vpop.f32.mrf.mxu0 }
 0x141   : > { %v973_v45 = vadd.f32 %v972_v60, %v803_v41  ;;  %v878_v58 = vpop.f32.mrf.mxu2  ;;  %v1047_v60 = vpop.f32.mrf.mxu3 }
 0x142   : > { %v2450_v61 = vadd.f32 %v1047_v60, %v878_v58 }
 0x143   : > { %1104 = vst.msk [vmem:[%s2194_s18 + $0x98] sm:$0xff] %vm650_vm0, %v973_v45  ;;  %v1186_v42 = vsel %vm650_vm0, %v973_v45, 0.0  ;;  %v1301_v49 = vmul.f32 %v973_v45, %v973_v45 }
 0x144   : > { %v1187_v50 = vadd.f32 %v1186_v42, %v1185_v39  ;;  %1134 = vst.msk [vmem:[%s2194_s18 + $0x188] sm:$0xff] %vm650_vm0, %v2450_v61 }
 0x145   : > { %v1383_v51 = vsel %vm650_vm0, %v1301_v49, 0.0 }
 0x146   : > { %v1384_v53 = vadd.f32 %v1383_v51, %v1382_v35  ;;  %v982_v59 = vpop.f32.mrf.mxu1 }
 0x148   : > { %v806_v56 = vpop.f32.mrf.mxu0 }
 0x149   : > { %v976_v52 = vadd.f32 %v975_v18, %v806_v56  ;;  %v881_v7 = vpop.f32.mrf.mxu2  ;;  %v1050_v11 = vpop.f32.mrf.mxu3 }
 0x14a   : > { %v2465_v12 = vadd.f32 %v1050_v11, %v881_v7 }
 0x14b   : > { %1105 = vst.msk [vmem:[%s2194_s18 + $0xa0] sm:$0xff] %vm650_vm0, %v976_v52  ;;  %v1188_v63 = vsel %vm650_vm0, %v976_v52, 0.0  ;;  %v1302_v0 = vmul.f32 %v976_v52, %v976_v52 }
 0x14c   : > { %v2455_v2 = vadd.f32 %v1188_v63, %v1187_v50  ;;  %1135 = vst.msk [vmem:[%s2194_s18 + $0x190] sm:$0xff] %vm650_vm0, %v2465_v12 }
 0x14d   : > { %v1385_v3 = vsel %vm650_vm0, %v1302_v0, 0.0 }
 0x14e   : > { %v2461_v4 = vadd.f32 %v1385_v3, %v1384_v53  ;;  %v985_v6 = vpop.f32.mrf.mxu1 }
 0x150   : > { %v808_v5 = vpop.f32.mrf.mxu0 }
 0x151   : > { %v978_v9 = vadd.f32 %v977_v31, %v808_v5  ;;  %v883_v15 = vpop.f32.mrf.mxu2  ;;  %v1052_v19 = vpop.f32.mrf.mxu3 }
 0x152   : > { %v2470_v20 = vadd.f32 %v1052_v19, %v883_v15 }
 0x153   : > { %1106 = vst.msk [vmem:[%s2194_s18 + $0xa8] sm:$0xff] %vm650_vm0, %v978_v9  ;;  %v1190_v15 = vsel %vm650_vm0, %v978_v9, 0.0 }
 0x154   : > { %1136 = vst.msk [vmem:[%s2194_s18 + $0x198] sm:$0xff] %vm650_vm0, %v2470_v20 }
 0x156   : > { %v987_v18 = vpop.f32.mrf.mxu1 }
 0x158   : > { %v811_v13 = vpop.f32.mrf.mxu0 }
 0x159   : > { %v981_v17 = vadd.f32 %v980_v46, %v811_v13  ;;  %v886_v14 = vpop.f32.mrf.mxu2  ;;  %v1055_v28 = vpop.f32.mrf.mxu3  ;;  %v1303_v13 = vmul.f32 %v978_v9, %v978_v9 }
 0x15a   : > { %v2479_v27 = vadd.f32 %v1055_v28, %v886_v14 }
 0x15b   : > { %1107 = vst.msk [vmem:[%s2194_s18 + $0xb0] sm:$0xff] %vm650_vm0, %v981_v17  ;;  %v1387_v19 = vsel %vm650_vm0, %v1303_v13, 0.0 }
 0x15c   : > { %1137 = vst.msk [vmem:[%s2194_s18 + $0x1a0] sm:$0xff] %vm650_vm0, %v2479_v27 }
 0x15e   : > { %v990_v25 = vpop.f32.mrf.mxu1 }
 0x160   : > { %v813_v21 = vpop.f32.mrf.mxu0 }
 0x161   : > { %v983_v23 = vadd.f32 %v982_v59, %v813_v21  ;;  %v888_v31 = vpop.f32.mrf.mxu2  ;;  %v1057_v38 = vpop.f32.mrf.mxu3  ;;  %v1192_v21 = vsel %vm650_vm0, %v981_v17, 0.0 }
 0x162   : > { %v2484_v39 = vadd.f32 %v1057_v38, %v888_v31 }
 0x163   : > { %1108 = vst.msk [vmem:[%s2194_s18 + $0xb8] sm:$0xff] %vm650_vm0, %v983_v23  ;;  %v1305_v14 = vmul.f32 %v983_v23, %v983_v23 }
 0x164   : > { %1138 = vst.msk [vmem:[%s2194_s18 + $0x1a8] sm:$0xff] %vm650_vm0, %v2484_v39 }
 0x166   : > { %v992_v34 = vpop.f32.mrf.mxu1 }
 0x168   : > { %v816_v30 = vpop.f32.mrf.mxu0 }
 0x169   : > { %v986_v32 = vadd.f32 %v985_v6, %v816_v30  ;;  %v891_v35 = vpop.f32.mrf.mxu2  ;;  %v1060_v45 = vpop.f32.mrf.mxu3 }
 0x16a   : > { %v2493_v46 = vadd.f32 %v1060_v45, %v891_v35 }
 0x16b   : > { %1109 = vst.msk [vmem:[%s2194_s18 + $0xc0] sm:$0xff] %vm650_vm0, %v986_v32  ;;  %v1306_v9 = vmul.f32 %v986_v32, %v986_v32 }
 0x16c   : > { %1139 = vst.msk [vmem:[%s2194_s18 + $0x1b0] sm:$0xff] %vm650_vm0, %v2493_v46 }
 0x16e   : > { %v995_v43 = vpop.f32.mrf.mxu1 }
 0x170   : > { %v818_v40 = vpop.f32.mrf.mxu0 }
 0x171   : > { %v988_v41 = vadd.f32 %v987_v18, %v818_v40  ;;  %v893_v42 = vpop.f32.mrf.mxu2  ;;  %v1062_v51 = vpop.f32.mrf.mxu3  ;;  %v1304_v18 = vmul.f32 %v981_v17, %v981_v17 }
 0x172   : > { %v2498_v53 = vadd.f32 %v1062_v51, %v893_v42 }
 0x173   : > { %1110 = vst.msk [vmem:[%s2194_s18 + $0xc8] sm:$0xff] %vm650_vm0, %v988_v41  ;;  %v1389_v31 = vsel %vm650_vm0, %v1304_v18, 0.0  ;;  %v1307_v42 = vmul.f32 %v988_v41, %v988_v41 }
 0x174   : > { %1140 = vst.msk [vmem:[%s2194_s18 + $0x1b8] sm:$0xff] %vm650_vm0, %v2498_v53 }
 0x176   : > { %v997_v50 = vpop.f32.mrf.mxu1 }
 0x178   : > { %v821_v47 = vpop.f32.mrf.mxu0 }
 0x179   : > { %v991_v49 = vadd.f32 %v990_v25, %v821_v47  ;;  %v896_v58 = vpop.f32.mrf.mxu2  ;;  %v1065_v60 = vpop.f32.mrf.mxu3  ;;  %v1191_v25 = vadd.f32 %v1190_v15, %v2455_v2  ;;  %v1391_v47 = vsel %vm650_vm0, %v1305_v14, 0.0  ;;  %v1196_v2 = vsel %vm650_vm0, %v986_v32, 0.0 }
 0x17a   : > { %v2509_v7 = vadd.f32 %v1065_v60, %v896_v58 }
 0x17b   : > { %1111 = vst.msk [vmem:[%s2194_s18 + $0xd0] sm:$0xff] %vm650_vm0, %v991_v49  ;;  %v1193_v45 = vadd.f32 %v1192_v21, %v1191_v25  ;;  %v1308_v58 = vmul.f32 %v991_v49, %v991_v49 }
 0x17c   : > { %1141 = vst.msk [vmem:[%s2194_s18 + $0x1c0] sm:$0xff] %vm650_vm0, %v2509_v7 }
 0x17d   : > { %v1397_v13 = vsel %vm650_vm0, %v1308_v58, 0.0 }
 0x17e   : > { %v1000_v59 = vpop.f32.mrf.mxu1 }
 0x180   : > { %v823_v56 = vpop.f32.mrf.mxu0 }
 0x181   : > { %v993_v52 = vadd.f32 %v992_v34, %v823_v56  ;;  %v898_v0 = vpop.f32.mrf.mxu2  ;;  %v1067_v6 = vpop.f32.mrf.mxu3  ;;  %v1194_v34 = vsel %vm650_vm0, %v983_v23, 0.0  ;;  %v1393_v23 = vsel %vm650_vm0, %v1306_v9, 0.0 }
 0x182   : > { %v2511_v11 = vadd.f32 %v1067_v6, %v898_v0  ;;  %v1195_v56 = vadd.f32 %v1194_v34, %v1193_v45 }
 0x183   : > { %1112 = vst.msk [vmem:[%s2194_s18 + $0xd8] sm:$0xff] %vm650_vm0, %v993_v52  ;;  %v1309_v0 = vmul.f32 %v993_v52, %v993_v52 }
 0x184   : > { %1142 = vst.msk [vmem:[%s2194_s18 + $0x1c8] sm:$0xff] %vm650_vm0, %v2511_v11  ;;  %v1197_v60 = vadd.f32 %v1196_v2, %v1195_v56 }
 0x186   : > { %v2507_v5 = vpop.f32.mrf.mxu1 }
 0x188   : > { %v826_v63 = vpop.f32.mrf.mxu0 }
 0x189   : > { %v996_v3 = vadd.f32 %v995_v43, %v826_v63  ;;  %v901_v30 = vpop.f32.mrf.mxu2  ;;  %v1070_v35 = vpop.f32.mrf.mxu3  ;;  %v1388_v43 = vadd.f32 %v1387_v19, %v2461_v4  ;;  %v1200_v63 = vsel %vm650_vm0, %v991_v49, 0.0  ;;  %v1202_v19 = vsel %vm650_vm0, %v993_v52, 0.0 }
 0x18a   : > { %v2541_v25 = vadd.f32 %v1070_v35, %v901_v30 }
 0x18b   : > { %1113 = vst.msk [vmem:[%s2194_s18 + $0xe0] sm:$0xff] %vm650_vm0, %v996_v3  ;;  %v1390_v51 = vadd.f32 %v1389_v31, %v1388_v43  ;;  %v1310_v21 = vmul.f32 %v996_v3, %v996_v3  ;;  %v1204_v43 = vsel %vm650_vm0, %v996_v3, 0.0 }
 0x18c   : > { %1143 = vst.msk [vmem:[%s2194_s18 + $0x1d0] sm:$0xff] %vm650_vm0, %v2541_v25 }
 0x18d   : > { %v1392_v4 = vadd.f32 %v1391_v47, %v1390_v51  ;;  %v1401_v30 = vsel %vm650_vm0, %v1310_v21, 0.0 }
 0x18e   : > { %v1005_v40 = vpop.f32.mrf.mxu1 }
 0x18f   : > { %v1006_v17 = vadd.f32 %v1005_v40, %v2225_v24  ;;  %v1395_v24 = vsel %vm650_vm0, %v1307_v42, 0.0  ;;  %v1394_v32 = vadd.f32 %v1393_v23, %v1392_v4  ;;  %v1399_v40 = vsel %vm650_vm0, %v1309_v0, 0.0 }
 0x190   : > { %v828_v28 = vpop.f32.mrf.mxu0 }
 0x191   : > { %v998_v38 = vadd.f32 %v997_v50, %v828_v28  ;;  %1117 = vst.msk [vmem:[%s2194_s18 + $0x100] sm:$0xff] %vm650_vm0, %v1006_v17  ;;  %v1198_v50 = vsel %vm650_vm0, %v988_v41, 0.0  ;;  %v903_v18 = vpop.f32.mrf.mxu2  ;;  %v1072_v28 = vpop.f32.mrf.mxu3  ;;  %v1396_v31 = vadd.f32 %v1395_v24, %v1394_v32 }
 0x192   : > { %v1199_v6 = vadd.f32 %v1198_v50, %v1197_v60  ;;  %v2544_v9 = vadd.f32 %v1072_v28, %v903_v18 }
 0x193   : > { %1114 = vst.msk [vmem:[%s2194_s18 + $0xe8] sm:$0xff] %vm650_vm0, %v998_v38  ;;  %v1311_v52 = vmul.f32 %v998_v38, %v998_v38  ;;  %v1206_v35 = vsel %vm650_vm0, %v998_v38, 0.0 }
 0x194   : > { %v1201_v49 = vadd.f32 %v1200_v63, %v1199_v6  ;;  %1144 = vst.msk [vmem:[%s2194_s18 + $0x1d8] sm:$0xff] %vm650_vm0, %v2544_v9  ;;  %v1314_v63 = vmul.f32 %v1006_v17, %v1006_v17 }
 0x195   : > { %v1403_v3 = vsel %vm650_vm0, %v1311_v52, 0.0 }
 0x196   : > { %v1007_v41 = vpop.f32.mrf.mxu1  ;;  %v1203_v45 = vadd.f32 %v1202_v19, %v1201_v49 }
 0x197   : > { %v1008_v34 = vadd.f32 %v1007_v41, %v2234_v36  ;;  %v1409_v41 = vsel %vm650_vm0, %v1314_v63, 0.0 }
 0x198   : > { %v831_v15 = vpop.f32.mrf.mxu0  ;;  %v1205_v2 = vadd.f32 %v1204_v43, %v1203_v45  ;;  %v1317_v43 = vmul.f32 %v2263_v8, %v2263_v8 }
 0x199   : > { %v1001_v14 = vadd.f32 %v1000_v59, %v831_v15  ;;  %v1398_v59 = vadd.f32 %v1397_v13, %v1396_v31  ;;  %1118 = vst.msk [vmem:[%s2194_s18 + $0x108] sm:$0xff] %vm650_vm0, %v1008_v34  ;;  %v906_v23 = vpop.f32.mrf.mxu2  ;;  %v1212_v15 = vsel %vm650_vm0, %v1006_v17, 0.0  ;;  %v1315_v18 = vmul.f32 %v1008_v34, %v1008_v34 }
 0x19a   : > { %v1207_v56 = vadd.f32 %v1206_v35, %v1205_v2  ;;  %v1214_v28 = vsel %vm650_vm0, %v1008_v34, 0.0  ;;  %v1216_v17 = vsel %vm650_vm0, %v2256_v1, 0.0 }
 0x19b   : > { %1115 = vst.msk [vmem:[%s2194_s18 + $0xf0] sm:$0xff] %vm650_vm0, %v1001_v14  ;;  %v1312_v47 = vmul.f32 %v1001_v14, %v1001_v14  ;;  %v1400_v36 = vadd.f32 %v1399_v40, %v1398_v59  ;;  %v1208_v42 = vsel %vm650_vm0, %v1001_v14, 0.0  ;;  %v1411_v52 = vsel %vm650_vm0, %v1315_v18, 0.0 }
 0x19c   : > { %v1209_v24 = vadd.f32 %v1208_v42, %v1207_v56  ;;  %v1415_v42 = vsel %vm650_vm0, %v1317_v43, 0.0  ;;  %v1319_v56 = vmul.f32 %v2294_v44, %v2294_v44  ;;  %v1322_v18 = vmul.f32 %v2349_v48, %v2349_v48 }
 0x19d   : > { %v1402_v51 = vadd.f32 %v1401_v30, %v1400_v36  ;;  %v1405_v38 = vsel %vm650_vm0, %v1312_v47, 0.0  ;;  %v1218_v36 = vsel %vm650_vm0, %v2263_v8, 0.0 }
 0x19e   : > { %v1075_v4 = vpop.f32.mrf.mxu3  ;;  %v1419_v63 = vsel %vm650_vm0, %v1319_v56, 0.0  ;;  %v1236_v56 = vsel %vm650_vm0, %v2404_v57, 0.0 }
 0x19f   : > { %v1404_v60 = vadd.f32 %v1403_v3, %v1402_v51  ;;  %v2578_v59 = vadd.f32 %v1075_v4, %v906_v23  ;;  %v1220_v51 = vsel %vm650_vm0, %v2287_v37, 0.0 }
 0x1a0   : > { %v833_v58 = vpop.f32.mrf.mxu0 }
 0x1a1   : > { %v1003_v50 = vadd.f32 %v2507_v5, %v833_v58  ;;  %v1406_v6 = vadd.f32 %v1405_v38, %v1404_v60  ;;  %v1316_v5 = vmul.f32 %v2256_v1, %v2256_v1  ;;  %v908_v40 = vpop.f32.mrf.mxu2  ;;  %v1318_v1 = vmul.f32 %v2287_v37, %v2287_v37  ;;  %1145 = vst.msk [vmem:[%s2194_s18 + $0x1e0] sm:$0xff] %vm650_vm0, %v2578_v59 }
 0x1a2   : > { %v1222_v38 = vsel %vm650_vm0, %v2294_v44, 0.0  ;;  %v1224_v37 = vsel %vm650_vm0, %v2318_v10, 0.0  ;;  %v1226_v44 = vsel %vm650_vm0, %v2325_v16, 0.0 }
 0x1a3   : > { %1116 = vst.msk [vmem:[%s2194_s18 + $0xf8] sm:$0xff] %vm650_vm0, %v1003_v50  ;;  %v1210_v0 = vsel %vm650_vm0, %v1003_v50, 0.0  ;;  %v1313_v32 = vmul.f32 %v1003_v50, %v1003_v50  ;;  %v1413_v34 = vsel %vm650_vm0, %v1316_v5, 0.0  ;;  %v1417_v23 = vsel %vm650_vm0, %v1318_v1, 0.0 }
 0x1a4   : > { %v1211_v13 = vadd.f32 %v1210_v0, %v1209_v24  ;;  %v1320_v50 = vmul.f32 %v2318_v10, %v2318_v10  ;;  %v1321_v0 = vmul.f32 %v2325_v16, %v2325_v16  ;;  %v1228_v10 = vsel %vm650_vm0, %v2349_v48, 0.0 }
 0x1a5   : > { %v1407_v19 = vsel %vm650_vm0, %v1313_v32, 0.0  ;;  %v1323_v5 = vmul.f32 %v2356_v54, %v2356_v54  ;;  %v1230_v16 = vsel %vm650_vm0, %v2356_v54, 0.0 }
 0x1a6   : > { %v1213_v21 = vadd.f32 %v1212_v15, %v1211_v13  ;;  %v1408_v14 = vadd.f32 %v1407_v19, %v1406_v6  ;;  %v1077_v45 = vpop.f32.mrf.mxu3  ;;  %v1421_v15 = vsel %vm650_vm0, %v1320_v50, 0.0  ;;  %v1328_v50 = vmul.f32 %v2427_v26, %v2427_v26 }
 0x1a7   : > { %v2580_v47 = vadd.f32 %v1077_v45, %v908_v40  ;;  %v1427_v48 = vsel %vm650_vm0, %v1323_v5, 0.0  ;;  %v1325_v45 = vmul.f32 %v2385_v29, %v2385_v29 }
 0x1a8   : > { %v1215_v31 = vadd.f32 %v1214_v28, %v1213_v21  ;;  %v1410_v49 = vadd.f32 %v1409_v41, %v1408_v14  ;;  %v1423_v14 = vsel %vm650_vm0, %v1321_v0, 0.0 }
 0x1a9   : > { %1146 = vst.msk [vmem:[%s2194_s18 + $0x1e8] sm:$0xff] %vm650_vm0, %v2580_v47  ;;  %v911_v24 = vpop.f32.mrf.mxu2 }
 0x1aa   : > { %v1217_v30 = vadd.f32 %v1216_v17, %v1215_v31  ;;  %v1412_v35 = vadd.f32 %v1411_v52, %v1410_v49  ;;  %v1425_v31 = vsel %vm650_vm0, %v1322_v18, 0.0  ;;  %v1324_v49 = vmul.f32 %v2380_v22, %v2380_v22 }
 0x1ab   : > { %v1232_v52 = vsel %vm650_vm0, %v2380_v22, 0.0  ;;  %v1331_v18 = vmul.f32 %v2450_v61, %v2450_v61 }
 0x1ac   : > { %v1219_v2 = vadd.f32 %v1218_v36, %v1217_v30  ;;  %v1414_v3 = vadd.f32 %v1413_v34, %v1412_v35  ;;  %v1429_v1 = vsel %vm650_vm0, %v1324_v49, 0.0 }
 0x1ae   : > { %v1221_v8 = vadd.f32 %v1220_v51, %v1219_v2  ;;  %v1416_v58 = vadd.f32 %v1415_v42, %v1414_v3  ;;  %v1080_v32 = vpop.f32.mrf.mxu3  ;;  %v1234_v2 = vsel %vm650_vm0, %v2385_v29, 0.0  ;;  %v1326_v3 = vmul.f32 %v2404_v57, %v2404_v57 }
 0x1af   : > { %v2628_v30 = vadd.f32 %v1080_v32, %v911_v24  ;;  %v1431_v51 = vsel %vm650_vm0, %v1325_v45, 0.0  ;;  %v1240_v57 = vsel %vm650_vm0, %v2427_v26, 0.0  ;;  %v1437_v32 = vsel %vm650_vm0, %v1328_v50, 0.0 }
 0x1b0   : > { %v1223_v4 = vadd.f32 %v1222_v38, %v1221_v8  ;;  %v1418_v60 = vadd.f32 %v1417_v23, %v1416_v58  ;;  %v1327_v8 = vmul.f32 %v2409_v62, %v2409_v62  ;;  %v1433_v23 = vsel %vm650_vm0, %v1326_v3, 0.0 }
 0x1b1   : > { %v913_v43 = vpop.f32.mrf.mxu2  ;;  %1147 = vst.msk [vmem:[%s2194_s18 + $0x1f0] sm:$0xff] %vm650_vm0, %v2628_v30  ;;  %v1238_v38 = vsel %vm650_vm0, %v2409_v62, 0.0  ;;  %v1242_v62 = vsel %vm650_vm0, %v2432_v33, 0.0  ;;  %v1244_v26 = vsel %vm650_vm0, %v2445_v55, 0.0  ;;  %v1335_v45 = vmul.f32 %v2484_v39, %v2484_v39 }
 0x1b2   : > { %v1225_v6 = vadd.f32 %v1224_v37, %v1223_v4  ;;  %v1420_v13 = vadd.f32 %v1419_v63, %v1418_v60  ;;  %v1435_v24 = vsel %vm650_vm0, %v1327_v8, 0.0  ;;  %v1329_v63 = vmul.f32 %v2432_v33, %v2432_v33 }
 0x1b3   : > { %v1246_v33 = vsel %vm650_vm0, %v2450_v61, 0.0  ;;  %v1250_v61 = vsel %vm650_vm0, %v2470_v20, 0.0  ;;  %v1339_v50 = vmul.f32 %v2511_v11, %v2511_v11 }
 0x1b4   : > { %v1227_v19 = vadd.f32 %v1226_v44, %v1225_v6  ;;  %v1422_v21 = vadd.f32 %v1421_v15, %v1420_v13  ;;  %v1330_v6 = vmul.f32 %v2445_v55, %v2445_v55  ;;  %v1439_v44 = vsel %vm650_vm0, %v1329_v63, 0.0 }
 0x1b5   : > { %v1248_v55 = vsel %vm650_vm0, %v2465_v12, 0.0 }
 0x1b6   : > { %v1229_v41 = vadd.f32 %v1228_v10, %v1227_v19  ;;  %v1424_v28 = vadd.f32 %v1423_v14, %v1422_v21  ;;  %v1082_v35 = vpop.f32.mrf.mxu3  ;;  %v1441_v14 = vsel %vm650_vm0, %v1330_v6, 0.0  ;;  %v1332_v10 = vmul.f32 %v2465_v12, %v2465_v12 }
 0x1b7   : > { %v2630_v36 = vadd.f32 %v1082_v35, %v913_v43  ;;  %v1252_v12 = vsel %vm650_vm0, %v2479_v27, 0.0 }
 0x1b8   : > { %v1231_v40 = vadd.f32 %v1230_v16, %v1229_v41  ;;  %v1426_v17 = vadd.f32 %v1425_v31, %v1424_v28  ;;  %v1443_v28 = vsel %vm650_vm0, %v1331_v18, 0.0  ;;  %v1333_v31 = vmul.f32 %v2470_v20, %v2470_v20 }
 0x1b9   : > { %1148 = vst.msk [vmem:[%s2194_s18 + $0x1f8] sm:$0xff] %vm650_vm0, %v2630_v36  ;;  %v1254_v20 = vsel %vm650_vm0, %v2484_v39, 0.0  ;;  %v1258_v39 = vsel %vm650_vm0, %v2498_v53, 0.0 }
 0x1ba   : > { %v1233_v54 = vadd.f32 %v1232_v52, %v1231_v40  ;;  %v1428_v34 = vadd.f32 %v1427_v48, %v1426_v17  ;;  %v1445_v40 = vsel %vm650_vm0, %v1332_v10, 0.0  ;;  %v1334_v17 = vmul.f32 %v2479_v27, %v2479_v27 }
 0x1bb   : > { %v1447_v52 = vsel %vm650_vm0, %v1333_v31, 0.0  ;;  %v1256_v27 = vsel %vm650_vm0, %v2493_v46, 0.0  ;;  %v1344_v10 = vmul.f32 %v2628_v30, %v2628_v30 }
 0x1bc   : > { %v1235_v22 = vadd.f32 %v1234_v2, %v1233_v54  ;;  %v1430_v42 = vadd.f32 %v1429_v1, %v1428_v34  ;;  %v1449_v34 = vsel %vm650_vm0, %v1334_v17, 0.0  ;;  %v1336_v1 = vmul.f32 %v2493_v46, %v2493_v46 }
 0x1bd   : > { %v1260_v46 = vsel %vm650_vm0, %v2509_v7, 0.0 }
 0x1be   : > { %v1432_v29 = vadd.f32 %v1431_v51, %v1430_v42  ;;  %v1237_v58 = vadd.f32 %v1236_v56, %v1235_v22  ;;  %v1451_v22 = vsel %vm650_vm0, %v1335_v45, 0.0  ;;  %v1337_v42 = vmul.f32 %v2498_v53, %v2498_v53 }
 0x1bf   : > { %v1453_v8 = vsel %vm650_vm0, %v1336_v1, 0.0  ;;  %v1262_v53 = vsel %vm650_vm0, %v2511_v11, 0.0  ;;  %v1266_v11 = vsel %vm650_vm0, %v2544_v9, 0.0 }
 0x1c0   : > { %v1239_v4 = vadd.f32 %v1238_v38, %v1237_v58  ;;  %v1434_v60 = vadd.f32 %v1433_v23, %v1432_v29  ;;  %v1338_v29 = vmul.f32 %v2509_v7, %v2509_v7  ;;  %v1455_v38 = vsel %vm650_vm0, %v1337_v42, 0.0 }
 0x1c1   : > { %v1264_v7 = vsel %vm650_vm0, %v2541_v25, 0.0 }
 0x1c2   : > { %v1241_v37 = vadd.f32 %v1240_v57, %v1239_v4  ;;  %v1436_v0 = vadd.f32 %v1435_v24, %v1434_v60  ;;  %v1457_v24 = vsel %vm650_vm0, %v1338_v29, 0.0  ;;  %v1340_v57 = vmul.f32 %v2541_v25, %v2541_v25 }
 0x1c3   : > { %v1268_v25 = vsel %vm650_vm0, %v2578_v59, 0.0 }
 0x1c4   : > { %v1243_v13 = vadd.f32 %v1242_v62, %v1241_v37  ;;  %v1438_v15 = vadd.f32 %v1437_v32, %v1436_v0  ;;  %v1459_v0 = vsel %vm650_vm0, %v1339_v50, 0.0  ;;  %v1341_v32 = vmul.f32 %v2544_v9, %v2544_v9 }
 0x1c5   : > { %v1270_v9 = vsel %vm650_vm0, %v2580_v47, 0.0 }
 0x1c6   : > { %v1245_v19 = vadd.f32 %v1244_v26, %v1243_v13  ;;  %v1440_v21 = vadd.f32 %v1439_v44, %v1438_v15  ;;  %v1461_v13 = vsel %vm650_vm0, %v1340_v57, 0.0  ;;  %v1342_v15 = vmul.f32 %v2578_v59, %v2578_v59 }
 0x1c7   : > { %v1463_v18 = vsel %vm650_vm0, %v1341_v32, 0.0  ;;  %v1272_v59 = vsel %vm650_vm0, %v2628_v30, 0.0 }
 0x1c8   : > { %v1247_v5 = vadd.f32 %v1246_v33, %v1245_v19  ;;  %v1442_v41 = vadd.f32 %v1441_v14, %v1440_v21  ;;  %v1343_v19 = vmul.f32 %v2580_v47, %v2580_v47  ;;  %v1465_v33 = vsel %vm650_vm0, %v1342_v15, 0.0 }
 0x1c9   : > { %v1274_v47 = vsel %vm650_vm0, %v2630_v36, 0.0 }
 0x1ca   : > { %v1249_v16 = vadd.f32 %v1248_v55, %v1247_v5  ;;  %v1444_v49 = vadd.f32 %v1443_v28, %v1442_v41  ;;  %v1467_v28 = vsel %vm650_vm0, %v1343_v19, 0.0  ;;  %v1345_v55 = vmul.f32 %v2630_v36, %v2630_v36 }
 0x1cc   : > { %v1251_v43 = vadd.f32 %v1250_v61, %v1249_v16  ;;  %v1446_v48 = vadd.f32 %v1445_v40, %v1444_v49  ;;  %v1469_v49 = vsel %vm650_vm0, %v1344_v10, 0.0  ;;  %v1471_v17 = vsel %vm650_vm0, %v1345_v55, 0.0 }
 0x1ce   : > { %v1253_v35 = vadd.f32 %v1252_v12, %v1251_v43  ;;  %v1448_v54 = vadd.f32 %v1447_v52, %v1446_v48 }
 0x1d0   : > { %v1255_v2 = vadd.f32 %v1254_v20, %v1253_v35  ;;  %v1450_v3 = vadd.f32 %v1449_v34, %v1448_v54 }
 0x1d2   : > { %v1257_v51 = vadd.f32 %v1256_v27, %v1255_v2  ;;  %v1452_v56 = vadd.f32 %v1451_v22, %v1450_v3 }
 0x1d4   : > { %v1259_v58 = vadd.f32 %v1258_v39, %v1257_v51  ;;  %v1454_v23 = vadd.f32 %v1453_v8, %v1452_v56 }
 0x1d6   : > { %v1261_v4 = vadd.f32 %v1260_v46, %v1259_v58  ;;  %v1456_v60 = vadd.f32 %v1455_v38, %v1454_v23 }
 0x1d8   : > { %v1458_v63 = vadd.f32 %v1457_v24, %v1456_v60  ;;  %v1263_v37 = vadd.f32 %v1262_v53, %v1261_v4 }
 0x1da   : > { %v1460_v62 = vadd.f32 %v1459_v0, %v1458_v63  ;;  %v1265_v6 = vadd.f32 %v1264_v7, %v1263_v37 }
 0x1dc   : > { %v1462_v44 = vadd.f32 %v1461_v13, %v1460_v62  ;;  %v1267_v26 = vadd.f32 %v1266_v11, %v1265_v6 }
 0x1de   : > { %v1464_v21 = vadd.f32 %v1463_v18, %v1462_v44  ;;  %v1269_v14 = vadd.f32 %v1268_v25, %v1267_v26 }
 0x1e0   : > { %v1466_v5 = vadd.f32 %v1465_v33, %v1464_v21  ;;  %v1271_v41 = vadd.f32 %v1270_v9, %v1269_v14 }
 0x1e2   : > { %v1468_v31 = vadd.f32 %v1467_v28, %v1466_v5  ;;  %v1273_v16 = vadd.f32 %v1272_v59, %v1271_v41 }
 0x1e4   : > { %v1470_v40 = vadd.f32 %v1469_v49, %v1468_v31  ;;  %v1275_v61 = vadd.f32 %v1274_v47, %v1273_v16 }
 0x1e6   : > { %v1276_v43 = vrot.slane %v1275_v61, 4  ;;  %v1472_v48 = vadd.f32 %v1471_v17, %v1470_v40 }
 0x1e8   : > { %v1277_v52 = vadd.f32 %v1276_v43, %v1275_v61  ;;  %v1473_v30 = vrot.slane %v1472_v48, 4 }
 0x1ea   : > { %v1278_v12 = vrot.slane %v1277_v52, 2  ;;  %v1474_v45 = vadd.f32 %v1473_v30, %v1472_v48 }
 0x1ec   : > { %v1279_v35 = vadd.f32 %v1278_v12, %v1277_v52  ;;  %v1475_v54 = vrot.slane %v1474_v45, 2 }
 0x1ee   : > { %v1280_v34 = vrot.slane %v1279_v35, 1  ;;  %v1476_v20 = vadd.f32 %v1475_v54, %v1474_v45 }
 0x1f0   : > { %v1281_v36 = vadd.f32 %v1280_v34, %v1279_v35  ;;  %v1477_v1 = vrot.slane %v1476_v20, 1 }
 0x1f2   : > { %v1478_v2 = vadd.f32 %v1477_v1, %v1476_v20  ;;  %1479 = vst.msk [vmem:[%s220_s22] sm:$0xff] %vm650_vm0, %v1281_v36 }
 0x1f4   : > { %1480 = vst.msk [vmem:[%s224_s25] sm:$0xff] %vm650_vm0, %v1478_v2 }
 0x1f5 PF: > { %s15_s15 = sadd.s32 1, %s2034_s15  }
 0x1f6   : > { %p12_p5 = scmp.ge.s32.totalorder %s15_s15, 6  }
 0x1f8   :  { %14 = sbr.rel (!%p12_p5) target bundleno = 1 (0x1), region = 82 }

// kernel: _lambda_.21
= control target key start
LH: loop header
LB: loop body
LE: loop exit
PB: predicated region body
PF: predicated region fallthrough
CT: control target
= control target key end

     0   :  { %vm439_vm0 = vcmask 130048   ;;  %vm874_vm1 = vcmask 523264   ;;  %s2786_s1 = inlined_call_operand.vmem [shape: bf16[144,64], index: 1, kind: input, shape index: {}]   ;;  %s2787_s0 = inlined_call_operand.vmem [shape: bf16[512,144], index: 0, kind: input, shape index: {}]   ;;  %s2788_s2 = inlined_call_operand.vmem [shape: f32[512,64], index: 2, kind: output, shape index: {0}]   ;;  %s2789_s3 = inlined_call_operand.vmem [shape: f32[8,64], index: 3, kind: output, shape index: {1}]   ;;  %s2790_s4 = inlined_call_operand.vmem [shape: f32[8,64], index: 4, kind: output, shape index: {2}]  }
   0x1   :  { %v1678_v0 = vld [vmem:[%s2786_s1 + $0x38] sm:$0xff]  ;;  %v1679_v1 = vld [vmem:[%s2786_s1 + $0x40] sm:$0xff]  ;;  %v1287_v3 = vld [vmem:[%s2787_s0 + $0x8] sm:$0xf0] }
   0x2   :  { %v1607_v2 = vld [vmem:[%s2787_s0 + $0x4] sm:$0xf]  ;;  %536 = vmatpush.bf16.msra.mxu0 %v1678_v0  ;;  %712 = vmatpush.bf16.msra.mxu1 %v1679_v1  ;;  %v1677_v5 = vld [vmem:[%s2786_s1 + $0x30] sm:$0xff]  ;;  %v1676_v6 = vld [vmem:[%s2786_s1 + $0x28] sm:$0xff] }
   0x3   :  { %v1290_v4 = vor.u32 %v1607_v2, %v1287_v3  ;;  %1680 = vmatpush.bf16.msra.mxu2 %v1678_v0  ;;  %1688 = vmatpush.bf16.msra.mxu3 %v1679_v1  ;;  %v1675_v7 = vld [vmem:[%s2786_s1 + $0x20] sm:$0xff]  ;;  %v1674_v8 = vld [vmem:[%s2786_s1 + $0x18] sm:$0xff]  ;;  %v1609_v9 = vld [vmem:[%s2787_s0 + $0x14] sm:$0xf] }
   0x4   :  { %v1295_v10 = vld [vmem:[%s2787_s0 + $0x18] sm:$0xf0]  ;;  %v1673_v12 = vld [vmem:[%s2786_s1 + $0x10] sm:$0xff]  ;;  %v1672_v13 = vld [vmem:[%s2786_s1 + $0x8] sm:$0xff] }
   0x5   :  { %1575 = vmatmul.msk.bf16.vlgmr.msra.gmra.mxu1 %vm439_vm0, %v1290_v4  ;;  %v1298_v11 = vor.u32 %v1609_v9, %v1295_v10  ;;  %v1671_v14 = vld [vmem:[%s2786_s1] sm:$0xff]  ;;  %v1608_v16 = vld [vmem:[%s2787_s0 + $0x4] sm:$0xf0]  ;;  %v1303_v19 = vld [vmem:[%s2787_s0 + $0x28] sm:$0xf0] }
   0x6   :  { %537 = vmatpush.bf16.msra.mxu0 %v1677_v5  ;;  %v1285_v15 = vld [vmem:[%s2787_s0] sm:$0xf]  ;;  %v1611_v18 = vld [vmem:[%s2787_s0 + $0x24] sm:$0xf]  ;;  %v1293_v21 = vld [vmem:[%s2787_s0 + $0x10] sm:$0xf] }
   0x7   :  { %1681 = vmatpush.bf16.msra.mxu2 %v1677_v5  ;;  %v1286_v17 = vor.u32 %v1608_v16, %v1285_v15  ;;  %v1306_v20 = vor.u32 %v1611_v18, %v1303_v19  ;;  %v1610_v22 = vld [vmem:[%s2787_s0 + $0x14] sm:$0xf0]  ;;  %v1613_v24 = vld [vmem:[%s2787_s0 + $0x34] sm:$0xf]  ;;  %v1311_v25 = vld [vmem:[%s2787_s0 + $0x38] sm:$0xf0] }
   0x8   :  { %v1294_v23 = vor.u32 %v1610_v22, %v1293_v21  ;;  %v1413_v26 = vld [vmem:[%s2787_s0 + $0x100] sm:$0xf]  ;;  %v1640_v27 = vld [vmem:[%s2787_s0 + $0x104] sm:$0xf0]  ;;  %v1314_v28 = vor.u32 %v1613_v24, %v1311_v25  ;;  %v1615_v33 = vld [vmem:[%s2787_s0 + $0x44] sm:$0xf] }
   0x9   :  { %v1414_v29 = vor.u32 %v1640_v27, %v1413_v26  ;;  %v1301_v30 = vld [vmem:[%s2787_s0 + $0x20] sm:$0xf]  ;;  %v1612_v31 = vld [vmem:[%s2787_s0 + $0x24] sm:$0xf0]  ;;  %v1319_v34 = vld [vmem:[%s2787_s0 + $0x48] sm:$0xf0] }
   0xa   :  { %538 = vmatpush.bf16.msra.mxu0 %v1676_v6  ;;  %v1302_v32 = vor.u32 %v1612_v31, %v1301_v30  ;;  %v1421_v35 = vld [vmem:[%s2787_s0 + $0x110] sm:$0xf]  ;;  %v1642_v36 = vld [vmem:[%s2787_s0 + $0x114] sm:$0xf0]  ;;  %v1641_v37 = vld [vmem:[%s2787_s0 + $0x114] sm:$0xf]  ;;  %v1322_v38 = vor.u32 %v1615_v33, %v1319_v34 }
   0xb   :  { %1682 = vmatpush.bf16.msra.mxu2 %v1676_v6  ;;  %v1422_v39 = vor.u32 %v1642_v36, %v1421_v35  ;;  %v1423_v40 = vld [vmem:[%s2787_s0 + $0x118] sm:$0xf0]  ;;  %v1309_v42 = vld [vmem:[%s2787_s0 + $0x30] sm:$0xf]  ;;  %v1614_v43 = vld [vmem:[%s2787_s0 + $0x34] sm:$0xf0] }
   0xc   :  { %v1426_v41 = vor.u32 %v1641_v37, %v1423_v40  ;;  %v1310_v44 = vor.u32 %v1614_v43, %v1309_v42  ;;  %v1617_v45 = vld [vmem:[%s2787_s0 + $0x54] sm:$0xf]  ;;  %v1327_v46 = vld [vmem:[%s2787_s0 + $0x58] sm:$0xf0]  ;;  %v1429_v47 = vld [vmem:[%s2787_s0 + $0x120] sm:$0xf] }
   0xd   :  { %v1644_v48 = vld [vmem:[%s2787_s0 + $0x124] sm:$0xf0]  ;;  %v1643_v49 = vld [vmem:[%s2787_s0 + $0x124] sm:$0xf]  ;;  %v1330_v50 = vor.u32 %v1617_v45, %v1327_v46  ;;  %v1431_v52 = vld [vmem:[%s2787_s0 + $0x128] sm:$0xf0] }
   0xe   :  { %539 = vmatpush.bf16.msra.mxu0 %v1675_v7  ;;  %1592 = vmatmul.msk.bf16.vlgmr.msra.gmra.mxu3 %vm439_vm0, %v1426_v41  ;;  %v1430_v51 = vor.u32 %v1644_v48, %v1429_v47  ;;  %v1434_v53 = vor.u32 %v1643_v49, %v1431_v52  ;;  %v1317_v54 = vld [vmem:[%s2787_s0 + $0x40] sm:$0xf]  ;;  %v1616_v55 = vld [vmem:[%s2787_s0 + $0x44] sm:$0xf0]  ;;  %v1619_v57 = vld [vmem:[%s2787_s0 + $0x64] sm:$0xf] }
   0xf   :  { %1683 = vmatpush.bf16.msra.mxu2 %v1675_v7  ;;  %v1318_v56 = vor.u32 %v1616_v55, %v1317_v54  ;;  %v1335_v58 = vld [vmem:[%s2787_s0 + $0x68] sm:$0xf0]  ;;  %v1437_v59 = vld [vmem:[%s2787_s0 + $0x130] sm:$0xf]  ;;  %v1646_v60 = vld [vmem:[%s2787_s0 + $0x134] sm:$0xf0] }
  0x10   :  { %v1645_v61 = vld [vmem:[%s2787_s0 + $0x134] sm:$0xf]  ;;  %v1338_v62 = vor.u32 %v1619_v57, %v1335_v58  ;;  %v1438_v63 = vor.u32 %v1646_v60, %v1437_v59  ;;  %v1439_v0 = vld [vmem:[%s2787_s0 + $0x138] sm:$0xf0]  ;;  %v1325_v2 = vld [vmem:[%s2787_s0 + $0x50] sm:$0xf] }
  0x11   :  { %v1442_v1 = vor.u32 %v1645_v61, %v1439_v0  ;;  %v1618_v3 = vld [vmem:[%s2787_s0 + $0x54] sm:$0xf0]  ;;  %v1621_v5 = vld [vmem:[%s2787_s0 + $0x74] sm:$0xf]  ;;  %v1343_v6 = vld [vmem:[%s2787_s0 + $0x78] sm:$0xf0] }
  0x12   :  { %540 = vmatpush.bf16.msra.mxu0 %v1674_v8  ;;  %v1326_v4 = vor.u32 %v1618_v3, %v1325_v2  ;;  %v1445_v7 = vld [vmem:[%s2787_s0 + $0x140] sm:$0xf]  ;;  %v1647_v9 = vld [vmem:[%s2787_s0 + $0x144] sm:$0xf]  ;;  %v1346_v10 = vor.u32 %v1621_v5, %v1343_v6  ;;  %v1620_v15 = vld [vmem:[%s2787_s0 + $0x64] sm:$0xf0] }
  0x13   :  { %1684 = vmatpush.bf16.msra.mxu2 %v1674_v8  ;;  %v1648_v8 = vld [vmem:[%s2787_s0 + $0x144] sm:$0xf0]  ;;  %v1351_v18 = vld [vmem:[%s2787_s0 + $0x88] sm:$0xf0]  ;;  %v1453_v19 = vld [vmem:[%s2787_s0 + $0x150] sm:$0xf] }
  0x14   :  { %v1649_v21 = vld [vmem:[%s2787_s0 + $0x154] sm:$0xf]  ;;  %v1455_v24 = vld [vmem:[%s2787_s0 + $0x158] sm:$0xf0]  ;;  %v1461_v33 = vld [vmem:[%s2787_s0 + $0x160] sm:$0xf] }
  0x15   :  { %1576 = vmatmul.msk.bf16.gmra.mxu1 %vm439_vm0, %v1298_v11  ;;  %v1446_v11 = vor.u32 %v1648_v8, %v1445_v7  ;;  %v1458_v26 = vor.u32 %v1649_v21, %v1455_v24  ;;  %v1625_v31 = vld [vmem:[%s2787_s0 + $0x94] sm:$0xf]  ;;  %v1652_v34 = vld [vmem:[%s2787_s0 + $0x164] sm:$0xf0]  ;;  %v1651_v35 = vld [vmem:[%s2787_s0 + $0x164] sm:$0xf] }
  0x16   :  { %541 = vmatpush.bf16.msra.mxu0 %v1673_v12  ;;  %v1462_v37 = vor.u32 %v1652_v34, %v1461_v33  ;;  %v1349_v42 = vld [vmem:[%s2787_s0 + $0x80] sm:$0xf]  ;;  %v1624_v43 = vld [vmem:[%s2787_s0 + $0x84] sm:$0xf0]  ;;  %v1627_v46 = vld [vmem:[%s2787_s0 + $0xa4] sm:$0xf] }
  0x17   :  { %1685 = vmatpush.bf16.msra.mxu2 %v1673_v12  ;;  %v1447_v12 = vld [vmem:[%s2787_s0 + $0x148] sm:$0xf0]  ;;  %v1469_v49 = vld [vmem:[%s2787_s0 + $0x170] sm:$0xf]  ;;  %v1471_v54 = vld [vmem:[%s2787_s0 + $0x178] sm:$0xf0] }
  0x18   :  { %v1367_v47 = vld [vmem:[%s2787_s0 + $0xa8] sm:$0xf0]  ;;  %v1626_v2 = vld [vmem:[%s2787_s0 + $0x94] sm:$0xf0]  ;;  %v1629_v8 = vld [vmem:[%s2787_s0 + $0xb4] sm:$0xf] }
  0x19   :  { %v1370_v52 = vor.u32 %v1627_v46, %v1367_v47 }
  0x1a   :  { %542 = vmatpush.bf16.msra.mxu0 %v1672_v13 }
  0x1b   :  { %1686 = vmatpush.bf16.msra.mxu2 %v1672_v13  ;;  %v1450_v13 = vor.u32 %v1647_v9, %v1447_v12  ;;  %v1375_v9 = vld [vmem:[%s2787_s0 + $0xb8] sm:$0xf0]  ;;  %v1656_v12 = vld [vmem:[%s2787_s0 + $0x184] sm:$0xf0] }
  0x1e   :  { %543 = vmatpush.bf16.msra.mxu0 %v1671_v14  ;;  %1593 = vmatmul.msk.bf16.gmra.mxu3 %vm439_vm0, %v1434_v53 }
  0x1f   :  { %1687 = vmatpush.bf16.msra.mxu2 %v1671_v14  ;;  %v1333_v14 = vld [vmem:[%s2787_s0 + $0x60] sm:$0xf] }
  0x20   :  { %v1334_v16 = vor.u32 %v1620_v15, %v1333_v14 }
  0x21   :  { %544 = vmatmul.bf16.vlgmr.msra.gmra.mxu0 %v1286_v17  ;;  %v1623_v17 = vld [vmem:[%s2787_s0 + $0x84] sm:$0xf] }
  0x22   :  { %624 = vmatmul.bf16.vlgmr.msra.gmra.mxu2 %v1414_v29  ;;  %v1354_v22 = vor.u32 %v1623_v17, %v1351_v18  ;;  %v1622_v29 = vld [vmem:[%s2787_s0 + $0x74] sm:$0xf0]  ;;  %v1479_v18 = vld [vmem:[%s2787_s0 + $0x188] sm:$0xf0] }
  0x25   :  { %1577 = vmatmul.msk.bf16.gmra.mxu1 %vm439_vm0, %v1306_v20  ;;  %v1650_v20 = vld [vmem:[%s2787_s0 + $0x154] sm:$0xf0] }
  0x2e   :  { %1594 = vmatmul.msk.bf16.gmra.mxu3 %vm439_vm0, %v1442_v1  ;;  %v1357_v1 = vld [vmem:[%s2787_s0 + $0x90] sm:$0xf] }
  0x2f   :  { %v1358_v6 = vor.u32 %v1626_v2, %v1357_v1 }
  0x31   :  { %549 = vmatmul.bf16.gmra.mxu0 %v1294_v23  ;;  %v1454_v23 = vor.u32 %v1650_v20, %v1453_v19 }
  0x32   :  { %629 = vmatmul.bf16.gmra.mxu2 %v1422_v39 }
  0x35   :  { %1578 = vmatmul.msk.bf16.gmra.mxu1 %vm439_vm0, %v1314_v28  ;;  %v1341_v28 = vld [vmem:[%s2787_s0 + $0x70] sm:$0xf] }
  0x36   :  { %v1342_v30 = vor.u32 %v1622_v29, %v1341_v28 }
  0x3e   :  { %1595 = vmatmul.msk.bf16.gmra.mxu3 %vm439_vm0, %v1450_v13  ;;  %v1655_v13 = vld [vmem:[%s2787_s0 + $0x184] sm:$0xf] }
  0x3f   :  { %v1482_v21 = vor.u32 %v1655_v13, %v1479_v18  ;;  %v1495_v18 = vld [vmem:[%s2787_s0 + $0x1a8] sm:$0xf0] }
  0x41   :  { %554 = vmatmul.bf16.gmra.mxu0 %v1302_v32  ;;  %v1359_v32 = vld [vmem:[%s2787_s0 + $0x98] sm:$0xf0] }
  0x42   :  { %634 = vmatmul.bf16.gmra.mxu2 %v1430_v51  ;;  %v1362_v36 = vor.u32 %v1625_v31, %v1359_v32  ;;  %v1653_v51 = vld [vmem:[%s2787_s0 + $0x174] sm:$0xf]  ;;  %v1365_v31 = vld [vmem:[%s2787_s0 + $0xa0] sm:$0xf]  ;;  %v1628_v32 = vld [vmem:[%s2787_s0 + $0xa4] sm:$0xf0] }
  0x45   :  { %1579 = vmatmul.msk.bf16.gmra.mxu1 %vm439_vm0, %v1322_v38  ;;  %v1463_v38 = vld [vmem:[%s2787_s0 + $0x168] sm:$0xf0] }
  0x46   :  { %v1466_v40 = vor.u32 %v1651_v35, %v1463_v38  ;;  %v1366_v35 = vor.u32 %v1628_v32, %v1365_v31  ;;  %v1383_v38 = vld [vmem:[%s2787_s0 + $0xc8] sm:$0xf0] }
  0x4e   :  { %1596 = vmatmul.msk.bf16.gmra.mxu3 %vm439_vm0, %v1458_v26 }
  0x51   :  { %559 = vmatmul.bf16.gmra.mxu0 %v1310_v44  ;;  %v1350_v44 = vor.u32 %v1624_v43, %v1349_v42  ;;  %v1658_v42 = vld [vmem:[%s2787_s0 + $0x194] sm:$0xf0]  ;;  %v1657_v43 = vld [vmem:[%s2787_s0 + $0x194] sm:$0xf] }
  0x52   :  { %639 = vmatmul.bf16.gmra.mxu2 %v1438_v63 }
  0x55   :  { %1580 = vmatmul.msk.bf16.gmra.mxu1 %vm439_vm0, %v1330_v50  ;;  %v1654_v50 = vld [vmem:[%s2787_s0 + $0x174] sm:$0xf0] }
  0x56   :  { %v1470_v53 = vor.u32 %v1654_v50, %v1469_v49 }
  0x5e   :  { %1597 = vmatmul.msk.bf16.gmra.mxu3 %vm439_vm0, %v1466_v40 }
  0x61   :  { %564 = vmatmul.bf16.gmra.mxu0 %v1318_v56  ;;  %v1474_v56 = vor.u32 %v1653_v51, %v1471_v54 }
  0x62   :  { %644 = vmatmul.bf16.gmra.mxu2 %v1446_v11  ;;  %v1477_v11 = vld [vmem:[%s2787_s0 + $0x180] sm:$0xf] }
  0x63   :  { %v1478_v17 = vor.u32 %v1656_v12, %v1477_v11  ;;  %v1493_v11 = vld [vmem:[%s2787_s0 + $0x1a0] sm:$0xf]  ;;  %v1660_v12 = vld [vmem:[%s2787_s0 + $0x1a4] sm:$0xf0] }
  0x65   :  { %1581 = vmatmul.msk.bf16.gmra.mxu1 %vm439_vm0, %v1338_v62 }
  0x6e   :  { %1598 = vmatmul.msk.bf16.gmra.mxu3 %vm439_vm0, %v1474_v56 }
  0x71   :  { %569 = vmatmul.bf16.gmra.mxu0 %v1326_v4 }
  0x72   :  { %649 = vmatmul.bf16.gmra.mxu2 %v1454_v23 }
  0x75   :  { %1582 = vmatmul.msk.bf16.gmra.mxu1 %vm439_vm0, %v1346_v10 }
  0x7e   :  { %1599 = vmatmul.msk.bf16.gmra.mxu3 %vm439_vm0, %v1482_v21 }
  0x81   :  { %574 = vmatmul.bf16.gmra.mxu0 %v1334_v16  ;;  %v1378_v16 = vor.u32 %v1629_v8, %v1375_v9 }
  0x82   :  { %v714_v25 = vpop.f32.mrf.mxu1  ;;  %654 = vmatmul.bf16.gmra.mxu2 %v1462_v37  ;;  %v1631_v37 = vld [vmem:[%s2787_s0 + $0xc4] sm:$0xf] }
  0x83   :  { %v1386_v46 = vor.u32 %v1631_v37, %v1383_v38 }
  0x85   :  { %1583 = vmatmul.msk.bf16.gmra.mxu1 %vm439_vm0, %v1354_v22 }
  0x8a   :  { %v716_v27 = vpop.f32.mrf.mxu1 }
  0x91   :  { %579 = vmatmul.bf16.gmra.mxu0 %v1342_v30 }
  0x92   :  { %v719_v39 = vpop.f32.mrf.mxu1  ;;  %659 = vmatmul.bf16.gmra.mxu2 %v1470_v53 }
  0x95   :  { %1584 = vmatmul.msk.bf16.gmra.mxu1 %vm439_vm0, %v1362_v36 }
  0x9a   :  { %v721_v41 = vpop.f32.mrf.mxu1 }
  0x9e   :  { %v545_v45 = vpop.f32.mrf.mxu0 }
  0x9f   :  { %v715_v48 = vadd.f32 %v714_v25, %v545_v45 }
  0xa1   :  { %875 = vst.msk [vmem:[%s2788_s2] sm:$0xff] %vm874_vm1, %v715_v48  ;;  %584 = vmatmul.bf16.gmra.mxu0 %v1350_v44  ;;  %v1072_v58 = vmul.f32 %v715_v48, %v715_v48  ;;  %v939_v60 = vsel %vm874_vm1, %v715_v48, 0.0  ;;  %v1487_v48 = vld [vmem:[%s2787_s0 + $0x198] sm:$0xf0] }
  0xa2   :  { %v724_v55 = vpop.f32.mrf.mxu1  ;;  %664 = vmatmul.bf16.gmra.mxu2 %v1478_v17  ;;  %v1490_v51 = vor.u32 %v1657_v43, %v1487_v48  ;;  %v1659_v17 = vld [vmem:[%s2787_s0 + $0x1a4] sm:$0xf]  ;;  %v1662_v48 = vld [vmem:[%s2787_s0 + $0x1b4] sm:$0xf0] }
  0xa3   :  { %v1136_v3 = vsel %vm874_vm1, %v1072_v58, 0.0  ;;  %v1498_v21 = vor.u32 %v1659_v17, %v1495_v18 }
  0xa4   :  { %1600 = vmatmul.msk.bf16.gmra.mxu3 %vm439_vm0, %v1490_v51 }
  0xa5   :  { %1585 = vmatmul.msk.bf16.gmra.mxu1 %vm439_vm0, %v1370_v52  ;;  %v2017_v25 = vpop.f32.mrf.mxu2 }
  0xa6   :  { %v547_v57 = vpop.f32.mrf.mxu0 }
  0xa7   :  { %v717_v59 = vadd.f32 %v716_v27, %v547_v57  ;;  %v799_v57 = vpop.f32.mrf.mxu3 }
  0xa9   :  { %876 = vst.msk [vmem:[%s2788_s2 + $0x8] sm:$0xff] %vm874_vm1, %v717_v59  ;;  %v940_v61 = vsel %vm874_vm1, %v717_v59, 0.0  ;;  %v1073_v62 = vmul.f32 %v717_v59, %v717_v59 }
  0xaa   :  { %v941_v63 = vadd.f32 %v940_v61, %v939_v60  ;;  %v1979_v0 = vpop.f32.mrf.mxu1 }
  0xab   :  { %v1137_v4 = vsel %vm874_vm1, %v1073_v62, 0.0  ;;  %v1373_v62 = vld [vmem:[%s2787_s0 + $0xb0] sm:$0xf] }
  0xac   :  { %v1138_v5 = vadd.f32 %v1137_v4, %v1136_v3 }
  0xae   :  { %v550_v7 = vpop.f32.mrf.mxu0 }
  0xaf   :  { %v720_v10 = vadd.f32 %v719_v39, %v550_v7  ;;  %v2039_v39 = vpop.f32.mrf.mxu2  ;;  %v801_v9 = vpop.f32.mrf.mxu3 }
  0xb1   :  { %877 = vst.msk [vmem:[%s2788_s2 + $0x10] sm:$0xff] %vm874_vm1, %v720_v10  ;;  %v942_v14 = vsel %vm874_vm1, %v720_v10, 0.0  ;;  %v1074_v15 = vmul.f32 %v720_v10, %v720_v10  ;;  %589 = vmatmul.bf16.gmra.mxu0 %v1358_v6  ;;  %v1391_v6 = vld [vmem:[%s2787_s0 + $0xd8] sm:$0xf0] }
  0xb2   :  { %v943_v19 = vadd.f32 %v942_v14, %v941_v63  ;;  %v2012_v20 = vpop.f32.mrf.mxu1  ;;  %v1630_v63 = vld [vmem:[%s2787_s0 + $0xb4] sm:$0xf0] }
  0xb3   :  { %v1139_v22 = vsel %vm874_vm1, %v1074_v15, 0.0  ;;  %v1374_v3 = vor.u32 %v1630_v63, %v1373_v62 }
  0xb4   :  { %v1140_v23 = vadd.f32 %v1139_v22, %v1138_v5  ;;  %v1633_v5 = vld [vmem:[%s2787_s0 + $0xd4] sm:$0xf]  ;;  %1601 = vmatmul.msk.bf16.gmra.mxu3 %vm439_vm0, %v1498_v21  ;;  %v1664_v21 = vld [vmem:[%s2787_s0 + $0x1c4] sm:$0xf0] }
  0xb5   :  { %1586 = vmatmul.msk.bf16.gmra.mxu1 %vm439_vm0, %v1378_v16  ;;  %v1394_v15 = vor.u32 %v1633_v5, %v1391_v6  ;;  %v1494_v16 = vor.u32 %v1660_v12, %v1493_v11  ;;  %v1389_v6 = vld [vmem:[%s2787_s0 + $0xd0] sm:$0xf] }
  0xb6   :  { %v552_v24 = vpop.f32.mrf.mxu0 }
  0xb7   :  { %v722_v26 = vadd.f32 %v721_v41, %v552_v24  ;;  %v1485_v41 = vld [vmem:[%s2787_s0 + $0x190] sm:$0xf] }
  0xb8   :  { %v1486_v47 = vor.u32 %v1658_v42, %v1485_v41  ;;  %v1635_v41 = vld [vmem:[%s2787_s0 + $0xe4] sm:$0xf]  ;;  %v1399_v42 = vld [vmem:[%s2787_s0 + $0xe8] sm:$0xf0] }
  0xb9   :  { %878 = vst.msk [vmem:[%s2788_s2 + $0x18] sm:$0xff] %vm874_vm1, %v722_v26  ;;  %v944_v27 = vsel %vm874_vm1, %v722_v26, 0.0  ;;  %v1075_v28 = vmul.f32 %v722_v26, %v722_v26 }
  0xba   :  { %v945_v29 = vadd.f32 %v944_v27, %v943_v19  ;;  %v2024_v30 = vpop.f32.mrf.mxu1  ;;  %669 = vmatmul.bf16.gmra.mxu2 %v1486_v47  ;;  %v1501_v47 = vld [vmem:[%s2787_s0 + $0x1b0] sm:$0xf] }
  0xbb   :  { %v1141_v33 = vsel %vm874_vm1, %v1075_v28, 0.0  ;;  %v804_v28 = vpop.f32.mrf.mxu3 }
  0xbc   :  { %v1142_v34 = vadd.f32 %v1141_v33, %v1140_v23 }
  0xbe   :  { %v555_v36 = vpop.f32.mrf.mxu0 }
  0xbf   :  { %v725_v40 = vadd.f32 %v724_v55, %v555_v36  ;;  %v630_v55 = vpop.f32.mrf.mxu2 }
  0xc0   :  { %v2078_v2 = vadd.f32 %v799_v57, %v630_v55 }
  0xc1   :  { %879 = vst.msk [vmem:[%s2788_s2 + $0x20] sm:$0xff] %vm874_vm1, %v725_v40  ;;  %v946_v44 = vsel %vm874_vm1, %v725_v40, 0.0  ;;  %v1076_v45 = vmul.f32 %v725_v40, %v725_v40  ;;  %594 = vmatmul.bf16.gmra.mxu0 %v1366_v35 }
  0xc2   :  { %v947_v49 = vadd.f32 %v946_v44, %v945_v29  ;;  %v2058_v50 = vpop.f32.mrf.mxu1  ;;  %909 = vst.msk [vmem:[%s2788_s2 + $0x110] sm:$0xff] %vm874_vm1, %v2078_v2 }
  0xc3   :  { %v1143_v52 = vsel %vm874_vm1, %v1076_v45, 0.0  ;;  %v806_v45 = vpop.f32.mrf.mxu3 }
  0xc4   :  { %v1144_v53 = vadd.f32 %v1143_v52, %v1142_v34  ;;  %v1381_v34 = vld [vmem:[%s2787_s0 + $0xc0] sm:$0xf]  ;;  %v1502_v52 = vor.u32 %v1662_v48, %v1501_v47 }
  0xc5   :  { %1587 = vmatmul.msk.bf16.gmra.mxu1 %vm439_vm0, %v1386_v46 }
  0xc6   :  { %v557_v54 = vpop.f32.mrf.mxu0 }
  0xc7   :  { %v727_v56 = vadd.f32 %v1979_v0, %v557_v54  ;;  %v632_v7 = vpop.f32.mrf.mxu2  ;;  %v1503_v54 = vld [vmem:[%s2787_s0 + $0x1b8] sm:$0xf0] }
  0xc8   :  { %v2092_v10 = vadd.f32 %v801_v9, %v632_v7 }
  0xc9   :  { %880 = vst.msk [vmem:[%s2788_s2 + $0x28] sm:$0xff] %vm874_vm1, %v727_v56  ;;  %v948_v58 = vsel %vm874_vm1, %v727_v56, 0.0  ;;  %v1077_v59 = vmul.f32 %v727_v56, %v727_v56 }
  0xca   :  { %v949_v60 = vadd.f32 %v948_v58, %v947_v49  ;;  %v2069_v61 = vpop.f32.mrf.mxu1  ;;  %910 = vst.msk [vmem:[%s2788_s2 + $0x118] sm:$0xff] %vm874_vm1, %v2092_v10  ;;  %674 = vmatmul.bf16.gmra.mxu2 %v1494_v16 }
  0xcb   :  { %v1145_v0 = vsel %vm874_vm1, %v1077_v59, 0.0 }
  0xcc   :  { %v1146_v1 = vadd.f32 %v1145_v0, %v1144_v53  ;;  %v1661_v53 = vld [vmem:[%s2787_s0 + $0x1b4] sm:$0xf]  ;;  %v809_v0 = vpop.f32.mrf.mxu3 }
  0xcd   :  { %v1506_v57 = vor.u32 %v1661_v53, %v1503_v54 }
  0xce   :  { %v560_v4 = vpop.f32.mrf.mxu0 }
  0xcf   :  { %v730_v8 = vadd.f32 %v2012_v20, %v560_v4  ;;  %v635_v26 = vpop.f32.mrf.mxu2  ;;  %1602 = vmatmul.msk.bf16.gmra.mxu3 %vm439_vm0, %v1506_v57 }
  0xd0   :  { %v2136_v37 = vadd.f32 %v804_v28, %v635_v26  ;;  %v1663_v26 = vld [vmem:[%s2787_s0 + $0x1c4] sm:$0xf] }
  0xd1   :  { %881 = vst.msk [vmem:[%s2788_s2 + $0x30] sm:$0xff] %vm874_vm1, %v730_v8  ;;  %v950_v13 = vsel %vm874_vm1, %v730_v8, 0.0  ;;  %v1078_v14 = vmul.f32 %v730_v8, %v730_v8  ;;  %599 = vmatmul.bf16.gmra.mxu0 %v1374_v3 }
  0xd2   :  { %v951_v19 = vadd.f32 %v950_v13, %v949_v60  ;;  %v2111_v20 = vpop.f32.mrf.mxu1  ;;  %911 = vst.msk [vmem:[%s2788_s2 + $0x120] sm:$0xff] %vm874_vm1, %v2136_v37  ;;  %v1637_v13 = vld [vmem:[%s2787_s0 + $0xf4] sm:$0xf] }
  0xd3   :  { %v1147_v22 = vsel %vm874_vm1, %v1078_v14, 0.0  ;;  %v1407_v14 = vld [vmem:[%s2787_s0 + $0xf8] sm:$0xf0] }
  0xd4   :  { %v1148_v23 = vadd.f32 %v1147_v22, %v1146_v1  ;;  %v811_v17 = vpop.f32.mrf.mxu3 }
  0xd5   :  { %1588 = vmatmul.msk.bf16.gmra.mxu1 %vm439_vm0, %v1394_v15 }
  0xd6   :  { %v562_v24 = vpop.f32.mrf.mxu0 }
  0xd7   :  { %v732_v27 = vadd.f32 %v2024_v30, %v562_v24  ;;  %v1632_v30 = vld [vmem:[%s2787_s0 + $0xc4] sm:$0xf0]  ;;  %v637_v43 = vpop.f32.mrf.mxu2 }
  0xd8   :  { %v1382_v38 = vor.u32 %v1632_v30, %v1381_v34  ;;  %v2150_v46 = vadd.f32 %v806_v45, %v637_v43 }
  0xd9   :  { %882 = vst.msk [vmem:[%s2788_s2 + $0x38] sm:$0xff] %vm874_vm1, %v732_v27  ;;  %v952_v29 = vsel %vm874_vm1, %v732_v27, 0.0  ;;  %v1079_v31 = vmul.f32 %v732_v27, %v732_v27  ;;  %v1511_v27 = vld [vmem:[%s2787_s0 + $0x1c8] sm:$0xf0] }
  0xda   :  { %v953_v32 = vadd.f32 %v952_v29, %v951_v19  ;;  %v2127_v33 = vpop.f32.mrf.mxu1  ;;  %912 = vst.msk [vmem:[%s2788_s2 + $0x128] sm:$0xff] %vm874_vm1, %v2150_v46  ;;  %679 = vmatmul.bf16.gmra.mxu2 %v1502_v52  ;;  %v1509_v19 = vld [vmem:[%s2787_s0 + $0x1c0] sm:$0xf]  ;;  %v1415_v52 = vld [vmem:[%s2787_s0 + $0x108] sm:$0xf0] }
  0xdb   :  { %v1149_v35 = vsel %vm874_vm1, %v1079_v31, 0.0  ;;  %v1510_v24 = vor.u32 %v1664_v21, %v1509_v19  ;;  %v1514_v31 = vor.u32 %v1663_v26, %v1511_v27  ;;  %v1405_v19 = vld [vmem:[%s2787_s0 + $0xf0] sm:$0xf] }
  0xdc   :  { %v1150_v36 = vadd.f32 %v1149_v35, %v1148_v23 }
  0xde   :  { %v565_v40 = vpop.f32.mrf.mxu0 }
  0xdf   :  { %v735_v44 = vadd.f32 %v2058_v50, %v565_v40  ;;  %v1402_v50 = vor.u32 %v1635_v41, %v1399_v42  ;;  %v640_v62 = vpop.f32.mrf.mxu2  ;;  %1603 = vmatmul.msk.bf16.gmra.mxu3 %vm439_vm0, %v1514_v31 }
  0xe0   :  { %v2194_v9 = vadd.f32 %v809_v0, %v640_v62  ;;  %v1665_v0 = vld [vmem:[%s2787_s0 + $0x1d4] sm:$0xf] }
  0xe1   :  { %883 = vst.msk [vmem:[%s2788_s2 + $0x40] sm:$0xff] %vm874_vm1, %v735_v44  ;;  %v954_v49 = vsel %vm874_vm1, %v735_v44, 0.0  ;;  %v1080_v51 = vmul.f32 %v735_v44, %v735_v44  ;;  %604 = vmatmul.bf16.gmra.mxu0 %v1382_v38  ;;  %v814_v38 = vpop.f32.mrf.mxu3  ;;  %v1397_v44 = vld [vmem:[%s2787_s0 + $0xe0] sm:$0xf] }
  0xe2   :  { %v955_v55 = vadd.f32 %v954_v49, %v953_v32  ;;  %v2169_v56 = vpop.f32.mrf.mxu1  ;;  %913 = vst.msk [vmem:[%s2788_s2 + $0x130] sm:$0xff] %vm874_vm1, %v2194_v9 }
  0xe3   :  { %v1151_v58 = vsel %vm874_vm1, %v1080_v51, 0.0 }
  0xe4   :  { %v1152_v59 = vadd.f32 %v1151_v58, %v1150_v36  ;;  %v1517_v58 = vld [vmem:[%s2787_s0 + $0x1d0] sm:$0xf] }
  0xe5   :  { %1589 = vmatmul.msk.bf16.gmra.mxu1 %vm439_vm0, %v1402_v50  ;;  %v1639_v50 = vld [vmem:[%s2787_s0 + $0x104] sm:$0xf] }
  0xe6   :  { %v567_v60 = vpop.f32.mrf.mxu0 }
  0xe7   :  { %v737_v63 = vadd.f32 %v2069_v61, %v567_v60  ;;  %v1634_v61 = vld [vmem:[%s2787_s0 + $0xd4] sm:$0xf0]  ;;  %v642_v15 = vpop.f32.mrf.mxu2 }
  0xe8   :  { %v1390_v11 = vor.u32 %v1634_v61, %v1389_v6  ;;  %v2208_v18 = vadd.f32 %v811_v17, %v642_v15 }
  0xe9   :  { %884 = vst.msk [vmem:[%s2788_s2 + $0x48] sm:$0xff] %vm874_vm1, %v737_v63  ;;  %v956_v1 = vsel %vm874_vm1, %v737_v63, 0.0  ;;  %v1081_v3 = vmul.f32 %v737_v63, %v737_v63 }
  0xea   :  { %v957_v4 = vadd.f32 %v956_v1, %v955_v55  ;;  %v2185_v5 = vpop.f32.mrf.mxu1  ;;  %914 = vst.msk [vmem:[%s2788_s2 + $0x138] sm:$0xff] %vm874_vm1, %v2208_v18  ;;  %684 = vmatmul.bf16.gmra.mxu2 %v1510_v24  ;;  %v816_v55 = vpop.f32.mrf.mxu3  ;;  %v1519_v1 = vld [vmem:[%s2787_s0 + $0x1d8] sm:$0xf0] }
  0xeb   :  { %v1153_v7 = vsel %vm874_vm1, %v1081_v3, 0.0  ;;  %v1522_v6 = vor.u32 %v1665_v0, %v1519_v1  ;;  %v1533_v0 = vld [vmem:[%s2787_s0 + $0x1f0] sm:$0xf]  ;;  %v1670_v1 = vld [vmem:[%s2787_s0 + $0x1f4] sm:$0xf0] }
  0xec   :  { %v1154_v8 = vadd.f32 %v1153_v7, %v1152_v59  ;;  %v1666_v59 = vld [vmem:[%s2787_s0 + $0x1d4] sm:$0xf0] }
  0xed   :  { %v1518_v63 = vor.u32 %v1666_v59, %v1517_v58 }
  0xee   :  { %v570_v12 = vpop.f32.mrf.mxu0 }
  0xef   :  { %v740_v16 = vadd.f32 %v2111_v20, %v570_v12  ;;  %v1410_v20 = vor.u32 %v1637_v13, %v1407_v14  ;;  %v645_v35 = vpop.f32.mrf.mxu2  ;;  %1604 = vmatmul.msk.bf16.gmra.mxu3 %vm439_vm0, %v1522_v6 }
  0xf0   :  { %v2252_v48 = vadd.f32 %v814_v38, %v645_v35  ;;  %v1527_v38 = vld [vmem:[%s2787_s0 + $0x1e8] sm:$0xf0] }
  0xf1   :  { %885 = vst.msk [vmem:[%s2788_s2 + $0x50] sm:$0xff] %vm874_vm1, %v740_v16  ;;  %v958_v22 = vsel %vm874_vm1, %v740_v16, 0.0  ;;  %v1082_v23 = vmul.f32 %v740_v16, %v740_v16  ;;  %609 = vmatmul.bf16.gmra.mxu0 %v1390_v11 }
  0xf2   :  { %v959_v28 = vadd.f32 %v958_v22, %v957_v4  ;;  %v2227_v29 = vpop.f32.mrf.mxu1  ;;  %915 = vst.msk [vmem:[%s2788_s2 + $0x140] sm:$0xff] %vm874_vm1, %v2252_v48  ;;  %v819_v13 = vpop.f32.mrf.mxu3 }
  0xf3   :  { %v1155_v32 = vsel %vm874_vm1, %v1082_v23, 0.0 }
  0xf4   :  { %v1156_v34 = vadd.f32 %v1155_v32, %v1154_v8  ;;  %v1525_v32 = vld [vmem:[%s2787_s0 + $0x1e0] sm:$0xf] }
  0xf5   :  { %1590 = vmatmul.msk.bf16.gmra.mxu1 %vm439_vm0, %v1410_v20 }
  0xf6   :  { %v572_v30 = vpop.f32.mrf.mxu0 }
  0xf7   :  { %v742_v36 = vadd.f32 %v2127_v33, %v572_v30  ;;  %v1636_v33 = vld [vmem:[%s2787_s0 + $0xe4] sm:$0xf0]  ;;  %v647_v53 = vpop.f32.mrf.mxu2 }
  0xf8   :  { %v1398_v49 = vor.u32 %v1636_v33, %v1397_v44  ;;  %v2266_v57 = vadd.f32 %v816_v55, %v647_v53 }
  0xf9   :  { %886 = vst.msk [vmem:[%s2788_s2 + $0x58] sm:$0xff] %vm874_vm1, %v742_v36  ;;  %v960_v40 = vsel %vm874_vm1, %v742_v36, 0.0  ;;  %v1083_v41 = vmul.f32 %v742_v36, %v742_v36  ;;  %v1667_v36 = vld [vmem:[%s2787_s0 + $0x1e4] sm:$0xf] }
  0xfa   :  { %v961_v42 = vadd.f32 %v960_v40, %v959_v28  ;;  %v2243_v43 = vpop.f32.mrf.mxu1  ;;  %916 = vst.msk [vmem:[%s2788_s2 + $0x148] sm:$0xff] %vm874_vm1, %v2266_v57  ;;  %689 = vmatmul.bf16.gmra.mxu2 %v1518_v63  ;;  %v821_v28 = vpop.f32.mrf.mxu3 }
  0xfb   :  { %v1157_v45 = vsel %vm874_vm1, %v1083_v41, 0.0 }
  0xfc   :  { %v1158_v47 = vadd.f32 %v1157_v45, %v1156_v34  ;;  %v1668_v34 = vld [vmem:[%s2787_s0 + $0x1e4] sm:$0xf0] }
  0xfe   :  { %v575_v51 = vpop.f32.mrf.mxu0 }
  0xff   :  { %v745_v54 = vadd.f32 %v2169_v56, %v575_v51  ;;  %v1418_v56 = vor.u32 %v1639_v50, %v1415_v52  ;;  %v650_v11 = vpop.f32.mrf.mxu2 }
 0x100   :  { %v2308_v23 = vadd.f32 %v819_v13, %v650_v11 }
 0x101   :  { %887 = vst.msk [vmem:[%s2788_s2 + $0x60] sm:$0xff] %vm874_vm1, %v745_v54  ;;  %v962_v60 = vsel %vm874_vm1, %v745_v54, 0.0  ;;  %v1084_v62 = vmul.f32 %v745_v54, %v745_v54  ;;  %614 = vmatmul.bf16.gmra.mxu0 %v1398_v49 }
 0x102   :  { %v963_v3 = vadd.f32 %v962_v60, %v961_v42  ;;  %v754_v4 = vpop.f32.mrf.mxu1  ;;  %917 = vst.msk [vmem:[%s2788_s2 + $0x150] sm:$0xff] %vm874_vm1, %v2308_v23  ;;  %v1530_v42 = vor.u32 %v1667_v36, %v1527_v38  ;;  %v824_v51 = vpop.f32.mrf.mxu3 }
 0x103   :  { %v1159_v61 = vsel %vm874_vm1, %v1084_v62, 0.0 }
 0x104   :  { %v1160_v7 = vadd.f32 %v1159_v61, %v1158_v47  ;;  %1605 = vmatmul.msk.bf16.gmra.mxu3 %vm439_vm0, %v1530_v42  ;;  %v1669_v61 = vld [vmem:[%s2787_s0 + $0x1f4] sm:$0xf] }
 0x105   :  { %1591 = vmatmul.msk.bf16.gmra.mxu1 %vm439_vm0, %v1418_v56 }
 0x106   :  { %v577_v8 = vpop.f32.mrf.mxu0 }
 0x107   :  { %v747_v12 = vadd.f32 %v2185_v5, %v577_v8  ;;  %v1638_v5 = vld [vmem:[%s2787_s0 + $0xf4] sm:$0xf0]  ;;  %v652_v26 = vpop.f32.mrf.mxu2 }
 0x108   :  { %v1406_v20 = vor.u32 %v1638_v5, %v1405_v19  ;;  %v2316_v31 = vadd.f32 %v821_v28, %v652_v26 }
 0x109   :  { %888 = vst.msk [vmem:[%s2788_s2 + $0x68] sm:$0xff] %vm874_vm1, %v747_v12  ;;  %v964_v14 = vsel %vm874_vm1, %v747_v12, 0.0  ;;  %v1085_v15 = vmul.f32 %v747_v12, %v747_v12 }
 0x10a   :  { %v965_v16 = vadd.f32 %v964_v14, %v963_v3  ;;  %v2299_v17 = vpop.f32.mrf.mxu1  ;;  %918 = vst.msk [vmem:[%s2788_s2 + $0x158] sm:$0xff] %vm874_vm1, %v2316_v31  ;;  %v826_v56 = vpop.f32.mrf.mxu3 }
 0x10b   :  { %v1161_v21 = vsel %vm874_vm1, %v1085_v15, 0.0 }
 0x10c   :  { %v1162_v22 = vadd.f32 %v1161_v21, %v1160_v7  ;;  %v1535_v7 = vld [vmem:[%s2787_s0 + $0x1f8] sm:$0xf0] }
 0x10d   :  { %v1538_v12 = vor.u32 %v1669_v61, %v1535_v7 }
 0x10e   :  { %v580_v24 = vpop.f32.mrf.mxu0 }
 0x10f   :  { %v750_v27 = vadd.f32 %v2227_v29, %v580_v24  ;;  %v1526_v29 = vor.u32 %v1668_v34, %v1525_v32  ;;  %v655_v47 = vpop.f32.mrf.mxu2 }
 0x110   :  { %v2349_v59 = vadd.f32 %v824_v51, %v655_v47 }
 0x111   :  { %889 = vst.msk [vmem:[%s2788_s2 + $0x70] sm:$0xff] %vm874_vm1, %v750_v27  ;;  %v966_v30 = vsel %vm874_vm1, %v750_v27, 0.0  ;;  %v1086_v35 = vmul.f32 %v750_v27, %v750_v27  ;;  %619 = vmatmul.bf16.gmra.mxu0 %v1406_v20  ;;  %694 = vmatmul.bf16.gmra.mxu2 %v1526_v29 }
 0x112   :  { %v967_v40 = vadd.f32 %v966_v30, %v965_v16  ;;  %v759_v41 = vpop.f32.mrf.mxu1  ;;  %919 = vst.msk [vmem:[%s2788_s2 + $0x160] sm:$0xff] %vm874_vm1, %v2349_v59  ;;  %v829_v5 = vpop.f32.mrf.mxu3 }
 0x113   :  { %v1163_v44 = vsel %vm874_vm1, %v1086_v35, 0.0 }
 0x114   :  { %v1164_v33 = vadd.f32 %v1163_v44, %v1162_v22  ;;  %1606 = vmatmul.msk.bf16.gmra.mxu3 %vm439_vm0, %v1538_v12 }
 0x116   :  { %v582_v45 = vpop.f32.mrf.mxu0 }
 0x117   :  { %v752_v49 = vadd.f32 %v2243_v43, %v582_v45  ;;  %v657_v43 = vpop.f32.mrf.mxu2 }
 0x118   :  { %v2356_v63 = vadd.f32 %v826_v56, %v657_v43 }
 0x119   :  { %890 = vst.msk [vmem:[%s2788_s2 + $0x78] sm:$0xff] %vm874_vm1, %v752_v49  ;;  %v968_v50 = vsel %vm874_vm1, %v752_v49, 0.0  ;;  %v1087_v52 = vmul.f32 %v752_v49, %v752_v49 }
 0x11a   :  { %v969_v53 = vadd.f32 %v968_v50, %v967_v40  ;;  %v761_v54 = vpop.f32.mrf.mxu1  ;;  %920 = vst.msk [vmem:[%s2788_s2 + $0x168] sm:$0xff] %vm874_vm1, %v2356_v63  ;;  %v831_v30 = vpop.f32.mrf.mxu3 }
 0x11b   :  { %v1165_v55 = vsel %vm874_vm1, %v1087_v52, 0.0 }
 0x11c   :  { %v1166_v58 = vadd.f32 %v1165_v55, %v1164_v33 }
 0x11e   :  { %v585_v60 = vpop.f32.mrf.mxu0 }
 0x11f   :  { %v755_v62 = vadd.f32 %v754_v4, %v585_v60  ;;  %v1534_v4 = vor.u32 %v1670_v1, %v1533_v0  ;;  %v660_v16 = vpop.f32.mrf.mxu2 }
 0x120   :  { %v2389_v28 = vadd.f32 %v829_v5, %v660_v16 }
 0x121   :  { %891 = vst.msk [vmem:[%s2788_s2 + $0x80] sm:$0xff] %vm874_vm1, %v755_v62  ;;  %v970_v3 = vsel %vm874_vm1, %v755_v62, 0.0  ;;  %v1088_v6 = vmul.f32 %v755_v62, %v755_v62  ;;  %699 = vmatmul.bf16.gmra.mxu2 %v1534_v4 }
 0x122   :  { %v971_v8 = vadd.f32 %v970_v3, %v969_v53  ;;  %v764_v11 = vpop.f32.mrf.mxu1  ;;  %921 = vst.msk [vmem:[%s2788_s2 + $0x170] sm:$0xff] %vm874_vm1, %v2389_v28  ;;  %v834_v47 = vpop.f32.mrf.mxu3 }
 0x123   :  { %v1167_v13 = vsel %vm874_vm1, %v1088_v6, 0.0 }
 0x124   :  { %v1168_v14 = vadd.f32 %v1167_v13, %v1166_v58 }
 0x126   :  { %v587_v15 = vpop.f32.mrf.mxu0 }
 0x127   :  { %v757_v19 = vadd.f32 %v2299_v17, %v587_v15  ;;  %v662_v17 = vpop.f32.mrf.mxu2 }
 0x128   :  { %v2396_v35 = vadd.f32 %v831_v30, %v662_v17 }
 0x129   :  { %892 = vst.msk [vmem:[%s2788_s2 + $0x88] sm:$0xff] %vm874_vm1, %v757_v19  ;;  %v972_v21 = vsel %vm874_vm1, %v757_v19, 0.0  ;;  %v1089_v22 = vmul.f32 %v757_v19, %v757_v19 }
 0x12a   :  { %v973_v20 = vadd.f32 %v972_v21, %v971_v8  ;;  %v766_v24 = vpop.f32.mrf.mxu1  ;;  %922 = vst.msk [vmem:[%s2788_s2 + $0x178] sm:$0xff] %vm874_vm1, %v2396_v35  ;;  %v836_v62 = vpop.f32.mrf.mxu3 }
 0x12b   :  { %v1169_v26 = vsel %vm874_vm1, %v1089_v22, 0.0 }
 0x12c   :  { %v1170_v27 = vadd.f32 %v1169_v26, %v1168_v14 }
 0x12e   :  { %v590_v32 = vpop.f32.mrf.mxu0 }
 0x12f   :  { %v760_v34 = vadd.f32 %v759_v41, %v590_v32  ;;  %v665_v33 = vpop.f32.mrf.mxu2 }
 0x130   :  { %v2415_v58 = vadd.f32 %v834_v47, %v665_v33 }
 0x131   :  { %893 = vst.msk [vmem:[%s2788_s2 + $0x90] sm:$0xff] %vm874_vm1, %v760_v34  ;;  %v974_v29 = vsel %vm874_vm1, %v760_v34, 0.0  ;;  %v1090_v36 = vmul.f32 %v760_v34, %v760_v34 }
 0x132   :  { %v975_v38 = vadd.f32 %v974_v29, %v973_v20  ;;  %v769_v40 = vpop.f32.mrf.mxu1  ;;  %923 = vst.msk [vmem:[%s2788_s2 + $0x180] sm:$0xff] %vm874_vm1, %v2415_v58  ;;  %v839_v12 = vpop.f32.mrf.mxu3 }
 0x133   :  { %v1171_v41 = vsel %vm874_vm1, %v1090_v36, 0.0 }
 0x134   :  { %v1172_v42 = vadd.f32 %v1171_v41, %v1170_v27 }
 0x136   :  { %v592_v44 = vpop.f32.mrf.mxu0 }
 0x137   :  { %v762_v45 = vadd.f32 %v761_v54, %v592_v44  ;;  %v667_v54 = vpop.f32.mrf.mxu2 }
 0x138   :  { %v2422_v56 = vadd.f32 %v836_v62, %v667_v54 }
 0x139   :  { %894 = vst.msk [vmem:[%s2788_s2 + $0x98] sm:$0xff] %vm874_vm1, %v762_v45  ;;  %v976_v49 = vsel %vm874_vm1, %v762_v45, 0.0  ;;  %v1091_v51 = vmul.f32 %v762_v45, %v762_v45 }
 0x13a   :  { %v977_v50 = vadd.f32 %v976_v49, %v975_v38  ;;  %v771_v52 = vpop.f32.mrf.mxu1  ;;  %924 = vst.msk [vmem:[%s2788_s2 + $0x188] sm:$0xff] %vm874_vm1, %v2422_v56  ;;  %v841_v5 = vpop.f32.mrf.mxu3 }
 0x13b   :  { %v1173_v53 = vsel %vm874_vm1, %v1091_v51, 0.0 }
 0x13c   :  { %v1174_v55 = vadd.f32 %v1173_v53, %v1172_v42 }
 0x13e   :  { %v595_v60 = vpop.f32.mrf.mxu0 }
 0x13f   :  { %v765_v43 = vadd.f32 %v764_v11, %v595_v60  ;;  %v670_v8 = vpop.f32.mrf.mxu2 }
 0x140   :  { %v2443_v14 = vadd.f32 %v839_v12, %v670_v8 }
 0x141   :  { %895 = vst.msk [vmem:[%s2788_s2 + $0xa0] sm:$0xff] %vm874_vm1, %v765_v43  ;;  %v978_v0 = vsel %vm874_vm1, %v765_v43, 0.0  ;;  %v1092_v1 = vmul.f32 %v765_v43, %v765_v43 }
 0x142   :  { %v2429_v3 = vadd.f32 %v978_v0, %v977_v50  ;;  %v774_v6 = vpop.f32.mrf.mxu1  ;;  %925 = vst.msk [vmem:[%s2788_s2 + $0x190] sm:$0xff] %vm874_vm1, %v2443_v14  ;;  %v844_v27 = vpop.f32.mrf.mxu3 }
 0x143   :  { %v1175_v4 = vsel %vm874_vm1, %v1092_v1, 0.0 }
 0x144   :  { %v2437_v61 = vadd.f32 %v1175_v4, %v1174_v55 }
 0x146   :  { %v597_v7 = vpop.f32.mrf.mxu0 }
 0x147   :  { %v767_v11 = vadd.f32 %v766_v24, %v597_v7  ;;  %v672_v16 = vpop.f32.mrf.mxu2 }
 0x148   :  { %v2450_v21 = vadd.f32 %v841_v5, %v672_v16 }
 0x149   :  { %896 = vst.msk [vmem:[%s2788_s2 + $0xa8] sm:$0xff] %vm874_vm1, %v767_v11  ;;  %v980_v16 = vsel %vm874_vm1, %v767_v11, 0.0 }
 0x14a   :  { %v776_v13 = vpop.f32.mrf.mxu1  ;;  %926 = vst.msk [vmem:[%s2788_s2 + $0x198] sm:$0xff] %vm874_vm1, %v2450_v21  ;;  %v846_v36 = vpop.f32.mrf.mxu3 }
 0x14e   :  { %v600_v15 = vpop.f32.mrf.mxu0 }
 0x14f   :  { %v770_v19 = vadd.f32 %v769_v40, %v600_v15  ;;  %v675_v24 = vpop.f32.mrf.mxu2 }
 0x150   :  { %v2465_v17 = vadd.f32 %v844_v27, %v675_v24 }
 0x151   :  { %897 = vst.msk [vmem:[%s2788_s2 + $0xb0] sm:$0xff] %vm874_vm1, %v770_v19  ;;  %v1094_v5 = vmul.f32 %v770_v19, %v770_v19  ;;  %v982_v24 = vsel %vm874_vm1, %v770_v19, 0.0 }
 0x152   :  { %v779_v22 = vpop.f32.mrf.mxu1  ;;  %927 = vst.msk [vmem:[%s2788_s2 + $0x1a0] sm:$0xff] %vm874_vm1, %v2465_v17  ;;  %v849_v33 = vpop.f32.mrf.mxu3 }
 0x156   :  { %v602_v20 = vpop.f32.mrf.mxu0 }
 0x157   :  { %v772_v26 = vadd.f32 %v771_v52, %v602_v20  ;;  %v677_v30 = vpop.f32.mrf.mxu2 }
 0x158   :  { %v2472_v38 = vadd.f32 %v846_v36, %v677_v30 }
 0x159   :  { %898 = vst.msk [vmem:[%s2788_s2 + $0xb8] sm:$0xff] %vm874_vm1, %v772_v26  ;;  %v1095_v27 = vmul.f32 %v772_v26, %v772_v26  ;;  %v984_v30 = vsel %vm874_vm1, %v772_v26, 0.0 }
 0x15a   :  { %v781_v32 = vpop.f32.mrf.mxu1  ;;  %928 = vst.msk [vmem:[%s2788_s2 + $0x1a8] sm:$0xff] %vm874_vm1, %v2472_v38  ;;  %v851_v52 = vpop.f32.mrf.mxu3 }
 0x15e   :  { %v605_v34 = vpop.f32.mrf.mxu0 }
 0x15f   :  { %v775_v29 = vadd.f32 %v774_v6, %v605_v34  ;;  %v680_v42 = vpop.f32.mrf.mxu2  ;;  %v1179_v34 = vsel %vm874_vm1, %v1094_v5, 0.0 }
 0x160   :  { %v2487_v47 = vadd.f32 %v849_v33, %v680_v42  ;;  %v1181_v33 = vsel %vm874_vm1, %v1095_v27, 0.0 }
 0x161   :  { %899 = vst.msk [vmem:[%s2788_s2 + $0xc0] sm:$0xff] %vm874_vm1, %v775_v29  ;;  %v1096_v36 = vmul.f32 %v775_v29, %v775_v29 }
 0x162   :  { %v784_v40 = vpop.f32.mrf.mxu1  ;;  %929 = vst.msk [vmem:[%s2788_s2 + $0x1b0] sm:$0xff] %vm874_vm1, %v2487_v47  ;;  %v854_v62 = vpop.f32.mrf.mxu3 }
 0x166   :  { %v607_v41 = vpop.f32.mrf.mxu0 }
 0x167   :  { %v777_v44 = vadd.f32 %v776_v13, %v607_v41  ;;  %v682_v51 = vpop.f32.mrf.mxu2  ;;  %v1093_v13 = vmul.f32 %v767_v11, %v767_v11 }
 0x168   :  { %v2494_v53 = vadd.f32 %v851_v52, %v682_v51 }
 0x169   :  { %900 = vst.msk [vmem:[%s2788_s2 + $0xc8] sm:$0xff] %vm874_vm1, %v777_v44  ;;  %v1177_v20 = vsel %vm874_vm1, %v1093_v13, 0.0  ;;  %v1097_v51 = vmul.f32 %v777_v44, %v777_v44 }
 0x16a   :  { %v786_v45 = vpop.f32.mrf.mxu1  ;;  %930 = vst.msk [vmem:[%s2788_s2 + $0x1b8] sm:$0xff] %vm874_vm1, %v2494_v53  ;;  %v856_v8 = vpop.f32.mrf.mxu3  ;;  %v1178_v19 = vadd.f32 %v1177_v20, %v2437_v61 }
 0x16e   :  { %v610_v49 = vpop.f32.mrf.mxu0 }
 0x16f   :  { %v780_v50 = vadd.f32 %v779_v22, %v610_v49  ;;  %v685_v54 = vpop.f32.mrf.mxu2  ;;  %v986_v49 = vsel %vm874_vm1, %v775_v29, 0.0  ;;  %v1185_v29 = vsel %vm874_vm1, %v1097_v51, 0.0 }
 0x170   :  { %v2511_v7 = vadd.f32 %v854_v62, %v685_v54  ;;  %v988_v54 = vsel %vm874_vm1, %v777_v44, 0.0 }
 0x171   :  { %901 = vst.msk [vmem:[%s2788_s2 + $0xd0] sm:$0xff] %vm874_vm1, %v780_v50 }
 0x172   :  { %v789_v55 = vpop.f32.mrf.mxu1  ;;  %931 = vst.msk [vmem:[%s2788_s2 + $0x1c0] sm:$0xff] %vm874_vm1, %v2511_v7  ;;  %v859_v41 = vpop.f32.mrf.mxu3 }
 0x176   :  { %v612_v60 = vpop.f32.mrf.mxu0 }
 0x177   :  { %v782_v43 = vadd.f32 %v781_v32, %v612_v60  ;;  %v687_v6 = vpop.f32.mrf.mxu2  ;;  %v1098_v60 = vmul.f32 %v780_v50, %v780_v50 }
 0x178   :  { %v2513_v12 = vadd.f32 %v856_v8, %v687_v6  ;;  %v990_v6 = vsel %vm874_vm1, %v780_v50, 0.0 }
 0x179   :  { %902 = vst.msk [vmem:[%s2788_s2 + $0xd8] sm:$0xff] %vm874_vm1, %v782_v43  ;;  %v1099_v8 = vmul.f32 %v782_v43, %v782_v43 }
 0x17a   :  { %v2509_v0 = vpop.f32.mrf.mxu1  ;;  %932 = vst.msk [vmem:[%s2788_s2 + $0x1c8] sm:$0xff] %vm874_vm1, %v2513_v12 }
 0x17e   :  { %v615_v1 = vpop.f32.mrf.mxu0 }
 0x17f   :  { %v785_v4 = vadd.f32 %v784_v40, %v615_v1  ;;  %v690_v32 = vpop.f32.mrf.mxu2 }
 0x180   :  { %v2561_v27 = vadd.f32 %v859_v41, %v690_v32 }
 0x181   :  { %903 = vst.msk [vmem:[%s2788_s2 + $0xe0] sm:$0xff] %vm874_vm1, %v785_v4  ;;  %v1100_v20 = vmul.f32 %v785_v4, %v785_v4 }
 0x182   :  { %v794_v15 = vpop.f32.mrf.mxu1  ;;  %933 = vst.msk [vmem:[%s2788_s2 + $0x1d0] sm:$0xff] %vm874_vm1, %v2561_v27 }
 0x183   :  { %v2526_v22 = vadd.f32 %v794_v15, %v2017_v25  ;;  %v981_v25 = vadd.f32 %v980_v16, %v2429_v3  ;;  %v1180_v3 = vadd.f32 %v1179_v34, %v1178_v19  ;;  %v1187_v16 = vsel %vm874_vm1, %v1098_v60, 0.0 }
 0x185   :  { %907 = vst.msk [vmem:[%s2788_s2 + $0x100] sm:$0xff] %vm874_vm1, %v2526_v22  ;;  %v983_v42 = vadd.f32 %v982_v24, %v981_v25  ;;  %v1182_v62 = vadd.f32 %v1181_v33, %v1180_v3  ;;  %v861_v25 = vpop.f32.mrf.mxu3 }
 0x186   :  { %v617_v11 = vpop.f32.mrf.mxu0 }
 0x187   :  { %v787_v40 = vadd.f32 %v786_v45, %v617_v11  ;;  %v985_v52 = vadd.f32 %v984_v30, %v983_v42  ;;  %v1183_v45 = vsel %vm874_vm1, %v1096_v36, 0.0  ;;  %v692_v44 = vpop.f32.mrf.mxu2  ;;  %v1189_v30 = vsel %vm874_vm1, %v1099_v8, 0.0 }
 0x188   :  { %v1184_v13 = vadd.f32 %v1183_v45, %v1182_v62  ;;  %v2563_v34 = vadd.f32 %v861_v25, %v692_v44  ;;  %v994_v36 = vsel %vm874_vm1, %v785_v4, 0.0 }
 0x189   :  { %904 = vst.msk [vmem:[%s2788_s2 + $0xe8] sm:$0xff] %vm874_vm1, %v787_v40  ;;  %v987_v1 = vadd.f32 %v986_v49, %v985_v52  ;;  %v1101_v19 = vmul.f32 %v787_v40, %v787_v40  ;;  %v996_v32 = vsel %vm874_vm1, %v787_v40, 0.0 }
 0x18a   :  { %v796_v26 = vpop.f32.mrf.mxu1  ;;  %v1186_v50 = vadd.f32 %v1185_v29, %v1184_v13  ;;  %934 = vst.msk [vmem:[%s2788_s2 + $0x1d8] sm:$0xff] %vm874_vm1, %v2563_v34  ;;  %v1104_v29 = vmul.f32 %v2526_v22, %v2526_v22 }
 0x18b   :  { %v797_v61 = vadd.f32 %v796_v26, %v2039_v39  ;;  %v989_v15 = vadd.f32 %v988_v54, %v987_v1  ;;  %v992_v39 = vsel %vm874_vm1, %v782_v43, 0.0  ;;  %v1193_v49 = vsel %vm874_vm1, %v1101_v19, 0.0 }
 0x18c   :  { %v1188_v43 = vadd.f32 %v1187_v16, %v1186_v50  ;;  %v1002_v16 = vsel %vm874_vm1, %v2526_v22, 0.0  ;;  %v1107_v22 = vmul.f32 %v2092_v10, %v2092_v10 }
 0x18d   :  { %908 = vst.msk [vmem:[%s2788_s2 + $0x108] sm:$0xff] %vm874_vm1, %v797_v61  ;;  %v991_v11 = vadd.f32 %v990_v6, %v989_v15  ;;  %v864_v54 = vpop.f32.mrf.mxu3  ;;  %v1004_v25 = vsel %vm874_vm1, %v797_v61, 0.0 }
 0x18e   :  { %v620_v5 = vpop.f32.mrf.mxu0  ;;  %v1190_v4 = vadd.f32 %v1189_v30, %v1188_v43 }
 0x18f   :  { %v790_v24 = vadd.f32 %v789_v55, %v620_v5  ;;  %v993_v42 = vadd.f32 %v992_v39, %v991_v11  ;;  %v1191_v55 = vsel %vm874_vm1, %v1100_v20, 0.0  ;;  %v1106_v20 = vmul.f32 %v2078_v2, %v2078_v2 }
 0x190   :  { %v1192_v3 = vadd.f32 %v1191_v55, %v1190_v4  ;;  %v1008_v4 = vsel %vm874_vm1, %v2092_v10, 0.0  ;;  %v1010_v10 = vsel %vm874_vm1, %v2136_v37, 0.0 }
 0x191   :  { %905 = vst.msk [vmem:[%s2788_s2 + $0xf0] sm:$0xff] %vm874_vm1, %v790_v24  ;;  %v1102_v41 = vmul.f32 %v790_v24, %v790_v24  ;;  %v995_v33 = vadd.f32 %v994_v36, %v993_v42  ;;  %v998_v51 = vsel %vm874_vm1, %v790_v24, 0.0  ;;  %v1199_v24 = vsel %vm874_vm1, %v1104_v29, 0.0 }
 0x192   :  { %v1194_v62 = vadd.f32 %v1193_v49, %v1192_v3  ;;  %v1006_v36 = vsel %vm874_vm1, %v2078_v2, 0.0  ;;  %v1108_v2 = vmul.f32 %v2136_v37, %v2136_v37  ;;  %v1109_v3 = vmul.f32 %v2150_v46, %v2150_v46 }
 0x193   :  { %v997_v52 = vadd.f32 %v996_v32, %v995_v33  ;;  %v1195_v45 = vsel %vm874_vm1, %v1102_v41, 0.0  ;;  %v1014_v37 = vsel %vm874_vm1, %v2194_v9, 0.0 }
 0x194   :  { %v695_v26 = vpop.f32.mrf.mxu2  ;;  %v1196_v13 = vadd.f32 %v1195_v45, %v1194_v62  ;;  %v1012_v45 = vsel %vm874_vm1, %v2150_v46, 0.0  ;;  %v1209_v29 = vsel %vm874_vm1, %v1109_v3, 0.0  ;;  %v1016_v46 = vsel %vm874_vm1, %v2208_v18, 0.0 }
 0x195   :  { %v999_v1 = vadd.f32 %v998_v51, %v997_v52  ;;  %v2606_v43 = vadd.f32 %v864_v54, %v695_v26  ;;  %v866_v42 = vpop.f32.mrf.mxu3  ;;  %v1205_v51 = vsel %vm874_vm1, %v1107_v22, 0.0  ;;  %v1207_v26 = vsel %vm874_vm1, %v1108_v2, 0.0 }
 0x196   :  { %v622_v60 = vpop.f32.mrf.mxu0  ;;  %v1117_v3 = vmul.f32 %v2356_v63, %v2356_v63 }
 0x197   :  { %v792_v40 = vadd.f32 %v2509_v0, %v622_v60  ;;  %v1105_v0 = vmul.f32 %v797_v61, %v797_v61  ;;  %v1203_v61 = vsel %vm874_vm1, %v1106_v20, 0.0  ;;  %935 = vst.msk [vmem:[%s2788_s2 + $0x1e0] sm:$0xff] %vm874_vm1, %v2606_v43  ;;  %v1113_v20 = vmul.f32 %v2266_v57, %v2266_v57 }
 0x199   :  { %906 = vst.msk [vmem:[%s2788_s2 + $0xf8] sm:$0xff] %vm874_vm1, %v792_v40  ;;  %v1000_v6 = vsel %vm874_vm1, %v792_v40, 0.0  ;;  %v1103_v8 = vmul.f32 %v792_v40, %v792_v40  ;;  %v1201_v19 = vsel %vm874_vm1, %v1105_v0, 0.0  ;;  %v1110_v40 = vmul.f32 %v2194_v9, %v2194_v9 }
 0x19a   :  { %v1001_v15 = vadd.f32 %v1000_v6, %v999_v1  ;;  %v1111_v6 = vmul.f32 %v2208_v18, %v2208_v18  ;;  %v1112_v0 = vmul.f32 %v2252_v48, %v2252_v48  ;;  %v1018_v9 = vsel %vm874_vm1, %v2252_v48, 0.0 }
 0x19b   :  { %v1197_v5 = vsel %vm874_vm1, %v1103_v8, 0.0  ;;  %v1020_v18 = vsel %vm874_vm1, %v2266_v57, 0.0  ;;  %v1022_v48 = vsel %vm874_vm1, %v2308_v23, 0.0 }
 0x19c   :  { %v1003_v44 = vadd.f32 %v1002_v16, %v1001_v15  ;;  %v1198_v39 = vadd.f32 %v1197_v5, %v1196_v13  ;;  %v697_v30 = vpop.f32.mrf.mxu2  ;;  %v1211_v16 = vsel %vm874_vm1, %v1110_v40, 0.0  ;;  %v1118_v40 = vmul.f32 %v2389_v28, %v2389_v28 }
 0x19d   :  { %v2608_v41 = vadd.f32 %v866_v42, %v697_v30  ;;  %v869_v8 = vpop.f32.mrf.mxu3  ;;  %v1115_v42 = vmul.f32 %v2316_v31, %v2316_v31 }
 0x19e   :  { %v1005_v50 = vadd.f32 %v1004_v25, %v1003_v44  ;;  %v1200_v11 = vadd.f32 %v1199_v24, %v1198_v39  ;;  %v1213_v39 = vsel %vm874_vm1, %v1111_v6, 0.0 }
 0x19f   :  { %936 = vst.msk [vmem:[%s2788_s2 + $0x1e8] sm:$0xff] %vm874_vm1, %v2608_v41 }
 0x1a0   :  { %v1007_v55 = vadd.f32 %v1006_v36, %v1005_v50  ;;  %v1202_v32 = vadd.f32 %v1201_v19, %v1200_v11  ;;  %v1215_v50 = vsel %vm874_vm1, %v1112_v0, 0.0  ;;  %v1114_v11 = vmul.f32 %v2308_v23, %v2308_v23 }
 0x1a1   :  { %v1217_v19 = vsel %vm874_vm1, %v1113_v20, 0.0  ;;  %v1121_v0 = vmul.f32 %v2422_v56, %v2422_v56 }
 0x1a2   :  { %v1009_v33 = vadd.f32 %v1008_v4, %v1007_v55  ;;  %v1204_v49 = vadd.f32 %v1203_v61, %v1202_v32  ;;  %v1219_v2 = vsel %vm874_vm1, %v1114_v11, 0.0 }
 0x1a4   :  { %v1011_v52 = vadd.f32 %v1010_v10, %v1009_v33  ;;  %v1206_v60 = vadd.f32 %v1205_v51, %v1204_v49  ;;  %v700_v1 = vpop.f32.mrf.mxu2  ;;  %v1024_v33 = vsel %vm874_vm1, %v2316_v31, 0.0  ;;  %v1116_v49 = vmul.f32 %v2349_v59, %v2349_v59 }
 0x1a5   :  { %v2660_v55 = vadd.f32 %v869_v8, %v700_v1  ;;  %v871_v32 = vpop.f32.mrf.mxu3  ;;  %v1221_v10 = vsel %vm874_vm1, %v1115_v42, 0.0  ;;  %v1026_v31 = vsel %vm874_vm1, %v2349_v59, 0.0  ;;  %v1225_v1 = vsel %vm874_vm1, %v1117_v3, 0.0 }
 0x1a6   :  { %v1013_v54 = vadd.f32 %v1012_v45, %v1011_v52  ;;  %v1208_v62 = vadd.f32 %v1207_v26, %v1206_v60  ;;  %v1223_v26 = vsel %vm874_vm1, %v1116_v49, 0.0  ;;  %v1028_v45 = vsel %vm874_vm1, %v2356_v63, 0.0 }
 0x1a7   :  { %937 = vst.msk [vmem:[%s2788_s2 + $0x1f0] sm:$0xff] %vm874_vm1, %v2660_v55  ;;  %v1030_v59 = vsel %vm874_vm1, %v2389_v28, 0.0  ;;  %v1227_v8 = vsel %vm874_vm1, %v1118_v40, 0.0  ;;  %v1032_v63 = vsel %vm874_vm1, %v2396_v35, 0.0  ;;  %v1034_v28 = vsel %vm874_vm1, %v2415_v58, 0.0 }
 0x1a8   :  { %v1015_v13 = vadd.f32 %v1014_v37, %v1013_v54  ;;  %v1210_v15 = vadd.f32 %v1209_v29, %v1208_v62  ;;  %v1119_v29 = vmul.f32 %v2396_v35, %v2396_v35  ;;  %v1036_v35 = vsel %vm874_vm1, %v2422_v56, 0.0 }
 0x1a9   :  { %v1040_v56 = vsel %vm874_vm1, %v2450_v21, 0.0  ;;  %v1125_v42 = vmul.f32 %v2472_v38, %v2472_v38  ;;  %v1129_v40 = vmul.f32 %v2513_v12, %v2513_v12 }
 0x1aa   :  { %v1017_v5 = vadd.f32 %v1016_v46, %v1015_v13  ;;  %v1212_v44 = vadd.f32 %v1211_v16, %v1210_v15  ;;  %v1120_v13 = vmul.f32 %v2415_v58, %v2415_v58  ;;  %v1229_v46 = vsel %vm874_vm1, %v1119_v29, 0.0 }
 0x1ab   :  { %v1038_v58 = vsel %vm874_vm1, %v2443_v14, 0.0 }
 0x1ac   :  { %v1019_v24 = vadd.f32 %v1018_v9, %v1017_v5  ;;  %v1214_v25 = vadd.f32 %v1213_v39, %v1212_v44  ;;  %v702_v22 = vpop.f32.mrf.mxu2  ;;  %v1231_v39 = vsel %vm874_vm1, %v1120_v13, 0.0  ;;  %v1122_v9 = vmul.f32 %v2443_v14, %v2443_v14 }
 0x1ad   :  { %v2662_v57 = vadd.f32 %v871_v32, %v702_v22  ;;  %v1042_v14 = vsel %vm874_vm1, %v2465_v17, 0.0 }
 0x1ae   :  { %v1021_v30 = vadd.f32 %v1020_v18, %v1019_v24  ;;  %v1216_v36 = vadd.f32 %v1215_v50, %v1214_v25  ;;  %v1233_v25 = vsel %vm874_vm1, %v1121_v0, 0.0  ;;  %v1123_v50 = vmul.f32 %v2450_v21, %v2450_v21 }
 0x1af   :  { %938 = vst.msk [vmem:[%s2788_s2 + $0x1f8] sm:$0xff] %vm874_vm1, %v2662_v57  ;;  %v1044_v21 = vsel %vm874_vm1, %v2472_v38, 0.0  ;;  %v1048_v38 = vsel %vm874_vm1, %v2494_v53, 0.0 }
 0x1b0   :  { %v1023_v61 = vadd.f32 %v1022_v48, %v1021_v30  ;;  %v1218_v4 = vadd.f32 %v1217_v19, %v1216_v36  ;;  %v1235_v30 = vsel %vm874_vm1, %v1122_v9, 0.0  ;;  %v1124_v36 = vmul.f32 %v2465_v17, %v2465_v17 }
 0x1b1   :  { %v1237_v48 = vsel %vm874_vm1, %v1123_v50, 0.0  ;;  %v1046_v17 = vsel %vm874_vm1, %v2487_v47, 0.0  ;;  %v1134_v9 = vmul.f32 %v2660_v55, %v2660_v55 }
 0x1b2   :  { %v1025_v23 = vadd.f32 %v1024_v33, %v1023_v61  ;;  %v1220_v51 = vadd.f32 %v1219_v2, %v1218_v4  ;;  %v1239_v4 = vsel %vm874_vm1, %v1124_v36, 0.0  ;;  %v1126_v2 = vmul.f32 %v2487_v47, %v2487_v47 }
 0x1b3   :  { %v1050_v47 = vsel %vm874_vm1, %v2511_v7, 0.0 }
 0x1b4   :  { %v1222_v52 = vadd.f32 %v1221_v10, %v1220_v51  ;;  %v1027_v60 = vadd.f32 %v1026_v31, %v1025_v23  ;;  %v1241_v23 = vsel %vm874_vm1, %v1125_v42, 0.0  ;;  %v1127_v51 = vmul.f32 %v2494_v53, %v2494_v53 }
 0x1b5   :  { %v1243_v3 = vsel %vm874_vm1, %v1126_v2, 0.0  ;;  %v1052_v53 = vsel %vm874_vm1, %v2513_v12, 0.0  ;;  %v1056_v12 = vsel %vm874_vm1, %v2563_v34, 0.0 }
 0x1b6   :  { %v1029_v54 = vadd.f32 %v1028_v45, %v1027_v60  ;;  %v1224_v62 = vadd.f32 %v1223_v26, %v1222_v52  ;;  %v1128_v52 = vmul.f32 %v2511_v7, %v2511_v7  ;;  %v1245_v45 = vsel %vm874_vm1, %v1127_v51, 0.0 }
 0x1b7   :  { %v1054_v7 = vsel %vm874_vm1, %v2561_v27, 0.0 }
 0x1b8   :  { %v1031_v37 = vadd.f32 %v1030_v59, %v1029_v54  ;;  %v1226_v6 = vadd.f32 %v1225_v1, %v1224_v62  ;;  %v1247_v1 = vsel %vm874_vm1, %v1128_v52, 0.0  ;;  %v1130_v59 = vmul.f32 %v2561_v27, %v2561_v27 }
 0x1b9   :  { %v1058_v27 = vsel %vm874_vm1, %v2606_v43, 0.0 }
 0x1ba   :  { %v1033_v15 = vadd.f32 %v1032_v63, %v1031_v37  ;;  %v1228_v16 = vadd.f32 %v1227_v8, %v1226_v6  ;;  %v1249_v6 = vsel %vm874_vm1, %v1129_v40, 0.0  ;;  %v1131_v8 = vmul.f32 %v2563_v34, %v2563_v34 }
 0x1bb   :  { %v1060_v34 = vsel %vm874_vm1, %v2608_v41, 0.0 }
 0x1bc   :  { %v1035_v5 = vadd.f32 %v1034_v28, %v1033_v15  ;;  %v1230_v44 = vadd.f32 %v1229_v46, %v1228_v16  ;;  %v1251_v15 = vsel %vm874_vm1, %v1130_v59, 0.0  ;;  %v1132_v16 = vmul.f32 %v2606_v43, %v2606_v43 }
 0x1bd   :  { %v1253_v0 = vsel %vm874_vm1, %v1131_v8, 0.0  ;;  %v1062_v43 = vsel %vm874_vm1, %v2660_v55, 0.0 }
 0x1be   :  { %v1037_v20 = vadd.f32 %v1036_v35, %v1035_v5  ;;  %v1232_v24 = vadd.f32 %v1231_v39, %v1230_v44  ;;  %v1133_v5 = vmul.f32 %v2608_v41, %v2608_v41  ;;  %v1255_v35 = vsel %vm874_vm1, %v1132_v16, 0.0 }
 0x1bf   :  { %v1064_v41 = vsel %vm874_vm1, %v2662_v57, 0.0 }
 0x1c0   :  { %v1039_v18 = vadd.f32 %v1038_v58, %v1037_v20  ;;  %v1234_v11 = vadd.f32 %v1233_v25, %v1232_v24  ;;  %v1257_v25 = vsel %vm874_vm1, %v1133_v5, 0.0  ;;  %v1135_v58 = vmul.f32 %v2662_v57, %v2662_v57 }
 0x1c2   :  { %v1041_v22 = vadd.f32 %v1040_v56, %v1039_v18  ;;  %v1236_v19 = vadd.f32 %v1235_v30, %v1234_v11  ;;  %v1259_v11 = vsel %vm874_vm1, %v1134_v9, 0.0  ;;  %v1261_v36 = vsel %vm874_vm1, %v1135_v58, 0.0 }
 0x1c4   :  { %v1043_v32 = vadd.f32 %v1042_v14, %v1041_v22  ;;  %v1238_v61 = vadd.f32 %v1237_v48, %v1236_v19 }
 0x1c6   :  { %v1045_v33 = vadd.f32 %v1044_v21, %v1043_v32  ;;  %v1240_v49 = vadd.f32 %v1239_v4, %v1238_v61 }
 0x1c8   :  { %v1047_v10 = vadd.f32 %v1046_v17, %v1045_v33  ;;  %v1242_v31 = vadd.f32 %v1241_v23, %v1240_v49 }
 0x1ca   :  { %v1049_v60 = vadd.f32 %v1048_v38, %v1047_v10  ;;  %v1244_v26 = vadd.f32 %v1243_v3, %v1242_v31 }
 0x1cc   :  { %v1051_v54 = vadd.f32 %v1050_v47, %v1049_v60  ;;  %v1246_v62 = vadd.f32 %v1245_v45, %v1244_v26 }
 0x1ce   :  { %v1248_v29 = vadd.f32 %v1247_v1, %v1246_v62  ;;  %v1053_v37 = vadd.f32 %v1052_v53, %v1051_v54 }
 0x1d0   :  { %v1250_v63 = vadd.f32 %v1249_v6, %v1248_v29  ;;  %v1055_v13 = vadd.f32 %v1054_v7, %v1053_v37 }
 0x1d2   :  { %v1252_v46 = vadd.f32 %v1251_v15, %v1250_v63  ;;  %v1057_v28 = vadd.f32 %v1056_v12, %v1055_v13 }
 0x1d4   :  { %v1254_v44 = vadd.f32 %v1253_v0, %v1252_v46  ;;  %v1059_v39 = vadd.f32 %v1058_v27, %v1057_v28 }
 0x1d6   :  { %v1256_v20 = vadd.f32 %v1255_v35, %v1254_v44  ;;  %v1061_v24 = vadd.f32 %v1060_v34, %v1059_v39 }
 0x1d8   :  { %v1258_v50 = vadd.f32 %v1257_v25, %v1256_v20  ;;  %v1063_v18 = vadd.f32 %v1062_v43, %v1061_v24 }
 0x1da   :  { %v1260_v30 = vadd.f32 %v1259_v11, %v1258_v50  ;;  %v1065_v56 = vadd.f32 %v1064_v41, %v1063_v18 }
 0x1dc   :  { %v1066_v22 = vrot.slane %v1065_v56, 4  ;;  %v1262_v19 = vadd.f32 %v1261_v36, %v1260_v30 }
 0x1de   :  { %v1067_v48 = vadd.f32 %v1066_v22, %v1065_v56  ;;  %v1263_v14 = vrot.slane %v1262_v19, 4 }
 0x1e0   :  { %v1068_v42 = vrot.slane %v1067_v48, 2  ;;  %v1264_v55 = vadd.f32 %v1263_v14, %v1262_v19 }
 0x1e2   :  { %v1069_v32 = vadd.f32 %v1068_v42, %v1067_v48  ;;  %v1265_v61 = vrot.slane %v1264_v55, 2 }
 0x1e4   :  { %v1070_v4 = vrot.slane %v1069_v32, 1  ;;  %v1266_v21 = vadd.f32 %v1265_v61, %v1264_v55 }
 0x1e6   :  { %v1071_v2 = vadd.f32 %v1070_v4, %v1069_v32  ;;  %v1267_v33 = vrot.slane %v1266_v21, 1 }
 0x1e8   :  { %v1268_v49 = vadd.f32 %v1267_v33, %v1266_v21  ;;  %1269 = vst.msk [vmem:[%s2789_s3] sm:$0xff] %vm874_vm1, %v1071_v2 }
 0x1ea   :  { %1270 = vst.msk [vmem:[%s2790_s4] sm:$0xff] %vm874_vm1, %v1268_v49 }

// kernel: tile.148
= control target key start
LH: loop header
LB: loop body
LE: loop exit
PB: predicated region body
PF: predicated region fallthrough
CT: control target
= control target key end

     0   :  { %s28_s0 = inlined_call_operand.vmem [shape: f32[32], index: 0, kind: input, shape index: {}]   ;;  %s29_s1 = inlined_call_operand.vmem [shape: f32[16,32], index: 1, kind: output, shape index: {}]  }
   0x1   :  { %v4_v0 = vld [vmem:[%s28_s0] ss:$0 sm:$0xff] }
   0x2   :  { %5 = vst [vmem:[%s29_s1] sm:$0xff] %v4_v0 }
   0x3   :  { %8 = vst [vmem:[%s29_s1 + $0x8] sm:$0xff] %v4_v0 }

// kernel: tile.149
= control target key start
LH: loop header
LB: loop body
LE: loop exit
PB: predicated region body
PF: predicated region fallthrough
CT: control target
= control target key end

     0   :  { %s56_s8 = smov 96   ;;  %s57_s11 = smov 32   ;;  %vm3_vm0 = vcmask 261120   ;;  %vm9_vm1 = vcmask 1048320   ;;  %vm15_vm2 = vcmask 785920   ;;  %vm21_vm3 = vcmask 523520   ;;  %s93_s0 = inlined_call_operand.vmem [shape: f32[16,32], index: 0, kind: input, shape index: {}]   ;;  %s94_s1 = inlined_call_operand.vmem [shape: f32[1,512], index: 1, kind: output, shape index: {}]  }
   0x1   :  { %v47_v0 = vld [vmem:[%s93_s0 + $0x3] ss:$4 sm:$0xf]   ;;  %v49_v1 = vld [vmem:[%s93_s0 + $0x1] ss:$4 sm:$0xf]  }
   0x2   :  { %7 = vrot.lane.b32.xlu0 %v47_v0, %s56_s8  ;;  %19 = vrot.lane.b32.xlu1 %v49_v1, %s57_s11  ;;  %v48_v2 = vld [vmem:[%s93_s0 + $0x2] ss:$4 sm:$0xf]   ;;  %s58_s14 = smov 64  }
   0x3   :  { %v2_v3 = vld [vmem:[%s93_s0] ss:$4 sm:$0xf]  }
   0x4   :  { %4 = vst.msk [vmem:[#allocation0] ss:$8 sm:$0xf] %vm3_vm0, %v2_v3  }
   0xa   :  { %13 = vrot.lane.b32.xlu0 %v48_v2, %s58_s14 }
  0x74   :  { %v8_v4 = vpop.permute.xlu0 %7   ;;  %v20_v5 = vpop.permute.xlu1 %19  }
  0x75   :  { %10 = vst.msk [vmem:[#allocation0] ss:$8 sm:$0xf] %vm9_vm1, %v8_v4  }
  0x7c   :  { %v14_v6 = vpop.permute.xlu0 %13  }
  0x7d   :  { %16 = vst.msk [vmem:[#allocation0] ss:$8 sm:$0xf] %vm15_vm2, %v14_v6  }
  0x7e   :  { %22 = vst.msk [vmem:[#allocation0] ss:$8 sm:$0xf] %vm21_vm3, %v20_v5  }
  0x85   :  { %v25_v7 = vld [vmem:[#allocation0] sm:$0x1]  ;;  %v30_v8 = vld [vmem:[#allocation0 + $0x8] sm:$0x1]  ;;  %v36_v9 = vld [vmem:[#allocation0 + $0x10] sm:$0x1] }
  0x86   :  { %28 = vst [vmem:[%s94_s1] sm:$0x1] %v25_v7  ;;  %v42_v10 = vld [vmem:[#allocation0 + $0x18] sm:$0x1] }
  0x87   :  { %50 = vst [vmem:[%s94_s1 + $0x1] sm:$0x1] %v30_v8 }
  0x88   :  { %51 = vst [vmem:[%s94_s1 + $0x2] sm:$0x1] %v36_v9 }
  0x89   :  { %52 = vst [vmem:[%s94_s1 + $0x3] sm:$0x1] %v42_v10 }

// kernel: _lambda_.22
= control target key start
LH: loop header
LB: loop body
LE: loop exit
PB: predicated region body
PF: predicated region fallthrough
CT: control target
= control target key end

     0   :  { %s264_s0 = inlined_call_operand.vmem [shape: f32[32,512], index: 0, kind: input, shape index: {}]   ;;  %s265_s1 = inlined_call_operand.vmem [shape: f32[1,512], index: 1, kind: input, shape index: {}]   ;;  %s266_s2 = inlined_call_operand.vmem [shape: f32[1,512], index: 2, kind: input, shape index: {}]   ;;  %s267_s3 = inlined_call_operand.vmem [shape: f32[32,512], index: 3, kind: output, shape index: {}]  }
   0x1   :  { %v14_v0 = vld [vmem:[%s264_s0] sm:$0xff]  ;;  %v15_v5 = vld [vmem:[%s264_s0 + $0x8] sm:$0xff]  ;;  %v16_v8 = vld [vmem:[%s264_s0 + $0x10] sm:$0xff] }
   0x2   :  { %v30_v1 = vld [vmem:[%s265_s1] sm:$0xf]  ;;  %v17_v11 = vld [vmem:[%s264_s0 + $0x18] sm:$0xff]  ;;  %v19_v18 = vld [vmem:[%s264_s0 + $0x28] sm:$0xff] }
   0x3   :  { %v56_v2 = vld [vmem:[%s266_s2] sm:$0xf]  ;;  %v32_v3 = vperm.slane %v30_v1, 0  ;;  %v33_v6 = vperm.slane %v30_v1, 1  ;;  %v34_v9 = vperm.slane %v30_v1, 2  ;;  %v35_v12 = vperm.slane %v30_v1, 3 }
   0x4   :  { %v147_v4 = vperm.slane %v56_v2, 0  ;;  %v152_v7 = vperm.slane %v56_v2, 1  ;;  %v157_v10 = vperm.slane %v56_v2, 2  ;;  %v162_v13 = vperm.slane %v56_v2, 3  ;;  %v18_v14 = vld [vmem:[%s264_s0 + $0x20] sm:$0xff]  ;;  %v20_v19 = vld [vmem:[%s264_s0 + $0x30] sm:$0xff] }
   0x5   :  { %v40_v15 = vmul.f32 %v32_v3, %v14_v0  ;;  %v41_v16 = vmul.f32 %v33_v6, %v15_v5  ;;  %v44_v17 = vmul.f32 %v32_v3, %v18_v14  ;;  %v21_v20 = vld [vmem:[%s264_s0 + $0x38] sm:$0xff]  ;;  %v42_v21 = vmul.f32 %v34_v9, %v16_v8  ;;  %v22_v33 = vld [vmem:[%s264_s0 + $0x40] sm:$0xff]  ;;  %v23_v34 = vld [vmem:[%s264_s0 + $0x48] sm:$0xff] }
   0x6   :  { %v43_v22 = vmul.f32 %v35_v12, %v17_v11  ;;  %v45_v23 = vmul.f32 %v33_v6, %v19_v18  ;;  %v46_v24 = vmul.f32 %v34_v9, %v20_v19  ;;  %v47_v28 = vmul.f32 %v35_v12, %v21_v20  ;;  %v24_v35 = vld [vmem:[%s264_s0 + $0x50] sm:$0xff]  ;;  %v25_v38 = vld [vmem:[%s264_s0 + $0x58] sm:$0xff]  ;;  %v26_v39 = vld [vmem:[%s264_s0 + $0x60] sm:$0xff] }
   0x7   :  { %v66_v25 = vadd.f32 %v147_v4, %v40_v15  ;;  %v67_v26 = vadd.f32 %v152_v7, %v41_v16  ;;  %v70_v27 = vadd.f32 %v147_v4, %v44_v17  ;;  %v68_v29 = vadd.f32 %v157_v10, %v42_v21  ;;  %v27_v40 = vld [vmem:[%s264_s0 + $0x68] sm:$0xff]  ;;  %v28_v45 = vld [vmem:[%s264_s0 + $0x70] sm:$0xff]  ;;  %v29_v50 = vld [vmem:[%s264_s0 + $0x78] sm:$0xff] }
   0x8   :  { %v69_v30 = vadd.f32 %v162_v13, %v43_v22  ;;  %v71_v31 = vadd.f32 %v152_v7, %v45_v23  ;;  %v72_v32 = vadd.f32 %v157_v10, %v46_v24  ;;  %v73_v44 = vadd.f32 %v162_v13, %v47_v28 }
   0x9   :  { %v82_v36 = vmax.f32 %v66_v25, 0.0  ;;  %v83_v37 = vmax.f32 %v67_v26, 0.0  ;;  %v84_v41 = vmax.f32 %v68_v29, 0.0  ;;  %v86_v43 = vmax.f32 %v70_v27, 0.0 }
   0xa   :  { %v85_v42 = vmax.f32 %v69_v30, 0.0  ;;  %v87_v46 = vmax.f32 %v71_v31, 0.0  ;;  %v48_v47 = vmul.f32 %v32_v3, %v22_v33  ;;  %v49_v48 = vmul.f32 %v33_v6, %v23_v34 }
   0xb   :  { %98 = vst [vmem:[%s267_s3] sm:$0xff] %v82_v36  ;;  %v50_v49 = vmul.f32 %v34_v9, %v24_v35  ;;  %v88_v51 = vmax.f32 %v72_v32, 0.0  ;;  %v51_v52 = vmul.f32 %v35_v12, %v25_v38  ;;  %v52_v53 = vmul.f32 %v32_v3, %v26_v39 }
   0xc   :  { %99 = vst [vmem:[%s267_s3 + $0x8] sm:$0xff] %v83_v37  ;;  %v53_v54 = vmul.f32 %v33_v6, %v27_v40  ;;  %v74_v55 = vadd.f32 %v147_v4, %v48_v47  ;;  %v75_v56 = vadd.f32 %v152_v7, %v49_v48  ;;  %v54_v58 = vmul.f32 %v34_v9, %v28_v45 }
   0xd   :  { %100 = vst [vmem:[%s267_s3 + $0x10] sm:$0xff] %v84_v41  ;;  %v76_v57 = vadd.f32 %v157_v10, %v50_v49  ;;  %v89_v59 = vmax.f32 %v73_v44, 0.0  ;;  %v77_v60 = vadd.f32 %v162_v13, %v51_v52  ;;  %v55_v61 = vmul.f32 %v35_v12, %v29_v50 }
   0xe   :  { %101 = vst [vmem:[%s267_s3 + $0x18] sm:$0xff] %v85_v42  ;;  %v90_v62 = vmax.f32 %v74_v55, 0.0  ;;  %v78_v63 = vadd.f32 %v147_v4, %v52_v53  ;;  %v91_v0 = vmax.f32 %v75_v56, 0.0  ;;  %v79_v1 = vadd.f32 %v152_v7, %v53_v54 }
   0xf   :  { %102 = vst [vmem:[%s267_s3 + $0x20] sm:$0xff] %v86_v43  ;;  %v92_v2 = vmax.f32 %v76_v57, 0.0  ;;  %v80_v3 = vadd.f32 %v157_v10, %v54_v58  ;;  %v93_v5 = vmax.f32 %v77_v60, 0.0  ;;  %v81_v4 = vadd.f32 %v162_v13, %v55_v61 }
  0x10   :  { %103 = vst [vmem:[%s267_s3 + $0x28] sm:$0xff] %v87_v46  ;;  %v94_v6 = vmax.f32 %v78_v63, 0.0  ;;  %v95_v7 = vmax.f32 %v79_v1, 0.0 }
  0x11   :  { %104 = vst [vmem:[%s267_s3 + $0x30] sm:$0xff] %v88_v51  ;;  %v96_v8 = vmax.f32 %v80_v3, 0.0  ;;  %v97_v9 = vmax.f32 %v81_v4, 0.0 }
  0x12   :  { %105 = vst [vmem:[%s267_s3 + $0x38] sm:$0xff] %v89_v59 }
  0x13   :  { %106 = vst [vmem:[%s267_s3 + $0x40] sm:$0xff] %v90_v62 }
  0x14   :  { %107 = vst [vmem:[%s267_s3 + $0x48] sm:$0xff] %v91_v0 }
  0x15   :  { %108 = vst [vmem:[%s267_s3 + $0x50] sm:$0xff] %v92_v2 }
  0x16   :  { %109 = vst [vmem:[%s267_s3 + $0x58] sm:$0xff] %v93_v5 }
  0x17   :  { %110 = vst [vmem:[%s267_s3 + $0x60] sm:$0xff] %v94_v6 }
  0x18   :  { %111 = vst [vmem:[%s267_s3 + $0x68] sm:$0xff] %v95_v7 }
  0x19   :  { %112 = vst [vmem:[%s267_s3 + $0x70] sm:$0xff] %v96_v8 }
  0x1a   :  { %113 = vst [vmem:[%s267_s3 + $0x78] sm:$0xff] %v97_v9 }

// kernel: _lambda_.23
= control target key start
LH: loop header
LB: loop body
LE: loop exit
PB: predicated region body
PF: predicated region fallthrough
CT: control target
= control target key end

     0   :  { %vm767_vm0 = vcmask 261120   ;;  %s3669_s1 = inlined_call_operand.vmem [shape: bf16[288,32], index: 1, kind: input, shape index: {}]   ;;  %s3670_s0 = inlined_call_operand.vmem [shape: bf16[512,288], index: 0, kind: input, shape index: {}]   ;;  %s3671_s2 = inlined_call_operand.vmem [shape: f32[512,32], index: 2, kind: output, shape index: {0}]   ;;  %s3672_s3 = inlined_call_operand.vmem [shape: f32[8,32], index: 3, kind: output, shape index: {1}]   ;;  %s3673_s4 = inlined_call_operand.vmem [shape: f32[8,32], index: 4, kind: output, shape index: {2}]  }
   0x1   :  { %v2370_v0 = vld [vmem:[%s3669_s1 + $0x38] sm:$0xff]  ;;  %v2433_v2 = vld [vmem:[%s3669_s1 + $0x88] sm:$0xff]  ;;  %v2369_v3 = vld [vmem:[%s3669_s1 + $0x30] sm:$0xff] }
   0x2   :  { %v2378_v1 = vld [vmem:[%s3669_s1 + $0x78] sm:$0xff]  ;;  %864 = vmatpush.bf16.msra.mxu0 %v2370_v0  ;;  %2381 = vmatpush.bf16.msra.mxu3 %v2370_v0  ;;  %v2377_v4 = vld [vmem:[%s3669_s1 + $0x70] sm:$0xff]  ;;  %v2445_v5 = vld [vmem:[%s3669_s1 + $0x80] sm:$0xff] }
   0x3   :  { %1033 = vmatpush.bf16.msra.mxu1 %v2378_v1  ;;  %1208 = vmatpush.bf16.msra.mxu2 %v2433_v2  ;;  %v1789_v6 = vld [vmem:[%s3670_s0 + $0x8] sm:$0xf]  ;;  %v2269_v7 = vld [vmem:[%s3670_s0 + $0x10] sm:$0xf0]  ;;  %v2367_v11 = vld [vmem:[%s3669_s1 + $0x20] sm:$0xff] }
   0x4   :  { %v1790_v8 = vor.u32 %v2269_v7, %v1789_v6  ;;  %v2368_v9 = vld [vmem:[%s3669_s1 + $0x28] sm:$0xff]  ;;  %v2375_v12 = vld [vmem:[%s3669_s1 + $0x60] sm:$0xff]  ;;  %v2366_v13 = vld [vmem:[%s3669_s1 + $0x18] sm:$0xff] }
   0x5   :  { %v2376_v10 = vld [vmem:[%s3669_s1 + $0x68] sm:$0xff]  ;;  %v2374_v14 = vld [vmem:[%s3669_s1 + $0x58] sm:$0xff]  ;;  %v2365_v15 = vld [vmem:[%s3669_s1 + $0x10] sm:$0xff] }
   0x6   :  { %865 = vmatpush.bf16.msra.mxu0 %v2369_v3  ;;  %2382 = vmatpush.bf16.msra.mxu3 %v2369_v3  ;;  %v2373_v16 = vld [vmem:[%s3669_s1 + $0x50] sm:$0xff]  ;;  %v1801_v17 = vld [vmem:[%s3670_s0 + $0x20] sm:$0xf]  ;;  %v2272_v18 = vld [vmem:[%s3670_s0 + $0x28] sm:$0xf0] }
   0x7   :  { %1034 = vmatpush.bf16.msra.mxu1 %v2377_v4  ;;  %1209 = vmatpush.bf16.msra.mxu2 %v2445_v5  ;;  %v1802_v19 = vor.u32 %v2272_v18, %v1801_v17  ;;  %v2364_v20 = vld [vmem:[%s3669_s1 + $0x8] sm:$0xff]  ;;  %v2363_v22 = vld [vmem:[%s3669_s1] sm:$0xff]  ;;  %v1783_v29 = vld [vmem:[%s3670_s0 + $0xc] sm:$0xf0] }
   0x8   :  { %v2372_v21 = vld [vmem:[%s3669_s1 + $0x48] sm:$0xff]  ;;  %v2371_v23 = vld [vmem:[%s3669_s1 + $0x40] sm:$0xff]  ;;  %v1813_v33 = vld [vmem:[%s3670_s0 + $0x38] sm:$0xf] }
   0x9   :  { %v1781_v24 = vld [vmem:[%s3670_s0] sm:$0xf]  ;;  %v2268_v25 = vld [vmem:[%s3670_s0 + $0x8] sm:$0xf0]  ;;  %v2267_v28 = vld [vmem:[%s3670_s0 + $0x4] sm:$0xf] }
   0xa   :  { %2235 = vmatmul.msk.bf16.vlgmr.msra.gmra.mxu2 %vm767_vm0, %v1790_v8  ;;  %866 = vmatpush.bf16.msra.mxu0 %v2368_v9  ;;  %v2069_v26 = vld [vmem:[%s3670_s0 + $0x240] sm:$0xf]  ;;  %v2340_v27 = vld [vmem:[%s3670_s0 + $0x248] sm:$0xf0]  ;;  %v1782_v30 = vor.u32 %v2268_v25, %v1781_v24  ;;  %v1786_v32 = vor.u32 %v2267_v28, %v1783_v29  ;;  %v2275_v34 = vld [vmem:[%s3670_s0 + $0x40] sm:$0xf0] }
   0xb   :  { %2383 = vmatpush.bf16.msra.mxu3 %v2368_v9  ;;  %1035 = vmatpush.bf16.msra.mxu1 %v2376_v10  ;;  %v2070_v31 = vor.u32 %v2340_v27, %v2069_v26  ;;  %v1814_v35 = vor.u32 %v2275_v34, %v1813_v33  ;;  %v1793_v36 = vld [vmem:[%s3670_s0 + $0x18] sm:$0xf]  ;;  %v2271_v37 = vld [vmem:[%s3670_s0 + $0x20] sm:$0xf0]  ;;  %v2270_v40 = vld [vmem:[%s3670_s0 + $0x1c] sm:$0xf] }
   0xc   :  { %v2081_v38 = vld [vmem:[%s3670_s0 + $0x258] sm:$0xf]  ;;  %v2343_v39 = vld [vmem:[%s3670_s0 + $0x260] sm:$0xf0]  ;;  %v1795_v41 = vld [vmem:[%s3670_s0 + $0x24] sm:$0xf0]  ;;  %v1794_v42 = vor.u32 %v2271_v37, %v1793_v36 }
   0xd   :  { %v2082_v43 = vor.u32 %v2343_v39, %v2081_v38  ;;  %v1798_v44 = vor.u32 %v2270_v40, %v1795_v41  ;;  %v1825_v45 = vld [vmem:[%s3670_s0 + $0x50] sm:$0xf]  ;;  %v2278_v46 = vld [vmem:[%s3670_s0 + $0x58] sm:$0xf0]  ;;  %v2273_v52 = vld [vmem:[%s3670_s0 + $0x34] sm:$0xf] }
   0xe   :  { %867 = vmatpush.bf16.msra.mxu0 %v2367_v11  ;;  %v1826_v47 = vor.u32 %v2278_v46, %v1825_v45  ;;  %v1805_v48 = vld [vmem:[%s3670_s0 + $0x30] sm:$0xf]  ;;  %v2274_v49 = vld [vmem:[%s3670_s0 + $0x38] sm:$0xf0]  ;;  %v1807_v53 = vld [vmem:[%s3670_s0 + $0x3c] sm:$0xf0] }
   0xf   :  { %2384 = vmatpush.bf16.msra.mxu3 %v2367_v11  ;;  %1036 = vmatpush.bf16.msra.mxu1 %v2375_v12  ;;  %v2093_v50 = vld [vmem:[%s3670_s0 + $0x270] sm:$0xf]  ;;  %v2346_v51 = vld [vmem:[%s3670_s0 + $0x278] sm:$0xf0]  ;;  %v1806_v54 = vor.u32 %v2274_v49, %v1805_v48  ;;  %v1810_v56 = vor.u32 %v2273_v52, %v1807_v53  ;;  %v1837_v57 = vld [vmem:[%s3670_s0 + $0x68] sm:$0xf] }
  0x10   :  { %v2094_v55 = vor.u32 %v2346_v51, %v2093_v50  ;;  %v2281_v58 = vld [vmem:[%s3670_s0 + $0x70] sm:$0xf0]  ;;  %v1817_v60 = vld [vmem:[%s3670_s0 + $0x48] sm:$0xf]  ;;  %v2276_v0 = vld [vmem:[%s3670_s0 + $0x4c] sm:$0xf] }
  0x11   :  { %v1838_v59 = vor.u32 %v2281_v58, %v1837_v57  ;;  %v2277_v61 = vld [vmem:[%s3670_s0 + $0x50] sm:$0xf0]  ;;  %v2105_v62 = vld [vmem:[%s3670_s0 + $0x288] sm:$0xf]  ;;  %v2284_v6 = vld [vmem:[%s3670_s0 + $0x88] sm:$0xf0] }
  0x12   :  { %868 = vmatpush.bf16.msra.mxu0 %v2366_v13  ;;  %v2349_v63 = vld [vmem:[%s3670_s0 + $0x290] sm:$0xf0]  ;;  %v1829_v8 = vld [vmem:[%s3670_s0 + $0x60] sm:$0xf]  ;;  %v2280_v9 = vld [vmem:[%s3670_s0 + $0x68] sm:$0xf0] }
  0x13   :  { %2385 = vmatpush.bf16.msra.mxu3 %v2366_v13  ;;  %1037 = vmatpush.bf16.msra.mxu1 %v2374_v14  ;;  %v2106_v3 = vor.u32 %v2349_v63, %v2105_v62  ;;  %v2352_v11 = vld [vmem:[%s3670_s0 + $0x2a8] sm:$0xf0]  ;;  %v1831_v13 = vld [vmem:[%s3670_s0 + $0x6c] sm:$0xf0]  ;;  %v1861_v17 = vld [vmem:[%s3670_s0 + $0x98] sm:$0xf] }
  0x14   :  { %v2287_v18 = vld [vmem:[%s3670_s0 + $0xa0] sm:$0xf0]  ;;  %v2282_v24 = vld [vmem:[%s3670_s0 + $0x7c] sm:$0xf]  ;;  %v1843_v25 = vld [vmem:[%s3670_s0 + $0x84] sm:$0xf0] }
  0x15   :  { %v1846_v28 = vor.u32 %v2282_v24, %v1843_v25  ;;  %v1873_v29 = vld [vmem:[%s3670_s0 + $0xb0] sm:$0xf]  ;;  %v2286_v33 = vld [vmem:[%s3670_s0 + $0x98] sm:$0xf0]  ;;  %v2285_v36 = vld [vmem:[%s3670_s0 + $0x94] sm:$0xf] }
  0x16   :  { %869 = vmatpush.bf16.msra.mxu0 %v2365_v15  ;;  %v2141_v34 = vld [vmem:[%s3670_s0 + $0x2d0] sm:$0xf]  ;;  %v1855_v37 = vld [vmem:[%s3670_s0 + $0x9c] sm:$0xf0]  ;;  %v1885_v41 = vld [vmem:[%s3670_s0 + $0xc8] sm:$0xf] }
  0x17   :  { %2386 = vmatpush.bf16.msra.mxu3 %v2365_v15  ;;  %1038 = vmatpush.bf16.msra.mxu1 %v2373_v16  ;;  %v1858_v40 = vor.u32 %v2285_v36, %v1855_v37  ;;  %v2289_v45 = vld [vmem:[%s3670_s0 + $0xb0] sm:$0xf0]  ;;  %v2153_v46 = vld [vmem:[%s3670_s0 + $0x2e8] sm:$0xf]  ;;  %v2288_v48 = vld [vmem:[%s3670_s0 + $0xac] sm:$0xf] }
  0x18   :  { %v1867_v49 = vld [vmem:[%s3670_s0 + $0xb4] sm:$0xf0]  ;;  %v1877_v58 = vld [vmem:[%s3670_s0 + $0xc0] sm:$0xf]  ;;  %v2339_v62 = vld [vmem:[%s3670_s0 + $0x244] sm:$0xf] }
  0x19   :  { %v1870_v53 = vor.u32 %v2288_v48, %v1867_v49  ;;  %v2071_v63 = vld [vmem:[%s3670_s0 + $0x24c] sm:$0xf0] }
  0x1a   :  { %2236 = vmatmul.msk.bf16.gmra.mxu2 %vm767_vm0, %v1802_v19  ;;  %870 = vmatpush.bf16.msra.mxu0 %v2364_v20  ;;  %v1862_v19 = vor.u32 %v2287_v18, %v1861_v17  ;;  %v1889_v18 = vld [vmem:[%s3670_s0 + $0xd8] sm:$0xf] }
  0x1b   :  { %2387 = vmatpush.bf16.msra.mxu3 %v2364_v20  ;;  %1039 = vmatpush.bf16.msra.mxu1 %v2372_v21  ;;  %v1841_v20 = vld [vmem:[%s3670_s0 + $0x78] sm:$0xf] }
  0x1e   :  { %871 = vmatpush.bf16.msra.mxu0 %v2363_v22 }
  0x1f   :  { %2388 = vmatpush.bf16.msra.mxu3 %v2363_v22  ;;  %1040 = vmatpush.bf16.msra.mxu1 %v2371_v23  ;;  %v2129_v22 = vld [vmem:[%s3670_s0 + $0x2b8] sm:$0xf] }
  0x21   :  { %872 = vmatmul.bf16.vlgmr.msra.gmra.mxu0 %v1782_v30  ;;  %v2290_v30 = vld [vmem:[%s3670_s0 + $0xb8] sm:$0xf0] }
  0x22   :  { %992 = vmatmul.bf16.vlgmr.msra.gmra.mxu3 %v2070_v31  ;;  %1041 = vmatmul.bf16.vlgmr.msra.gmra.mxu1 %v1786_v32  ;;  %v1874_v31 = vor.u32 %v2290_v30, %v1873_v29  ;;  %v1853_v32 = vld [vmem:[%s3670_s0 + $0x90] sm:$0xf] }
  0x23   :  { %2389 = vmatpush.bf16.msrb.mxu3 %v2378_v1  ;;  %v1819_v1 = vld [vmem:[%s3670_s0 + $0x54] sm:$0xf0]  ;;  %v1854_v38 = vor.u32 %v2286_v33, %v1853_v32 }
  0x27   :  { %2390 = vmatpush.bf16.msrb.mxu3 %v2377_v4  ;;  %v1822_v4 = vor.u32 %v2276_v0, %v1819_v1 }
  0x2a   :  { %2237 = vmatmul.msk.bf16.gmra.mxu2 %vm767_vm0, %v1814_v35  ;;  %v2358_v35 = vld [vmem:[%s3670_s0 + $0x2d8] sm:$0xf0] }
  0x2b   :  { %2391 = vmatpush.bf16.msrb.mxu3 %v2376_v10  ;;  %v2117_v10 = vld [vmem:[%s3670_s0 + $0x2a0] sm:$0xf]  ;;  %v2142_v39 = vor.u32 %v2358_v35, %v2141_v34 }
  0x2c   :  { %v2118_v15 = vor.u32 %v2352_v11, %v2117_v10 }
  0x2f   :  { %2392 = vmatpush.bf16.msrb.mxu3 %v2375_v12  ;;  %v2279_v12 = vld [vmem:[%s3670_s0 + $0x64] sm:$0xf] }
  0x31   :  { %877 = vmatmul.bf16.gmra.mxu0 %v1794_v42  ;;  %v2293_v42 = vld [vmem:[%s3670_s0 + $0xd0] sm:$0xf0] }
  0x32   :  { %997 = vmatmul.bf16.gmra.mxu3 %v2082_v43  ;;  %1046 = vmatmul.bf16.gmra.mxu1 %v1798_v44  ;;  %v1886_v43 = vor.u32 %v2293_v42, %v1885_v41  ;;  %v1865_v44 = vld [vmem:[%s3670_s0 + $0xa8] sm:$0xf]  ;;  %v2302_v41 = vld [vmem:[%s3670_s0 + $0x118] sm:$0xf0] }
  0x33   :  { %2393 = vmatpush.bf16.msrb.mxu3 %v2374_v14  ;;  %v1830_v14 = vor.u32 %v2280_v9, %v1829_v8  ;;  %v1866_v51 = vor.u32 %v2289_v45, %v1865_v44  ;;  %v1909_v8 = vld [vmem:[%s3670_s0 + $0xf8] sm:$0xf]  ;;  %v2299_v9 = vld [vmem:[%s3670_s0 + $0x100] sm:$0xf0] }
  0x37   :  { %2394 = vmatpush.bf16.msrb.mxu3 %v2373_v16  ;;  %v1834_v16 = vor.u32 %v2279_v12, %v1831_v13  ;;  %v1910_v13 = vor.u32 %v2299_v9, %v1909_v8 }
  0x3a   :  { %2238 = vmatmul.msk.bf16.gmra.mxu2 %vm767_vm0, %v1826_v47  ;;  %v2361_v47 = vld [vmem:[%s3670_s0 + $0x2f0] sm:$0xf0] }
  0x3b   :  { %2395 = vmatpush.bf16.msrb.mxu3 %v2372_v21  ;;  %v2283_v21 = vld [vmem:[%s3670_s0 + $0x80] sm:$0xf0]  ;;  %v2154_v52 = vor.u32 %v2361_v47, %v2153_v46 }
  0x3c   :  { %v1842_v26 = vor.u32 %v2283_v21, %v1841_v20  ;;  %v2294_v20 = vld [vmem:[%s3670_s0 + $0xdc] sm:$0xf]  ;;  %v1891_v21 = vld [vmem:[%s3670_s0 + $0xe4] sm:$0xf0] }
  0x3d   :  { %v1894_v34 = vor.u32 %v2294_v20, %v1891_v21 }
  0x3f   :  { %2396 = vmatpush.bf16.msrb.mxu3 %v2371_v23  ;;  %v2355_v23 = vld [vmem:[%s3670_s0 + $0x2c0] sm:$0xf0] }
  0x40   :  { %v2130_v27 = vor.u32 %v2355_v23, %v2129_v22  ;;  %v2342_v22 = vld [vmem:[%s3670_s0 + $0x25c] sm:$0xf]  ;;  %v2083_v23 = vld [vmem:[%s3670_s0 + $0x264] sm:$0xf0] }
  0x41   :  { %882 = vmatmul.bf16.gmra.mxu0 %v1806_v54  ;;  %v1897_v54 = vld [vmem:[%s3670_s0 + $0xe0] sm:$0xf]  ;;  %v2086_v35 = vor.u32 %v2342_v22, %v2083_v23 }
  0x42   :  { %1002 = vmatmul.bf16.gmra.mxu3 %v2094_v55  ;;  %1051 = vmatmul.bf16.gmra.mxu1 %v1810_v56  ;;  %v2296_v55 = vld [vmem:[%s3670_s0 + $0xe8] sm:$0xf0] }
  0x43   :  { %2397 = vmatpush.bf16.msra.mxu3 %v2433_v2  ;;  %v1818_v2 = vor.u32 %v2277_v61, %v1817_v60  ;;  %v1898_v57 = vor.u32 %v2296_v55, %v1897_v54  ;;  %v2291_v60 = vld [vmem:[%s3670_s0 + $0xc4] sm:$0xf]  ;;  %v1879_v61 = vld [vmem:[%s3670_s0 + $0xcc] sm:$0xf0]  ;;  %v2298_v55 = vld [vmem:[%s3670_s0 + $0xf8] sm:$0xf0] }
  0x44   :  { %v1901_v54 = vld [vmem:[%s3670_s0 + $0xf0] sm:$0xf] }
  0x47   :  { %2398 = vmatpush.bf16.msra.mxu3 %v2445_v5  ;;  %v1849_v5 = vld [vmem:[%s3670_s0 + $0x80] sm:$0xf] }
  0x48   :  { %v1850_v7 = vor.u32 %v2284_v6, %v1849_v5 }
  0x4a   :  { %2239 = vmatmul.msk.bf16.gmra.mxu2 %vm767_vm0, %v1838_v59  ;;  %v2292_v59 = vld [vmem:[%s3670_s0 + $0xc8] sm:$0xf0] }
  0x4b   :  { %v1878_v1 = vor.u32 %v2292_v59, %v1877_v58  ;;  %v2345_v58 = vld [vmem:[%s3670_s0 + $0x274] sm:$0xf]  ;;  %v2095_v59 = vld [vmem:[%s3670_s0 + $0x27c] sm:$0xf0] }
  0x51   :  { %887 = vmatmul.bf16.gmra.mxu0 %v1818_v2 }
  0x52   :  { %1007 = vmatmul.bf16.gmra.mxu3 %v2106_v3  ;;  %1056 = vmatmul.bf16.gmra.mxu1 %v1822_v4  ;;  %v1882_v3 = vor.u32 %v2291_v60, %v1879_v61  ;;  %v2074_v4 = vor.u32 %v2339_v62, %v2071_v63 }
  0x5a   :  { %2240 = vmatmul.msk.bf16.gmra.mxu2 %vm767_vm0, %v1850_v7 }
  0x61   :  { %892 = vmatmul.bf16.gmra.mxu0 %v1830_v14 }
  0x62   :  { %1012 = vmatmul.bf16.gmra.mxu3 %v2118_v15  ;;  %1061 = vmatmul.bf16.gmra.mxu1 %v1834_v16 }
  0x6a   :  { %2241 = vmatmul.msk.bf16.gmra.mxu2 %vm767_vm0, %v1862_v19  ;;  %v2295_v19 = vld [vmem:[%s3670_s0 + $0xe0] sm:$0xf0] }
  0x6b   :  { %v1890_v30 = vor.u32 %v2295_v19, %v1889_v18 }
  0x71   :  { %897 = vmatmul.bf16.gmra.mxu0 %v1842_v26 }
  0x72   :  { %1017 = vmatmul.bf16.gmra.mxu3 %v2130_v27  ;;  %1066 = vmatmul.bf16.gmra.mxu1 %v1846_v28 }
  0x7a   :  { %2242 = vmatmul.msk.bf16.gmra.mxu2 %vm767_vm0, %v1874_v31 }
  0x81   :  { %902 = vmatmul.bf16.gmra.mxu0 %v1854_v38 }
  0x82   :  { %1022 = vmatmul.bf16.gmra.mxu3 %v2142_v39  ;;  %1071 = vmatmul.bf16.gmra.mxu1 %v1858_v40  ;;  %v1921_v40 = vld [vmem:[%s3670_s0 + $0x110] sm:$0xf] }
  0x83   :  { %v1922_v49 = vor.u32 %v2302_v41, %v1921_v40 }
  0x8a   :  { %2243 = vmatmul.msk.bf16.gmra.mxu2 %vm767_vm0, %v1886_v43 }
  0x8d   :  { %v1211_v50 = vpop.f32.mrf.mxu2 }
  0x91   :  { %907 = vmatmul.bf16.gmra.mxu0 %v1866_v51 }
  0x92   :  { %1027 = vmatmul.bf16.gmra.mxu3 %v2154_v52  ;;  %1076 = vmatmul.bf16.gmra.mxu1 %v1870_v53 }
  0x95   :  { %v1213_v56 = vpop.f32.mrf.mxu2 }
  0x9a   :  { %2244 = vmatmul.msk.bf16.gmra.mxu2 %vm767_vm0, %v1898_v57  ;;  %v1903_v57 = vld [vmem:[%s3670_s0 + $0xfc] sm:$0xf0] }
  0x9d   :  { %v1216_v0 = vpop.f32.mrf.mxu2 }
  0x9e   :  { %v873_v2 = vpop.f32.mrf.mxu0 }
  0x9f   :  { %v1042_v5 = vpop.f32.mrf.mxu1 }
  0xa0   :  { %v1043_v6 = vadd.f32 %v1042_v5, %v873_v2  ;;  %v2098_v5 = vor.u32 %v2345_v58, %v2095_v59 }
  0xa1   :  { %912 = vmatmul.bf16.gmra.mxu0 %v1878_v1  ;;  %v1902_v1 = vor.u32 %v2298_v55, %v1901_v54 }
  0xa2   :  { %v1212_v7 = vadd.f32 %v1211_v50, %v1043_v6  ;;  %1081 = vmatmul.bf16.gmra.mxu1 %v1882_v3  ;;  %1161 = vmatmul.bf16.vlgmr.msrb.gmra.mxu3 %v2074_v4 }
  0xa4   :  { %1371 = vst.msk [vmem:[%s3671_s2] sm:$0xff] %vm767_vm0, %v1212_v7  ;;  %v1568_v16 = vmul.f32 %v1212_v7, %v1212_v7  ;;  %v1435_v24 = vsel %vm767_vm0, %v1212_v7, 0.0 }
  0xa5   :  { %v2728_v10 = vpop.f32.mrf.mxu3  ;;  %v1218_v11 = vpop.f32.mrf.mxu2 }
  0xa6   :  { %v875_v12 = vpop.f32.mrf.mxu0  ;;  %v1632_v31 = vsel %vm767_vm0, %v1568_v16, 0.0 }
  0xa7   :  { %v1044_v14 = vpop.f32.mrf.mxu1 }
  0xa8   :  { %v1045_v15 = vadd.f32 %v1044_v14, %v875_v12  ;;  %v2305_v12 = vld [vmem:[%s3670_s0 + $0x130] sm:$0xf0] }
  0xaa   :  { %v1214_v17 = vadd.f32 %v1213_v56, %v1045_v15  ;;  %2245 = vmatmul.msk.bf16.gmra.mxu2 %vm767_vm0, %v1910_v13  ;;  %v2297_v56 = vld [vmem:[%s3670_s0 + $0xf4] sm:$0xf] }
  0xab   :  { %v1906_v4 = vor.u32 %v2297_v56, %v1903_v57 }
  0xac   :  { %1372 = vst.msk [vmem:[%s3671_s2 + $0x8] sm:$0xff] %vm767_vm0, %v1214_v17  ;;  %v1436_v25 = vsel %vm767_vm0, %v1214_v17, 0.0  ;;  %v1569_v26 = vmul.f32 %v1214_v17, %v1214_v17 }
  0xad   :  { %v1437_v27 = vadd.f32 %v1436_v25, %v1435_v24  ;;  %v2755_v28 = vpop.f32.mrf.mxu3  ;;  %v1221_v29 = vpop.f32.mrf.mxu2  ;;  %v1913_v25 = vld [vmem:[%s3670_s0 + $0x108] sm:$0xf] }
  0xae   :  { %v1633_v32 = vsel %vm767_vm0, %v1569_v26, 0.0  ;;  %v878_v33 = vpop.f32.mrf.mxu0  ;;  %v2301_v26 = vld [vmem:[%s3670_s0 + $0x110] sm:$0xf0] }
  0xaf   :  { %v1634_v36 = vadd.f32 %v1633_v32, %v1632_v31  ;;  %v1047_v37 = vpop.f32.mrf.mxu1  ;;  %v2107_v31 = vld [vmem:[%s3670_s0 + $0x294] sm:$0xf0] }
  0xb0   :  { %v1048_v38 = vadd.f32 %v1047_v37, %v878_v33  ;;  %v1914_v37 = vor.u32 %v2301_v26, %v1913_v25 }
  0xb1   :  { %917 = vmatmul.bf16.gmra.mxu0 %v1890_v30  ;;  %v2348_v30 = vld [vmem:[%s3670_s0 + $0x28c] sm:$0xf] }
  0xb2   :  { %v1217_v39 = vadd.f32 %v1216_v0, %v1048_v38  ;;  %1086 = vmatmul.bf16.gmra.mxu1 %v1894_v34  ;;  %1166 = vmatmul.bf16.gmra.mxu3 %v2086_v35  ;;  %v2110_v41 = vor.u32 %v2348_v30, %v2107_v31 }
  0xb4   :  { %1373 = vst.msk [vmem:[%s3671_s2 + $0x10] sm:$0xff] %vm767_vm0, %v1217_v39  ;;  %v1438_v42 = vsel %vm767_vm0, %v1217_v39, 0.0  ;;  %v1570_v43 = vmul.f32 %v1217_v39, %v1217_v39 }
  0xb5   :  { %v1439_v44 = vadd.f32 %v1438_v42, %v1437_v27  ;;  %v2770_v45 = vpop.f32.mrf.mxu3  ;;  %v1223_v46 = vpop.f32.mrf.mxu2  ;;  %v2300_v27 = vld [vmem:[%s3670_s0 + $0x10c] sm:$0xf] }
  0xb6   :  { %v1635_v47 = vsel %vm767_vm0, %v1570_v43, 0.0  ;;  %v880_v48 = vpop.f32.mrf.mxu0 }
  0xb7   :  { %v1636_v50 = vadd.f32 %v1635_v47, %v1634_v36  ;;  %v1049_v51 = vpop.f32.mrf.mxu1  ;;  %v1945_v47 = vld [vmem:[%s3670_s0 + $0x140] sm:$0xf] }
  0xb8   :  { %v1050_v52 = vadd.f32 %v1049_v51, %v880_v48  ;;  %v2308_v48 = vld [vmem:[%s3670_s0 + $0x148] sm:$0xf0] }
  0xb9   :  { %v1946_v56 = vor.u32 %v2308_v48, %v1945_v47 }
  0xba   :  { %v1219_v53 = vadd.f32 %v1218_v11, %v1050_v52  ;;  %2246 = vmatmul.msk.bf16.gmra.mxu2 %vm767_vm0, %v1922_v49  ;;  %v1933_v11 = vld [vmem:[%s3670_s0 + $0x128] sm:$0xf] }
  0xbb   :  { %v1934_v20 = vor.u32 %v2305_v12, %v1933_v11 }
  0xbc   :  { %1374 = vst.msk [vmem:[%s3671_s2 + $0x18] sm:$0xff] %vm767_vm0, %v1219_v53  ;;  %v1440_v60 = vsel %vm767_vm0, %v1219_v53, 0.0  ;;  %v1571_v61 = vmul.f32 %v1219_v53, %v1219_v53 }
  0xbd   :  { %v1441_v62 = vadd.f32 %v1440_v60, %v1439_v44  ;;  %v2797_v63 = vpop.f32.mrf.mxu3  ;;  %v1226_v0 = vpop.f32.mrf.mxu2 }
  0xbe   :  { %v1637_v2 = vsel %vm767_vm0, %v1571_v61, 0.0  ;;  %v883_v3 = vpop.f32.mrf.mxu0  ;;  %v1925_v61 = vld [vmem:[%s3670_s0 + $0x120] sm:$0xf] }
  0xbf   :  { %v1638_v6 = vadd.f32 %v1637_v2, %v1636_v50  ;;  %v1052_v7 = vpop.f32.mrf.mxu1  ;;  %v2351_v2 = vld [vmem:[%s3670_s0 + $0x2a4] sm:$0xf] }
  0xc0   :  { %v1053_v8 = vadd.f32 %v1052_v7, %v883_v3  ;;  %v2119_v3 = vld [vmem:[%s3670_s0 + $0x2ac] sm:$0xf0] }
  0xc1   :  { %922 = vmatmul.bf16.gmra.mxu0 %v1902_v1  ;;  %v1927_v1 = vld [vmem:[%s3670_s0 + $0x12c] sm:$0xf0] }
  0xc2   :  { %v1222_v9 = vadd.f32 %v1221_v29, %v1053_v8  ;;  %1091 = vmatmul.bf16.gmra.mxu1 %v1906_v4  ;;  %1171 = vmatmul.bf16.gmra.mxu3 %v2098_v5  ;;  %v1915_v29 = vld [vmem:[%s3670_s0 + $0x114] sm:$0xf0] }
  0xc3   :  { %v1918_v40 = vor.u32 %v2300_v27, %v1915_v29 }
  0xc4   :  { %1375 = vst.msk [vmem:[%s3671_s2 + $0x20] sm:$0xff] %vm767_vm0, %v1222_v9  ;;  %v1442_v13 = vsel %vm767_vm0, %v1222_v9, 0.0  ;;  %v1572_v14 = vmul.f32 %v1222_v9, %v1222_v9 }
  0xc5   :  { %v1443_v15 = vadd.f32 %v1442_v13, %v1441_v62  ;;  %v2811_v16 = vpop.f32.mrf.mxu3  ;;  %v1228_v17 = vpop.f32.mrf.mxu2  ;;  %v2304_v62 = vld [vmem:[%s3670_s0 + $0x128] sm:$0xf0] }
  0xc6   :  { %v1639_v18 = vsel %vm767_vm0, %v1572_v14, 0.0  ;;  %v885_v19 = vpop.f32.mrf.mxu0  ;;  %v1926_v9 = vor.u32 %v2304_v62, %v1925_v61  ;;  %v2122_v14 = vor.u32 %v2351_v2, %v2119_v3 }
  0xc7   :  { %v1640_v21 = vadd.f32 %v1639_v18, %v1638_v6  ;;  %v1054_v22 = vpop.f32.mrf.mxu1 }
  0xc8   :  { %v1055_v23 = vadd.f32 %v1054_v22, %v885_v19 }
  0xca   :  { %v1224_v24 = vadd.f32 %v1223_v46, %v1055_v23  ;;  %2247 = vmatmul.msk.bf16.gmra.mxu2 %vm767_vm0, %v1934_v20  ;;  %v1957_v20 = vld [vmem:[%s3670_s0 + $0x158] sm:$0xf] }
  0xcc   :  { %1376 = vst.msk [vmem:[%s3671_s2 + $0x28] sm:$0xff] %vm767_vm0, %v1224_v24  ;;  %v1444_v32 = vsel %vm767_vm0, %v1224_v24, 0.0  ;;  %v1573_v33 = vmul.f32 %v1224_v24, %v1224_v24 }
  0xcd   :  { %v1445_v34 = vadd.f32 %v1444_v32, %v1443_v15  ;;  %v2838_v35 = vpop.f32.mrf.mxu3  ;;  %v1231_v36 = vpop.f32.mrf.mxu2 }
  0xce   :  { %v1641_v38 = vsel %vm767_vm0, %v1573_v33, 0.0  ;;  %v888_v39 = vpop.f32.mrf.mxu0 }
  0xcf   :  { %v1642_v42 = vadd.f32 %v1641_v38, %v1640_v21  ;;  %v1057_v43 = vpop.f32.mrf.mxu1  ;;  %v2311_v21 = vld [vmem:[%s3670_s0 + $0x160] sm:$0xf0]  ;;  %v2306_v38 = vld [vmem:[%s3670_s0 + $0x13c] sm:$0xf] }
  0xd0   :  { %v1058_v44 = vadd.f32 %v1057_v43, %v888_v39  ;;  %v1958_v30 = vor.u32 %v2311_v21, %v1957_v20  ;;  %v1939_v39 = vld [vmem:[%s3670_s0 + $0x144] sm:$0xf0] }
  0xd1   :  { %927 = vmatmul.bf16.gmra.mxu0 %v1914_v37  ;;  %v2307_v37 = vld [vmem:[%s3670_s0 + $0x140] sm:$0xf0] }
  0xd2   :  { %v1227_v46 = vadd.f32 %v1226_v0, %v1058_v44  ;;  %1096 = vmatmul.bf16.gmra.mxu1 %v1918_v40  ;;  %1176 = vmatmul.bf16.gmra.mxu3 %v2110_v41  ;;  %v2303_v0 = vld [vmem:[%s3670_s0 + $0x124] sm:$0xf]  ;;  %v2354_v40 = vld [vmem:[%s3670_s0 + $0x2bc] sm:$0xf]  ;;  %v2131_v41 = vld [vmem:[%s3670_s0 + $0x2c4] sm:$0xf0] }
  0xd3   :  { %v1930_v13 = vor.u32 %v2303_v0, %v1927_v1 }
  0xd4   :  { %1377 = vst.msk [vmem:[%s3671_s2 + $0x30] sm:$0xff] %vm767_vm0, %v1227_v46  ;;  %v1446_v49 = vsel %vm767_vm0, %v1227_v46, 0.0  ;;  %v1574_v50 = vmul.f32 %v1227_v46, %v1227_v46 }
  0xd5   :  { %v1447_v51 = vadd.f32 %v1446_v49, %v1445_v34  ;;  %v2852_v52 = vpop.f32.mrf.mxu3  ;;  %v1233_v53 = vpop.f32.mrf.mxu2 }
  0xd6   :  { %v1643_v54 = vsel %vm767_vm0, %v1574_v50, 0.0  ;;  %v890_v55 = vpop.f32.mrf.mxu0 }
  0xd7   :  { %v1644_v57 = vadd.f32 %v1643_v54, %v1642_v42  ;;  %v1059_v58 = vpop.f32.mrf.mxu1 }
  0xd8   :  { %v1060_v59 = vadd.f32 %v1059_v58, %v890_v55  ;;  %v1969_v58 = vld [vmem:[%s3670_s0 + $0x170] sm:$0xf] }
  0xda   :  { %v1229_v60 = vadd.f32 %v1228_v17, %v1060_v59  ;;  %2248 = vmatmul.msk.bf16.gmra.mxu2 %vm767_vm0, %v1946_v56  ;;  %v2314_v59 = vld [vmem:[%s3670_s0 + $0x178] sm:$0xf0] }
  0xdc   :  { %1378 = vst.msk [vmem:[%s3671_s2 + $0x38] sm:$0xff] %vm767_vm0, %v1229_v60  ;;  %v1448_v4 = vsel %vm767_vm0, %v1229_v60, 0.0  ;;  %v1575_v5 = vmul.f32 %v1229_v60, %v1229_v60 }
  0xdd   :  { %v1449_v6 = vadd.f32 %v1448_v4, %v1447_v51  ;;  %v2879_v7 = vpop.f32.mrf.mxu3  ;;  %v1236_v8 = vpop.f32.mrf.mxu2  ;;  %v1942_v51 = vor.u32 %v2306_v38, %v1939_v39  ;;  %v1970_v4 = vor.u32 %v2314_v59, %v1969_v58 }
  0xde   :  { %v1645_v11 = vsel %vm767_vm0, %v1575_v5, 0.0  ;;  %v893_v12 = vpop.f32.mrf.mxu0 }
  0xdf   :  { %v1646_v15 = vadd.f32 %v1645_v11, %v1644_v57  ;;  %v1062_v17 = vpop.f32.mrf.mxu1  ;;  %v1949_v11 = vld [vmem:[%s3670_s0 + $0x150] sm:$0xf] }
  0xe0   :  { %v1063_v18 = vadd.f32 %v1062_v17, %v893_v12  ;;  %v2310_v12 = vld [vmem:[%s3670_s0 + $0x158] sm:$0xf0]  ;;  %v2143_v17 = vld [vmem:[%s3670_s0 + $0x2dc] sm:$0xf0] }
  0xe1   :  { %932 = vmatmul.bf16.gmra.mxu0 %v1926_v9 }
  0xe2   :  { %v1232_v19 = vadd.f32 %v1231_v36, %v1063_v18  ;;  %1101 = vmatmul.bf16.gmra.mxu1 %v1930_v13  ;;  %1181 = vmatmul.bf16.gmra.mxu3 %v2122_v14  ;;  %v1937_v36 = vld [vmem:[%s3670_s0 + $0x138] sm:$0xf]  ;;  %v2309_v13 = vld [vmem:[%s3670_s0 + $0x154] sm:$0xf]  ;;  %v1951_v14 = vld [vmem:[%s3670_s0 + $0x15c] sm:$0xf0] }
  0xe3   :  { %v1938_v48 = vor.u32 %v2307_v37, %v1937_v36  ;;  %v2317_v36 = vld [vmem:[%s3670_s0 + $0x190] sm:$0xf0] }
  0xe4   :  { %1379 = vst.msk [vmem:[%s3671_s2 + $0x40] sm:$0xff] %vm767_vm0, %v1232_v19  ;;  %v1450_v22 = vsel %vm767_vm0, %v1232_v19, 0.0  ;;  %v1576_v23 = vmul.f32 %v1232_v19, %v1232_v19 }
  0xe5   :  { %v1451_v24 = vadd.f32 %v1450_v22, %v1449_v6  ;;  %v2893_v25 = vpop.f32.mrf.mxu3  ;;  %v1238_v26 = vpop.f32.mrf.mxu2 }
  0xe6   :  { %v1647_v27 = vsel %vm767_vm0, %v1576_v23, 0.0  ;;  %v895_v29 = vpop.f32.mrf.mxu0  ;;  %v1950_v23 = vor.u32 %v2310_v12, %v1949_v11  ;;  %v1993_v12 = vld [vmem:[%s3670_s0 + $0x1a0] sm:$0xf] }
  0xe7   :  { %v1648_v31 = vadd.f32 %v1647_v27, %v1646_v15  ;;  %v1064_v32 = vpop.f32.mrf.mxu1  ;;  %v2357_v15 = vld [vmem:[%s3670_s0 + $0x2d4] sm:$0xf]  ;;  %v1954_v27 = vor.u32 %v2309_v13, %v1951_v14  ;;  %v2320_v13 = vld [vmem:[%s3670_s0 + $0x1a8] sm:$0xf0] }
  0xe8   :  { %v1065_v33 = vadd.f32 %v1064_v32, %v895_v29  ;;  %v2146_v29 = vor.u32 %v2357_v15, %v2143_v17 }
  0xea   :  { %v1234_v34 = vadd.f32 %v1233_v53, %v1065_v33  ;;  %2249 = vmatmul.msk.bf16.gmra.mxu2 %vm767_vm0, %v1958_v30  ;;  %v2134_v53 = vor.u32 %v2354_v40, %v2131_v41 }
  0xec   :  { %1380 = vst.msk [vmem:[%s3671_s2 + $0x48] sm:$0xff] %vm767_vm0, %v1234_v34  ;;  %v1452_v42 = vsel %vm767_vm0, %v1234_v34, 0.0  ;;  %v1577_v43 = vmul.f32 %v1234_v34, %v1234_v34  ;;  %v1981_v34 = vld [vmem:[%s3670_s0 + $0x188] sm:$0xf] }
  0xed   :  { %v1453_v44 = vadd.f32 %v1452_v42, %v1451_v24  ;;  %v2920_v46 = vpop.f32.mrf.mxu3  ;;  %v1241_v47 = vpop.f32.mrf.mxu2 }
  0xee   :  { %v1649_v49 = vsel %vm767_vm0, %v1577_v43, 0.0  ;;  %v898_v50 = vpop.f32.mrf.mxu0 }
  0xef   :  { %v1650_v54 = vadd.f32 %v1649_v49, %v1648_v31  ;;  %v1067_v55 = vpop.f32.mrf.mxu1 }
  0xf0   :  { %v1068_v56 = vadd.f32 %v1067_v55, %v898_v50  ;;  %v1963_v55 = vld [vmem:[%s3670_s0 + $0x174] sm:$0xf0] }
  0xf1   :  { %937 = vmatmul.bf16.gmra.mxu0 %v1938_v48 }
  0xf2   :  { %v1237_v57 = vadd.f32 %v1236_v8, %v1068_v56  ;;  %1106 = vmatmul.bf16.gmra.mxu1 %v1942_v51  ;;  %1186 = vmatmul.bf16.gmra.mxu3 %v2134_v53  ;;  %v1961_v51 = vld [vmem:[%s3670_s0 + $0x168] sm:$0xf]  ;;  %v2313_v53 = vld [vmem:[%s3670_s0 + $0x170] sm:$0xf0]  ;;  %v2360_v56 = vld [vmem:[%s3670_s0 + $0x2ec] sm:$0xf] }
  0xf4   :  { %1381 = vst.msk [vmem:[%s3671_s2 + $0x50] sm:$0xff] %vm767_vm0, %v1237_v57  ;;  %v1454_v60 = vsel %vm767_vm0, %v1237_v57, 0.0  ;;  %v1578_v61 = vmul.f32 %v1237_v57, %v1237_v57  ;;  %v2155_v57 = vld [vmem:[%s3670_s0 + $0x2f4] sm:$0xf0] }
  0xf5   :  { %v1455_v62 = vadd.f32 %v1454_v60, %v1453_v44  ;;  %v2934_v0 = vpop.f32.mrf.mxu3  ;;  %v1243_v1 = vpop.f32.mrf.mxu2  ;;  %v1982_v44 = vor.u32 %v2317_v36, %v1981_v34  ;;  %v2101_v34 = vld [vmem:[%s3670_s0 + $0x278] sm:$0xf]  ;;  %v2347_v36 = vld [vmem:[%s3670_s0 + $0x280] sm:$0xf0] }
  0xf6   :  { %v1651_v2 = vsel %vm767_vm0, %v1578_v61, 0.0  ;;  %v900_v3 = vpop.f32.mrf.mxu0 }
  0xf7   :  { %v1652_v5 = vadd.f32 %v1651_v2, %v1650_v54  ;;  %v1069_v6 = vpop.f32.mrf.mxu1  ;;  %v2312_v54 = vld [vmem:[%s3670_s0 + $0x16c] sm:$0xf] }
  0xf8   :  { %v1070_v8 = vadd.f32 %v1069_v6, %v900_v3 }
  0xfa   :  { %v1239_v9 = vadd.f32 %v1238_v26, %v1070_v8  ;;  %2250 = vmatmul.msk.bf16.gmra.mxu2 %vm767_vm0, %v1970_v4  ;;  %v1966_v4 = vor.u32 %v2312_v54, %v1963_v55  ;;  %v2005_v55 = vld [vmem:[%s3670_s0 + $0x1b8] sm:$0xf] }
  0xfc   :  { %1382 = vst.msk [vmem:[%s3671_s2 + $0x58] sm:$0xff] %vm767_vm0, %v1239_v9  ;;  %v1456_v18 = vsel %vm767_vm0, %v1239_v9, 0.0  ;;  %v1579_v19 = vmul.f32 %v1239_v9, %v1239_v9 }
  0xfd   :  { %v1457_v20 = vadd.f32 %v1456_v18, %v1455_v62  ;;  %v2961_v21 = vpop.f32.mrf.mxu3  ;;  %v1246_v22 = vpop.f32.mrf.mxu2 }
  0xfe   :  { %v1653_v24 = vsel %vm767_vm0, %v1579_v19, 0.0  ;;  %v903_v26 = vpop.f32.mrf.mxu0 }
  0xff   :  { %v1654_v30 = vadd.f32 %v1653_v24, %v1652_v5  ;;  %v1072_v31 = vpop.f32.mrf.mxu1  ;;  %v2158_v5 = vor.u32 %v2360_v56, %v2155_v57  ;;  %v2323_v56 = vld [vmem:[%s3670_s0 + $0x1c0] sm:$0xf0] }
 0x100   :  { %v1073_v32 = vadd.f32 %v1072_v31, %v903_v26  ;;  %v2316_v31 = vld [vmem:[%s3670_s0 + $0x188] sm:$0xf0] }
 0x101   :  { %942 = vmatmul.bf16.gmra.mxu0 %v1950_v23  ;;  %v1994_v23 = vor.u32 %v2320_v13, %v1993_v12  ;;  %v2318_v12 = vld [vmem:[%s3670_s0 + $0x19c] sm:$0xf]  ;;  %v1987_v13 = vld [vmem:[%s3670_s0 + $0x1a4] sm:$0xf0] }
 0x102   :  { %v1242_v33 = vadd.f32 %v1241_v47, %v1073_v32  ;;  %1111 = vmatmul.bf16.gmra.mxu1 %v1954_v27  ;;  %1191 = vmatmul.bf16.gmra.mxu3 %v2146_v29  ;;  %v2315_v32 = vld [vmem:[%s3670_s0 + $0x184] sm:$0xf] }
 0x104   :  { %1383 = vst.msk [vmem:[%s3671_s2 + $0x60] sm:$0xff] %vm767_vm0, %v1242_v33  ;;  %v1458_v37 = vsel %vm767_vm0, %v1242_v33, 0.0  ;;  %v1580_v38 = vmul.f32 %v1242_v33, %v1242_v33  ;;  %v1975_v33 = vld [vmem:[%s3670_s0 + $0x18c] sm:$0xf0] }
 0x105   :  { %v1459_v39 = vadd.f32 %v1458_v37, %v1457_v20  ;;  %v2975_v40 = vpop.f32.mrf.mxu3  ;;  %v1248_v41 = vpop.f32.mrf.mxu2 }
 0x106   :  { %v1655_v42 = vsel %vm767_vm0, %v1580_v38, 0.0  ;;  %v905_v43 = vpop.f32.mrf.mxu0 }
 0x107   :  { %v1656_v47 = vadd.f32 %v1655_v42, %v1654_v30  ;;  %v1074_v48 = vpop.f32.mrf.mxu1  ;;  %v1973_v30 = vld [vmem:[%s3670_s0 + $0x180] sm:$0xf] }
 0x108   :  { %v1075_v49 = vadd.f32 %v1074_v48, %v905_v43  ;;  %v1974_v43 = vor.u32 %v2316_v31, %v1973_v30  ;;  %v1978_v48 = vor.u32 %v2315_v32, %v1975_v33 }
 0x10a   :  { %v1244_v50 = vadd.f32 %v1243_v1, %v1075_v49  ;;  %2251 = vmatmul.msk.bf16.gmra.mxu2 %vm767_vm0, %v1982_v44  ;;  %v1962_v1 = vor.u32 %v2313_v53, %v1961_v51  ;;  %v2102_v49 = vor.u32 %v2347_v36, %v2101_v34  ;;  %v2017_v36 = vld [vmem:[%s3670_s0 + $0x1d0] sm:$0xf] }
 0x10c   :  { %1384 = vst.msk [vmem:[%s3671_s2 + $0x68] sm:$0xff] %vm767_vm0, %v1244_v50  ;;  %v1460_v58 = vsel %vm767_vm0, %v1244_v50, 0.0  ;;  %v1581_v59 = vmul.f32 %v1244_v50, %v1244_v50 }
 0x10d   :  { %v1461_v60 = vadd.f32 %v1460_v58, %v1459_v39  ;;  %v3002_v61 = vpop.f32.mrf.mxu3  ;;  %v1251_v62 = vpop.f32.mrf.mxu2 }
 0x10e   :  { %v1657_v2 = vsel %vm767_vm0, %v1581_v59, 0.0  ;;  %v908_v3 = vpop.f32.mrf.mxu0 }
 0x10f   :  { %v1658_v6 = vadd.f32 %v1657_v2, %v1656_v47  ;;  %v1077_v8 = vpop.f32.mrf.mxu1 }
 0x110   :  { %v1078_v9 = vadd.f32 %v1077_v8, %v908_v3  ;;  %v2006_v3 = vor.u32 %v2323_v56, %v2005_v55  ;;  %v1997_v55 = vld [vmem:[%s3670_s0 + $0x1b0] sm:$0xf]  ;;  %v2322_v56 = vld [vmem:[%s3670_s0 + $0x1b8] sm:$0xf0] }
 0x111   :  { %947 = vmatmul.bf16.gmra.mxu0 %v1962_v1 }
 0x112   :  { %v1247_v11 = vadd.f32 %v1246_v22, %v1078_v9  ;;  %1116 = vmatmul.bf16.gmra.mxu1 %v1966_v4  ;;  %1196 = vmatmul.bf16.gmra.mxu3 %v2158_v5  ;;  %v1985_v9 = vld [vmem:[%s3670_s0 + $0x198] sm:$0xf] }
 0x114   :  { %1385 = vst.msk [vmem:[%s3671_s2 + $0x70] sm:$0xff] %vm767_vm0, %v1247_v11  ;;  %v1462_v14 = vsel %vm767_vm0, %v1247_v11, 0.0  ;;  %v1582_v15 = vmul.f32 %v1247_v11, %v1247_v11  ;;  %v2319_v11 = vld [vmem:[%s3670_s0 + $0x1a0] sm:$0xf0] }
 0x115   :  { %v1463_v17 = vadd.f32 %v1462_v14, %v1461_v60  ;;  %v3016_v18 = vpop.f32.mrf.mxu3  ;;  %v1253_v19 = vpop.f32.mrf.mxu2  ;;  %v2113_v14 = vld [vmem:[%s3670_s0 + $0x290] sm:$0xf] }
 0x116   :  { %v1659_v20 = vsel %vm767_vm0, %v1582_v15, 0.0  ;;  %v910_v22 = vpop.f32.mrf.mxu0  ;;  %v2350_v15 = vld [vmem:[%s3670_s0 + $0x298] sm:$0xf0] }
 0x117   :  { %v1660_v24 = vadd.f32 %v1659_v20, %v1658_v6  ;;  %v1079_v26 = vpop.f32.mrf.mxu1  ;;  %v2114_v30 = vor.u32 %v2350_v15, %v2113_v14 }
 0x118   :  { %v1080_v27 = vadd.f32 %v1079_v26, %v910_v22 }
 0x11a   :  { %v1249_v29 = vadd.f32 %v1248_v41, %v1080_v27  ;;  %2252 = vmatmul.msk.bf16.gmra.mxu2 %vm767_vm0, %v1994_v23 }
 0x11c   :  { %1386 = vst.msk [vmem:[%s3671_s2 + $0x78] sm:$0xff] %vm767_vm0, %v1249_v29  ;;  %v1464_v37 = vsel %vm767_vm0, %v1249_v29, 0.0  ;;  %v1583_v38 = vmul.f32 %v1249_v29, %v1249_v29  ;;  %v1990_v29 = vor.u32 %v2318_v12, %v1987_v13 }
 0x11d   :  { %v1465_v39 = vadd.f32 %v1464_v37, %v1463_v17  ;;  %v3043_v41 = vpop.f32.mrf.mxu3  ;;  %v1256_v42 = vpop.f32.mrf.mxu2  ;;  %v2326_v37 = vld [vmem:[%s3670_s0 + $0x1d8] sm:$0xf0] }
 0x11e   :  { %v1661_v44 = vsel %vm767_vm0, %v1583_v38, 0.0  ;;  %v913_v47 = vpop.f32.mrf.mxu0 }
 0x11f   :  { %v1662_v50 = vadd.f32 %v1661_v44, %v1660_v24  ;;  %v1082_v51 = vpop.f32.mrf.mxu1  ;;  %v1986_v24 = vor.u32 %v2319_v11, %v1985_v9 }
 0x120   :  { %v1083_v53 = vadd.f32 %v1082_v51, %v913_v47 }
 0x121   :  { %952 = vmatmul.bf16.gmra.mxu0 %v1974_v43 }
 0x122   :  { %v1252_v54 = vadd.f32 %v1251_v62, %v1083_v53  ;;  %1121 = vmatmul.bf16.gmra.mxu1 %v1978_v48  ;;  %2261 = vmatmul.msk.bf16.vlgmr.msra.gmra.mxu3 %vm767_vm0, %v2102_v49  ;;  %v2018_v49 = vor.u32 %v2326_v37, %v2017_v36 }
 0x124   :  { %1387 = vst.msk [vmem:[%s3671_s2 + $0x80] sm:$0xff] %vm767_vm0, %v1252_v54  ;;  %v1466_v57 = vsel %vm767_vm0, %v1252_v54, 0.0  ;;  %v1584_v58 = vmul.f32 %v1252_v54, %v1252_v54 }
 0x125   :  { %v1467_v59 = vadd.f32 %v1466_v57, %v1465_v39  ;;  %v3058_v60 = vpop.f32.mrf.mxu3  ;;  %v1258_v62 = vpop.f32.mrf.mxu2  ;;  %v2321_v57 = vld [vmem:[%s3670_s0 + $0x1b4] sm:$0xf] }
 0x126   :  { %v1663_v1 = vsel %vm767_vm0, %v1584_v58, 0.0  ;;  %v915_v2 = vpop.f32.mrf.mxu0  ;;  %v1999_v58 = vld [vmem:[%s3670_s0 + $0x1bc] sm:$0xf0] }
 0x127   :  { %v1664_v4 = vadd.f32 %v1663_v1, %v1662_v50  ;;  %v1084_v5 = vpop.f32.mrf.mxu1  ;;  %v2002_v11 = vor.u32 %v2321_v57, %v1999_v58 }
 0x128   :  { %v1085_v6 = vadd.f32 %v1084_v5, %v915_v2 }
 0x12a   :  { %v1254_v8 = vadd.f32 %v1253_v19, %v1085_v6  ;;  %2253 = vmatmul.msk.bf16.gmra.mxu2 %vm767_vm0, %v2006_v3  ;;  %v1998_v6 = vor.u32 %v2322_v56, %v1997_v55 }
 0x12c   :  { %1388 = vst.msk [vmem:[%s3671_s2 + $0x88] sm:$0xff] %vm767_vm0, %v1254_v8  ;;  %v1468_v17 = vsel %vm767_vm0, %v1254_v8, 0.0  ;;  %v1585_v19 = vmul.f32 %v1254_v8, %v1254_v8 }
 0x12d   :  { %v1469_v20 = vadd.f32 %v1468_v17, %v1467_v59  ;;  %v3085_v22 = vpop.f32.mrf.mxu3  ;;  %v1261_v23 = vpop.f32.mrf.mxu2  ;;  %v2125_v59 = vld [vmem:[%s3670_s0 + $0x2a8] sm:$0xf] }
 0x12e   :  { %v1665_v26 = vsel %vm767_vm0, %v1585_v19, 0.0  ;;  %v918_v27 = vpop.f32.mrf.mxu0  ;;  %v2029_v19 = vld [vmem:[%s3670_s0 + $0x1e8] sm:$0xf] }
 0x12f   :  { %v1666_v31 = vadd.f32 %v1665_v26, %v1664_v4  ;;  %v1087_v32 = vpop.f32.mrf.mxu1 }
 0x130   :  { %v1088_v33 = vadd.f32 %v1087_v32, %v918_v27 }
 0x131   :  { %957 = vmatmul.bf16.gmra.mxu0 %v1986_v24 }
 0x132   :  { %v1257_v34 = vadd.f32 %v1256_v42, %v1088_v33  ;;  %1126 = vmatmul.bf16.gmra.mxu1 %v1990_v29  ;;  %2262 = vmatmul.msk.bf16.gmra.mxu3 %vm767_vm0, %v2114_v30 }
 0x134   :  { %1389 = vst.msk [vmem:[%s3671_s2 + $0x90] sm:$0xff] %vm767_vm0, %v1257_v34  ;;  %v1470_v38 = vsel %vm767_vm0, %v1257_v34, 0.0  ;;  %v1586_v39 = vmul.f32 %v1257_v34, %v1257_v34 }
 0x135   :  { %v1471_v42 = vadd.f32 %v1470_v38, %v1469_v20  ;;  %v3100_v43 = vpop.f32.mrf.mxu3  ;;  %v1263_v44 = vpop.f32.mrf.mxu2  ;;  %v2329_v20 = vld [vmem:[%s3670_s0 + $0x1f0] sm:$0xf0]  ;;  %v2009_v38 = vld [vmem:[%s3670_s0 + $0x1c8] sm:$0xf] }
 0x136   :  { %v1667_v47 = vsel %vm767_vm0, %v1586_v39, 0.0  ;;  %v920_v48 = vpop.f32.mrf.mxu0  ;;  %v2030_v32 = vor.u32 %v2329_v20, %v2029_v19  ;;  %v2325_v39 = vld [vmem:[%s3670_s0 + $0x1d0] sm:$0xf0] }
 0x137   :  { %v1668_v50 = vadd.f32 %v1667_v47, %v1666_v31  ;;  %v1089_v51 = vpop.f32.mrf.mxu1  ;;  %v2011_v47 = vld [vmem:[%s3670_s0 + $0x1d4] sm:$0xf0]  ;;  %v2010_v55 = vor.u32 %v2325_v39, %v2009_v38 }
 0x138   :  { %v1090_v53 = vadd.f32 %v1089_v51, %v920_v48  ;;  %v2356_v48 = vld [vmem:[%s3670_s0 + $0x2c8] sm:$0xf0] }
 0x13a   :  { %v1259_v54 = vadd.f32 %v1258_v62, %v1090_v53  ;;  %2254 = vmatmul.msk.bf16.gmra.mxu2 %vm767_vm0, %v2018_v49  ;;  %v2353_v62 = vld [vmem:[%s3670_s0 + $0x2b0] sm:$0xf0] }
 0x13b   :  { %v2126_v12 = vor.u32 %v2353_v62, %v2125_v59 }
 0x13c   :  { %1390 = vst.msk [vmem:[%s3671_s2 + $0x98] sm:$0xff] %vm767_vm0, %v1259_v54  ;;  %v1472_v1 = vsel %vm767_vm0, %v1259_v54, 0.0  ;;  %v1587_v2 = vmul.f32 %v1259_v54, %v1259_v54 }
 0x13d   :  { %v1473_v3 = vadd.f32 %v1472_v1, %v1471_v42  ;;  %v3127_v4 = vpop.f32.mrf.mxu3  ;;  %v1266_v5 = vpop.f32.mrf.mxu2  ;;  %v2324_v42 = vld [vmem:[%s3670_s0 + $0x1cc] sm:$0xf] }
 0x13e   :  { %v1669_v8 = vsel %vm767_vm0, %v1587_v2, 0.0  ;;  %v923_v9 = vpop.f32.mrf.mxu0  ;;  %v2014_v58 = vor.u32 %v2324_v42, %v2011_v47 }
 0x13f   :  { %v1670_v13 = vadd.f32 %v1669_v8, %v1668_v50  ;;  %v1092_v14 = vpop.f32.mrf.mxu1  ;;  %v2332_v8 = vld [vmem:[%s3670_s0 + $0x208] sm:$0xf0] }
 0x140   :  { %v1093_v15 = vadd.f32 %v1092_v14, %v923_v9 }
 0x141   :  { %962 = vmatmul.bf16.gmra.mxu0 %v1998_v6  ;;  %v2041_v6 = vld [vmem:[%s3670_s0 + $0x200] sm:$0xf] }
 0x142   :  { %v1262_v17 = vadd.f32 %v1261_v23, %v1093_v15  ;;  %1131 = vmatmul.bf16.gmra.mxu1 %v2002_v11  ;;  %2263 = vmatmul.msk.bf16.gmra.mxu3 %vm767_vm0, %v2126_v12 }
 0x144   :  { %1391 = vst.msk [vmem:[%s3671_s2 + $0xa0] sm:$0xff] %vm767_vm0, %v1262_v17  ;;  %v1474_v24 = vsel %vm767_vm0, %v1262_v17, 0.0  ;;  %v1588_v26 = vmul.f32 %v1262_v17, %v1262_v17  ;;  %v2042_v17 = vor.u32 %v2332_v8, %v2041_v6 }
 0x145   :  { %v1475_v23 = vadd.f32 %v1474_v24, %v1473_v3  ;;  %v3142_v27 = vpop.f32.mrf.mxu3  ;;  %v1268_v29 = vpop.f32.mrf.mxu2 }
 0x146   :  { %v1671_v30 = vsel %vm767_vm0, %v1588_v26, 0.0  ;;  %v925_v31 = vpop.f32.mrf.mxu0 }
 0x147   :  { %v1672_v33 = vadd.f32 %v1671_v30, %v1670_v13  ;;  %v1094_v34 = vpop.f32.mrf.mxu1  ;;  %v2328_v30 = vld [vmem:[%s3670_s0 + $0x1e8] sm:$0xf0] }
 0x148   :  { %v1095_v36 = vadd.f32 %v1094_v34, %v925_v31  ;;  %v2327_v31 = vld [vmem:[%s3670_s0 + $0x1e4] sm:$0xf] }
 0x14a   :  { %v1264_v37 = vadd.f32 %v1263_v44, %v1095_v36  ;;  %2255 = vmatmul.msk.bf16.gmra.mxu2 %vm767_vm0, %v2030_v32  ;;  %v2137_v44 = vld [vmem:[%s3670_s0 + $0x2c0] sm:$0xf]  ;;  %v2023_v32 = vld [vmem:[%s3670_s0 + $0x1ec] sm:$0xf0] }
 0x14b   :  { %v2138_v59 = vor.u32 %v2356_v48, %v2137_v44  ;;  %v2026_v48 = vor.u32 %v2327_v31, %v2023_v32 }
 0x14c   :  { %1392 = vst.msk [vmem:[%s3671_s2 + $0xa8] sm:$0xff] %vm767_vm0, %v1264_v37  ;;  %v1476_v49 = vsel %vm767_vm0, %v1264_v37, 0.0  ;;  %v1589_v50 = vmul.f32 %v1264_v37, %v1264_v37 }
 0x14d   :  { %v1477_v51 = vadd.f32 %v1476_v49, %v1475_v23  ;;  %v3169_v53 = vpop.f32.mrf.mxu3  ;;  %v1271_v54 = vpop.f32.mrf.mxu2  ;;  %v2021_v23 = vld [vmem:[%s3670_s0 + $0x1e0] sm:$0xf] }
 0x14e   :  { %v1673_v56 = vsel %vm767_vm0, %v1589_v50, 0.0  ;;  %v928_v57 = vpop.f32.mrf.mxu0  ;;  %v2022_v42 = vor.u32 %v2328_v30, %v2021_v23 }
 0x14f   :  { %v1674_v62 = vadd.f32 %v1673_v56, %v1672_v33  ;;  %v1097_v1 = vpop.f32.mrf.mxu1  ;;  %v2359_v33 = vld [vmem:[%s3670_s0 + $0x2e0] sm:$0xf0] }
 0x150   :  { %v1098_v2 = vadd.f32 %v1097_v1, %v928_v57  ;;  %v2053_v57 = vld [vmem:[%s3670_s0 + $0x218] sm:$0xf] }
 0x151   :  { %967 = vmatmul.bf16.gmra.mxu0 %v2010_v55 }
 0x152   :  { %v1267_v3 = vadd.f32 %v1266_v5, %v1098_v2  ;;  %1136 = vmatmul.bf16.gmra.mxu1 %v2014_v58  ;;  %2264 = vmatmul.msk.bf16.gmra.mxu3 %vm767_vm0, %v2138_v59  ;;  %v2335_v58 = vld [vmem:[%s3670_s0 + $0x220] sm:$0xf0] }
 0x153   :  { %v2054_v8 = vor.u32 %v2335_v58, %v2053_v57 }
 0x154   :  { %1393 = vst.msk [vmem:[%s3671_s2 + $0xb0] sm:$0xff] %vm767_vm0, %v1267_v3  ;;  %v1478_v9 = vsel %vm767_vm0, %v1267_v3, 0.0  ;;  %v1590_v11 = vmul.f32 %v1267_v3, %v1267_v3 }
 0x155   :  { %v1479_v5 = vadd.f32 %v1478_v9, %v1477_v51  ;;  %v3184_v12 = vpop.f32.mrf.mxu3  ;;  %v1273_v13 = vpop.f32.mrf.mxu2 }
 0x156   :  { %v1675_v14 = vsel %vm767_vm0, %v1590_v11, 0.0  ;;  %v930_v15 = vpop.f32.mrf.mxu0 }
 0x157   :  { %v1676_v19 = vadd.f32 %v1675_v14, %v1674_v62  ;;  %v1099_v20 = vpop.f32.mrf.mxu1 }
 0x158   :  { %v1100_v24 = vadd.f32 %v1099_v20, %v930_v15  ;;  %v2033_v15 = vld [vmem:[%s3670_s0 + $0x1f8] sm:$0xf]  ;;  %v2035_v20 = vld [vmem:[%s3670_s0 + $0x204] sm:$0xf0] }
 0x15a   :  { %v1269_v26 = vadd.f32 %v1268_v29, %v1100_v24  ;;  %2256 = vmatmul.msk.bf16.gmra.mxu2 %vm767_vm0, %v2042_v17  ;;  %v2149_v29 = vld [vmem:[%s3670_s0 + $0x2d8] sm:$0xf]  ;;  %v2331_v17 = vld [vmem:[%s3670_s0 + $0x200] sm:$0xf0]  ;;  %v2362_v24 = vld [vmem:[%s3670_s0 + $0x2f8] sm:$0xf0] }
 0x15b   :  { %v2150_v49 = vor.u32 %v2359_v33, %v2149_v29  ;;  %v2034_v29 = vor.u32 %v2331_v17, %v2033_v15 }
 0x15c   :  { %1394 = vst.msk [vmem:[%s3671_s2 + $0xb8] sm:$0xff] %vm767_vm0, %v1269_v26  ;;  %v1480_v34 = vsel %vm767_vm0, %v1269_v26, 0.0  ;;  %v1591_v36 = vmul.f32 %v1269_v26, %v1269_v26 }
 0x15d   :  { %v1481_v37 = vadd.f32 %v1480_v34, %v1479_v5  ;;  %v3211_v38 = vpop.f32.mrf.mxu3  ;;  %v1276_v39 = vpop.f32.mrf.mxu2 }
 0x15e   :  { %v1677_v47 = vsel %vm767_vm0, %v1591_v36, 0.0  ;;  %v933_v44 = vpop.f32.mrf.mxu0 }
 0x15f   :  { %v1678_v50 = vadd.f32 %v1677_v47, %v1676_v19  ;;  %v1102_v51 = vpop.f32.mrf.mxu1  ;;  %v2330_v19 = vld [vmem:[%s3670_s0 + $0x1fc] sm:$0xf] }
 0x160   :  { %v1103_v55 = vadd.f32 %v1102_v51, %v933_v44  ;;  %v2038_v36 = vor.u32 %v2330_v19, %v2035_v20 }
 0x161   :  { %972 = vmatmul.bf16.gmra.mxu0 %v2022_v42 }
 0x162   :  { %v1272_v56 = vadd.f32 %v1271_v54, %v1103_v55  ;;  %1141 = vmatmul.bf16.gmra.mxu1 %v2026_v48  ;;  %2265 = vmatmul.msk.bf16.gmra.mxu3 %vm767_vm0, %v2150_v49  ;;  %v2065_v49 = vld [vmem:[%s3670_s0 + $0x230] sm:$0xf] }
 0x164   :  { %1395 = vst.msk [vmem:[%s3671_s2 + $0xc0] sm:$0xff] %vm767_vm0, %v1272_v56  ;;  %v1482_v59 = vsel %vm767_vm0, %v1272_v56, 0.0  ;;  %v1592_v62 = vmul.f32 %v1272_v56, %v1272_v56 }
 0x165   :  { %v1483_v54 = vadd.f32 %v1482_v59, %v1481_v37  ;;  %v3226_v1 = vpop.f32.mrf.mxu3  ;;  %v1278_v2 = vpop.f32.mrf.mxu2 }
 0x166   :  { %v1679_v3 = vsel %vm767_vm0, %v1592_v62, 0.0  ;;  %v935_v6 = vpop.f32.mrf.mxu0 }
 0x167   :  { %v1680_v9 = vadd.f32 %v1679_v3, %v1678_v50  ;;  %v1104_v11 = vpop.f32.mrf.mxu1  ;;  %v2338_v50 = vld [vmem:[%s3670_s0 + $0x238] sm:$0xf0] }
 0x168   :  { %v1105_v5 = vadd.f32 %v1104_v11, %v935_v6  ;;  %v2066_v62 = vor.u32 %v2338_v50, %v2065_v49  ;;  %v2334_v11 = vld [vmem:[%s3670_s0 + $0x218] sm:$0xf0] }
 0x16a   :  { %v1274_v14 = vadd.f32 %v1273_v13, %v1105_v5  ;;  %2257 = vmatmul.msk.bf16.gmra.mxu2 %vm767_vm0, %v2054_v8  ;;  %v2161_v13 = vld [vmem:[%s3670_s0 + $0x2f0] sm:$0xf]  ;;  %v2333_v5 = vld [vmem:[%s3670_s0 + $0x214] sm:$0xf] }
 0x16b   :  { %v2162_v37 = vor.u32 %v2362_v24, %v2161_v13 }
 0x16c   :  { %1396 = vst.msk [vmem:[%s3671_s2 + $0xc8] sm:$0xff] %vm767_vm0, %v1274_v14  ;;  %v1484_v26 = vsel %vm767_vm0, %v1274_v14, 0.0  ;;  %v1593_v23 = vmul.f32 %v1274_v14, %v1274_v14  ;;  %v2047_v14 = vld [vmem:[%s3670_s0 + $0x21c] sm:$0xf0] }
 0x16d   :  { %v1485_v30 = vadd.f32 %v1484_v26, %v1483_v54  ;;  %v3253_v31 = vpop.f32.mrf.mxu3  ;;  %v1281_v32 = vpop.f32.mrf.mxu2 }
 0x16e   :  { %v1681_v33 = vsel %vm767_vm0, %v1593_v23, 0.0  ;;  %v938_v34 = vpop.f32.mrf.mxu0  ;;  %v2050_v23 = vor.u32 %v2333_v5, %v2047_v14 }
 0x16f   :  { %v1682_v42 = vadd.f32 %v1681_v33, %v1680_v9  ;;  %v1107_v47 = vpop.f32.mrf.mxu1  ;;  %v2045_v9 = vld [vmem:[%s3670_s0 + $0x210] sm:$0xf] }
 0x170   :  { %v1108_v44 = vadd.f32 %v1107_v47, %v938_v34  ;;  %v2046_v13 = vor.u32 %v2334_v11, %v2045_v9 }
 0x171   :  { %977 = vmatmul.bf16.gmra.mxu0 %v2034_v29 }
 0x172   :  { %v1277_v48 = vadd.f32 %v1276_v39, %v1108_v44  ;;  %1146 = vmatmul.bf16.gmra.mxu1 %v2038_v36  ;;  %2266 = vmatmul.msk.bf16.gmra.mxu3 %vm767_vm0, %v2162_v37  ;;  %v2077_v36 = vld [vmem:[%s3670_s0 + $0x248] sm:$0xf]  ;;  %v2341_v37 = vld [vmem:[%s3670_s0 + $0x250] sm:$0xf0] }
 0x174   :  { %1397 = vst.msk [vmem:[%s3671_s2 + $0xd0] sm:$0xff] %vm767_vm0, %v1277_v48  ;;  %v1486_v51 = vsel %vm767_vm0, %v1277_v48, 0.0  ;;  %v1594_v55 = vmul.f32 %v1277_v48, %v1277_v48 }
 0x175   :  { %v1487_v39 = vadd.f32 %v1486_v51, %v1485_v30  ;;  %v3268_v56 = vpop.f32.mrf.mxu3  ;;  %v1283_v57 = vpop.f32.mrf.mxu2  ;;  %v2078_v51 = vor.u32 %v2341_v37, %v2077_v36 }
 0x176   :  { %v1683_v58 = vsel %vm767_vm0, %v1594_v55, 0.0  ;;  %v940_v59 = vpop.f32.mrf.mxu0 }
 0x177   :  { %v1684_v54 = vadd.f32 %v1683_v58, %v1682_v42  ;;  %v1109_v3 = vpop.f32.mrf.mxu1 }
 0x178   :  { %v1110_v6 = vadd.f32 %v1109_v3, %v940_v59  ;;  %v2336_v3 = vld [vmem:[%s3670_s0 + $0x22c] sm:$0xf] }
 0x17a   :  { %v1279_v8 = vadd.f32 %v1278_v2, %v1110_v6  ;;  %2258 = vmatmul.msk.bf16.gmra.mxu2 %vm767_vm0, %v2066_v62  ;;  %v2057_v62 = vld [vmem:[%s3670_s0 + $0x228] sm:$0xf]  ;;  %v2059_v6 = vld [vmem:[%s3670_s0 + $0x234] sm:$0xf0] }
 0x17c   :  { %1398 = vst.msk [vmem:[%s3671_s2 + $0xd8] sm:$0xff] %vm767_vm0, %v1279_v8  ;;  %v1488_v2 = vsel %vm767_vm0, %v1279_v8, 0.0  ;;  %v1595_v15 = vmul.f32 %v1279_v8, %v1279_v8 }
 0x17d   :  { %v1489_v17 = vadd.f32 %v1488_v2, %v1487_v39  ;;  %v3289_v19 = vpop.f32.mrf.mxu3  ;;  %v1286_v20 = vpop.f32.mrf.mxu2 }
 0x17e   :  { %v1685_v24 = vsel %vm767_vm0, %v1595_v15, 0.0  ;;  %v943_v26 = vpop.f32.mrf.mxu0 }
 0x17f   :  { %v1686_v30 = vadd.f32 %v1685_v24, %v1684_v54  ;;  %v1112_v29 = vpop.f32.mrf.mxu1  ;;  %v2337_v54 = vld [vmem:[%s3670_s0 + $0x230] sm:$0xf0] }
 0x180   :  { %v1113_v33 = vadd.f32 %v1112_v29, %v943_v26  ;;  %v2058_v14 = vor.u32 %v2337_v54, %v2057_v62  ;;  %v2344_v29 = vld [vmem:[%s3670_s0 + $0x268] sm:$0xf0] }
 0x181   :  { %982 = vmatmul.bf16.gmra.mxu0 %v2046_v13 }
 0x182   :  { %v1282_v34 = vadd.f32 %v1281_v32, %v1113_v33  ;;  %1151 = vmatmul.bf16.gmra.mxu1 %v2050_v23 }
 0x184   :  { %1399 = vst.msk [vmem:[%s3671_s2 + $0xe0] sm:$0xff] %vm767_vm0, %v1282_v34  ;;  %v1490_v42 = vsel %vm767_vm0, %v1282_v34, 0.0  ;;  %v1596_v47 = vmul.f32 %v1282_v34, %v1282_v34 }
 0x185   :  { %v1491_v44 = vadd.f32 %v1490_v42, %v1489_v17  ;;  %v3303_v48 = vpop.f32.mrf.mxu3  ;;  %v1288_v32 = vpop.f32.mrf.mxu2  ;;  %v2062_v17 = vor.u32 %v2336_v3, %v2059_v6 }
 0x186   :  { %v1687_v49 = vsel %vm767_vm0, %v1596_v47, 0.0  ;;  %v945_v50 = vpop.f32.mrf.mxu0 }
 0x187   :  { %v1688_v55 = vadd.f32 %v1687_v49, %v1686_v30  ;;  %v1114_v39 = vpop.f32.mrf.mxu1  ;;  %v2089_v30 = vld [vmem:[%s3670_s0 + $0x260] sm:$0xf] }
 0x188   :  { %v1115_v58 = vadd.f32 %v1114_v39, %v945_v50 }
 0x18a   :  { %v1284_v59 = vadd.f32 %v1283_v57, %v1115_v58  ;;  %2259 = vmatmul.msk.bf16.gmra.mxu2 %vm767_vm0, %v2078_v51 }
 0x18c   :  { %1400 = vst.msk [vmem:[%s3671_s2 + $0xe8] sm:$0xff] %vm767_vm0, %v1284_v59  ;;  %v1492_v57 = vsel %vm767_vm0, %v1284_v59, 0.0  ;;  %v1597_v8 = vmul.f32 %v1284_v59, %v1284_v59 }
 0x18d   :  { %v1493_v9 = vadd.f32 %v1492_v57, %v1491_v44  ;;  %v3324_v11 = vpop.f32.mrf.mxu3  ;;  %v1291_v5 = vpop.f32.mrf.mxu2  ;;  %v2090_v44 = vor.u32 %v2344_v29, %v2089_v30 }
 0x18e   :  { %v1689_v2 = vsel %vm767_vm0, %v1597_v8, 0.0  ;;  %v948_v15 = vpop.f32.mrf.mxu0 }
 0x18f   :  { %v1690_v13 = vadd.f32 %v1689_v2, %v1688_v55  ;;  %v1117_v24 = vpop.f32.mrf.mxu1 }
 0x190   :  { %v1118_v26 = vadd.f32 %v1117_v24, %v948_v15 }
 0x191   :  { %987 = vmatmul.bf16.gmra.mxu0 %v2058_v14  ;;  %v1173_v14 = vadd.f32 %v3142_v27, %v2811_v16 }
 0x192   :  { %v1287_v23 = vadd.f32 %v1286_v20, %v1118_v26  ;;  %1156 = vmatmul.bf16.gmra.mxu1 %v2062_v17 }
 0x194   :  { %1401 = vst.msk [vmem:[%s3671_s2 + $0xf0] sm:$0xff] %vm767_vm0, %v1287_v23  ;;  %v1494_v33 = vsel %vm767_vm0, %v1287_v23, 0.0  ;;  %v1598_v34 = vmul.f32 %v1287_v23, %v1287_v23 }
 0x195   :  { %v1495_v36 = vadd.f32 %v1494_v33, %v1493_v9  ;;  %v3338_v37 = vpop.f32.mrf.mxu3  ;;  %v1293_v20 = vpop.f32.mrf.mxu2  ;;  %v1175_v33 = vadd.f32 %v3169_v53, %v2838_v35 }
 0x196   :  { %v1691_v42 = vsel %vm767_vm0, %v1598_v34, 0.0  ;;  %v950_v47 = vpop.f32.mrf.mxu0 }
 0x197   :  { %v1692_v49 = vadd.f32 %v1691_v42, %v1690_v13  ;;  %v1119_v50 = vpop.f32.mrf.mxu1 }
 0x198   :  { %v1120_v51 = vadd.f32 %v1119_v50, %v950_v47 }
 0x19a   :  { %v1289_v55 = vadd.f32 %v1288_v32, %v1120_v51  ;;  %2260 = vmatmul.msk.bf16.gmra.mxu2 %vm767_vm0, %v2090_v44 }
 0x19c   :  { %1402 = vst.msk [vmem:[%s3671_s2 + $0xf8] sm:$0xff] %vm767_vm0, %v1289_v55  ;;  %v1496_v39 = vsel %vm767_vm0, %v1289_v55, 0.0  ;;  %v1599_v58 = vmul.f32 %v1289_v55, %v1289_v55 }
 0x19d   :  { %v1497_v59 = vadd.f32 %v1496_v39, %v1495_v36  ;;  %v3347_v62 = vpop.f32.mrf.mxu3  ;;  %v1296_v54 = vpop.f32.mrf.mxu2  ;;  %v1178_v39 = vadd.f32 %v3184_v12, %v2852_v52 }
 0x19e   :  { %v1693_v3 = vsel %vm767_vm0, %v1599_v58, 0.0  ;;  %v953_v6 = vpop.f32.mrf.mxu0 }
 0x19f   :  { %v1694_v57 = vadd.f32 %v1693_v3, %v1692_v49  ;;  %v1122_v8 = vpop.f32.mrf.mxu1 }
 0x1a0   :  { %v1123_v32 = vadd.f32 %v1122_v8, %v953_v6 }
 0x1a2   :  { %v1292_v9 = vadd.f32 %v1291_v5, %v1123_v32 }
 0x1a4   :  { %1403 = vst.msk [vmem:[%s3671_s2 + $0x100] sm:$0xff] %vm767_vm0, %v1292_v9  ;;  %v1498_v2 = vsel %vm767_vm0, %v1292_v9, 0.0  ;;  %v1600_v15 = vmul.f32 %v1292_v9, %v1292_v9 }
 0x1a5   :  { %v1499_v17 = vadd.f32 %v1498_v2, %v1497_v59  ;;  %v1298_v13 = vpop.f32.mrf.mxu2  ;;  %v1341_v24 = vpop.f32.mrf.mxu3  ;;  %v1180_v2 = vadd.f32 %v3211_v38, %v2879_v7 }
 0x1a6   :  { %v1695_v26 = vsel %vm767_vm0, %v1600_v15, 0.0  ;;  %v3358_v23 = vadd.f32 %v1341_v24, %v1173_v14  ;;  %v955_v30 = vpop.f32.mrf.mxu0 }
 0x1a7   :  { %v1696_v5 = vadd.f32 %v1695_v26, %v1694_v57  ;;  %v1124_v29 = vpop.f32.mrf.mxu1 }
 0x1a8   :  { %1423 = vst.msk [vmem:[%s3671_s2 + $0x1a0] sm:$0xff] %vm767_vm0, %v3358_v23  ;;  %v1125_v16 = vadd.f32 %v1124_v29, %v955_v30 }
 0x1aa   :  { %v1294_v27 = vadd.f32 %v1293_v20, %v1125_v16 }
 0x1ac   :  { %1404 = vst.msk [vmem:[%s3671_s2 + $0x108] sm:$0xff] %vm767_vm0, %v1294_v27  ;;  %v1500_v34 = vsel %vm767_vm0, %v1294_v27, 0.0  ;;  %v1601_v36 = vmul.f32 %v1294_v27, %v1294_v27 }
 0x1ad   :  { %v1501_v42 = vadd.f32 %v1500_v34, %v1499_v17  ;;  %v1301_v47 = vpop.f32.mrf.mxu2  ;;  %v1343_v44 = vpop.f32.mrf.mxu3 }
 0x1ae   :  { %v1697_v49 = vsel %vm767_vm0, %v1601_v36, 0.0  ;;  %v3373_v50 = vadd.f32 %v1343_v44, %v1175_v33  ;;  %v958_v51 = vpop.f32.mrf.mxu0  ;;  %v1183_v33 = vadd.f32 %v3226_v1, %v2893_v25 }
 0x1af   :  { %v1698_v20 = vadd.f32 %v1697_v49, %v1696_v5  ;;  %v1127_v55 = vpop.f32.mrf.mxu1 }
 0x1b0   :  { %1424 = vst.msk [vmem:[%s3671_s2 + $0x1a8] sm:$0xff] %vm767_vm0, %v3373_v50  ;;  %v1128_v35 = vadd.f32 %v1127_v55, %v958_v51 }
 0x1b2   :  { %v1297_v53 = vadd.f32 %v1296_v54, %v1128_v35 }
 0x1b4   :  { %1405 = vst.msk [vmem:[%s3671_s2 + $0x110] sm:$0xff] %vm767_vm0, %v1297_v53  ;;  %v1502_v58 = vsel %vm767_vm0, %v1297_v53, 0.0  ;;  %v1602_v59 = vmul.f32 %v1297_v53, %v1297_v53  ;;  %v1185_v53 = vadd.f32 %v3253_v31, %v2920_v46 }
 0x1b5   :  { %v1503_v3 = vadd.f32 %v1502_v58, %v1501_v42  ;;  %v1303_v6 = vpop.f32.mrf.mxu2  ;;  %v1346_v57 = vpop.f32.mrf.mxu3 }
 0x1b6   :  { %v1699_v8 = vsel %vm767_vm0, %v1602_v59, 0.0  ;;  %v3388_v32 = vadd.f32 %v1346_v57, %v1178_v39  ;;  %v960_v9 = vpop.f32.mrf.mxu0 }
 0x1b7   :  { %v1700_v54 = vadd.f32 %v1699_v8, %v1698_v20  ;;  %v1129_v14 = vpop.f32.mrf.mxu1 }
 0x1b8   :  { %1425 = vst.msk [vmem:[%s3671_s2 + $0x1b0] sm:$0xff] %vm767_vm0, %v3388_v32  ;;  %v1130_v52 = vadd.f32 %v1129_v14, %v960_v9 }
 0x1ba   :  { %v1299_v12 = vadd.f32 %v1298_v13, %v1130_v52  ;;  %v1188_v52 = vadd.f32 %v3268_v56, %v2934_v0  ;;  %v1190_v56 = vadd.f32 %v3289_v19, %v2961_v21  ;;  %v1193_v21 = vadd.f32 %v3303_v48, %v2975_v40 }
 0x1bb   :  { %v1195_v40 = vadd.f32 %v3324_v11, %v3002_v61  ;;  %v1198_v61 = vadd.f32 %v3338_v37, %v3016_v18  ;;  %v1200_v18 = vadd.f32 %v3347_v62, %v3043_v41 }
 0x1bc   :  { %1406 = vst.msk [vmem:[%s3671_s2 + $0x118] sm:$0xff] %vm767_vm0, %v1299_v12  ;;  %v1504_v15 = vsel %vm767_vm0, %v1299_v12, 0.0  ;;  %v1603_v17 = vmul.f32 %v1299_v12, %v1299_v12 }
 0x1bd   :  { %v1505_v24 = vadd.f32 %v1504_v15, %v1503_v3  ;;  %v1306_v26 = vpop.f32.mrf.mxu2  ;;  %v1348_v30 = vpop.f32.mrf.mxu3 }
 0x1be   :  { %v1701_v5 = vsel %vm767_vm0, %v1603_v17, 0.0  ;;  %v3403_v29 = vadd.f32 %v1348_v30, %v1180_v2  ;;  %v963_v16 = vpop.f32.mrf.mxu0 }
 0x1bf   :  { %v1702_v13 = vadd.f32 %v1701_v5, %v1700_v54  ;;  %v1132_v27 = vpop.f32.mrf.mxu1 }
 0x1c0   :  { %1426 = vst.msk [vmem:[%s3671_s2 + $0x1b8] sm:$0xff] %vm767_vm0, %v3403_v29  ;;  %v1133_v7 = vadd.f32 %v1132_v27, %v963_v16 }
 0x1c2   :  { %v1302_v38 = vadd.f32 %v1301_v47, %v1133_v7 }
 0x1c4   :  { %1407 = vst.msk [vmem:[%s3671_s2 + $0x120] sm:$0xff] %vm767_vm0, %v1302_v38  ;;  %v1506_v34 = vsel %vm767_vm0, %v1302_v38, 0.0  ;;  %v1604_v36 = vmul.f32 %v1302_v38, %v1302_v38 }
 0x1c5   :  { %v1507_v42 = vadd.f32 %v1506_v34, %v1505_v24  ;;  %v1308_v44 = vpop.f32.mrf.mxu2  ;;  %v1351_v49 = vpop.f32.mrf.mxu3 }
 0x1c6   :  { %v1703_v51 = vsel %vm767_vm0, %v1604_v36, 0.0  ;;  %v3418_v20 = vadd.f32 %v1351_v49, %v1183_v33  ;;  %v965_v55 = vpop.f32.mrf.mxu0 }
 0x1c7   :  { %v1704_v47 = vadd.f32 %v1703_v51, %v1702_v13  ;;  %v1134_v35 = vpop.f32.mrf.mxu1 }
 0x1c8   :  { %1427 = vst.msk [vmem:[%s3671_s2 + $0x1c0] sm:$0xff] %vm767_vm0, %v3418_v20  ;;  %v1135_v25 = vadd.f32 %v1134_v35, %v965_v55 }
 0x1ca   :  { %v1304_v1 = vadd.f32 %v1303_v6, %v1135_v25 }
 0x1cc   :  { %1408 = vst.msk [vmem:[%s3671_s2 + $0x128] sm:$0xff] %vm767_vm0, %v1304_v1  ;;  %v1508_v39 = vsel %vm767_vm0, %v1304_v1, 0.0  ;;  %v1605_v58 = vmul.f32 %v1304_v1, %v1304_v1 }
 0x1cd   :  { %v3432_v59 = vadd.f32 %v1508_v39, %v1507_v42  ;;  %v1311_v3 = vpop.f32.mrf.mxu2  ;;  %v1353_v57 = vpop.f32.mrf.mxu3 }
 0x1ce   :  { %v1705_v8 = vsel %vm767_vm0, %v1605_v58, 0.0  ;;  %v3435_v9 = vadd.f32 %v1353_v57, %v1185_v53  ;;  %v968_v6 = vpop.f32.mrf.mxu0 }
 0x1cf   :  { %v3437_v54 = vadd.f32 %v1705_v8, %v1704_v47  ;;  %v1137_v46 = vpop.f32.mrf.mxu1 }
 0x1d0   :  { %1428 = vst.msk [vmem:[%s3671_s2 + $0x1c8] sm:$0xff] %vm767_vm0, %v3435_v9  ;;  %v1138_v31 = vadd.f32 %v1137_v46, %v968_v6 }
 0x1d2   :  { %v3444_v14 = vadd.f32 %v1306_v26, %v1138_v31 }
 0x1d4   :  { %1409 = vst.msk [vmem:[%s3671_s2 + $0x130] sm:$0xff] %vm767_vm0, %v3444_v14  ;;  %v1606_v62 = vmul.f32 %v3444_v14, %v3444_v14 }
 0x1d5   :  { %v1313_v12 = vpop.f32.mrf.mxu2  ;;  %v1356_v2 = vpop.f32.mrf.mxu3 }
 0x1d6   :  { %v3453_v15 = vadd.f32 %v1356_v2, %v1188_v52  ;;  %v970_v17 = vpop.f32.mrf.mxu0 }
 0x1d7   :  { %v1139_v24 = vpop.f32.mrf.mxu1 }
 0x1d8   :  { %1429 = vst.msk [vmem:[%s3671_s2 + $0x1d0] sm:$0xff] %vm767_vm0, %v3453_v15  ;;  %v1140_v26 = vadd.f32 %v1139_v24, %v970_v17 }
 0x1da   :  { %v1309_v0 = vadd.f32 %v1308_v44, %v1140_v26  ;;  %v1510_v26 = vsel %vm767_vm0, %v3444_v14, 0.0 }
 0x1dc   :  { %1410 = vst.msk [vmem:[%s3671_s2 + $0x138] sm:$0xff] %vm767_vm0, %v1309_v0 }
 0x1dd   :  { %v1316_v30 = vpop.f32.mrf.mxu2  ;;  %v1358_v5 = vpop.f32.mrf.mxu3 }
 0x1de   :  { %v3466_v16 = vadd.f32 %v1358_v5, %v1190_v56  ;;  %v973_v13 = vpop.f32.mrf.mxu0  ;;  %v1607_v56 = vmul.f32 %v1309_v0, %v1309_v0  ;;  %v1707_v5 = vsel %vm767_vm0, %v1606_v62, 0.0 }
 0x1df   :  { %v1142_v27 = vpop.f32.mrf.mxu1  ;;  %v1708_v14 = vadd.f32 %v1707_v5, %v3437_v54 }
 0x1e0   :  { %1430 = vst.msk [vmem:[%s3671_s2 + $0x1d8] sm:$0xff] %vm767_vm0, %v3466_v16  ;;  %v1143_v7 = vadd.f32 %v1142_v27, %v973_v13  ;;  %v1512_v13 = vsel %vm767_vm0, %v1309_v0, 0.0 }
 0x1e2   :  { %v1312_v38 = vadd.f32 %v1311_v3, %v1143_v7 }
 0x1e4   :  { %1411 = vst.msk [vmem:[%s3671_s2 + $0x140] sm:$0xff] %vm767_vm0, %v1312_v38  ;;  %v1608_v27 = vmul.f32 %v1312_v38, %v1312_v38 }
 0x1e5   :  { %v1318_v19 = vpop.f32.mrf.mxu2  ;;  %v1361_v33 = vpop.f32.mrf.mxu3 }
 0x1e6   :  { %v3479_v34 = vadd.f32 %v1361_v33, %v1193_v21  ;;  %v975_v36 = vpop.f32.mrf.mxu0  ;;  %v1511_v21 = vadd.f32 %v1510_v26, %v3432_v59  ;;  %v1709_v33 = vsel %vm767_vm0, %v1607_v56, 0.0 }
 0x1e7   :  { %v1144_v42 = vpop.f32.mrf.mxu1 }
 0x1e8   :  { %1431 = vst.msk [vmem:[%s3671_s2 + $0x1e0] sm:$0xff] %vm767_vm0, %v3479_v34  ;;  %v1145_v44 = vadd.f32 %v1144_v42, %v975_v36  ;;  %v1514_v36 = vsel %vm767_vm0, %v1312_v38, 0.0  ;;  %v1513_v0 = vadd.f32 %v1512_v13, %v1511_v21 }
 0x1ea   :  { %v1314_v49 = vadd.f32 %v1313_v12, %v1145_v44 }
 0x1ec   :  { %1412 = vst.msk [vmem:[%s3671_s2 + $0x148] sm:$0xff] %vm767_vm0, %v1314_v49  ;;  %v1609_v42 = vmul.f32 %v1314_v49, %v1314_v49  ;;  %v1516_v59 = vsel %vm767_vm0, %v1314_v49, 0.0 }
 0x1ed   :  { %v1321_v48 = vpop.f32.mrf.mxu2  ;;  %v1363_v51 = vpop.f32.mrf.mxu3 }
 0x1ee   :  { %v3492_v55 = vadd.f32 %v1363_v51, %v1195_v40  ;;  %v978_v47 = vpop.f32.mrf.mxu0  ;;  %v1711_v40 = vsel %vm767_vm0, %v1608_v27, 0.0  ;;  %v1710_v51 = vadd.f32 %v1709_v33, %v1708_v14  ;;  %v1168_v14 = vadd.f32 %v3100_v43, %v2770_v45 }
 0x1ef   :  { %v1147_v35 = vpop.f32.mrf.mxu1 }
 0x1f0   :  { %1432 = vst.msk [vmem:[%s3671_s2 + $0x1e8] sm:$0xff] %vm767_vm0, %v3492_v55  ;;  %v1148_v25 = vadd.f32 %v1147_v35, %v978_v47  ;;  %v1515_v47 = vadd.f32 %v1514_v36, %v1513_v0  ;;  %v1713_v35 = vsel %vm767_vm0, %v1609_v42, 0.0 }
 0x1f2   :  { %v1317_v1 = vadd.f32 %v1316_v30, %v1148_v25 }
 0x1f4   :  { %1413 = vst.msk [vmem:[%s3671_s2 + $0x150] sm:$0xff] %vm767_vm0, %v1317_v1  ;;  %v1518_v25 = vsel %vm767_vm0, %v1317_v1, 0.0 }
 0x1f5   :  { %v1323_v11 = vpop.f32.mrf.mxu2  ;;  %v1366_v53 = vpop.f32.mrf.mxu3 }
 0x1f6   :  { %v3505_v39 = vadd.f32 %v1366_v53, %v1198_v61  ;;  %v980_v58 = vpop.f32.mrf.mxu0  ;;  %v1517_v53 = vadd.f32 %v1516_v59, %v1515_v47 }
 0x1f7   :  { %v1149_v3 = vpop.f32.mrf.mxu1 }
 0x1f8   :  { %1433 = vst.msk [vmem:[%s3671_s2 + $0x1f0] sm:$0xff] %vm767_vm0, %v3505_v39  ;;  %v1150_v57 = vadd.f32 %v1149_v3, %v980_v58 }
 0x1fa   :  { %v1319_v8 = vadd.f32 %v1318_v19, %v1150_v57  ;;  %v1163_v19 = vadd.f32 %v3058_v60, %v2728_v10 }
 0x1fc   :  { %1414 = vst.msk [vmem:[%s3671_s2 + $0x158] sm:$0xff] %vm767_vm0, %v1319_v8  ;;  %v1611_v61 = vmul.f32 %v1319_v8, %v1319_v8  ;;  %v1520_v58 = vsel %vm767_vm0, %v1319_v8, 0.0 }
 0x1fd   :  { %v1326_v37 = vpop.f32.mrf.mxu2  ;;  %v1368_v6 = vpop.f32.mrf.mxu3 }
 0x1fe   :  { %v3518_v46 = vadd.f32 %v1368_v6, %v1200_v18  ;;  %v983_v31 = vpop.f32.mrf.mxu0  ;;  %v1519_v6 = vadd.f32 %v1518_v25, %v1517_v53 }
 0x1ff   :  { %v1152_v52 = vpop.f32.mrf.mxu1 }
 0x200   :  { %1434 = vst.msk [vmem:[%s3671_s2 + $0x1f8] sm:$0xff] %vm767_vm0, %v3518_v46  ;;  %v1153_v12 = vadd.f32 %v1152_v52, %v983_v31  ;;  %v1717_v31 = vsel %vm767_vm0, %v1611_v61, 0.0 }
 0x202   :  { %v1322_v2 = vadd.f32 %v1321_v48, %v1153_v12  ;;  %v1610_v48 = vmul.f32 %v1317_v1, %v1317_v1  ;;  %v1165_v1 = vadd.f32 %v3085_v22, %v2755_v28 }
 0x204   :  { %1415 = vst.msk [vmem:[%s3671_s2 + $0x160] sm:$0xff] %vm767_vm0, %v1322_v2  ;;  %v1715_v49 = vsel %vm767_vm0, %v1610_v48, 0.0  ;;  %v1612_v3 = vmul.f32 %v1322_v2, %v1322_v2  ;;  %v1522_v52 = vsel %vm767_vm0, %v1322_v2, 0.0 }
 0x205   :  { %v3529_v41 = vpop.f32.mrf.mxu2 }
 0x206   :  { %v985_v17 = vpop.f32.mrf.mxu0 }
 0x207   :  { %v1154_v24 = vpop.f32.mrf.mxu1 }
 0x208   :  { %v1155_v30 = vadd.f32 %v1154_v24, %v985_v17  ;;  %v1521_v17 = vadd.f32 %v1520_v58, %v1519_v6 }
 0x20a   :  { %v1324_v7 = vadd.f32 %v1323_v11, %v1155_v30  ;;  %v1712_v11 = vadd.f32 %v1711_v40, %v1710_v51  ;;  %v1523_v30 = vadd.f32 %v1522_v52, %v1521_v17 }
 0x20c   :  { %1416 = vst.msk [vmem:[%s3671_s2 + $0x168] sm:$0xff] %vm767_vm0, %v1324_v7  ;;  %v1714_v18 = vadd.f32 %v1713_v35, %v1712_v11  ;;  %v1613_v12 = vmul.f32 %v1324_v7, %v1324_v7  ;;  %v1524_v24 = vsel %vm767_vm0, %v1324_v7, 0.0 }
 0x20d   :  { %v1331_v44 = vpop.f32.mrf.mxu2 }
 0x20e   :  { %v1332_v10 = vadd.f32 %v1331_v44, %v1163_v19  ;;  %v988_v60 = vpop.f32.mrf.mxu0  ;;  %v1716_v62 = vadd.f32 %v1715_v49, %v1714_v18  ;;  %v1721_v2 = vsel %vm767_vm0, %v1613_v12, 0.0  ;;  %v1525_v19 = vadd.f32 %v1524_v24, %v1523_v30 }
 0x20f   :  { %v1157_v38 = vpop.f32.mrf.mxu1 }
 0x210   :  { %1419 = vst.msk [vmem:[%s3671_s2 + $0x180] sm:$0xff] %vm767_vm0, %v1332_v10  ;;  %v1158_v54 = vadd.f32 %v1157_v38, %v988_v60  ;;  %v1718_v22 = vadd.f32 %v1717_v31, %v1716_v62  ;;  %v1616_v0 = vmul.f32 %v1332_v10, %v1332_v10  ;;  %v1530_v51 = vsel %vm767_vm0, %v1332_v10, 0.0 }
 0x211   :  { %v1620_v31 = vmul.f32 %v3358_v23, %v3358_v23 }
 0x212   :  { %v1327_v57 = vadd.f32 %v1326_v37, %v1158_v54  ;;  %v1719_v37 = vsel %vm767_vm0, %v1612_v3, 0.0  ;;  %v1727_v43 = vsel %vm767_vm0, %v1616_v0, 0.0  ;;  %v1170_v3 = vadd.f32 %v3127_v4, %v2797_v63 }
 0x213   :  { %v1720_v21 = vadd.f32 %v1719_v37, %v1718_v22  ;;  %v1538_v63 = vsel %vm767_vm0, %v3358_v23, 0.0  ;;  %v1621_v4 = vmul.f32 %v3373_v50, %v3373_v50  ;;  %v1735_v24 = vsel %vm767_vm0, %v1620_v31, 0.0 }
 0x214   :  { %1417 = vst.msk [vmem:[%s3671_s2 + $0x170] sm:$0xff] %vm767_vm0, %v1327_v57  ;;  %v1614_v26 = vmul.f32 %v1327_v57, %v1327_v57  ;;  %v1526_v13 = vsel %vm767_vm0, %v1327_v57, 0.0  ;;  %v1542_v23 = vsel %vm767_vm0, %v3388_v32, 0.0 }
 0x215   :  { %v1333_v8 = vpop.f32.mrf.mxu2  ;;  %v1722_v36 = vadd.f32 %v1721_v2, %v1720_v21  ;;  %v1527_v42 = vadd.f32 %v1526_v13, %v1525_v19  ;;  %v1737_v30 = vsel %vm767_vm0, %v1621_v4, 0.0  ;;  %v1624_v21 = vmul.f32 %v3418_v20, %v3418_v20 }
 0x216   :  { %v1334_v56 = vadd.f32 %v1333_v8, %v1165_v1  ;;  %v990_v28 = vpop.f32.mrf.mxu0  ;;  %v1723_v7 = vsel %vm767_vm0, %v1614_v26, 0.0  ;;  %v1540_v26 = vsel %vm767_vm0, %v3373_v50, 0.0  ;;  %v1544_v50 = vsel %vm767_vm0, %v3403_v29, 0.0 }
 0x217   :  { %v1159_v5 = vpop.f32.mrf.mxu1  ;;  %v1724_v59 = vadd.f32 %v1723_v7, %v1722_v36  ;;  %v1625_v36 = vmul.f32 %v3435_v9, %v3435_v9  ;;  %v1743_v0 = vsel %vm767_vm0, %v1624_v21, 0.0 }
 0x218   :  { %1420 = vst.msk [vmem:[%s3671_s2 + $0x188] sm:$0xff] %vm767_vm0, %v1334_v56  ;;  %v1160_v27 = vadd.f32 %v1159_v5, %v990_v28  ;;  %v1532_v25 = vsel %vm767_vm0, %v1334_v56, 0.0  ;;  %v1623_v5 = vmul.f32 %v3403_v29, %v3403_v29  ;;  %v1548_v29 = vsel %vm767_vm0, %v3435_v9, 0.0 }
 0x219   :  { %v1552_v9 = vsel %vm767_vm0, %v3466_v16, 0.0 }
 0x21a   :  { %v1329_v33 = vadd.f32 %v3529_v41, %v1160_v27  ;;  %v1617_v41 = vmul.f32 %v1334_v56, %v1334_v56  ;;  %v1622_v56 = vmul.f32 %v3388_v32, %v3388_v32  ;;  %v1546_v32 = vsel %vm767_vm0, %v3418_v20, 0.0 }
 0x21b   :  { %v1550_v20 = vsel %vm767_vm0, %v3453_v15, 0.0 }
 0x21c   :  { %1418 = vst.msk [vmem:[%s3671_s2 + $0x178] sm:$0xff] %vm767_vm0, %v1329_v33  ;;  %v1528_v44 = vsel %vm767_vm0, %v1329_v33, 0.0  ;;  %v1615_v40 = vmul.f32 %v1329_v33, %v1329_v33  ;;  %v1729_v10 = vsel %vm767_vm0, %v1617_v41, 0.0  ;;  %v1739_v27 = vsel %vm767_vm0, %v1622_v56, 0.0 }
 0x21d   :  { %v1529_v48 = vadd.f32 %v1528_v44, %v1527_v42  ;;  %v1336_v60 = vpop.f32.mrf.mxu2  ;;  %v1741_v33 = vsel %vm767_vm0, %v1623_v5, 0.0  ;;  %v1626_v44 = vmul.f32 %v3453_v15, %v3453_v15  ;;  %v1554_v15 = vsel %vm767_vm0, %v3479_v34, 0.0 }
 0x21e   :  { %v1725_v47 = vsel %vm767_vm0, %v1615_v40, 0.0  ;;  %v1337_v38 = vadd.f32 %v1336_v60, %v1168_v14  ;;  %v1627_v60 = vmul.f32 %v3466_v16, %v3466_v16  ;;  %v1556_v16 = vsel %vm767_vm0, %v3492_v55, 0.0 }
 0x21f   :  { %v1726_v35 = vadd.f32 %v1725_v47, %v1724_v59  ;;  %v1531_v45 = vadd.f32 %v1530_v51, %v1529_v48  ;;  %v1745_v48 = vsel %vm767_vm0, %v1625_v36, 0.0  ;;  %v1747_v47 = vsel %vm767_vm0, %v1626_v44, 0.0 }
 0x220   :  { %1421 = vst.msk [vmem:[%s3671_s2 + $0x190] sm:$0xff] %vm767_vm0, %v1337_v38  ;;  %v1618_v61 = vmul.f32 %v1337_v38, %v1337_v38  ;;  %v1534_v53 = vsel %vm767_vm0, %v1337_v38, 0.0  ;;  %v1628_v38 = vmul.f32 %v3479_v34, %v3479_v34  ;;  %v1558_v34 = vsel %vm767_vm0, %v3505_v39, 0.0 }
 0x221   :  { %v1533_v54 = vadd.f32 %v1532_v25, %v1531_v45  ;;  %v1728_v11 = vadd.f32 %v1727_v43, %v1726_v35  ;;  %v1749_v43 = vsel %vm767_vm0, %v1627_v60, 0.0  ;;  %v1629_v25 = vmul.f32 %v3492_v55, %v3492_v55 }
 0x222   :  { %v1731_v57 = vsel %vm767_vm0, %v1618_v61, 0.0  ;;  %v1560_v55 = vsel %vm767_vm0, %v3518_v46, 0.0 }
 0x223   :  { %v1535_v49 = vadd.f32 %v1534_v53, %v1533_v54  ;;  %v1730_v58 = vadd.f32 %v1729_v10, %v1728_v11  ;;  %v1751_v11 = vsel %vm767_vm0, %v1628_v38, 0.0  ;;  %v1630_v10 = vmul.f32 %v3505_v39, %v3505_v39 }
 0x225   :  { %v1732_v18 = vadd.f32 %v1731_v57, %v1730_v58  ;;  %v1338_v6 = vpop.f32.mrf.mxu2  ;;  %v1753_v58 = vsel %vm767_vm0, %v1629_v25, 0.0 }
 0x226   :  { %v1339_v1 = vadd.f32 %v1338_v6, %v1170_v3  ;;  %v1631_v3 = vmul.f32 %v3518_v46, %v3518_v46  ;;  %v1755_v6 = vsel %vm767_vm0, %v1630_v10, 0.0 }
 0x228   :  { %1422 = vst.msk [vmem:[%s3671_s2 + $0x198] sm:$0xff] %vm767_vm0, %v1339_v1  ;;  %v1536_v52 = vsel %vm767_vm0, %v1339_v1, 0.0  ;;  %v1619_v12 = vmul.f32 %v1339_v1, %v1339_v1 }
 0x229   :  { %v1537_v62 = vadd.f32 %v1536_v52, %v1535_v49  ;;  %v1757_v52 = vsel %vm767_vm0, %v1631_v3, 0.0 }
 0x22a   :  { %v1733_v17 = vsel %vm767_vm0, %v1619_v12, 0.0 }
 0x22b   :  { %v1539_v8 = vadd.f32 %v1538_v63, %v1537_v62  ;;  %v1734_v37 = vadd.f32 %v1733_v17, %v1732_v18 }
 0x22d   :  { %v1541_v28 = vadd.f32 %v1540_v26, %v1539_v8  ;;  %v1736_v22 = vadd.f32 %v1735_v24, %v1734_v37 }
 0x22f   :  { %v1543_v2 = vadd.f32 %v1542_v23, %v1541_v28  ;;  %v1738_v13 = vadd.f32 %v1737_v30, %v1736_v22 }
 0x231   :  { %v1545_v19 = vadd.f32 %v1544_v50, %v1543_v2  ;;  %v1740_v7 = vadd.f32 %v1739_v27, %v1738_v13 }
 0x233   :  { %v1547_v42 = vadd.f32 %v1546_v32, %v1545_v19  ;;  %v1742_v14 = vadd.f32 %v1741_v33, %v1740_v7 }
 0x235   :  { %v1549_v40 = vadd.f32 %v1548_v29, %v1547_v42  ;;  %v1744_v59 = vadd.f32 %v1743_v0, %v1742_v14 }
 0x237   :  { %v1551_v51 = vadd.f32 %v1550_v20, %v1549_v40  ;;  %v1746_v41 = vadd.f32 %v1745_v48, %v1744_v59 }
 0x239   :  { %v1553_v35 = vadd.f32 %v1552_v9, %v1551_v51  ;;  %v1748_v45 = vadd.f32 %v1747_v47, %v1746_v41 }
 0x23b   :  { %v1555_v61 = vadd.f32 %v1554_v15, %v1553_v35  ;;  %v1750_v54 = vadd.f32 %v1749_v43, %v1748_v45 }
 0x23d   :  { %v1557_v53 = vadd.f32 %v1556_v16, %v1555_v61  ;;  %v1752_v49 = vadd.f32 %v1751_v11, %v1750_v54 }
 0x23f   :  { %v1559_v57 = vadd.f32 %v1558_v34, %v1557_v53  ;;  %v1754_v18 = vadd.f32 %v1753_v58, %v1752_v49 }
 0x241   :  { %v1561_v1 = vadd.f32 %v1560_v55, %v1559_v57  ;;  %v1756_v31 = vadd.f32 %v1755_v6, %v1754_v18 }
 0x243   :  { %v1562_v12 = vrot.slane %v1561_v1, 4  ;;  %v1758_v62 = vadd.f32 %v1757_v52, %v1756_v31 }
 0x245   :  { %v1563_v63 = vadd.f32 %v1562_v12, %v1561_v1  ;;  %v1759_v4 = vrot.slane %v1758_v62, 4 }
 0x247   :  { %v1564_v17 = vrot.slane %v1563_v63, 2  ;;  %v1760_v39 = vadd.f32 %v1759_v4, %v1758_v62 }
 0x249   :  { %v1565_v8 = vadd.f32 %v1564_v17, %v1563_v63  ;;  %v1761_v37 = vrot.slane %v1760_v39, 2 }
 0x24b   :  { %v1566_v24 = vrot.slane %v1565_v8, 1  ;;  %v1762_v26 = vadd.f32 %v1761_v37, %v1760_v39 }
 0x24d   :  { %v1567_v56 = vadd.f32 %v1566_v24, %v1565_v8  ;;  %v1763_v28 = vrot.slane %v1762_v26, 1 }
 0x24f   :  { %v1764_v22 = vadd.f32 %v1763_v28, %v1762_v26  ;;  %1765 = vst.msk [vmem:[%s3672_s3] sm:$0xff] %vm767_vm0, %v1567_v56 }
 0x251   :  { %1766 = vst.msk [vmem:[%s3673_s4] sm:$0xff] %vm767_vm0, %v1764_v22 }

// kernel: _lambda_.24
= control target key start
LH: loop header
LB: loop body
LE: loop exit
PB: predicated region body
PF: predicated region fallthrough
CT: control target
= control target key end

     0   :  { %s498_s0 = inlined_call_operand.vmem [shape: f32[32,512], index: 0, kind: input, shape index: {}]   ;;  %s499_s1 = inlined_call_operand.vmem [shape: f32[1,512], index: 1, kind: input, shape index: {}]   ;;  %s500_s2 = inlined_call_operand.vmem [shape: f32[1,512], index: 2, kind: input, shape index: {}]   ;;  %s501_s3 = inlined_call_operand.vmem [shape: f32[32,512], index: 3, kind: input, shape index: {}]   ;;  %s502_s4 = inlined_call_operand.vmem [shape: f32[1,512], index: 4, kind: input, shape index: {}]   ;;  %s503_s5 = inlined_call_operand.vmem [shape: f32[1,512], index: 5, kind: input, shape index: {}]   ;;  %s504_s6 = inlined_call_operand.vmem [shape: f32[32,512], index: 6, kind: output, shape index: {}]  }
   0x1   :  { %v23_v0 = vld [vmem:[%s498_s0] sm:$0xff]  ;;  %v24_v7 = vld [vmem:[%s498_s0 + $0x8] sm:$0xff]  ;;  %v25_v17 = vld [vmem:[%s498_s0 + $0x10] sm:$0xff] }
   0x2   :  { %v39_v1 = vld [vmem:[%s499_s1] sm:$0xf]  ;;  %v92_v12 = vld [vmem:[%s501_s3 + $0x8] sm:$0xff]  ;;  %v93_v22 = vld [vmem:[%s501_s3 + $0x10] sm:$0xff] }
   0x3   :  { %v65_v2 = vld [vmem:[%s500_s2] sm:$0xf]  ;;  %v255_v3 = vperm.slane %v39_v1, 0  ;;  %v273_v10 = vperm.slane %v39_v1, 1  ;;  %v292_v20 = vperm.slane %v39_v1, 2  ;;  %v26_v27 = vld [vmem:[%s498_s0 + $0x18] sm:$0xff] }
   0x4   :  { %v257_v4 = vperm.slane %v65_v2, 0  ;;  %v91_v5 = vld [vmem:[%s501_s3] sm:$0xff]  ;;  %v275_v11 = vperm.slane %v65_v2, 1  ;;  %v294_v21 = vperm.slane %v65_v2, 2  ;;  %v313_v31 = vperm.slane %v39_v1, 3  ;;  %v94_v33 = vld [vmem:[%s501_s3 + $0x18] sm:$0xff] }
   0x5   :  { %v107_v6 = vld [vmem:[%s502_s4] sm:$0xf]  ;;  %v49_v13 = vmul.f32 %v255_v3, %v23_v0  ;;  %v50_v19 = vmul.f32 %v273_v10, %v24_v7  ;;  %v51_v30 = vmul.f32 %v292_v20, %v25_v17  ;;  %v315_v32 = vperm.slane %v65_v2, 3  ;;  %v28_v35 = vld [vmem:[%s498_s0 + $0x28] sm:$0xff]  ;;  %v29_v45 = vld [vmem:[%s498_s0 + $0x30] sm:$0xff] }
   0x6   :  { %v268_v8 = vperm.slane %v107_v6, 0  ;;  %v149_v9 = vld [vmem:[%s503_s5] sm:$0xf]  ;;  %v283_v15 = vperm.slane %v107_v6, 1  ;;  %v301_v25 = vperm.slane %v107_v6, 2  ;;  %v327_v38 = vperm.slane %v107_v6, 3 }
   0x7   :  { %v281_v14 = vperm.slane %v149_v9, 0  ;;  %v285_v16 = vperm.slane %v149_v9, 1  ;;  %v75_v23 = vadd.f32 %v257_v4, %v49_v13  ;;  %v303_v26 = vperm.slane %v149_v9, 2  ;;  %v27_v28 = vld [vmem:[%s498_s0 + $0x20] sm:$0xff]  ;;  %v96_v44 = vld [vmem:[%s501_s3 + $0x28] sm:$0xff]  ;;  %v97_v54 = vld [vmem:[%s501_s3 + $0x30] sm:$0xff] }
   0x8   :  { %v117_v18 = vmul.f32 %v268_v8, %v91_v5  ;;  %v118_v24 = vmul.f32 %v283_v15, %v92_v12  ;;  %v76_v29 = vadd.f32 %v275_v11, %v50_v19  ;;  %v95_v34 = vld [vmem:[%s501_s3 + $0x20] sm:$0xff]  ;;  %v119_v37 = vmul.f32 %v301_v25, %v93_v22  ;;  %v30_v55 = vld [vmem:[%s498_s0 + $0x38] sm:$0xff]  ;;  %v32_v12 = vld [vmem:[%s498_s0 + $0x48] sm:$0xff] }
   0x9   :  { %v329_v39 = vperm.slane %v149_v9, 3  ;;  %v77_v41 = vadd.f32 %v294_v21, %v51_v30  ;;  %v52_v42 = vmul.f32 %v313_v31, %v26_v27  ;;  %v53_v43 = vmul.f32 %v255_v3, %v27_v28  ;;  %v98_v60 = vld [vmem:[%s501_s3 + $0x38] sm:$0xff]  ;;  %v31_v1 = vld [vmem:[%s498_s0 + $0x40] sm:$0xff]  ;;  %v100_v28 = vld [vmem:[%s501_s3 + $0x48] sm:$0xff] }
   0xa   :  { %v133_v36 = vadd.f32 %v117_v18, %v75_v23  ;;  %v134_v40 = vadd.f32 %v118_v24, %v76_v29  ;;  %v120_v47 = vmul.f32 %v327_v38, %v94_v33  ;;  %v121_v48 = vmul.f32 %v268_v8, %v95_v34  ;;  %v99_v9 = vld [vmem:[%s501_s3 + $0x40] sm:$0xff]  ;;  %v33_v29 = vld [vmem:[%s498_s0 + $0x50] sm:$0xff] }
   0xb   :  { %v54_v49 = vmul.f32 %v273_v10, %v28_v35  ;;  %v135_v51 = vadd.f32 %v119_v37, %v77_v41  ;;  %v78_v52 = vadd.f32 %v315_v32, %v52_v42  ;;  %v79_v53 = vadd.f32 %v257_v4, %v53_v43  ;;  %v101_v30 = vld [vmem:[%s501_s3 + $0x50] sm:$0xff]  ;;  %v34_v37 = vld [vmem:[%s498_s0 + $0x58] sm:$0xff] }
   0xc   :  { %v159_v46 = vadd.f32 %v281_v14, %v133_v36  ;;  %v160_v50 = vadd.f32 %v285_v16, %v134_v40  ;;  %v122_v58 = vmul.f32 %v283_v15, %v96_v44  ;;  %v55_v59 = vmul.f32 %v292_v20, %v29_v45  ;;  %v102_v44 = vld [vmem:[%s501_s3 + $0x58] sm:$0xff]  ;;  %v35_v45 = vld [vmem:[%s498_s0 + $0x60] sm:$0xff] }
   0xd   :  { %v80_v57 = vadd.f32 %v275_v11, %v54_v49  ;;  %v161_v62 = vadd.f32 %v303_v26, %v135_v51  ;;  %v136_v63 = vadd.f32 %v120_v47, %v78_v52  ;;  %v137_v0 = vadd.f32 %v121_v48, %v79_v53 }
   0xe   :  { %v175_v56 = vmax.f32 %v159_v46, 0.0  ;;  %v176_v61 = vmax.f32 %v160_v50, 0.0  ;;  %v81_v5 = vadd.f32 %v294_v21, %v55_v59  ;;  %v123_v6 = vmul.f32 %v301_v25, %v97_v54  ;;  %v103_v50 = vld [vmem:[%s501_s3 + $0x60] sm:$0xff] }
   0xf   :  { %v138_v2 = vadd.f32 %v122_v58, %v80_v57  ;;  %v56_v7 = vmul.f32 %v313_v31, %v30_v55  ;;  %v177_v13 = vmax.f32 %v161_v62, 0.0  ;;  %v162_v17 = vadd.f32 %v329_v39, %v136_v63  ;;  %v36_v55 = vld [vmem:[%s498_s0 + $0x68] sm:$0xff] }
  0x10   :  { %191 = vst [vmem:[%s504_s6] sm:$0xff] %v175_v56  ;;  %v163_v18 = vadd.f32 %v281_v14, %v137_v0  ;;  %v124_v19 = vmul.f32 %v327_v38, %v98_v60  ;;  %v139_v23 = vadd.f32 %v123_v6, %v81_v5  ;;  %v57_v27 = vmul.f32 %v255_v3, %v31_v1  ;;  %v104_v60 = vld [vmem:[%s501_s3 + $0x68] sm:$0xff] }
  0x11   :  { %192 = vst [vmem:[%s504_s6 + $0x8] sm:$0xff] %v176_v61  ;;  %v164_v22 = vadd.f32 %v285_v16, %v138_v2  ;;  %v82_v24 = vadd.f32 %v315_v32, %v56_v7  ;;  %v178_v33 = vmax.f32 %v162_v17, 0.0  ;;  %v125_v35 = vmul.f32 %v268_v8, %v99_v9  ;;  %v37_v61 = vld [vmem:[%s498_s0 + $0x70] sm:$0xff]  ;;  %v38_v9 = vld [vmem:[%s498_s0 + $0x78] sm:$0xff] }
  0x12   :  { %193 = vst [vmem:[%s504_s6 + $0x10] sm:$0xff] %v177_v13  ;;  %v179_v34 = vmax.f32 %v163_v18, 0.0  ;;  %v58_v36 = vmul.f32 %v273_v10, %v32_v12  ;;  %v165_v41 = vadd.f32 %v303_v26, %v139_v23  ;;  %v83_v43 = vadd.f32 %v257_v4, %v57_v27  ;;  %v105_v7 = vld [vmem:[%s501_s3 + $0x70] sm:$0xff] }
  0x13   :  { %v180_v40 = vmax.f32 %v164_v22, 0.0  ;;  %v140_v42 = vadd.f32 %v124_v19, %v82_v24  ;;  %194 = vst [vmem:[%s504_s6 + $0x18] sm:$0xff] %v178_v33  ;;  %v126_v47 = vmul.f32 %v283_v15, %v100_v28  ;;  %v59_v48 = vmul.f32 %v292_v20, %v33_v29 }
  0x14   :  { %v84_v46 = vadd.f32 %v275_v11, %v58_v36  ;;  %v127_v49 = vmul.f32 %v301_v25, %v101_v30  ;;  %195 = vst [vmem:[%s504_s6 + $0x20] sm:$0xff] %v179_v34  ;;  %v181_v51 = vmax.f32 %v165_v41, 0.0  ;;  %v141_v53 = vadd.f32 %v125_v35, %v83_v43 }
  0x15   :  { %v166_v52 = vadd.f32 %v329_v39, %v140_v42  ;;  %v60_v54 = vmul.f32 %v313_v31, %v34_v37  ;;  %196 = vst [vmem:[%s504_s6 + $0x28] sm:$0xff] %v180_v40  ;;  %v85_v57 = vadd.f32 %v294_v21, %v59_v48  ;;  %v128_v58 = vmul.f32 %v327_v38, %v102_v44 }
  0x16   :  { %v142_v56 = vadd.f32 %v126_v47, %v84_v46  ;;  %v61_v59 = vmul.f32 %v255_v3, %v35_v45  ;;  %197 = vst [vmem:[%s504_s6 + $0x30] sm:$0xff] %v181_v51  ;;  %v167_v63 = vadd.f32 %v281_v14, %v141_v53  ;;  %v129_v1 = vmul.f32 %v268_v8, %v103_v50 }
  0x17   :  { %v182_v62 = vmax.f32 %v166_v52, 0.0  ;;  %v86_v0 = vadd.f32 %v315_v32, %v60_v54  ;;  %v143_v2 = vadd.f32 %v127_v49, %v85_v57  ;;  %v62_v6 = vmul.f32 %v273_v10, %v36_v55  ;;  %v106_v10 = vld [vmem:[%s501_s3 + $0x78] sm:$0xff] }
  0x18   :  { %v168_v3 = vadd.f32 %v285_v16, %v142_v56  ;;  %v87_v5 = vadd.f32 %v257_v4, %v61_v59  ;;  %v183_v8 = vmax.f32 %v167_v63, 0.0  ;;  %v130_v13 = vmul.f32 %v283_v15, %v104_v60 }
  0x19   :  { %198 = vst [vmem:[%s504_s6 + $0x38] sm:$0xff] %v182_v62  ;;  %v144_v12 = vadd.f32 %v128_v58, %v86_v0  ;;  %v63_v4 = vmul.f32 %v292_v20, %v37_v61  ;;  %v169_v18 = vadd.f32 %v303_v26, %v143_v2  ;;  %v88_v22 = vadd.f32 %v275_v11, %v62_v6 }
  0x1a   :  { %v184_v17 = vmax.f32 %v168_v3, 0.0  ;;  %v145_v19 = vadd.f32 %v129_v1, %v87_v5  ;;  %199 = vst [vmem:[%s504_s6 + $0x40] sm:$0xff] %v183_v8  ;;  %v131_v20 = vmul.f32 %v301_v25, %v105_v7  ;;  %v64_v24 = vmul.f32 %v313_v31, %v38_v9 }
  0x1b   :  { %v170_v23 = vadd.f32 %v329_v39, %v144_v12  ;;  %v89_v15 = vadd.f32 %v294_v21, %v63_v4  ;;  %v185_v27 = vmax.f32 %v169_v18, 0.0  ;;  %v146_v11 = vadd.f32 %v130_v13, %v88_v22 }
  0x1c   :  { %200 = vst [vmem:[%s504_s6 + $0x48] sm:$0xff] %v184_v17  ;;  %v171_v28 = vadd.f32 %v281_v14, %v145_v19  ;;  %v132_v29 = vmul.f32 %v327_v38, %v106_v10  ;;  %v90_v34 = vadd.f32 %v315_v32, %v64_v24 }
  0x1d   :  { %v186_v30 = vmax.f32 %v170_v23, 0.0  ;;  %v147_v33 = vadd.f32 %v131_v20, %v89_v15  ;;  %201 = vst [vmem:[%s504_s6 + $0x50] sm:$0xff] %v185_v27  ;;  %v172_v25 = vadd.f32 %v285_v16, %v146_v11 }
  0x1e   :  { %v187_v21 = vmax.f32 %v171_v28, 0.0  ;;  %v148_v31 = vadd.f32 %v132_v29, %v90_v34 }
  0x1f   :  { %202 = vst [vmem:[%s504_s6 + $0x58] sm:$0xff] %v186_v30  ;;  %v173_v14 = vadd.f32 %v303_v26, %v147_v33  ;;  %v188_v38 = vmax.f32 %v172_v25, 0.0 }
  0x20   :  { %203 = vst [vmem:[%s504_s6 + $0x60] sm:$0xff] %v187_v21  ;;  %v174_v35 = vadd.f32 %v329_v39, %v148_v31 }
  0x21   :  { %v189_v32 = vmax.f32 %v173_v14, 0.0  ;;  %204 = vst [vmem:[%s504_s6 + $0x68] sm:$0xff] %v188_v38 }
  0x22   :  { %v190_v16 = vmax.f32 %v174_v35, 0.0 }
  0x23   :  { %205 = vst [vmem:[%s504_s6 + $0x70] sm:$0xff] %v189_v32 }
  0x24   :  { %206 = vst [vmem:[%s504_s6 + $0x78] sm:$0xff] %v190_v16 }

// kernel: tile.178
= control target key start
LH: loop header
LB: loop body
LE: loop exit
PB: predicated region body
PF: predicated region fallthrough
CT: control target
= control target key end

     0   :  { %s22_s0 = inlined_call_operand.vmem [shape: f32[64], index: 0, kind: input, shape index: {}]   ;;  %s23_s1 = inlined_call_operand.vmem [shape: f32[8,64], index: 1, kind: output, shape index: {}]  }
   0x1   :  { %v4_v0 = vld [vmem:[%s22_s0] ss:$0 sm:$0xff] }
   0x2   :  { %5 = vst [vmem:[%s23_s1] sm:$0xff] %v4_v0 }

// kernel: tile.179
= control target key start
LH: loop header
LB: loop body
LE: loop exit
PB: predicated region body
PF: predicated region fallthrough
CT: control target
= control target key end

     0   :  { %vm3_vm0 = vcmask 523264   ;;  %s40_s8 = smov 64   ;;  %vm9_vm1 = vcmask 1048064   ;;  %s69_s0 = inlined_call_operand.vmem [shape: f32[8,64], index: 0, kind: input, shape index: {}]   ;;  %s70_s1 = inlined_call_operand.vmem [shape: f32[1,512], index: 1, kind: output, shape index: {}]  }
   0x1   :  { %v35_v0 = vld [vmem:[%s69_s0 + $0x1] ss:$2 sm:$0xf]   ;;  %v2_v1 = vld [vmem:[%s69_s0] ss:$2 sm:$0xf]  }
   0x2   :  { %7 = vrot.lane.b32.xlu0 %v35_v0, %s40_s8  ;;  %4 = vst.msk [vmem:[#allocation0] ss:$8 sm:$0xf] %vm3_vm0, %v2_v1  }
  0x74   :  { %v8_v2 = vpop.permute.xlu0 %7  }
  0x75   :  { %10 = vst.msk [vmem:[#allocation0] ss:$8 sm:$0xf] %vm9_vm1, %v8_v2  }
  0x7c   :  { %v13_v3 = vld [vmem:[#allocation0] sm:$0x1]  ;;  %v18_v4 = vld [vmem:[#allocation0 + $0x8] sm:$0x1]  ;;  %v24_v5 = vld [vmem:[#allocation0 + $0x10] sm:$0x1] }
  0x7d   :  { %16 = vst [vmem:[%s70_s1] sm:$0x1] %v13_v3  ;;  %v30_v6 = vld [vmem:[#allocation0 + $0x18] sm:$0x1] }
  0x7e   :  { %36 = vst [vmem:[%s70_s1 + $0x1] sm:$0x1] %v18_v4 }
  0x7f   :  { %37 = vst [vmem:[%s70_s1 + $0x2] sm:$0x1] %v24_v5 }
  0x80   :  { %38 = vst [vmem:[%s70_s1 + $0x3] sm:$0x1] %v30_v6 }

// kernel: _lambda_.25
= control target key start
LH: loop header
LB: loop body
LE: loop exit
PB: predicated region body
PF: predicated region fallthrough
CT: control target
= control target key end

     0   :  { %vm311_vm0 = vcmask 261120   ;;  %s1096_s1 = inlined_call_operand.vmem [shape: bf16[288,128], index: 1, kind: input, shape index: {}]   ;;  %s1097_s0 = inlined_call_operand.vmem [shape: bf16[128,288], index: 0, kind: input, shape index: {}]   ;;  %s1098_s2 = inlined_call_operand.vmem [shape: f32[128,128], index: 2, kind: output, shape index: {0}]   ;;  %s1099_s3 = inlined_call_operand.vmem [shape: f32[8,128], index: 3, kind: output, shape index: {1}]   ;;  %s1100_s4 = inlined_call_operand.vmem [shape: f32[8,128], index: 4, kind: output, shape index: {2}]  }
   0x1   :  { %v778_v0 = vld [vmem:[%s1096_s1 + $0x38] sm:$0xff]  ;;  %v788_v2 = vld [vmem:[%s1096_s1 + $0x88] sm:$0xff]  ;;  %v777_v3 = vld [vmem:[%s1096_s1 + $0x30] sm:$0xff] }
   0x2   :  { %v786_v1 = vld [vmem:[%s1096_s1 + $0x78] sm:$0xff]  ;;  %336 = vmatpush.bf16.msra.mxu0 %v778_v0  ;;  %789 = vmatpush.bf16.msra.mxu3 %v778_v0  ;;  %v785_v4 = vld [vmem:[%s1096_s1 + $0x70] sm:$0xff]  ;;  %v787_v5 = vld [vmem:[%s1096_s1 + $0x80] sm:$0xff] }
   0x3   :  { %385 = vmatpush.bf16.msra.mxu1 %v786_v1  ;;  %440 = vmatpush.bf16.msra.mxu2 %v788_v2  ;;  %v581_v6 = vld [vmem:[%s1097_s0 + $0x8] sm:$0xf]  ;;  %v749_v7 = vld [vmem:[%s1097_s0 + $0x10] sm:$0xf0]  ;;  %v775_v11 = vld [vmem:[%s1096_s1 + $0x20] sm:$0xff] }
   0x4   :  { %v582_v8 = vor.u32 %v749_v7, %v581_v6  ;;  %v776_v9 = vld [vmem:[%s1096_s1 + $0x28] sm:$0xff]  ;;  %v783_v12 = vld [vmem:[%s1096_s1 + $0x60] sm:$0xff]  ;;  %v774_v13 = vld [vmem:[%s1096_s1 + $0x18] sm:$0xff] }
   0x5   :  { %v784_v10 = vld [vmem:[%s1096_s1 + $0x68] sm:$0xff]  ;;  %v782_v14 = vld [vmem:[%s1096_s1 + $0x58] sm:$0xff]  ;;  %v773_v15 = vld [vmem:[%s1096_s1 + $0x10] sm:$0xff] }
   0x6   :  { %337 = vmatpush.bf16.msra.mxu0 %v777_v3  ;;  %790 = vmatpush.bf16.msra.mxu3 %v777_v3  ;;  %v781_v16 = vld [vmem:[%s1096_s1 + $0x50] sm:$0xff]  ;;  %v593_v17 = vld [vmem:[%s1097_s0 + $0x20] sm:$0xf]  ;;  %v752_v18 = vld [vmem:[%s1097_s0 + $0x28] sm:$0xf0] }
   0x7   :  { %386 = vmatpush.bf16.msra.mxu1 %v785_v4  ;;  %441 = vmatpush.bf16.msra.mxu2 %v787_v5  ;;  %v594_v19 = vor.u32 %v752_v18, %v593_v17  ;;  %v772_v20 = vld [vmem:[%s1096_s1 + $0x8] sm:$0xff]  ;;  %v771_v22 = vld [vmem:[%s1096_s1] sm:$0xff]  ;;  %v645_v26 = vld [vmem:[%s1097_s0 + $0x90] sm:$0xf] }
   0x8   :  { %v780_v21 = vld [vmem:[%s1096_s1 + $0x48] sm:$0xff]  ;;  %v779_v23 = vld [vmem:[%s1096_s1 + $0x40] sm:$0xff]  ;;  %v766_v27 = vld [vmem:[%s1097_s0 + $0x98] sm:$0xf0] }
   0x9   :  { %v573_v24 = vld [vmem:[%s1097_s0] sm:$0xf]  ;;  %v748_v25 = vld [vmem:[%s1097_s0 + $0x8] sm:$0xf0]  ;;  %v747_v28 = vld [vmem:[%s1097_s0 + $0x4] sm:$0xf]  ;;  %v646_v31 = vor.u32 %v766_v27, %v645_v26 }
   0xa   :  { %739 = vmatmul.msk.bf16.vlgmr.msra.gmra.mxu2 %vm311_vm0, %v582_v8  ;;  %338 = vmatpush.bf16.msra.mxu0 %v776_v9  ;;  %v575_v29 = vld [vmem:[%s1097_s0 + $0xc] sm:$0xf0]  ;;  %v574_v30 = vor.u32 %v748_v25, %v573_v24  ;;  %v605_v33 = vld [vmem:[%s1097_s0 + $0x38] sm:$0xf]  ;;  %v755_v34 = vld [vmem:[%s1097_s0 + $0x40] sm:$0xf0] }
   0xb   :  { %791 = vmatpush.bf16.msra.mxu3 %v776_v9  ;;  %387 = vmatpush.bf16.msra.mxu1 %v784_v10  ;;  %v578_v32 = vor.u32 %v747_v28, %v575_v29  ;;  %v606_v35 = vor.u32 %v755_v34, %v605_v33  ;;  %v585_v36 = vld [vmem:[%s1097_s0 + $0x18] sm:$0xf]  ;;  %v751_v37 = vld [vmem:[%s1097_s0 + $0x20] sm:$0xf0]  ;;  %v657_v38 = vld [vmem:[%s1097_s0 + $0xa8] sm:$0xf] }
   0xc   :  { %v769_v39 = vld [vmem:[%s1097_s0 + $0xb0] sm:$0xf0]  ;;  %v750_v40 = vld [vmem:[%s1097_s0 + $0x1c] sm:$0xf]  ;;  %v587_v41 = vld [vmem:[%s1097_s0 + $0x24] sm:$0xf0]  ;;  %v586_v42 = vor.u32 %v751_v37, %v585_v36 }
   0xd   :  { %v658_v43 = vor.u32 %v769_v39, %v657_v38  ;;  %v590_v44 = vor.u32 %v750_v40, %v587_v41  ;;  %v617_v45 = vld [vmem:[%s1097_s0 + $0x50] sm:$0xf]  ;;  %v758_v46 = vld [vmem:[%s1097_s0 + $0x58] sm:$0xf0]  ;;  %v753_v50 = vld [vmem:[%s1097_s0 + $0x34] sm:$0xf] }
   0xe   :  { %339 = vmatpush.bf16.msra.mxu0 %v775_v11  ;;  %v618_v47 = vor.u32 %v758_v46, %v617_v45  ;;  %v597_v48 = vld [vmem:[%s1097_s0 + $0x30] sm:$0xf]  ;;  %v754_v49 = vld [vmem:[%s1097_s0 + $0x38] sm:$0xf0]  ;;  %v599_v51 = vld [vmem:[%s1097_s0 + $0x3c] sm:$0xf0] }
   0xf   :  { %792 = vmatpush.bf16.msra.mxu3 %v775_v11  ;;  %388 = vmatpush.bf16.msra.mxu1 %v783_v12  ;;  %v765_v52 = vld [vmem:[%s1097_s0 + $0x94] sm:$0xf]  ;;  %v647_v53 = vld [vmem:[%s1097_s0 + $0x9c] sm:$0xf0]  ;;  %v598_v54 = vor.u32 %v754_v49, %v597_v48  ;;  %v602_v55 = vor.u32 %v753_v50, %v599_v51  ;;  %v629_v57 = vld [vmem:[%s1097_s0 + $0x68] sm:$0xf] }
  0x10   :  { %v650_v56 = vor.u32 %v765_v52, %v647_v53  ;;  %v761_v58 = vld [vmem:[%s1097_s0 + $0x70] sm:$0xf0]  ;;  %v609_v60 = vld [vmem:[%s1097_s0 + $0x48] sm:$0xf]  ;;  %v756_v62 = vld [vmem:[%s1097_s0 + $0x4c] sm:$0xf] }
  0x11   :  { %v630_v59 = vor.u32 %v761_v58, %v629_v57  ;;  %v757_v61 = vld [vmem:[%s1097_s0 + $0x50] sm:$0xf0]  ;;  %v611_v63 = vld [vmem:[%s1097_s0 + $0x54] sm:$0xf0]  ;;  %v768_v0 = vld [vmem:[%s1097_s0 + $0xac] sm:$0xf] }
  0x12   :  { %340 = vmatpush.bf16.msra.mxu0 %v774_v13  ;;  %v610_v2 = vor.u32 %v757_v61, %v609_v60  ;;  %v614_v3 = vor.u32 %v756_v62, %v611_v63  ;;  %v641_v5 = vld [vmem:[%s1097_s0 + $0x80] sm:$0xf]  ;;  %v764_v6 = vld [vmem:[%s1097_s0 + $0x88] sm:$0xf0]  ;;  %v623_v11 = vld [vmem:[%s1097_s0 + $0x6c] sm:$0xf0] }
  0x13   :  { %793 = vmatpush.bf16.msra.mxu3 %v774_v13  ;;  %389 = vmatpush.bf16.msra.mxu1 %v782_v14  ;;  %v642_v7 = vor.u32 %v764_v6, %v641_v5  ;;  %v621_v8 = vld [vmem:[%s1097_s0 + $0x60] sm:$0xf]  ;;  %v760_v9 = vld [vmem:[%s1097_s0 + $0x68] sm:$0xf0]  ;;  %v633_v17 = vld [vmem:[%s1097_s0 + $0x78] sm:$0xf] }
  0x14   :  { %v763_v18 = vld [vmem:[%s1097_s0 + $0x80] sm:$0xf0]  ;;  %v770_v24 = vld [vmem:[%s1097_s0 + $0xb8] sm:$0xf0] }
  0x16   :  { %341 = vmatpush.bf16.msra.mxu0 %v773_v15 }
  0x17   :  { %794 = vmatpush.bf16.msra.mxu3 %v773_v15  ;;  %390 = vmatpush.bf16.msra.mxu1 %v781_v16  ;;  %v767_v15 = vld [vmem:[%s1097_s0 + $0xa0] sm:$0xf0] }
  0x1a   :  { %740 = vmatmul.msk.bf16.gmra.mxu2 %vm311_vm0, %v594_v19  ;;  %342 = vmatpush.bf16.msra.mxu0 %v772_v20  ;;  %v762_v19 = vld [vmem:[%s1097_s0 + $0x7c] sm:$0xf] }
  0x1b   :  { %795 = vmatpush.bf16.msra.mxu3 %v772_v20  ;;  %391 = vmatpush.bf16.msra.mxu1 %v780_v21  ;;  %v635_v20 = vld [vmem:[%s1097_s0 + $0x84] sm:$0xf0] }
  0x1e   :  { %343 = vmatpush.bf16.msra.mxu0 %v771_v22 }
  0x1f   :  { %796 = vmatpush.bf16.msra.mxu3 %v771_v22  ;;  %392 = vmatpush.bf16.msra.mxu1 %v779_v23  ;;  %v638_v22 = vor.u32 %v762_v19, %v635_v20 }
  0x21   :  { %344 = vmatmul.bf16.vlgmr.msra.gmra.mxu0 %v574_v30 }
  0x22   :  { %374 = vmatmul.bf16.vlgmr.msra.gmra.mxu3 %v646_v31  ;;  %393 = vmatmul.bf16.vlgmr.msra.gmra.mxu1 %v578_v32 }
  0x23   :  { %797 = vmatpush.bf16.msrb.mxu3 %v786_v1  ;;  %v659_v1 = vld [vmem:[%s1097_s0 + $0xb4] sm:$0xf0] }
  0x27   :  { %798 = vmatpush.bf16.msrb.mxu3 %v785_v4  ;;  %v662_v4 = vor.u32 %v768_v0, %v659_v1 }
  0x2a   :  { %741 = vmatmul.msk.bf16.gmra.mxu2 %vm311_vm0, %v606_v35 }
  0x2b   :  { %799 = vmatpush.bf16.msrb.mxu3 %v784_v10  ;;  %v759_v10 = vld [vmem:[%s1097_s0 + $0x64] sm:$0xf] }
  0x2c   :  { %v626_v13 = vor.u32 %v759_v10, %v623_v11 }
  0x2f   :  { %800 = vmatpush.bf16.msrb.mxu3 %v783_v12  ;;  %v622_v12 = vor.u32 %v760_v9, %v621_v8 }
  0x31   :  { %349 = vmatmul.bf16.gmra.mxu0 %v586_v42 }
  0x32   :  { %379 = vmatmul.bf16.gmra.mxu3 %v658_v43  ;;  %398 = vmatmul.bf16.gmra.mxu1 %v590_v44 }
  0x33   :  { %801 = vmatpush.bf16.msrb.mxu3 %v782_v14  ;;  %v653_v14 = vld [vmem:[%s1097_s0 + $0x98] sm:$0xf] }
  0x37   :  { %802 = vmatpush.bf16.msrb.mxu3 %v781_v16  ;;  %v654_v16 = vor.u32 %v767_v15, %v653_v14 }
  0x3a   :  { %742 = vmatmul.msk.bf16.gmra.mxu2 %vm311_vm0, %v618_v47 }
  0x3b   :  { %803 = vmatpush.bf16.msrb.mxu3 %v780_v21  ;;  %v634_v21 = vor.u32 %v763_v18, %v633_v17 }
  0x3f   :  { %804 = vmatpush.bf16.msrb.mxu3 %v779_v23  ;;  %v665_v23 = vld [vmem:[%s1097_s0 + $0xb0] sm:$0xf] }
  0x40   :  { %v666_v25 = vor.u32 %v770_v24, %v665_v23 }
  0x41   :  { %354 = vmatmul.bf16.gmra.mxu0 %v598_v54 }
  0x42   :  { %403 = vmatmul.bf16.gmra.mxu1 %v602_v55  ;;  %423 = vmatmul.bf16.vlgmr.msrb.gmra.mxu3 %v650_v56 }
  0x4a   :  { %743 = vmatmul.msk.bf16.gmra.mxu2 %vm311_vm0, %v630_v59 }
  0x51   :  { %359 = vmatmul.bf16.gmra.mxu0 %v610_v2 }
  0x52   :  { %408 = vmatmul.bf16.gmra.mxu1 %v614_v3  ;;  %428 = vmatmul.bf16.gmra.mxu3 %v662_v4 }
  0x5a   :  { %744 = vmatmul.msk.bf16.gmra.mxu2 %vm311_vm0, %v642_v7 }
  0x61   :  { %364 = vmatmul.bf16.gmra.mxu0 %v622_v12 }
  0x62   :  { %413 = vmatmul.bf16.gmra.mxu1 %v626_v13 }
  0x6a   :  { %745 = vmatmul.msk.bf16.gmra.mxu2 %vm311_vm0, %v654_v16 }
  0x71   :  { %369 = vmatmul.bf16.gmra.mxu0 %v634_v21 }
  0x72   :  { %418 = vmatmul.bf16.gmra.mxu1 %v638_v22 }
  0x7a   :  { %746 = vmatmul.msk.bf16.gmra.mxu2 %vm311_vm0, %v666_v25 }
  0x8d   :  { %v443_v26 = vpop.f32.mrf.mxu2 }
  0x95   :  { %v445_v27 = vpop.f32.mrf.mxu2 }
  0x9d   :  { %v448_v28 = vpop.f32.mrf.mxu2 }
  0x9e   :  { %v345_v29 = vpop.f32.mrf.mxu0 }
  0x9f   :  { %v394_v30 = vpop.f32.mrf.mxu1 }
  0xa0   :  { %v395_v31 = vadd.f32 %v394_v30, %v345_v29 }
  0xa2   :  { %v444_v32 = vadd.f32 %v443_v26, %v395_v31 }
  0xa4   :  { %483 = vst [vmem:[%s1098_s2] sm:$0xff] %v444_v32  ;;  %v520_v38 = vmul.f32 %v444_v32, %v444_v32 }
  0xa5   :  { %v450_v33 = vpop.f32.mrf.mxu2  ;;  %v375_v52 = vpop.f32.mrf.mxu3 }
  0xa6   :  { %v347_v34 = vpop.f32.mrf.mxu0 }
  0xa7   :  { %v396_v35 = vpop.f32.mrf.mxu1 }
  0xa8   :  { %v397_v36 = vadd.f32 %v396_v35, %v347_v34 }
  0xaa   :  { %v446_v37 = vadd.f32 %v445_v27, %v397_v36 }
  0xac   :  { %484 = vst [vmem:[%s1098_s2 + $0x8] sm:$0xff] %v446_v37  ;;  %v499_v39 = vadd.f32 %v446_v37, %v444_v32  ;;  %v521_v40 = vmul.f32 %v446_v37, %v446_v37 }
  0xad   :  { %v453_v41 = vpop.f32.mrf.mxu2  ;;  %v377_v58 = vpop.f32.mrf.mxu3 }
  0xae   :  { %v536_v42 = vadd.f32 %v521_v40, %v520_v38  ;;  %v350_v43 = vpop.f32.mrf.mxu0 }
  0xaf   :  { %v399_v44 = vpop.f32.mrf.mxu1 }
  0xb0   :  { %v400_v45 = vadd.f32 %v399_v44, %v350_v43 }
  0xb2   :  { %v449_v46 = vadd.f32 %v448_v28, %v400_v45 }
  0xb4   :  { %485 = vst [vmem:[%s1098_s2 + $0x10] sm:$0xff] %v449_v46  ;;  %v522_v21 = vmul.f32 %v449_v46, %v449_v46  ;;  %v500_v23 = vadd.f32 %v499_v39, %v449_v46 }
  0xb5   :  { %v455_v47 = vpop.f32.mrf.mxu2  ;;  %v1054_v2 = vpop.f32.mrf.mxu3 }
  0xb6   :  { %v352_v48 = vpop.f32.mrf.mxu0  ;;  %v537_v26 = vadd.f32 %v536_v42, %v522_v21 }
  0xb7   :  { %v401_v49 = vpop.f32.mrf.mxu1 }
  0xb8   :  { %v402_v50 = vadd.f32 %v401_v49, %v352_v48 }
  0xba   :  { %v451_v51 = vadd.f32 %v450_v33, %v402_v50 }
  0xbc   :  { %486 = vst [vmem:[%s1098_s2 + $0x18] sm:$0xff] %v451_v51  ;;  %v523_v24 = vmul.f32 %v451_v51, %v451_v51  ;;  %v501_v27 = vadd.f32 %v500_v23, %v451_v51 }
  0xbd   :  { %v458_v53 = vpop.f32.mrf.mxu2  ;;  %v1059_v10 = vpop.f32.mrf.mxu3 }
  0xbe   :  { %v355_v54 = vpop.f32.mrf.mxu0  ;;  %v538_v32 = vadd.f32 %v537_v26, %v523_v24 }
  0xbf   :  { %v404_v55 = vpop.f32.mrf.mxu1 }
  0xc0   :  { %v405_v56 = vadd.f32 %v404_v55, %v355_v54 }
  0xc2   :  { %v454_v57 = vadd.f32 %v453_v41, %v405_v56 }
  0xc4   :  { %487 = vst [vmem:[%s1098_s2 + $0x20] sm:$0xff] %v454_v57  ;;  %v524_v28 = vmul.f32 %v454_v57, %v454_v57  ;;  %v502_v33 = vadd.f32 %v501_v27, %v454_v57 }
  0xc5   :  { %v460_v59 = vpop.f32.mrf.mxu2  ;;  %v424_v17 = vpop.f32.mrf.mxu3 }
  0xc6   :  { %v357_v60 = vpop.f32.mrf.mxu0  ;;  %v425_v29 = vadd.f32 %v424_v17, %v375_v52  ;;  %v539_v38 = vadd.f32 %v538_v32, %v524_v28 }
  0xc7   :  { %v406_v61 = vpop.f32.mrf.mxu1 }
  0xc8   :  { %v407_v62 = vadd.f32 %v406_v61, %v357_v60 }
  0xca   :  { %v456_v63 = vadd.f32 %v455_v47, %v407_v62 }
  0xcc   :  { %488 = vst [vmem:[%s1098_s2 + $0x28] sm:$0xff] %v456_v63  ;;  %v525_v34 = vmul.f32 %v456_v63, %v456_v63  ;;  %v503_v39 = vadd.f32 %v502_v33, %v456_v63 }
  0xcd   :  { %v463_v0 = vpop.f32.mrf.mxu2  ;;  %v426_v30 = vpop.f32.mrf.mxu3 }
  0xce   :  { %v360_v1 = vpop.f32.mrf.mxu0  ;;  %v540_v42 = vadd.f32 %v539_v38, %v525_v34  ;;  %v427_v46 = vadd.f32 %v426_v30, %v377_v58 }
  0xcf   :  { %v409_v3 = vpop.f32.mrf.mxu1 }
  0xd0   :  { %v410_v4 = vadd.f32 %v409_v3, %v360_v1 }
  0xd2   :  { %v459_v5 = vadd.f32 %v458_v53, %v410_v4 }
  0xd4   :  { %489 = vst [vmem:[%s1098_s2 + $0x30] sm:$0xff] %v459_v5  ;;  %v526_v40 = vmul.f32 %v459_v5, %v459_v5  ;;  %v504_v43 = vadd.f32 %v503_v39, %v459_v5 }
  0xd5   :  { %v465_v6 = vpop.f32.mrf.mxu2  ;;  %v429_v56 = vpop.f32.mrf.mxu3 }
  0xd6   :  { %v362_v7 = vpop.f32.mrf.mxu0  ;;  %v541_v47 = vadd.f32 %v540_v42, %v526_v40  ;;  %v430_v1 = vadd.f32 %v429_v56, %v1054_v2 }
  0xd7   :  { %v411_v8 = vpop.f32.mrf.mxu1 }
  0xd8   :  { %v412_v9 = vadd.f32 %v411_v8, %v362_v7 }
  0xda   :  { %v461_v11 = vadd.f32 %v460_v59, %v412_v9 }
  0xdc   :  { %490 = vst [vmem:[%s1098_s2 + $0x38] sm:$0xff] %v461_v11  ;;  %v527_v44 = vmul.f32 %v461_v11, %v461_v11  ;;  %v505_v48 = vadd.f32 %v504_v43, %v461_v11 }
  0xdd   :  { %v468_v12 = vpop.f32.mrf.mxu2 }
  0xde   :  { %v365_v13 = vpop.f32.mrf.mxu0  ;;  %v542_v51 = vadd.f32 %v541_v47, %v527_v44 }
  0xdf   :  { %v414_v14 = vpop.f32.mrf.mxu1 }
  0xe0   :  { %v415_v15 = vadd.f32 %v414_v14, %v365_v13  ;;  %v431_v13 = vpop.f32.mrf.mxu3 }
  0xe2   :  { %v464_v16 = vadd.f32 %v463_v0, %v415_v15  ;;  %v432_v15 = vadd.f32 %v431_v13, %v1059_v10 }
  0xe4   :  { %491 = vst [vmem:[%s1098_s2 + $0x40] sm:$0xff] %v464_v16  ;;  %v528_v49 = vmul.f32 %v464_v16, %v464_v16  ;;  %v506_v52 = vadd.f32 %v505_v48, %v464_v16 }
  0xe5   :  { %v470_v18 = vpop.f32.mrf.mxu2 }
  0xe6   :  { %v367_v19 = vpop.f32.mrf.mxu0  ;;  %v543_v59 = vadd.f32 %v542_v51, %v528_v49 }
  0xe7   :  { %v416_v20 = vpop.f32.mrf.mxu1 }
  0xe8   :  { %v417_v22 = vadd.f32 %v416_v20, %v367_v19 }
  0xea   :  { %v466_v25 = vadd.f32 %v465_v6, %v417_v22 }
  0xec   :  { %492 = vst [vmem:[%s1098_s2 + $0x48] sm:$0xff] %v466_v25  ;;  %v529_v53 = vmul.f32 %v466_v25, %v466_v25  ;;  %v507_v60 = vadd.f32 %v506_v52, %v466_v25 }
  0xed   :  { %v473_v31 = vpop.f32.mrf.mxu2 }
  0xee   :  { %v474_v35 = vadd.f32 %v473_v31, %v425_v29  ;;  %v370_v36 = vpop.f32.mrf.mxu0  ;;  %v544_v62 = vadd.f32 %v543_v59, %v529_v53 }
  0xef   :  { %v419_v37 = vpop.f32.mrf.mxu1 }
  0xf0   :  { %495 = vst [vmem:[%s1098_s2 + $0x60] sm:$0xff] %v474_v35  ;;  %v420_v41 = vadd.f32 %v419_v37, %v370_v36  ;;  %v532_v7 = vmul.f32 %v474_v35, %v474_v35 }
  0xf2   :  { %v469_v45 = vadd.f32 %v468_v12, %v420_v41 }
  0xf4   :  { %493 = vst [vmem:[%s1098_s2 + $0x50] sm:$0xff] %v469_v45  ;;  %v530_v61 = vmul.f32 %v469_v45, %v469_v45  ;;  %v508_v63 = vadd.f32 %v507_v60, %v469_v45 }
  0xf5   :  { %v475_v50 = vpop.f32.mrf.mxu2 }
  0xf6   :  { %v476_v54 = vadd.f32 %v475_v50, %v427_v46  ;;  %v372_v55 = vpop.f32.mrf.mxu0  ;;  %v545_v3 = vadd.f32 %v544_v62, %v530_v61 }
  0xf7   :  { %v421_v57 = vpop.f32.mrf.mxu1 }
  0xf8   :  { %496 = vst [vmem:[%s1098_s2 + $0x68] sm:$0xff] %v476_v54  ;;  %v422_v58 = vadd.f32 %v421_v57, %v372_v55  ;;  %v533_v14 = vmul.f32 %v476_v54, %v476_v54 }
  0xfa   :  { %v471_v0 = vadd.f32 %v470_v18, %v422_v58 }
  0xfc   :  { %494 = vst [vmem:[%s1098_s2 + $0x58] sm:$0xff] %v471_v0  ;;  %v509_v4 = vadd.f32 %v508_v63, %v471_v0  ;;  %v531_v5 = vmul.f32 %v471_v0, %v471_v0 }
  0xfd   :  { %v478_v6 = vpop.f32.mrf.mxu2 }
  0xfe   :  { %v546_v8 = vadd.f32 %v545_v3, %v531_v5  ;;  %v479_v9 = vadd.f32 %v478_v6, %v430_v1  ;;  %v510_v11 = vadd.f32 %v509_v4, %v474_v35 }
 0x100   :  { %497 = vst [vmem:[%s1098_s2 + $0x70] sm:$0xff] %v479_v9  ;;  %v547_v12 = vadd.f32 %v546_v8, %v532_v7  ;;  %v511_v2 = vadd.f32 %v510_v11, %v476_v54  ;;  %v534_v19 = vmul.f32 %v479_v9, %v479_v9 }
 0x102   :  { %v548_v16 = vadd.f32 %v547_v12, %v533_v14  ;;  %v512_v18 = vadd.f32 %v511_v2, %v479_v9 }
 0x104   :  { %v549_v21 = vadd.f32 %v548_v16, %v534_v19 }
 0x105   :  { %v480_v17 = vpop.f32.mrf.mxu2 }
 0x106   :  { %v481_v20 = vadd.f32 %v480_v17, %v432_v15 }
 0x108   :  { %498 = vst [vmem:[%s1098_s2 + $0x78] sm:$0xff] %v481_v20  ;;  %v513_v22 = vadd.f32 %v512_v18, %v481_v20  ;;  %v535_v23 = vmul.f32 %v481_v20, %v481_v20 }
 0x10a   :  { %v514_v24 = vrot.slane %v513_v22, 4  ;;  %v550_v25 = vadd.f32 %v549_v21, %v535_v23 }
 0x10c   :  { %v515_v26 = vadd.f32 %v514_v24, %v513_v22  ;;  %v551_v27 = vrot.slane %v550_v25, 4 }
 0x10e   :  { %v516_v28 = vrot.slane %v515_v26, 2  ;;  %v552_v29 = vadd.f32 %v551_v27, %v550_v25 }
 0x110   :  { %v517_v30 = vadd.f32 %v516_v28, %v515_v26  ;;  %v553_v10 = vrot.slane %v552_v29, 2 }
 0x112   :  { %v518_v31 = vrot.slane %v517_v30, 1  ;;  %v554_v32 = vadd.f32 %v553_v10, %v552_v29 }
 0x114   :  { %v519_v33 = vadd.f32 %v518_v31, %v517_v30  ;;  %v555_v34 = vrot.slane %v554_v32, 1 }
 0x116   :  { %v556_v35 = vadd.f32 %v555_v34, %v554_v32  ;;  %557 = vst [vmem:[%s1099_s3] sm:$0xff] %v519_v33 }
 0x118   :  { %558 = vst [vmem:[%s1100_s4] sm:$0xff] %v556_v35 }

// kernel: _lambda_.26
= control target key start
LH: loop header
LB: loop body
LE: loop exit
PB: predicated region body
PF: predicated region fallthrough
CT: control target
= control target key end

     0   :  { %s152_s0 = inlined_call_operand.vmem [shape: f32[16,512], index: 0, kind: input, shape index: {}]   ;;  %s153_s1 = inlined_call_operand.vmem [shape: f32[1,512], index: 1, kind: input, shape index: {}]   ;;  %s154_s2 = inlined_call_operand.vmem [shape: f32[1,512], index: 2, kind: input, shape index: {}]   ;;  %s155_s3 = inlined_call_operand.vmem [shape: f32[16,512], index: 3, kind: output, shape index: {}]  }
   0x1   :  { %v14_v0 = vld [vmem:[%s152_s0] sm:$0xff]  ;;  %v15_v5 = vld [vmem:[%s152_s0 + $0x8] sm:$0xff]  ;;  %v16_v8 = vld [vmem:[%s152_s0 + $0x10] sm:$0xff] }
   0x2   :  { %v22_v1 = vld [vmem:[%s153_s1] sm:$0xf]  ;;  %v17_v11 = vld [vmem:[%s152_s0 + $0x18] sm:$0xff]  ;;  %v19_v18 = vld [vmem:[%s152_s0 + $0x28] sm:$0xff] }
   0x3   :  { %v40_v2 = vld [vmem:[%s154_s2] sm:$0xf]  ;;  %v24_v3 = vperm.slane %v22_v1, 0  ;;  %v25_v6 = vperm.slane %v22_v1, 1  ;;  %v26_v9 = vperm.slane %v22_v1, 2  ;;  %v27_v12 = vperm.slane %v22_v1, 3 }
   0x4   :  { %v42_v4 = vperm.slane %v40_v2, 0  ;;  %v43_v7 = vperm.slane %v40_v2, 1  ;;  %v44_v10 = vperm.slane %v40_v2, 2  ;;  %v45_v13 = vperm.slane %v40_v2, 3  ;;  %v18_v14 = vld [vmem:[%s152_s0 + $0x20] sm:$0xff]  ;;  %v20_v19 = vld [vmem:[%s152_s0 + $0x30] sm:$0xff] }
   0x5   :  { %v32_v15 = vmul.f32 %v24_v3, %v14_v0  ;;  %v33_v16 = vmul.f32 %v25_v6, %v15_v5  ;;  %v36_v17 = vmul.f32 %v24_v3, %v18_v14  ;;  %v21_v20 = vld [vmem:[%s152_s0 + $0x38] sm:$0xff]  ;;  %v34_v21 = vmul.f32 %v26_v9, %v16_v8 }
   0x6   :  { %v35_v22 = vmul.f32 %v27_v12, %v17_v11  ;;  %v37_v23 = vmul.f32 %v25_v6, %v19_v18  ;;  %v38_v24 = vmul.f32 %v26_v9, %v20_v19  ;;  %v39_v28 = vmul.f32 %v27_v12, %v21_v20 }
   0x7   :  { %v50_v25 = vadd.f32 %v42_v4, %v32_v15  ;;  %v51_v26 = vadd.f32 %v43_v7, %v33_v16  ;;  %v54_v27 = vadd.f32 %v42_v4, %v36_v17  ;;  %v52_v29 = vadd.f32 %v44_v10, %v34_v21 }
   0x8   :  { %v53_v30 = vadd.f32 %v45_v13, %v35_v22  ;;  %v55_v31 = vadd.f32 %v43_v7, %v37_v23  ;;  %v56_v34 = vadd.f32 %v44_v10, %v38_v24  ;;  %v57_v37 = vadd.f32 %v45_v13, %v39_v28 }
   0x9   :  { %v58_v32 = vmax.f32 %v50_v25, 0.0  ;;  %v59_v33 = vmax.f32 %v51_v26, 0.0  ;;  %v60_v35 = vmax.f32 %v52_v29, 0.0  ;;  %v62_v38 = vmax.f32 %v54_v27, 0.0 }
   0xa   :  { %v61_v36 = vmax.f32 %v53_v30, 0.0  ;;  %v63_v39 = vmax.f32 %v55_v31, 0.0  ;;  %v64_v40 = vmax.f32 %v56_v34, 0.0  ;;  %v65_v41 = vmax.f32 %v57_v37, 0.0 }
   0xb   :  { %66 = vst [vmem:[%s155_s3] sm:$0xff] %v58_v32 }
   0xc   :  { %67 = vst [vmem:[%s155_s3 + $0x8] sm:$0xff] %v59_v33 }
   0xd   :  { %68 = vst [vmem:[%s155_s3 + $0x10] sm:$0xff] %v60_v35 }
   0xe   :  { %69 = vst [vmem:[%s155_s3 + $0x18] sm:$0xff] %v61_v36 }
   0xf   :  { %70 = vst [vmem:[%s155_s3 + $0x20] sm:$0xff] %v62_v38 }
  0x10   :  { %71 = vst [vmem:[%s155_s3 + $0x28] sm:$0xff] %v63_v39 }
  0x11   :  { %72 = vst [vmem:[%s155_s3 + $0x30] sm:$0xff] %v64_v40 }
  0x12   :  { %73 = vst [vmem:[%s155_s3 + $0x38] sm:$0xff] %v65_v41 }

// kernel: _lambda_.27
= control target key start
LH: loop header
LB: loop body
LE: loop exit
PB: predicated region body
PF: predicated region fallthrough
CT: control target
= control target key end

     0   :  { %vm551_vm0 = vcmask 523264   ;;  %s1880_s1 = inlined_call_operand.vmem [shape: bf16[576,64], index: 1, kind: input, shape index: {}]   ;;  %s1881_s0 = inlined_call_operand.vmem [shape: bf16[128,576], index: 0, kind: input, shape index: {}]   ;;  %s1882_s2 = inlined_call_operand.vmem [shape: f32[128,64], index: 2, kind: output, shape index: {0}]   ;;  %s1883_s3 = inlined_call_operand.vmem [shape: f32[8,64], index: 3, kind: output, shape index: {1}]   ;;  %s1884_s4 = inlined_call_operand.vmem [shape: f32[8,64], index: 4, kind: output, shape index: {2}]  }
   0x1   :  { %v1300_v0 = vld [vmem:[%s1880_s1 + $0x38] sm:$0xff]  ;;  %v1299_v1 = vld [vmem:[%s1880_s1 + $0x30] sm:$0xff]  ;;  %v1298_v2 = vld [vmem:[%s1880_s1 + $0x28] sm:$0xff] }
   0x2   :  { %1329 = vmatpush.bf16.msra.mxu1 %v1300_v0  ;;  %1330 = vmatpush.bf16.msra.mxu2 %v1300_v0  ;;  %v1297_v3 = vld [vmem:[%s1880_s1 + $0x20] sm:$0xff]  ;;  %v1296_v4 = vld [vmem:[%s1880_s1 + $0x18] sm:$0xff]  ;;  %v1295_v5 = vld [vmem:[%s1880_s1 + $0x10] sm:$0xff] }
   0x3   :  { %1331 = vmatpush.bf16.msra.mxu3 %v1300_v0  ;;  %576 = vmatpush.bf16.msra.mxu0 %v1300_v0  ;;  %v1294_v6 = vld [vmem:[%s1880_s1 + $0x8] sm:$0xff]  ;;  %v1293_v7 = vld [vmem:[%s1880_s1] sm:$0xff]  ;;  %v983_v8 = vld [vmem:[%s1881_s0 + $0x50] sm:$0xf] }
   0x4   :  { %v1265_v9 = vld [vmem:[%s1881_s0 + $0x60] sm:$0xf0]  ;;  %v1023_v10 = vld [vmem:[%s1881_s0 + $0xa0] sm:$0xf]  ;;  %v1275_v11 = vld [vmem:[%s1881_s0 + $0xb0] sm:$0xf0] }
   0x5   :  { %v1063_v12 = vld [vmem:[%s1881_s0 + $0xf0] sm:$0xf]  ;;  %v1285_v13 = vld [vmem:[%s1881_s0 + $0x100] sm:$0xf0]  ;;  %v943_v14 = vld [vmem:[%s1881_s0] sm:$0xf]  ;;  %v984_v18 = vor.u32 %v1265_v9, %v983_v8  ;;  %v1024_v19 = vor.u32 %v1275_v11, %v1023_v10 }
   0x6   :  { %1332 = vmatpush.bf16.msra.mxu1 %v1299_v1  ;;  %1333 = vmatpush.bf16.msra.mxu2 %v1299_v1  ;;  %v1255_v15 = vld [vmem:[%s1881_s0 + $0x10] sm:$0xf0]  ;;  %v1316_v16 = vld [vmem:[%s1880_s1 + $0xb8] sm:$0xff]  ;;  %v1064_v20 = vor.u32 %v1285_v13, %v1063_v12  ;;  %v1314_v28 = vld [vmem:[%s1880_s1 + $0xa8] sm:$0xff] }
   0x7   :  { %1334 = vmatpush.bf16.msra.mxu3 %v1299_v1  ;;  %577 = vmatpush.bf16.msra.mxu0 %v1299_v1  ;;  %v1308_v17 = vld [vmem:[%s1880_s1 + $0x78] sm:$0xff]  ;;  %v944_v21 = vor.u32 %v1255_v15, %v943_v14  ;;  %v1315_v24 = vld [vmem:[%s1880_s1 + $0xb0] sm:$0xff]  ;;  %v1306_v29 = vld [vmem:[%s1880_s1 + $0x68] sm:$0xff] }
   0x8   :  { %v1324_v22 = vld [vmem:[%s1880_s1 + $0xf8] sm:$0xff]  ;;  %v1307_v25 = vld [vmem:[%s1880_s1 + $0x70] sm:$0xff]  ;;  %v1322_v30 = vld [vmem:[%s1880_s1 + $0xe8] sm:$0xff] }
   0x9   :  { %v1328_v23 = vld [vmem:[%s1880_s1 + $0x118] sm:$0xff]  ;;  %v1323_v26 = vld [vmem:[%s1880_s1 + $0xf0] sm:$0xff]  ;;  %v1326_v31 = vld [vmem:[%s1880_s1 + $0x108] sm:$0xff] }
   0xa   :  { %1335 = vmatpush.bf16.msra.mxu1 %v1298_v2  ;;  %1336 = vmatpush.bf16.msra.mxu2 %v1298_v2  ;;  %v1327_v27 = vld [vmem:[%s1880_s1 + $0x110] sm:$0xff]  ;;  %v1313_v32 = vld [vmem:[%s1880_s1 + $0xa0] sm:$0xff]  ;;  %v1003_v35 = vld [vmem:[%s1881_s0 + $0x78] sm:$0xf] }
   0xb   :  { %1337 = vmatpush.bf16.msra.mxu3 %v1298_v2  ;;  %578 = vmatpush.bf16.msra.mxu0 %v1298_v2  ;;  %v1305_v33 = vld [vmem:[%s1880_s1 + $0x60] sm:$0xff]  ;;  %v1270_v36 = vld [vmem:[%s1881_s0 + $0x88] sm:$0xf0]  ;;  %v1043_v37 = vld [vmem:[%s1881_s0 + $0xc8] sm:$0xf] }
   0xc   :  { %v1321_v34 = vld [vmem:[%s1880_s1 + $0xe0] sm:$0xff]  ;;  %v1280_v38 = vld [vmem:[%s1881_s0 + $0xd8] sm:$0xf0]  ;;  %v1083_v39 = vld [vmem:[%s1881_s0 + $0x118] sm:$0xf]  ;;  %v1004_v46 = vor.u32 %v1270_v36, %v1003_v35 }
   0xd   :  { %v1290_v40 = vld [vmem:[%s1881_s0 + $0x128] sm:$0xf0]  ;;  %v963_v41 = vld [vmem:[%s1881_s0 + $0x28] sm:$0xf]  ;;  %v1260_v42 = vld [vmem:[%s1881_s0 + $0x38] sm:$0xf0]  ;;  %v1044_v47 = vor.u32 %v1280_v38, %v1043_v37 }
   0xe   :  { %1338 = vmatpush.bf16.msra.mxu1 %v1297_v3  ;;  %1339 = vmatpush.bf16.msra.mxu2 %v1297_v3  ;;  %v1325_v43 = vld [vmem:[%s1880_s1 + $0x100] sm:$0xff]  ;;  %v1312_v44 = vld [vmem:[%s1880_s1 + $0x98] sm:$0xff]  ;;  %v1084_v48 = vor.u32 %v1290_v40, %v1083_v39  ;;  %v964_v49 = vor.u32 %v1260_v42, %v963_v41  ;;  %v1311_v51 = vld [vmem:[%s1880_s1 + $0x90] sm:$0xff] }
   0xf   :  { %1340 = vmatpush.bf16.msra.mxu3 %v1297_v3  ;;  %579 = vmatpush.bf16.msra.mxu0 %v1297_v3  ;;  %v1304_v45 = vld [vmem:[%s1880_s1 + $0x58] sm:$0xff]  ;;  %v1303_v52 = vld [vmem:[%s1880_s1 + $0x50] sm:$0xff]  ;;  %v1310_v54 = vld [vmem:[%s1880_s1 + $0x88] sm:$0xff] }
  0x10   :  { %v1320_v50 = vld [vmem:[%s1880_s1 + $0xd8] sm:$0xff]  ;;  %v1319_v53 = vld [vmem:[%s1880_s1 + $0xd0] sm:$0xff]  ;;  %v1302_v55 = vld [vmem:[%s1880_s1 + $0x48] sm:$0xff] }
  0x11   :  { %v1318_v56 = vld [vmem:[%s1880_s1 + $0xc8] sm:$0xff]  ;;  %v1309_v57 = vld [vmem:[%s1880_s1 + $0x80] sm:$0xff]  ;;  %v945_v61 = vld [vmem:[%s1881_s0 + $0x14] sm:$0xf0] }
  0x12   :  { %1341 = vmatpush.bf16.msra.mxu1 %v1296_v4  ;;  %1342 = vmatpush.bf16.msra.mxu2 %v1296_v4  ;;  %v1301_v58 = vld [vmem:[%s1880_s1 + $0x40] sm:$0xff]  ;;  %v951_v62 = vld [vmem:[%s1881_s0 + $0x8] sm:$0xf]  ;;  %v1256_v63 = vld [vmem:[%s1881_s0 + $0x18] sm:$0xf0] }
  0x13   :  { %1343 = vmatpush.bf16.msra.mxu3 %v1296_v4  ;;  %580 = vmatpush.bf16.msra.mxu0 %v1296_v4  ;;  %v1317_v59 = vld [vmem:[%s1880_s1 + $0xc0] sm:$0xff]  ;;  %v1254_v0 = vld [vmem:[%s1881_s0 + $0xc] sm:$0xf]  ;;  %v959_v2 = vld [vmem:[%s1881_s0 + $0x10] sm:$0xf] }
  0x14   :  { %v1253_v60 = vld [vmem:[%s1881_s0 + $0x4] sm:$0xf]  ;;  %v953_v1 = vld [vmem:[%s1881_s0 + $0x1c] sm:$0xf0]  ;;  %v1258_v8 = vld [vmem:[%s1881_s0 + $0x2c] sm:$0xf] }
  0x15   :  { %v1257_v3 = vld [vmem:[%s1881_s0 + $0x20] sm:$0xf0]  ;;  %v948_v4 = vor.u32 %v1253_v60, %v945_v61  ;;  %v965_v9 = vld [vmem:[%s1881_s0 + $0x3c] sm:$0xf0]  ;;  %v971_v10 = vld [vmem:[%s1881_s0 + $0x30] sm:$0xf] }
  0x16   :  { %1344 = vmatpush.bf16.msra.mxu1 %v1295_v5  ;;  %1345 = vmatpush.bf16.msra.mxu2 %v1295_v5  ;;  %v1261_v11 = vld [vmem:[%s1881_s0 + $0x40] sm:$0xf0]  ;;  %v1259_v12 = vld [vmem:[%s1881_s0 + $0x34] sm:$0xf]  ;;  %v973_v13 = vld [vmem:[%s1881_s0 + $0x44] sm:$0xf0] }
  0x17   :  { %1346 = vmatpush.bf16.msra.mxu3 %v1295_v5  ;;  %581 = vmatpush.bf16.msra.mxu0 %v1295_v5  ;;  %v952_v5 = vor.u32 %v1256_v63, %v951_v62  ;;  %v979_v14 = vld [vmem:[%s1881_s0 + $0x38] sm:$0xf]  ;;  %v1262_v15 = vld [vmem:[%s1881_s0 + $0x48] sm:$0xf0]  ;;  %v1271_v35 = vld [vmem:[%s1881_s0 + $0x90] sm:$0xf0] }
  0x18   :  { %v1269_v36 = vld [vmem:[%s1881_s0 + $0x84] sm:$0xf]  ;;  %v1013_v37 = vld [vmem:[%s1881_s0 + $0x94] sm:$0xf0]  ;;  %v1019_v38 = vld [vmem:[%s1881_s0 + $0x88] sm:$0xf] }
  0x19   :  { %v1272_v39 = vld [vmem:[%s1881_s0 + $0x98] sm:$0xf0]  ;;  %v1016_v42 = vor.u32 %v1269_v36, %v1013_v37  ;;  %v1279_v60 = vld [vmem:[%s1881_s0 + $0xd4] sm:$0xf]  ;;  %v1053_v61 = vld [vmem:[%s1881_s0 + $0xe4] sm:$0xf0] }
  0x1a   :  { %1347 = vmatpush.bf16.msra.mxu1 %v1294_v6  ;;  %1348 = vmatpush.bf16.msra.mxu2 %v1294_v6  ;;  %v1059_v62 = vld [vmem:[%s1881_s0 + $0xd8] sm:$0xf]  ;;  %v1282_v63 = vld [vmem:[%s1881_s0 + $0xe8] sm:$0xf0] }
  0x1b   :  { %1349 = vmatpush.bf16.msra.mxu3 %v1294_v6  ;;  %582 = vmatpush.bf16.msra.mxu0 %v1294_v6  ;;  %v956_v6 = vor.u32 %v1254_v0, %v953_v1 }
  0x1e   :  { %1350 = vmatpush.bf16.msra.mxu1 %v1293_v7  ;;  %1351 = vmatpush.bf16.msra.mxu2 %v1293_v7 }
  0x1f   :  { %1352 = vmatpush.bf16.msra.mxu3 %v1293_v7  ;;  %583 = vmatpush.bf16.msra.mxu0 %v1293_v7  ;;  %v960_v7 = vor.u32 %v1257_v3, %v959_v2  ;;  %v1056_v2 = vor.u32 %v1279_v60, %v1053_v61  ;;  %v1060_v3 = vor.u32 %v1282_v63, %v1059_v62 }
  0x21   :  { %594 = vmatmul.bf16.vlgmr.msra.gmra.mxu1 %v984_v18  ;;  %604 = vmatmul.bf16.vlgmr.msra.gmra.mxu2 %v1024_v19  ;;  %v976_v18 = vor.u32 %v1259_v12, %v973_v13  ;;  %v980_v19 = vor.u32 %v1262_v15, %v979_v14 }
  0x22   :  { %674 = vmatpush.bf16.msrb.mxu2 %v1316_v16  ;;  %625 = vmatpush.bf16.msrb.mxu1 %v1308_v17  ;;  %v968_v16 = vor.u32 %v1258_v8, %v965_v9  ;;  %v972_v17 = vor.u32 %v1261_v11, %v971_v10  ;;  %v1284_v8 = vld [vmem:[%s1881_s0 + $0xfc] sm:$0xf]  ;;  %v1073_v9 = vld [vmem:[%s1881_s0 + $0x10c] sm:$0xf0]  ;;  %v1079_v10 = vld [vmem:[%s1881_s0 + $0x100] sm:$0xf] }
  0x23   :  { %614 = vmatmul.bf16.vlgmr.msra.gmra.mxu3 %v1064_v20  ;;  %584 = vmatmul.bf16.vlgmr.msra.gmra.mxu0 %v944_v21  ;;  %v1263_v20 = vld [vmem:[%s1881_s0 + $0x54] sm:$0xf]  ;;  %v985_v21 = vld [vmem:[%s1881_s0 + $0x64] sm:$0xf0]  ;;  %v1076_v15 = vor.u32 %v1284_v8, %v1073_v9 }
  0x24   :  { %723 = vmatpush.bf16.msrb.mxu3 %v1324_v22  ;;  %776 = vmatpush.bf16.msrb.mxu0 %v1328_v23  ;;  %v991_v22 = vld [vmem:[%s1881_s0 + $0x58] sm:$0xf]  ;;  %v1266_v23 = vld [vmem:[%s1881_s0 + $0x68] sm:$0xf0]  ;;  %v1287_v11 = vld [vmem:[%s1881_s0 + $0x110] sm:$0xf0] }
  0x26   :  { %675 = vmatpush.bf16.msrb.mxu2 %v1315_v24  ;;  %626 = vmatpush.bf16.msrb.mxu1 %v1307_v25  ;;  %v1264_v24 = vld [vmem:[%s1881_s0 + $0x5c] sm:$0xf]  ;;  %v993_v25 = vld [vmem:[%s1881_s0 + $0x6c] sm:$0xf0] }
  0x28   :  { %724 = vmatpush.bf16.msrb.mxu3 %v1323_v26  ;;  %777 = vmatpush.bf16.msrb.mxu0 %v1327_v27  ;;  %v999_v26 = vld [vmem:[%s1881_s0 + $0x60] sm:$0xf]  ;;  %v1267_v27 = vld [vmem:[%s1881_s0 + $0x70] sm:$0xf0] }
  0x2a   :  { %676 = vmatpush.bf16.msrb.mxu2 %v1314_v28  ;;  %627 = vmatpush.bf16.msrb.mxu1 %v1306_v29  ;;  %v988_v28 = vor.u32 %v1263_v20, %v985_v21  ;;  %v992_v29 = vor.u32 %v1266_v23, %v991_v22  ;;  %v1288_v22 = vld [vmem:[%s1881_s0 + $0x11c] sm:$0xf]  ;;  %v1085_v23 = vld [vmem:[%s1881_s0 + $0x12c] sm:$0xf0] }
  0x2c   :  { %725 = vmatpush.bf16.msrb.mxu3 %v1322_v30  ;;  %778 = vmatpush.bf16.msrb.mxu0 %v1326_v31  ;;  %v996_v30 = vor.u32 %v1264_v24, %v993_v25  ;;  %v1000_v31 = vor.u32 %v1267_v27, %v999_v26  ;;  %v1091_v24 = vld [vmem:[%s1881_s0 + $0x120] sm:$0xf]  ;;  %v1291_v25 = vld [vmem:[%s1881_s0 + $0x130] sm:$0xf0]  ;;  %v1289_v26 = vld [vmem:[%s1881_s0 + $0x124] sm:$0xf] }
  0x2d   :  { %v1093_v27 = vld [vmem:[%s1881_s0 + $0x134] sm:$0xf0] }
  0x2e   :  { %677 = vmatpush.bf16.msrb.mxu2 %v1313_v32  ;;  %628 = vmatpush.bf16.msrb.mxu1 %v1305_v33  ;;  %v1268_v32 = vld [vmem:[%s1881_s0 + $0x7c] sm:$0xf]  ;;  %v1005_v33 = vld [vmem:[%s1881_s0 + $0x8c] sm:$0xf0] }
  0x2f   :  { %v1008_v40 = vor.u32 %v1268_v32, %v1005_v33  ;;  %v1088_v32 = vor.u32 %v1288_v22, %v1085_v23  ;;  %v1092_v33 = vor.u32 %v1291_v25, %v1091_v24 }
  0x30   :  { %726 = vmatpush.bf16.msrb.mxu3 %v1321_v34  ;;  %779 = vmatpush.bf16.msrb.mxu0 %v1325_v43  ;;  %v1011_v34 = vld [vmem:[%s1881_s0 + $0x80] sm:$0xf]  ;;  %v1020_v43 = vor.u32 %v1272_v39, %v1019_v38 }
  0x31   :  { %599 = vmatmul.bf16.gmra.mxu1 %v1004_v46  ;;  %609 = vmatmul.bf16.gmra.mxu2 %v1044_v47  ;;  %v1012_v41 = vor.u32 %v1271_v35, %v1011_v34  ;;  %v1031_v46 = vld [vmem:[%s1881_s0 + $0xa8] sm:$0xf]  ;;  %v1276_v47 = vld [vmem:[%s1881_s0 + $0xb8] sm:$0xf0]  ;;  %v1096_v35 = vor.u32 %v1289_v26, %v1093_v27 }
  0x32   :  { %678 = vmatpush.bf16.msrb.mxu2 %v1312_v44  ;;  %629 = vmatpush.bf16.msrb.mxu1 %v1304_v45  ;;  %v1273_v44 = vld [vmem:[%s1881_s0 + $0xa4] sm:$0xf]  ;;  %v1025_v45 = vld [vmem:[%s1881_s0 + $0xb4] sm:$0xf0] }
  0x33   :  { %619 = vmatmul.bf16.gmra.mxu3 %v1084_v48  ;;  %589 = vmatmul.bf16.gmra.mxu0 %v964_v49  ;;  %v1274_v48 = vld [vmem:[%s1881_s0 + $0xac] sm:$0xf]  ;;  %v1033_v49 = vld [vmem:[%s1881_s0 + $0xbc] sm:$0xf0] }
  0x34   :  { %727 = vmatpush.bf16.msrb.mxu3 %v1320_v50  ;;  %v1039_v50 = vld [vmem:[%s1881_s0 + $0xb0] sm:$0xf] }
  0x36   :  { %679 = vmatpush.bf16.msrb.mxu2 %v1311_v51  ;;  %630 = vmatpush.bf16.msrb.mxu1 %v1303_v52  ;;  %v1277_v51 = vld [vmem:[%s1881_s0 + $0xc0] sm:$0xf0]  ;;  %v1028_v52 = vor.u32 %v1273_v44, %v1025_v45 }
  0x38   :  { %728 = vmatpush.bf16.msrb.mxu3 %v1319_v53  ;;  %v1032_v53 = vor.u32 %v1276_v47, %v1031_v46 }
  0x3a   :  { %680 = vmatpush.bf16.msrb.mxu2 %v1310_v54  ;;  %631 = vmatpush.bf16.msrb.mxu1 %v1302_v55  ;;  %v1036_v54 = vor.u32 %v1274_v48, %v1033_v49  ;;  %v1040_v55 = vor.u32 %v1277_v51, %v1039_v50 }
  0x3c   :  { %729 = vmatpush.bf16.msrb.mxu3 %v1318_v56  ;;  %v1278_v56 = vld [vmem:[%s1881_s0 + $0xcc] sm:$0xf] }
  0x3e   :  { %681 = vmatpush.bf16.msrb.mxu2 %v1309_v57  ;;  %632 = vmatpush.bf16.msrb.mxu1 %v1301_v58  ;;  %v1045_v57 = vld [vmem:[%s1881_s0 + $0xdc] sm:$0xf0]  ;;  %v1051_v58 = vld [vmem:[%s1881_s0 + $0xd0] sm:$0xf] }
  0x3f   :  { %v1048_v0 = vor.u32 %v1278_v56, %v1045_v57 }
  0x40   :  { %730 = vmatpush.bf16.msrb.mxu3 %v1317_v59  ;;  %v1281_v59 = vld [vmem:[%s1881_s0 + $0xe0] sm:$0xf0] }
  0x41   :  { %633 = vmatmul.bf16.vlgmr.msrb.gmra.mxu1 %v948_v4  ;;  %682 = vmatmul.bf16.vlgmr.msrb.gmra.mxu2 %v952_v5  ;;  %v1052_v1 = vor.u32 %v1281_v59, %v1051_v58  ;;  %v1283_v4 = vld [vmem:[%s1881_s0 + $0xf4] sm:$0xf]  ;;  %v1065_v5 = vld [vmem:[%s1881_s0 + $0x104] sm:$0xf0] }
  0x42   :  { %v1068_v12 = vor.u32 %v1283_v4, %v1065_v5 }
  0x43   :  { %731 = vmatmul.bf16.vlgmr.msrb.gmra.mxu3 %v956_v6  ;;  %1245 = vmatmul.msk.bf16.vlgmr.msrb.gmra.mxu0 %vm551_vm0, %v960_v7  ;;  %v1071_v6 = vld [vmem:[%s1881_s0 + $0xf8] sm:$0xf]  ;;  %v1286_v7 = vld [vmem:[%s1881_s0 + $0x108] sm:$0xf0] }
  0x44   :  { %v1072_v13 = vor.u32 %v1286_v7, %v1071_v6 }
  0x51   :  { %638 = vmatmul.bf16.gmra.mxu1 %v968_v16  ;;  %687 = vmatmul.bf16.gmra.mxu2 %v972_v17  ;;  %v1080_v16 = vor.u32 %v1287_v11, %v1079_v10 }
  0x53   :  { %736 = vmatmul.bf16.gmra.mxu3 %v976_v18  ;;  %1246 = vmatmul.msk.bf16.gmra.mxu0 %vm551_vm0, %v980_v19 }
  0x61   :  { %643 = vmatmul.bf16.gmra.mxu1 %v988_v28  ;;  %692 = vmatmul.bf16.gmra.mxu2 %v992_v29  ;;  %v1099_v28 = vld [vmem:[%s1881_s0 + $0x128] sm:$0xf]  ;;  %v1292_v29 = vld [vmem:[%s1881_s0 + $0x138] sm:$0xf0] }
  0x62   :  { %v1100_v36 = vor.u32 %v1292_v29, %v1099_v28 }
  0x63   :  { %741 = vmatmul.bf16.gmra.mxu3 %v996_v30  ;;  %1247 = vmatmul.msk.bf16.gmra.mxu0 %vm551_vm0, %v1000_v31 }
  0x71   :  { %648 = vmatmul.bf16.gmra.mxu1 %v1008_v40  ;;  %697 = vmatmul.bf16.gmra.mxu2 %v1012_v41 }
  0x73   :  { %746 = vmatmul.bf16.gmra.mxu3 %v1016_v42  ;;  %1248 = vmatmul.msk.bf16.gmra.mxu0 %vm551_vm0, %v1020_v43 }
  0x81   :  { %653 = vmatmul.bf16.gmra.mxu1 %v1028_v52  ;;  %702 = vmatmul.bf16.gmra.mxu2 %v1032_v53 }
  0x83   :  { %751 = vmatmul.bf16.gmra.mxu3 %v1036_v54  ;;  %1249 = vmatmul.msk.bf16.gmra.mxu0 %vm551_vm0, %v1040_v55 }
  0x91   :  { %658 = vmatmul.bf16.gmra.mxu1 %v1048_v0  ;;  %707 = vmatmul.bf16.gmra.mxu2 %v1052_v1 }
  0x93   :  { %756 = vmatmul.bf16.gmra.mxu3 %v1056_v2  ;;  %1250 = vmatmul.msk.bf16.gmra.mxu0 %vm551_vm0, %v1060_v3 }
  0x9e   :  { %v1708_v14 = vpop.f32.mrf.mxu1 }
  0xa0   :  { %v585_v17 = vpop.f32.mrf.mxu0 }
  0xa1   :  { %663 = vmatmul.bf16.gmra.mxu1 %v1068_v12  ;;  %712 = vmatmul.bf16.gmra.mxu2 %v1072_v13 }
  0xa3   :  { %761 = vmatmul.bf16.gmra.mxu3 %v1076_v15  ;;  %1251 = vmatmul.msk.bf16.gmra.mxu0 %vm551_vm0, %v1080_v16 }
  0xa4   :  { %v1711_v18 = vpop.f32.mrf.mxu2 }
  0xa6   :  { %v1713_v19 = vpop.f32.mrf.mxu3  ;;  %v1715_v20 = vpop.f32.mrf.mxu1 }
  0xa8   :  { %v587_v21 = vpop.f32.mrf.mxu0 }
  0xac   :  { %v1741_v30 = vpop.f32.mrf.mxu2 }
  0xae   :  { %v1743_v31 = vpop.f32.mrf.mxu3  ;;  %v1745_v34 = vpop.f32.mrf.mxu1 }
  0xb0   :  { %v590_v37 = vpop.f32.mrf.mxu0 }
  0xb1   :  { %668 = vmatmul.bf16.gmra.mxu1 %v1088_v32  ;;  %717 = vmatmul.bf16.gmra.mxu2 %v1092_v33 }
  0xb3   :  { %766 = vmatmul.bf16.gmra.mxu3 %v1096_v35  ;;  %1252 = vmatmul.msk.bf16.gmra.mxu0 %vm551_vm0, %v1100_v36 }
  0xb4   :  { %v1748_v38 = vpop.f32.mrf.mxu2 }
  0xb6   :  { %v1750_v39 = vpop.f32.mrf.mxu3  ;;  %v1752_v40 = vpop.f32.mrf.mxu1 }
  0xb8   :  { %v592_v41 = vpop.f32.mrf.mxu0 }
  0xbc   :  { %v1754_v42 = vpop.f32.mrf.mxu2 }
  0xbe   :  { %v1756_v43 = vpop.f32.mrf.mxu3  ;;  %v634_v44 = vpop.f32.mrf.mxu1 }
  0xbf   :  { %v635_v46 = vadd.f32 %v634_v44, %v585_v17 }
  0xc0   :  { %v781_v45 = vpop.f32.mrf.mxu0 }
  0xc4   :  { %v683_v47 = vpop.f32.mrf.mxu2 }
  0xc5   :  { %v684_v48 = vadd.f32 %v683_v47, %v635_v46 }
  0xc6   :  { %v732_v49 = vpop.f32.mrf.mxu3  ;;  %v636_v50 = vpop.f32.mrf.mxu1 }
  0xc7   :  { %v733_v51 = vadd.f32 %v732_v49, %v684_v48  ;;  %v637_v54 = vadd.f32 %v636_v50, %v587_v21 }
  0xc8   :  { %v783_v52 = vpop.f32.mrf.mxu0 }
  0xc9   :  { %v782_v53 = vadd.f32 %v781_v45, %v733_v51 }
  0xcb   :  { %821 = vst.msk [vmem:[%s1882_s2] sm:$0xff] %vm551_vm0, %v782_v53  ;;  %v874_v61 = vmul.f32 %v782_v53, %v782_v53  ;;  %v837_v63 = vsel %vm551_vm0, %v782_v53, 0.0 }
  0xcc   :  { %v685_v55 = vpop.f32.mrf.mxu2 }
  0xcd   :  { %v686_v56 = vadd.f32 %v685_v55, %v637_v54  ;;  %v890_v5 = vsel %vm551_vm0, %v874_v61, 0.0 }
  0xce   :  { %v734_v57 = vpop.f32.mrf.mxu3  ;;  %v639_v58 = vpop.f32.mrf.mxu1 }
  0xcf   :  { %v735_v59 = vadd.f32 %v734_v57, %v686_v56  ;;  %v640_v2 = vadd.f32 %v639_v58, %v590_v37 }
  0xd0   :  { %v786_v60 = vpop.f32.mrf.mxu0 }
  0xd1   :  { %v784_v62 = vadd.f32 %v783_v52, %v735_v59 }
  0xd3   :  { %822 = vst.msk [vmem:[%s1882_s2 + $0x8] sm:$0xff] %vm551_vm0, %v784_v62  ;;  %v838_v0 = vsel %vm551_vm0, %v784_v62, 0.0  ;;  %v875_v1 = vmul.f32 %v784_v62, %v784_v62 }
  0xd4   :  { %v839_v3 = vadd.f32 %v838_v0, %v837_v63  ;;  %v688_v4 = vpop.f32.mrf.mxu2 }
  0xd5   :  { %v891_v6 = vsel %vm551_vm0, %v875_v1, 0.0  ;;  %v689_v7 = vadd.f32 %v688_v4, %v640_v2 }
  0xd6   :  { %v737_v8 = vpop.f32.mrf.mxu3  ;;  %v892_v9 = vadd.f32 %v891_v6, %v890_v5  ;;  %v641_v10 = vpop.f32.mrf.mxu1 }
  0xd7   :  { %v738_v11 = vadd.f32 %v737_v8, %v689_v7  ;;  %v642_v17 = vadd.f32 %v641_v10, %v592_v41 }
  0xd8   :  { %v788_v12 = vpop.f32.mrf.mxu0 }
  0xd9   :  { %v787_v13 = vadd.f32 %v786_v60, %v738_v11 }
  0xdb   :  { %823 = vst.msk [vmem:[%s1882_s2 + $0x10] sm:$0xff] %vm551_vm0, %v787_v13  ;;  %v840_v15 = vsel %vm551_vm0, %v787_v13, 0.0  ;;  %v876_v16 = vmul.f32 %v787_v13, %v787_v13 }
  0xdc   :  { %v841_v21 = vadd.f32 %v840_v15, %v839_v3  ;;  %v690_v22 = vpop.f32.mrf.mxu2 }
  0xdd   :  { %v893_v23 = vsel %vm551_vm0, %v876_v16, 0.0  ;;  %v691_v24 = vadd.f32 %v690_v22, %v642_v17 }
  0xde   :  { %v739_v25 = vpop.f32.mrf.mxu3  ;;  %v894_v26 = vadd.f32 %v893_v23, %v892_v9  ;;  %v644_v27 = vpop.f32.mrf.mxu1 }
  0xdf   :  { %v740_v28 = vadd.f32 %v739_v25, %v691_v24  ;;  %v645_v36 = vadd.f32 %v644_v27, %v1708_v14 }
  0xe0   :  { %v791_v29 = vpop.f32.mrf.mxu0 }
  0xe1   :  { %v789_v32 = vadd.f32 %v788_v12, %v740_v28 }
  0xe3   :  { %824 = vst.msk [vmem:[%s1882_s2 + $0x18] sm:$0xff] %vm551_vm0, %v789_v32  ;;  %v842_v33 = vsel %vm551_vm0, %v789_v32, 0.0  ;;  %v877_v35 = vmul.f32 %v789_v32, %v789_v32 }
  0xe4   :  { %v843_v37 = vadd.f32 %v842_v33, %v841_v21  ;;  %v693_v41 = vpop.f32.mrf.mxu2 }
  0xe5   :  { %v895_v44 = vsel %vm551_vm0, %v877_v35, 0.0  ;;  %v694_v45 = vadd.f32 %v693_v41, %v645_v36 }
  0xe6   :  { %v742_v46 = vpop.f32.mrf.mxu3  ;;  %v896_v47 = vadd.f32 %v895_v44, %v894_v26  ;;  %v646_v48 = vpop.f32.mrf.mxu1 }
  0xe7   :  { %v743_v49 = vadd.f32 %v742_v46, %v694_v45  ;;  %v647_v14 = vadd.f32 %v646_v48, %v1715_v20 }
  0xe8   :  { %v793_v50 = vpop.f32.mrf.mxu0 }
  0xe9   :  { %v792_v51 = vadd.f32 %v791_v29, %v743_v49 }
  0xeb   :  { %825 = vst.msk [vmem:[%s1882_s2 + $0x20] sm:$0xff] %vm551_vm0, %v792_v51  ;;  %v844_v52 = vsel %vm551_vm0, %v792_v51, 0.0  ;;  %v878_v53 = vmul.f32 %v792_v51, %v792_v51 }
  0xec   :  { %v845_v54 = vadd.f32 %v844_v52, %v843_v37  ;;  %v695_v55 = vpop.f32.mrf.mxu2 }
  0xed   :  { %v897_v56 = vsel %vm551_vm0, %v878_v53, 0.0  ;;  %v696_v57 = vadd.f32 %v695_v55, %v647_v14 }
  0xee   :  { %v744_v58 = vpop.f32.mrf.mxu3  ;;  %v898_v59 = vadd.f32 %v897_v56, %v896_v47  ;;  %v649_v60 = vpop.f32.mrf.mxu1 }
  0xef   :  { %v745_v61 = vadd.f32 %v744_v58, %v696_v57  ;;  %v650_v20 = vadd.f32 %v649_v60, %v1745_v34 }
  0xf0   :  { %v796_v62 = vpop.f32.mrf.mxu0 }
  0xf1   :  { %v794_v63 = vadd.f32 %v793_v50, %v745_v61 }
  0xf3   :  { %826 = vst.msk [vmem:[%s1882_s2 + $0x28] sm:$0xff] %vm551_vm0, %v794_v63  ;;  %v846_v0 = vsel %vm551_vm0, %v794_v63, 0.0  ;;  %v879_v1 = vmul.f32 %v794_v63, %v794_v63 }
  0xf4   :  { %v847_v2 = vadd.f32 %v846_v0, %v845_v54  ;;  %v698_v3 = vpop.f32.mrf.mxu2 }
  0xf5   :  { %v899_v4 = vsel %vm551_vm0, %v879_v1, 0.0  ;;  %v699_v5 = vadd.f32 %v698_v3, %v650_v20 }
  0xf6   :  { %v747_v6 = vpop.f32.mrf.mxu3  ;;  %v900_v7 = vadd.f32 %v899_v4, %v898_v59  ;;  %v651_v8 = vpop.f32.mrf.mxu1 }
  0xf7   :  { %v748_v9 = vadd.f32 %v747_v6, %v699_v5  ;;  %v652_v34 = vadd.f32 %v651_v8, %v1752_v40 }
  0xf8   :  { %v798_v10 = vpop.f32.mrf.mxu0 }
  0xf9   :  { %v797_v11 = vadd.f32 %v796_v62, %v748_v9 }
  0xfb   :  { %827 = vst.msk [vmem:[%s1882_s2 + $0x30] sm:$0xff] %vm551_vm0, %v797_v11  ;;  %v848_v12 = vsel %vm551_vm0, %v797_v11, 0.0  ;;  %v880_v13 = vmul.f32 %v797_v11, %v797_v11 }
  0xfc   :  { %v849_v15 = vadd.f32 %v848_v12, %v847_v2  ;;  %v700_v16 = vpop.f32.mrf.mxu2 }
  0xfd   :  { %v901_v17 = vsel %vm551_vm0, %v880_v13, 0.0  ;;  %v701_v21 = vadd.f32 %v700_v16, %v652_v34 }
  0xfe   :  { %v749_v22 = vpop.f32.mrf.mxu3  ;;  %v902_v23 = vadd.f32 %v901_v17, %v900_v7  ;;  %v654_v24 = vpop.f32.mrf.mxu1 }
  0xff   :  { %v750_v25 = vadd.f32 %v749_v22, %v701_v21  ;;  %v655_v40 = vadd.f32 %v654_v24, %v1711_v18 }
 0x100   :  { %v801_v26 = vpop.f32.mrf.mxu0 }
 0x101   :  { %v799_v27 = vadd.f32 %v798_v10, %v750_v25 }
 0x103   :  { %828 = vst.msk [vmem:[%s1882_s2 + $0x38] sm:$0xff] %vm551_vm0, %v799_v27  ;;  %v850_v28 = vsel %vm551_vm0, %v799_v27, 0.0  ;;  %v881_v29 = vmul.f32 %v799_v27, %v799_v27 }
 0x104   :  { %v1810_v32 = vadd.f32 %v850_v28, %v849_v15  ;;  %v703_v33 = vpop.f32.mrf.mxu2 }
 0x105   :  { %v903_v35 = vsel %vm551_vm0, %v881_v29, 0.0  ;;  %v704_v36 = vadd.f32 %v703_v33, %v655_v40 }
 0x106   :  { %v752_v37 = vpop.f32.mrf.mxu3  ;;  %v1813_v41 = vadd.f32 %v903_v35, %v902_v23  ;;  %v656_v44 = vpop.f32.mrf.mxu1 }
 0x107   :  { %v753_v45 = vadd.f32 %v752_v37, %v704_v36  ;;  %v657_v18 = vadd.f32 %v656_v44, %v1741_v30 }
 0x108   :  { %v803_v46 = vpop.f32.mrf.mxu0 }
 0x109   :  { %v802_v47 = vadd.f32 %v801_v26, %v753_v45 }
 0x10b   :  { %829 = vst.msk [vmem:[%s1882_s2 + $0x40] sm:$0xff] %vm551_vm0, %v802_v47  ;;  %v852_v17 = vsel %vm551_vm0, %v802_v47, 0.0 }
 0x10c   :  { %v705_v48 = vpop.f32.mrf.mxu2  ;;  %v853_v28 = vadd.f32 %v852_v17, %v1810_v32 }
 0x10d   :  { %v706_v49 = vadd.f32 %v705_v48, %v657_v18 }
 0x10e   :  { %v754_v50 = vpop.f32.mrf.mxu3  ;;  %v659_v51 = vpop.f32.mrf.mxu1 }
 0x10f   :  { %v755_v52 = vadd.f32 %v754_v50, %v706_v49  ;;  %v660_v54 = vadd.f32 %v659_v51, %v1748_v38 }
 0x110   :  { %v806_v53 = vpop.f32.mrf.mxu0 }
 0x111   :  { %v804_v14 = vadd.f32 %v803_v46, %v755_v52 }
 0x113   :  { %830 = vst.msk [vmem:[%s1882_s2 + $0x48] sm:$0xff] %vm551_vm0, %v804_v14  ;;  %v883_v21 = vmul.f32 %v804_v14, %v804_v14  ;;  %v854_v24 = vsel %vm551_vm0, %v804_v14, 0.0 }
 0x114   :  { %v708_v55 = vpop.f32.mrf.mxu2 }
 0x115   :  { %v709_v56 = vadd.f32 %v708_v55, %v660_v54  ;;  %v907_v40 = vsel %vm551_vm0, %v883_v21, 0.0 }
 0x116   :  { %v757_v57 = vpop.f32.mrf.mxu3  ;;  %v661_v58 = vpop.f32.mrf.mxu1 }
 0x117   :  { %v758_v59 = vadd.f32 %v757_v57, %v709_v56  ;;  %v662_v61 = vadd.f32 %v661_v58, %v1754_v42 }
 0x118   :  { %v808_v30 = vpop.f32.mrf.mxu0 }
 0x119   :  { %v807_v60 = vadd.f32 %v806_v53, %v758_v59 }
 0x11b   :  { %831 = vst.msk [vmem:[%s1882_s2 + $0x50] sm:$0xff] %vm551_vm0, %v807_v60  ;;  %v884_v25 = vmul.f32 %v807_v60, %v807_v60  ;;  %v856_v33 = vsel %vm551_vm0, %v807_v60, 0.0 }
 0x11c   :  { %v710_v62 = vpop.f32.mrf.mxu2 }
 0x11d   :  { %v711_v63 = vadd.f32 %v710_v62, %v662_v61  ;;  %v909_v45 = vsel %vm551_vm0, %v884_v25, 0.0 }
 0x11e   :  { %v759_v0 = vpop.f32.mrf.mxu3  ;;  %v664_v1 = vpop.f32.mrf.mxu1 }
 0x11f   :  { %v760_v20 = vadd.f32 %v759_v0, %v711_v63  ;;  %v665_v3 = vadd.f32 %v664_v1, %v1713_v19  ;;  %v882_v19 = vmul.f32 %v802_v47, %v802_v47 }
 0x120   :  { %v811_v2 = vpop.f32.mrf.mxu0 }
 0x121   :  { %v809_v38 = vadd.f32 %v808_v30, %v760_v20 }
 0x123   :  { %832 = vst.msk [vmem:[%s1882_s2 + $0x58] sm:$0xff] %vm551_vm0, %v809_v38  ;;  %v885_v35 = vmul.f32 %v809_v38, %v809_v38  ;;  %v858_v46 = vsel %vm551_vm0, %v809_v38, 0.0 }
 0x124   :  { %v713_v4 = vpop.f32.mrf.mxu2 }
 0x125   :  { %v714_v5 = vadd.f32 %v713_v4, %v665_v3  ;;  %v911_v32 = vsel %vm551_vm0, %v885_v35, 0.0 }
 0x126   :  { %v762_v6 = vpop.f32.mrf.mxu3  ;;  %v666_v7 = vpop.f32.mrf.mxu1 }
 0x127   :  { %v763_v8 = vadd.f32 %v762_v6, %v714_v5  ;;  %v667_v9 = vadd.f32 %v666_v7, %v1743_v31  ;;  %v905_v31 = vsel %vm551_vm0, %v882_v19, 0.0 }
 0x128   :  { %v813_v10 = vpop.f32.mrf.mxu0  ;;  %v906_v37 = vadd.f32 %v905_v31, %v1813_v41 }
 0x129   :  { %v812_v42 = vadd.f32 %v811_v2, %v763_v8 }
 0x12a   :  { %v908_v48 = vadd.f32 %v907_v40, %v906_v37 }
 0x12b   :  { %833 = vst.msk [vmem:[%s1882_s2 + $0x60] sm:$0xff] %vm551_vm0, %v812_v42  ;;  %v886_v47 = vmul.f32 %v812_v42, %v812_v42  ;;  %v860_v50 = vsel %vm551_vm0, %v812_v42, 0.0 }
 0x12c   :  { %v715_v11 = vpop.f32.mrf.mxu2  ;;  %v910_v52 = vadd.f32 %v909_v45, %v908_v48 }
 0x12d   :  { %v716_v12 = vadd.f32 %v715_v11, %v667_v9  ;;  %v913_v54 = vsel %vm551_vm0, %v886_v47, 0.0 }
 0x12e   :  { %v764_v13 = vpop.f32.mrf.mxu3  ;;  %v669_v34 = vpop.f32.mrf.mxu1  ;;  %v912_v58 = vadd.f32 %v911_v32, %v910_v52 }
 0x12f   :  { %v765_v15 = vadd.f32 %v764_v13, %v716_v12  ;;  %v670_v22 = vadd.f32 %v669_v34, %v1750_v39  ;;  %v855_v39 = vadd.f32 %v854_v24, %v853_v28 }
 0x130   :  { %v816_v29 = vpop.f32.mrf.mxu0  ;;  %v914_v63 = vadd.f32 %v913_v54, %v912_v58 }
 0x131   :  { %v814_v16 = vadd.f32 %v813_v10, %v765_v15  ;;  %v857_v49 = vadd.f32 %v856_v33, %v855_v39 }
 0x133   :  { %834 = vst.msk [vmem:[%s1882_s2 + $0x68] sm:$0xff] %vm551_vm0, %v814_v16  ;;  %v887_v51 = vmul.f32 %v814_v16, %v814_v16  ;;  %v859_v53 = vadd.f32 %v858_v46, %v857_v49  ;;  %v862_v55 = vsel %vm551_vm0, %v814_v16, 0.0 }
 0x134   :  { %v718_v23 = vpop.f32.mrf.mxu2 }
 0x135   :  { %v719_v26 = vadd.f32 %v718_v23, %v670_v22  ;;  %v861_v59 = vadd.f32 %v860_v50, %v859_v53  ;;  %v915_v60 = vsel %vm551_vm0, %v887_v51, 0.0 }
 0x136   :  { %v767_v27 = vpop.f32.mrf.mxu3  ;;  %v671_v44 = vpop.f32.mrf.mxu1  ;;  %v916_v38 = vadd.f32 %v915_v60, %v914_v63 }
 0x137   :  { %v768_v36 = vadd.f32 %v767_v27, %v719_v26  ;;  %v672_v41 = vadd.f32 %v671_v44, %v1756_v43  ;;  %v863_v0 = vadd.f32 %v862_v55, %v861_v59 }
 0x138   :  { %v818_v43 = vpop.f32.mrf.mxu0 }
 0x139   :  { %v817_v18 = vadd.f32 %v816_v29, %v768_v36 }
 0x13b   :  { %835 = vst.msk [vmem:[%s1882_s2 + $0x70] sm:$0xff] %vm551_vm0, %v817_v18  ;;  %v888_v56 = vmul.f32 %v817_v18, %v817_v18  ;;  %v864_v61 = vsel %vm551_vm0, %v817_v18, 0.0 }
 0x13c   :  { %v720_v14 = vpop.f32.mrf.mxu2  ;;  %v865_v2 = vadd.f32 %v864_v61, %v863_v0 }
 0x13d   :  { %v721_v57 = vadd.f32 %v720_v14, %v672_v41  ;;  %v917_v1 = vsel %vm551_vm0, %v888_v56, 0.0 }
 0x13e   :  { %v769_v30 = vpop.f32.mrf.mxu3  ;;  %v918_v5 = vadd.f32 %v917_v1, %v916_v38 }
 0x13f   :  { %v770_v62 = vadd.f32 %v769_v30, %v721_v57 }
 0x141   :  { %v819_v20 = vadd.f32 %v818_v43, %v770_v62 }
 0x143   :  { %836 = vst.msk [vmem:[%s1882_s2 + $0x78] sm:$0xff] %vm551_vm0, %v819_v20  ;;  %v866_v3 = vsel %vm551_vm0, %v819_v20, 0.0  ;;  %v889_v4 = vmul.f32 %v819_v20, %v819_v20 }
 0x144   :  { %v867_v6 = vadd.f32 %v866_v3, %v865_v2 }
 0x145   :  { %v919_v7 = vsel %vm551_vm0, %v889_v4, 0.0 }
 0x146   :  { %v868_v8 = vrot.slane %v867_v6, 4  ;;  %v920_v42 = vadd.f32 %v919_v7, %v918_v5 }
 0x148   :  { %v869_v9 = vadd.f32 %v868_v8, %v867_v6  ;;  %v921_v10 = vrot.slane %v920_v42, 4 }
 0x14a   :  { %v870_v11 = vrot.slane %v869_v9, 2  ;;  %v922_v12 = vadd.f32 %v921_v10, %v920_v42 }
 0x14c   :  { %v871_v13 = vadd.f32 %v870_v11, %v869_v9  ;;  %v923_v34 = vrot.slane %v922_v12, 2 }
 0x14e   :  { %v872_v15 = vrot.slane %v871_v13, 1  ;;  %v924_v19 = vadd.f32 %v923_v34, %v922_v12 }
 0x150   :  { %v873_v16 = vadd.f32 %v872_v15, %v871_v13  ;;  %v925_v17 = vrot.slane %v924_v19, 1 }
 0x152   :  { %v926_v21 = vadd.f32 %v925_v17, %v924_v19  ;;  %927 = vst.msk [vmem:[%s1883_s3] sm:$0xff] %vm551_vm0, %v873_v16 }
 0x154   :  { %928 = vst.msk [vmem:[%s1884_s4] sm:$0xff] %vm551_vm0, %v926_v21 }

// kernel: _lambda_.28
= control target key start
LH: loop header
LB: loop body
LE: loop exit
PB: predicated region body
PF: predicated region fallthrough
CT: control target
= control target key end

     0   :  { %s282_s0 = inlined_call_operand.vmem [shape: f32[16,512], index: 0, kind: input, shape index: {}]   ;;  %s283_s1 = inlined_call_operand.vmem [shape: f32[1,512], index: 1, kind: input, shape index: {}]   ;;  %s284_s2 = inlined_call_operand.vmem [shape: f32[1,512], index: 2, kind: input, shape index: {}]   ;;  %s285_s3 = inlined_call_operand.vmem [shape: f32[16,512], index: 3, kind: input, shape index: {}]   ;;  %s286_s4 = inlined_call_operand.vmem [shape: f32[1,512], index: 4, kind: input, shape index: {}]   ;;  %s287_s5 = inlined_call_operand.vmem [shape: f32[1,512], index: 5, kind: input, shape index: {}]   ;;  %s288_s6 = inlined_call_operand.vmem [shape: f32[16,512], index: 6, kind: output, shape index: {}]  }
   0x1   :  { %v23_v0 = vld [vmem:[%s282_s0] sm:$0xff]  ;;  %v24_v7 = vld [vmem:[%s282_s0 + $0x8] sm:$0xff]  ;;  %v25_v17 = vld [vmem:[%s282_s0 + $0x10] sm:$0xff] }
   0x2   :  { %v180_v1 = vld [vmem:[%s283_s1] sm:$0xf]  ;;  %v68_v12 = vld [vmem:[%s285_s3 + $0x8] sm:$0xff]  ;;  %v69_v22 = vld [vmem:[%s285_s3 + $0x10] sm:$0xff] }
   0x3   :  { %v185_v2 = vld [vmem:[%s284_s2] sm:$0xf]  ;;  %v33_v3 = vperm.slane %v180_v1, 0  ;;  %v34_v10 = vperm.slane %v180_v1, 1  ;;  %v35_v20 = vperm.slane %v180_v1, 2  ;;  %v26_v27 = vld [vmem:[%s282_s0 + $0x18] sm:$0xff] }
   0x4   :  { %v51_v4 = vperm.slane %v185_v2, 0  ;;  %v67_v5 = vld [vmem:[%s285_s3] sm:$0xff]  ;;  %v52_v11 = vperm.slane %v185_v2, 1  ;;  %v53_v21 = vperm.slane %v185_v2, 2  ;;  %v36_v31 = vperm.slane %v180_v1, 3  ;;  %v70_v33 = vld [vmem:[%s285_s3 + $0x18] sm:$0xff] }
   0x5   :  { %v195_v6 = vld [vmem:[%s286_s4] sm:$0xf]  ;;  %v41_v13 = vmul.f32 %v33_v3, %v23_v0  ;;  %v42_v19 = vmul.f32 %v34_v10, %v24_v7  ;;  %v43_v30 = vmul.f32 %v35_v20, %v25_v17  ;;  %v54_v32 = vperm.slane %v185_v2, 3  ;;  %v28_v35 = vld [vmem:[%s282_s0 + $0x28] sm:$0xff]  ;;  %v29_v45 = vld [vmem:[%s282_s0 + $0x30] sm:$0xff] }
   0x6   :  { %v77_v8 = vperm.slane %v195_v6, 0  ;;  %v204_v9 = vld [vmem:[%s287_s5] sm:$0xf]  ;;  %v78_v15 = vperm.slane %v195_v6, 1  ;;  %v79_v25 = vperm.slane %v195_v6, 2  ;;  %v80_v38 = vperm.slane %v195_v6, 3 }
   0x7   :  { %v103_v14 = vperm.slane %v204_v9, 0  ;;  %v104_v16 = vperm.slane %v204_v9, 1  ;;  %v59_v23 = vadd.f32 %v51_v4, %v41_v13  ;;  %v105_v26 = vperm.slane %v204_v9, 2  ;;  %v27_v28 = vld [vmem:[%s282_s0 + $0x20] sm:$0xff]  ;;  %v72_v44 = vld [vmem:[%s285_s3 + $0x28] sm:$0xff]  ;;  %v73_v54 = vld [vmem:[%s285_s3 + $0x30] sm:$0xff] }
   0x8   :  { %v85_v18 = vmul.f32 %v77_v8, %v67_v5  ;;  %v86_v24 = vmul.f32 %v78_v15, %v68_v12  ;;  %v60_v29 = vadd.f32 %v52_v11, %v42_v19  ;;  %v71_v34 = vld [vmem:[%s285_s3 + $0x20] sm:$0xff]  ;;  %v87_v37 = vmul.f32 %v79_v25, %v69_v22  ;;  %v30_v55 = vld [vmem:[%s282_s0 + $0x38] sm:$0xff] }
   0x9   :  { %v106_v39 = vperm.slane %v204_v9, 3  ;;  %v61_v41 = vadd.f32 %v53_v21, %v43_v30  ;;  %v44_v42 = vmul.f32 %v36_v31, %v26_v27  ;;  %v45_v43 = vmul.f32 %v33_v3, %v27_v28  ;;  %v74_v60 = vld [vmem:[%s285_s3 + $0x38] sm:$0xff] }
   0xa   :  { %v93_v36 = vadd.f32 %v85_v18, %v59_v23  ;;  %v94_v40 = vadd.f32 %v86_v24, %v60_v29  ;;  %v88_v47 = vmul.f32 %v80_v38, %v70_v33  ;;  %v89_v48 = vmul.f32 %v77_v8, %v71_v34 }
   0xb   :  { %v46_v49 = vmul.f32 %v34_v10, %v28_v35  ;;  %v95_v51 = vadd.f32 %v87_v37, %v61_v41  ;;  %v62_v52 = vadd.f32 %v54_v32, %v44_v42  ;;  %v63_v53 = vadd.f32 %v51_v4, %v45_v43 }
   0xc   :  { %v111_v46 = vadd.f32 %v103_v14, %v93_v36  ;;  %v112_v50 = vadd.f32 %v104_v16, %v94_v40  ;;  %v90_v58 = vmul.f32 %v78_v15, %v72_v44  ;;  %v47_v59 = vmul.f32 %v35_v20, %v29_v45 }
   0xd   :  { %v64_v57 = vadd.f32 %v52_v11, %v46_v49  ;;  %v113_v62 = vadd.f32 %v105_v26, %v95_v51  ;;  %v96_v63 = vadd.f32 %v88_v47, %v62_v52  ;;  %v97_v0 = vadd.f32 %v89_v48, %v63_v53 }
   0xe   :  { %v119_v56 = vmax.f32 %v111_v46, 0.0  ;;  %v120_v61 = vmax.f32 %v112_v50, 0.0  ;;  %v65_v2 = vadd.f32 %v53_v21, %v47_v59  ;;  %v91_v3 = vmul.f32 %v79_v25, %v73_v54 }
   0xf   :  { %v98_v1 = vadd.f32 %v90_v58, %v64_v57  ;;  %v48_v4 = vmul.f32 %v36_v31, %v30_v55  ;;  %v121_v5 = vmax.f32 %v113_v62, 0.0  ;;  %v114_v6 = vadd.f32 %v106_v39, %v96_v63 }
  0x10   :  { %127 = vst [vmem:[%s288_s6] sm:$0xff] %v119_v56  ;;  %v115_v7 = vadd.f32 %v103_v14, %v97_v0  ;;  %v92_v8 = vmul.f32 %v80_v38, %v74_v60  ;;  %v99_v10 = vadd.f32 %v91_v3, %v65_v2 }
  0x11   :  { %128 = vst [vmem:[%s288_s6 + $0x8] sm:$0xff] %v120_v61  ;;  %v116_v9 = vadd.f32 %v104_v16, %v98_v1  ;;  %v66_v11 = vadd.f32 %v54_v32, %v48_v4  ;;  %v122_v12 = vmax.f32 %v114_v6, 0.0 }
  0x12   :  { %129 = vst [vmem:[%s288_s6 + $0x10] sm:$0xff] %v121_v5  ;;  %v123_v13 = vmax.f32 %v115_v7, 0.0  ;;  %v117_v17 = vadd.f32 %v105_v26, %v99_v10 }
  0x13   :  { %v124_v15 = vmax.f32 %v116_v9, 0.0  ;;  %v100_v18 = vadd.f32 %v92_v8, %v66_v11  ;;  %130 = vst [vmem:[%s288_s6 + $0x18] sm:$0xff] %v122_v12 }
  0x14   :  { %131 = vst [vmem:[%s288_s6 + $0x20] sm:$0xff] %v123_v13  ;;  %v125_v14 = vmax.f32 %v117_v17, 0.0 }
  0x15   :  { %v118_v16 = vadd.f32 %v106_v39, %v100_v18  ;;  %132 = vst [vmem:[%s288_s6 + $0x28] sm:$0xff] %v124_v15 }
  0x16   :  { %133 = vst [vmem:[%s288_s6 + $0x30] sm:$0xff] %v125_v14 }
  0x17   :  { %v126_v19 = vmax.f32 %v118_v16, 0.0 }
  0x19   :  { %134 = vst [vmem:[%s288_s6 + $0x38] sm:$0xff] %v126_v19 }

// kernel: _lambda_.29
= control target key start
LH: loop header
LB: loop body
LE: loop exit
PB: predicated region body
PF: predicated region fallthrough
CT: control target
= control target key end

     0   :  { %s153_s0 = inlined_call_operand.vmem [shape: f32[2,64], index: 0, kind: input, shape index: {}]   ;;  %s154_s1 = inlined_call_operand.vmem [shape: f32[64,10], index: 1, kind: input, shape index: {}]   ;;  %s155_s2 = inlined_call_operand.vmem [shape: f32[1,10], index: 2, kind: input, shape index: {}]   ;;  %s156_s3 = inlined_call_operand.hbm [shape: f32[2,10], index: 3, kind: output, shape index: {}]  }
   0x1   :  { %v23_v0 = vld [vmem:[%s154_s1 + $0x38] sm:$0xff]  ;;  %v22_v1 = vld [vmem:[%s154_s1 + $0x30] sm:$0xff]  ;;  %v21_v2 = vld [vmem:[%s154_s1 + $0x28] sm:$0xff] }
   0x2   :  { %40 = vmatpush.msra.mxu0 %v23_v0 }
   0x4   :  { %41 = vmatpush.msra.mxu0 %v22_v1 }
   0x5   :  { %8 = vsyncpa [#allocation3], 0  ;;  %v20_v3 = vld [vmem:[%s154_s1 + $0x20] sm:$0xff]  ;;  %v19_v4 = vld [vmem:[%s154_s1 + $0x18] sm:$0xff]  ;;  %vm28_vm0 = vcmask 523264   ;;  %s99_s5 = smov [#allocation2]  }
   0x6   :  { %42 = vmatpush.msra.mxu0 %v21_v2  ;;  %v18_v5 = vld [vmem:[%s154_s1 + $0x10] sm:$0xff]  ;;  %v17_v6 = vld [vmem:[%s154_s1 + $0x8] sm:$0xff]  ;;  %v16_v7 = vld [vmem:[%s154_s1] sm:$0xff]  ;;  %s59_s6 = sshll.u32 %s99_s5, 4  ;;  %s61_s9 = sshll.u32 %s156_s3, 4  ;;  %vm52_vm1 = vcmask 74752   ;;  %s60_s6 = int_to_ptr.vmem [resolvable:$true] %s59_s6  ;;  %s62_s9 = int_to_ptr.hbm [resolvable:$true] %s61_s9 }
   0x7   :  { %v15_v8 = vld [vmem:[%s153_s0] sm:$0x3] }
   0x8   :  { %43 = vmatpush.msra.mxu0 %v20_v3  ;;  %v72_v9 = vld [vmem:[%s155_s2] ss:$0 sm:$0xff] }
   0xa   :  { %44 = vmatpush.msra.mxu0 %v19_v4 }
   0xc   :  { %45 = vmatpush.msra.mxu0 %v18_v5 }
   0xe   :  { %46 = vmatpush.msra.mxu0 %v17_v6 }
  0x10   :  { %47 = vmatpush.msra.mxu0 %v16_v7 }
  0x11   :  { %70 = vmatmul.msk.f32.vlgmr.msra.gmra.mxu0 %vm28_vm0, %v15_v8 }
  0x8e   :  { %v49_v10 = vpop.f32.mrf.mxu0 }
  0x8f   :  { %v50_v11 = vadd.f32 %v72_v9, %v49_v10 }
  0x91   :  { %53 = vst.msk [vmem:[#allocation2] sm:$0x3] %vm52_vm1, %v50_v11 }
  0x92   :  { %64 = dma.vmem_to_hbm [thread:$0]  %s60_s6, 32, %s62_s9, [#allocation3]  }
  0x93   :  { %97 = dma.done.wait [#allocation3], 32  }
  0x94   :  { %98 = vsyncadd [#allocation3], 4294967264 }
  0x95   :  { %69 = vsyncpa [#allocation3], 1 }

</bundles_post_ra>
